<compile_context>
chip_gen: v5e
topology: v5e:2x2
jax: 0.10.0
libtpu: 0.0.40
codegen_flags: <defaults>
</compile_context>

<pallas_src>
import functools

import jax
import jax.numpy as jnp
from jax import lax
from jax.experimental import pallas as pl
from jax.experimental.pallas import tpu as pltpu


def _cnn_kernel(scal_ref, x_ref, wd_ref, o_ref, pbuf, *, L1p, L2p):
    # SMEM scalars: [w0, w1, w2, conv_b, bn_scale, bn_shift, b_diff]
    cw0, cw1, cw2 = scal_ref[0], scal_ref[1], scal_ref[2]
    cb = scal_ref[3]
    bn_scale, bn_shift = scal_ref[4], scal_ref[5]
    b_diff = scal_ref[6]

    def fused_block(src_ref, l_out):
        # Conv1d(k=3,'valid') + BatchNorm1d(inference affine) + ReLU + MaxPool1d(2),
        # fused.  Only two stride-2 sublane gathers (even/odd phases); the
        # shifted taps c/d are +1-sublane views of those values.  BN+ReLU is
        # applied per branch before the max (valid for any sign of gamma); no
        # full-length conv intermediate is ever materialized.
        even = src_ref[pl.ds(0, l_out + 1, stride=2), :]   # rows 0,2,...,2*l_out
        odd = src_ref[pl.ds(1, l_out + 1, stride=2), :]    # rows 1,3,...,2*l_out+1
        a = even[0:l_out, :]          # x[2j]
        b = odd[0:l_out, :]           # x[2j+1]
        c = even[1:l_out + 1, :]      # x[2j+2]
        d = odd[1:l_out + 1, :]       # x[2j+3]
        z_even = (a * cw0 + b * cw1 + c * cw2 + cb) * bn_scale + bn_shift
        z_odd = (b * cw0 + c * cw1 + d * cw2 + cb) * bn_scale + bn_shift
        z_even = jnp.maximum(z_even, 0.0)
        z_odd = jnp.maximum(z_odd, 0.0)
        return jnp.maximum(z_even, z_odd)

    # ---- cnn_layers pass 1 (pooled result stored so pass 2 can re-slice it) ----
    pbuf[...] = fused_block(x_ref, L1p)                       # (L1p, Nb)
    # ---- cnn_layers pass 2 (same weights); result stays in registers ----
    p2 = fused_block(pbuf, L2p)                               # (510, Nb)

    # ---- Folded head: (Linear(510,128) -> Linear(128,2) -> Softmax(2)) ==
    # sigmoid of a single 510-deep weighted reduce.  Pure VPU/XLU/EUP work. ----
    d_logit = jnp.sum(p2 * wd_ref[...], axis=0, keepdims=True) + b_diff   # (1, Nb)

    # p0 = 1/(1+e^{+d}), p1 = 1/(1+e^{-d}); exact divide so sum(probs) == 1
    # to within a couple of ulps.  Single (2, Nb) store.
    sign = jnp.where(lax.broadcasted_iota(jnp.int32, (2, 1), 0) == 0, 1.0, -1.0)
    o_ref[...] = 1.0 / (1.0 + jnp.exp(sign * d_logit))


def cnn_forward(x, p, *, lane_block=None):
    """x: (N, L) float32 -> (N, 2) float32 softmax probabilities."""
    N, L = x.shape
    L1c = L - 2
    L1p = L1c // 2
    L2c = L1p - 2
    L2p = L2c // 2
    assert L1c % 2 == 0 and L2c % 2 == 0
    assert L2p == p["lin1_w"].shape[1], "flattened features must equal Linear in_features"

    # Head fold (exact linear identity): no activation between the two Linears,
    # and softmax(2) == sigmoid(logit difference).
    v = (p["lin2_w"][1] - p["lin2_w"][0]).astype(jnp.float32)            # (128,)
    w_diff = jnp.dot(v, p["lin1_w"], precision=jax.lax.Precision.HIGHEST)  # (510,)
    b_diff = (jnp.dot(v, p["lin1_b"], precision=jax.lax.Precision.HIGHEST)
              + (p["lin2_b"][1] - p["lin2_b"][0]))                         # ()

    # Batch ("lane") blocking: 128-lane blocks by default; 256-lane blocks only
    # when the grid still has >= 2 steps (keeps both v7x TensorCores busy while
    # amortizing per-step overhead on v6e/v7x).  All elementwise math stays f32
    # (v5e VPU has no bf16).
    if lane_block is None:
        lane_block = 256 if N >= 512 else 128
    Nb = N if N < lane_block else lane_block
    grid = (pl.cdiv(N, Nb),)

    scalars = jnp.concatenate(
        [p["conv_w"], p["conv_b"], p["bn_scale"], p["bn_shift"],
         jnp.reshape(b_diff, (1,))]).astype(jnp.float32)       # (7,) -> SMEM

    kernel = functools.partial(_cnn_kernel, L1p=L1p, L2p=L2p)

    grid_spec = pltpu.PrefetchScalarGridSpec(
        num_scalar_prefetch=1,
        grid=grid,
        in_specs=[
            pl.BlockSpec((L, Nb), lambda i, s: (0, i)),        # x      (L, N)
            pl.BlockSpec((L2p, 1), lambda i, s: (0, 0)),       # w_diff (510, 1)
        ],
        out_specs=pl.BlockSpec((2, Nb), lambda i, s: (0, i)),  # probs  (2, N)
        scratch_shapes=[
            pltpu.VMEM((L1p, Nb), jnp.float32),                # pooled pass-1
        ],
    )

    out_t = pl.pallas_call(
        kernel,
        out_shape=jax.ShapeDtypeStruct((2, N), jnp.float32),
        grid_spec=grid_spec,
        compiler_params=pltpu.CompilerParams(
            dimension_semantics=("parallel",)),
    )(scalars, x.T.astype(jnp.float32), w_diff[:, None].astype(jnp.float32))

    return out_t.T  # (N, 2)


def reference_forward(x, p):
    """Pure-JAX reference matching the PyTorch forward (inference-mode BN)."""
    def block(y):
        Lc = y.shape[1] - 2
        z = (y[:, 0:Lc] * p["conv_w"][0] + y[:, 1:Lc + 1] * p["conv_w"][1]
             + y[:, 2:Lc + 2] * p["conv_w"][2] + p["conv_b"][0])
        z = z * p["bn_scale"][0] + p["bn_shift"][0]
        z = jnp.maximum(z, 0.0)
        return jnp.maximum(z[:, 0:Lc:2], z[:, 1:Lc:2])

    y = block(block(x))                                   # (N, 510)
    h = jnp.dot(y, p["lin1_w"].T,
                precision=jax.lax.Precision.HIGHEST) + p["lin1_b"]
    logits = jnp.dot(h, p["lin2_w"].T,
                     precision=jax.lax.Precision.HIGHEST) + p["lin2_b"]
    return jax.nn.softmax(logits, axis=1)


def init_params(key):
    """Deterministic PyTorch-default-style init for all module parameters."""
    ks = jax.random.split(key, 6)
    cb = 1.0 / (1 * 3) ** 0.5                      # Conv1d(1, 1, 3)
    conv_w = jax.random.uniform(ks[0], (3,), jnp.float32, -cb, cb)
    conv_b = jax.random.uniform(ks[1], (1,), jnp.float32, -cb, cb)
    # BatchNorm1d(1) defaults: gamma=1, beta=0, running_mean=0, running_var=1.
    gamma, beta, rmean, rvar, eps = 1.0, 0.0, 0.0, 1.0, 1e-5
    bn_scale = jnp.asarray([gamma / (rvar + eps) ** 0.5], jnp.float32)
    bn_shift = jnp.asarray([beta - rmean * gamma / (rvar + eps) ** 0.5], jnp.float32)
    b1 = 1.0 / 510 ** 0.5                          # Linear(510, 128)
    lin1_w = jax.random.uniform(ks[2], (128, 510), jnp.float32, -b1, b1)
    lin1_b = jax.random.uniform(ks[3], (128,), jnp.float32, -b1, b1)
    b2 = 1.0 / 128 ** 0.5                          # Linear(128, 2)
    lin2_w = jax.random.uniform(ks[4], (2, 128), jnp.float32, -b2, b2)
    lin2_b = jax.random.uniform(ks[5], (2,), jnp.float32, -b2, b2)
    return dict(conv_w=conv_w, conv_b=conv_b, bn_scale=bn_scale, bn_shift=bn_shift,
                lin1_w=lin1_w, lin1_b=lin1_b, lin2_w=lin2_w, lin2_b=lin2_b)


if __name__ == "__main__":
    key = jax.random.PRNGKey(0)
    k_x, k_p = jax.random.split(key)

    N, L = 2, 2046                     # L=2046 so flattened features == 510
    x = jax.random.normal(k_x, (N, L), dtype=jnp.float32)
    params = init_params(k_p)

    out = cnn_forward(x, params)
    out = jax.block_until_ready(out)

    ref = reference_forward(x, params)
    assert out.shape == (N, 2), out.shape
    assert jnp.allclose(jnp.sum(out, axis=1), 1.0, atol=1e-5)
    assert jnp.allclose(out, ref, atol=2e-3, rtol=2e-3), (out, ref)

    print("KERNEL_OK")
</pallas_src>

<mosaic_0001>
module attributes {stable_mosaic.version = 11 : i64} {
  func.func @_cnn_kernel(%arg0: i32, %arg1: memref<7xf32, #tpu.memory_space<smem>>, %arg2: memref<2046x2xf32, #tpu.memory_space<vmem>>, %arg3: memref<510x1xf32, #tpu.memory_space<vmem>>, %arg4: memref<2x2xf32, #tpu.memory_space<vmem>>, %arg5: memref<1022x2xf32, #tpu.memory_space<vmem>>) attributes {dimension_semantics = [#tpu.dimension_semantics<parallel>], iteration_bounds = array<i64: 1>, scalar_prefetch = 1 : i64, scratch_operands = 1 : i64, tpu.core_type = #tpu.core_type<tc>, window_params = [{transform_indices = @transform_0, window_bounds = array<i64: 2046, 2>}, {pipeline_mode = #tpu.pipeline_mode<synchronous>, transform_indices = @transform_1, window_bounds = array<i64: 510, 1>}, {transform_indices = @transform_2, window_bounds = array<i64: 2, 2>}]} {
    %c0 = arith.constant 0 : index
    %0 = memref.load %arg1[%c0] : memref<7xf32, #tpu.memory_space<smem>>
    %c1 = arith.constant 1 : index
    %1 = memref.load %arg1[%c1] : memref<7xf32, #tpu.memory_space<smem>>
    %c2 = arith.constant 2 : index
    %2 = memref.load %arg1[%c2] : memref<7xf32, #tpu.memory_space<smem>>
    %c3 = arith.constant 3 : index
    %3 = memref.load %arg1[%c3] : memref<7xf32, #tpu.memory_space<smem>>
    %c4 = arith.constant 4 : index
    %4 = memref.load %arg1[%c4] : memref<7xf32, #tpu.memory_space<smem>>
    %c5 = arith.constant 5 : index
    %5 = memref.load %arg1[%c5] : memref<7xf32, #tpu.memory_space<smem>>
    %c6 = arith.constant 6 : index
    %6 = memref.load %arg1[%c6] : memref<7xf32, #tpu.memory_space<smem>>
    %c0_0 = arith.constant 0 : index
    %c0_1 = arith.constant 0 : index
    %7 = tpu.strided_load %arg2[%c0_0, %c0_1] {strides = array<i32: 2, 1>} : memref<2046x2xf32, #tpu.memory_space<vmem>>, vector<1023x2xf32>
    %c1_2 = arith.constant 1 : index
    %c0_3 = arith.constant 0 : index
    %8 = tpu.strided_load %arg2[%c1_2, %c0_3] {strides = array<i32: 2, 1>} : memref<2046x2xf32, #tpu.memory_space<vmem>>, vector<1023x2xf32>
    %9 = vector.extract_strided_slice %7 {offsets = [0, 0], sizes = [1022, 2], strides = [1, 1]} : vector<1023x2xf32> to vector<1022x2xf32>
    %10 = vector.extract_strided_slice %8 {offsets = [0, 0], sizes = [1022, 2], strides = [1, 1]} : vector<1023x2xf32> to vector<1022x2xf32>
    %11 = vector.extract_strided_slice %7 {offsets = [1, 0], sizes = [1022, 2], strides = [1, 1]} : vector<1023x2xf32> to vector<1022x2xf32>
    %12 = vector.extract_strided_slice %8 {offsets = [1, 0], sizes = [1022, 2], strides = [1, 1]} : vector<1023x2xf32> to vector<1022x2xf32>
    %13 = vector.broadcast %0 : f32 to vector<1022x2xf32>
    %14 = arith.mulf %9, %13 : vector<1022x2xf32>
    %15 = vector.broadcast %1 : f32 to vector<1022x2xf32>
    %16 = arith.mulf %10, %15 : vector<1022x2xf32>
    %17 = arith.addf %14, %16 : vector<1022x2xf32>
    %18 = vector.broadcast %2 : f32 to vector<1022x2xf32>
    %19 = arith.mulf %11, %18 : vector<1022x2xf32>
    %20 = arith.addf %17, %19 : vector<1022x2xf32>
    %21 = vector.broadcast %3 : f32 to vector<1022x2xf32>
    %22 = arith.addf %20, %21 : vector<1022x2xf32>
    %23 = vector.broadcast %4 : f32 to vector<1022x2xf32>
    %24 = arith.mulf %22, %23 : vector<1022x2xf32>
    %25 = vector.broadcast %5 : f32 to vector<1022x2xf32>
    %26 = arith.addf %24, %25 : vector<1022x2xf32>
    %27 = vector.broadcast %0 : f32 to vector<1022x2xf32>
    %28 = arith.mulf %10, %27 : vector<1022x2xf32>
    %29 = vector.broadcast %1 : f32 to vector<1022x2xf32>
    %30 = arith.mulf %11, %29 : vector<1022x2xf32>
    %31 = arith.addf %28, %30 : vector<1022x2xf32>
    %32 = vector.broadcast %2 : f32 to vector<1022x2xf32>
    %33 = arith.mulf %12, %32 : vector<1022x2xf32>
    %34 = arith.addf %31, %33 : vector<1022x2xf32>
    %35 = vector.broadcast %3 : f32 to vector<1022x2xf32>
    %36 = arith.addf %34, %35 : vector<1022x2xf32>
    %37 = vector.broadcast %4 : f32 to vector<1022x2xf32>
    %38 = arith.mulf %36, %37 : vector<1022x2xf32>
    %39 = vector.broadcast %5 : f32 to vector<1022x2xf32>
    %40 = arith.addf %38, %39 : vector<1022x2xf32>
    %cst = arith.constant 0.000000e+00 : f32
    %41 = vector.broadcast %cst : f32 to vector<1022x2xf32>
    %42 = arith.maximumf %26, %41 : vector<1022x2xf32>
    %cst_4 = arith.constant 0.000000e+00 : f32
    %43 = vector.broadcast %cst_4 : f32 to vector<1022x2xf32>
    %44 = arith.maximumf %40, %43 : vector<1022x2xf32>
    %45 = arith.maximumf %42, %44 : vector<1022x2xf32>
    %c0_5 = arith.constant 0 : index
    %c0_6 = arith.constant 0 : index
    %46 = vector.load %arg5[%c0_5, %c0_6] : memref<1022x2xf32, #tpu.memory_space<vmem>>, vector<1022x2xf32>
    tpu.vector_store %arg5[%c0_5, %c0_6], %45 {strides = array<i32>} : memref<1022x2xf32, #tpu.memory_space<vmem>>, vector<1022x2xf32>,
    %c0_7 = arith.constant 0 : index
    %c0_8 = arith.constant 0 : index
    %47 = tpu.strided_load %arg5[%c0_7, %c0_8] {strides = array<i32: 2, 1>} : memref<1022x2xf32, #tpu.memory_space<vmem>>, vector<511x2xf32>
    %c1_9 = arith.constant 1 : index
    %c0_10 = arith.constant 0 : index
    %48 = tpu.strided_load %arg5[%c1_9, %c0_10] {strides = array<i32: 2, 1>} : memref<1022x2xf32, #tpu.memory_space<vmem>>, vector<511x2xf32>
    %49 = vector.extract_strided_slice %47 {offsets = [0, 0], sizes = [510, 2], strides = [1, 1]} : vector<511x2xf32> to vector<510x2xf32>
    %50 = vector.extract_strided_slice %48 {offsets = [0, 0], sizes = [510, 2], strides = [1, 1]} : vector<511x2xf32> to vector<510x2xf32>
    %51 = vector.extract_strided_slice %47 {offsets = [1, 0], sizes = [510, 2], strides = [1, 1]} : vector<511x2xf32> to vector<510x2xf32>
    %52 = vector.extract_strided_slice %48 {offsets = [1, 0], sizes = [510, 2], strides = [1, 1]} : vector<511x2xf32> to vector<510x2xf32>
    %53 = vector.broadcast %0 : f32 to vector<510x2xf32>
    %54 = arith.mulf %49, %53 : vector<510x2xf32>
    %55 = vector.broadcast %1 : f32 to vector<510x2xf32>
    %56 = arith.mulf %50, %55 : vector<510x2xf32>
    %57 = arith.addf %54, %56 : vector<510x2xf32>
    %58 = vector.broadcast %2 : f32 to vector<510x2xf32>
    %59 = arith.mulf %51, %58 : vector<510x2xf32>
    %60 = arith.addf %57, %59 : vector<510x2xf32>
    %61 = vector.broadcast %3 : f32 to vector<510x2xf32>
    %62 = arith.addf %60, %61 : vector<510x2xf32>
    %63 = vector.broadcast %4 : f32 to vector<510x2xf32>
    %64 = arith.mulf %62, %63 : vector<510x2xf32>
    %65 = vector.broadcast %5 : f32 to vector<510x2xf32>
    %66 = arith.addf %64, %65 : vector<510x2xf32>
    %67 = vector.broadcast %0 : f32 to vector<510x2xf32>
    %68 = arith.mulf %50, %67 : vector<510x2xf32>
    %69 = vector.broadcast %1 : f32 to vector<510x2xf32>
    %70 = arith.mulf %51, %69 : vector<510x2xf32>
    %71 = arith.addf %68, %70 : vector<510x2xf32>
    %72 = vector.broadcast %2 : f32 to vector<510x2xf32>
    %73 = arith.mulf %52, %72 : vector<510x2xf32>
    %74 = arith.addf %71, %73 : vector<510x2xf32>
    %75 = vector.broadcast %3 : f32 to vector<510x2xf32>
    %76 = arith.addf %74, %75 : vector<510x2xf32>
    %77 = vector.broadcast %4 : f32 to vector<510x2xf32>
    %78 = arith.mulf %76, %77 : vector<510x2xf32>
    %79 = vector.broadcast %5 : f32 to vector<510x2xf32>
    %80 = arith.addf %78, %79 : vector<510x2xf32>
    %cst_11 = arith.constant 0.000000e+00 : f32
    %81 = vector.broadcast %cst_11 : f32 to vector<510x2xf32>
    %82 = arith.maximumf %66, %81 : vector<510x2xf32>
    %cst_12 = arith.constant 0.000000e+00 : f32
    %83 = vector.broadcast %cst_12 : f32 to vector<510x2xf32>
    %84 = arith.maximumf %80, %83 : vector<510x2xf32>
    %85 = arith.maximumf %82, %84 : vector<510x2xf32>
    %c0_13 = arith.constant 0 : index
    %c0_14 = arith.constant 0 : index
    %86 = vector.load %arg3[%c0_13, %c0_14] : memref<510x1xf32, #tpu.memory_space<vmem>>, vector<510x1xf32>
    %87 = vector.broadcast %86 : vector<510x1xf32> to vector<510x2xf32>
    %88 = arith.mulf %85, %87 : vector<510x2xf32>
    %cst_15 = arith.constant dense<0.000000e+00> : vector<2xf32>
    %89 = vector.multi_reduction <add>, %88, %cst_15 [0] : vector<510x2xf32> to vector<2xf32>
    %90 = vector.shape_cast %89 : vector<2xf32> to vector<1x2xf32>
    %91 = vector.broadcast %6 : f32 to vector<1x2xf32>
    %92 = arith.addf %90, %91 : vector<1x2xf32>
    %93 = tpu.iota {dimensions = array<i32: 0>} : vector<2x1xi32>
    %c0_i32 = arith.constant 0 : i32
    %94 = vector.broadcast %c0_i32 : i32 to vector<2x1xi32>
    %95 = arith.cmpi eq, %93, %94 : vector<2x1xi32>
    %cst_16 = arith.constant 1.000000e+00 : f32
    %cst_17 = arith.constant -1.000000e+00 : f32
    %96 = vector.broadcast %cst_16 : f32 to vector<2x1xf32>
    %97 = vector.broadcast %cst_17 : f32 to vector<2x1xf32>
    %98 = arith.select %95, %96, %97 : vector<2x1xi1>, vector<2x1xf32>
    %99 = vector.broadcast %98 : vector<2x1xf32> to vector<2x2xf32>
    %100 = vector.broadcast %92 : vector<1x2xf32> to vector<2x2xf32>
    %101 = arith.mulf %99, %100 : vector<2x2xf32>
    %102 = math.exp %101 : vector<2x2xf32>
    %cst_18 = arith.constant 1.000000e+00 : f32
    %103 = vector.broadcast %cst_18 : f32 to vector<2x2xf32>
    %104 = arith.addf %103, %102 : vector<2x2xf32>
    %cst_19 = arith.constant 1.000000e+00 : f32
    %105 = vector.broadcast %cst_19 : f32 to vector<2x2xf32>
    %106 = arith.divf %105, %104 : vector<2x2xf32>
    %c0_20 = arith.constant 0 : index
    %c0_21 = arith.constant 0 : index
    %107 = vector.load %arg4[%c0_20, %c0_21] : memref<2x2xf32, #tpu.memory_space<vmem>>, vector<2x2xf32>
    tpu.vector_store %arg4[%c0_20, %c0_21], %106 {strides = array<i32>} : memref<2x2xf32, #tpu.memory_space<vmem>>, vector<2x2xf32>,
    return
  }
  func.func @transform_0(%arg0: i32, %arg1: memref<7xf32, #tpu.memory_space<smem>>) -> (i32, i32) {
    %c0_i32 = arith.constant 0 : i32
    %c0_i32_0 = arith.constant 0 : i32
    return %c0_i32, %arg0 : i32, i32
  }
  func.func @transform_1(%arg0: i32, %arg1: memref<7xf32, #tpu.memory_space<smem>>) -> (i32, i32) {
    %c0_i32 = arith.constant 0 : i32
    %c0_i32_0 = arith.constant 0 : i32
    %c0_i32_1 = arith.constant 0 : i32
    return %c0_i32, %c0_i32_0 : i32, i32
  }
  func.func @transform_2(%arg0: i32, %arg1: memref<7xf32, #tpu.memory_space<smem>>) -> (i32, i32) {
    %c0_i32 = arith.constant 0 : i32
    %c0_i32_0 = arith.constant 0 : i32
    return %c0_i32, %arg0 : i32, i32
  }
}

</mosaic_0001>

<bundles_post_ra>
// kernel: tpu_custom_call.1
= control target key start
LH: loop header
LB: loop body
LE: loop exit
PB: predicated region body
PF: predicated region fallthrough
CT: control target
= control target key end

     0   :  { %s7888_s15 = smov [#allocation4]   ;;  %s15934_s0 = inlined_call_operand.vmem [shape: f32[7], index: 0, kind: input, shape index: {}]   ;;  %s15935_s1 = inlined_call_operand.vmem [shape: f32[2046,2], index: 1, kind: input, shape index: {}]   ;;  %s15936_s2 = inlined_call_operand.vmem [shape: f32[510,1], index: 2, kind: input, shape index: {}]   ;;  %s15937_s3 = inlined_call_operand.hbm [shape: f32[2,2], index: 3, kind: output, shape index: {}]  }
   0x1   :  { %s9_s14 = sshll.u32 %s15934_s0, 4  ;;  %s10_s14 = int_to_ptr.vmem [resolvable:$true] %s9_s14 }
   0x2   :  { %12 = dma.vmem_to_smem %s10_s14, 16, %s7888_s15, [#allocation3] }
   0x3   :  { %7884 = dma.done.wait [#allocation3], 16 }
   0x4   :  { %7885 = vsyncadd [#allocation3], 4294967280 }
   0x5   :  { %15 = sfence }
   0x6   :  { %v6881_v0 = vld [vmem:[%s15936_s2 + $0x20] sm:$0xff]  ;;  %v6879_v1 = vld [vmem:[%s15936_s2 + $0x10] sm:$0xff]  ;;  %v7889_v3 = vmov 0  }
   0x7   :  { %v6877_v2 = vld [vmem:[%s15936_s2] sm:$0xff]  ;;  %7768 = vset.pattern.permute.xlu2 %v7889_v3  ;;  %7767 = vset.pattern.permute.xlu1 %v7889_v3 }
   0x8   :  { %7766 = vset.pattern.permute.xlu0 %v7889_v3  ;;  %6963 = vperm.xlu2 %7768, %v6881_v0  }
   0x9   :  { %6953 = vperm.xlu1 %7767, %v6879_v1   ;;  %6943 = vperm.xlu0 %7766, %v6877_v2  }
   0xa   :  { %16 = vsyncpa [#allocation6], 0  ;;  %v6882_v4 = vld [vmem:[%s15936_s2 + $0x28] sm:$0xff]  ;;  %v6880_v5 = vld [vmem:[%s15936_s2 + $0x18] sm:$0xff]  ;;  %s21_s18 = sld [smem:[#allocation4]]  ;;  %vm1182_vm0 = vcmask 1046528  }
   0xb   :  { %v6878_v6 = vld [vmem:[%s15936_s2 + $0x8] sm:$0xff]  ;;  %v6885_v7 = vld [vmem:[%s15936_s2 + $0x40] sm:$0xff]  ;;  %v6884_v8 = vld [vmem:[%s15936_s2 + $0x38] sm:$0xff]  ;;  %s7501_s19 = sld [smem:[#allocation4 + $0x1]]  ;;  %vm4511_vm1 = vcmask 15360   ;;  %vm4639_vm2 = vcmask 13312  }
   0xc   :  { %v6883_v9 = vld [vmem:[%s15936_s2 + $0x30] sm:$0xff]  ;;  %v6888_v10 = vld [vmem:[%s15936_s2 + $0x58] sm:$0xff]  ;;  %v6886_v12 = vld [vmem:[%s15936_s2 + $0x48] sm:$0xff]  ;;  %s7502_s20 = sld [smem:[#allocation4 + $0x2]]  ;;  %s7891_s26 = smov [#allocation5]   ;;  %vm7483_vm7 = vcmask 9216  }
   0xd   :  { %v6887_v11 = vld [vmem:[%s15936_s2 + $0x50] sm:$0xff]  ;;  %v6890_v14 = vld [vmem:[%s15936_s2 + $0x68] sm:$0xff]  ;;  %v6889_v15 = vld [vmem:[%s15936_s2 + $0x60] sm:$0xff]  ;;  %s7986_s9 = sld [smem:[#allocation4 + $0x3]]  ;;  %s7490_s27 = sshll.u32 %s7891_s26, 4  ;;  %s7491_s27 = int_to_ptr.vmem [resolvable:$true] %s7490_s27 }
   0xe   :  { %v6891_v13 = vld [vmem:[%s15936_s2 + $0x70] sm:$0xff]  ;;  %v6894_v16 = vld [vmem:[%s15936_s2 + $0x88] sm:$0xff]  ;;  %v6893_v17 = vld [vmem:[%s15936_s2 + $0x80] sm:$0xff]  ;;  %s8033_s0 = sld [smem:[#allocation4 + $0x4]]  ;;  %s7492_s30 = sshll.u32 %s15937_s3, 4  ;;  %s7493_s30 = int_to_ptr.hbm [resolvable:$true] %s7492_s30 }
   0xf   :  { %v6892_v18 = vld [vmem:[%s15936_s2 + $0x78] sm:$0xff]  ;;  %v7514_v19 = vld [vmem:[%s15935_s1 + $0x80] ss:$2 sm:$0xff]  ;;  %v8008_v30 = vld [vmem:[%s15935_s1 + $0xa1] ss:$2 sm:$0xff]  ;;  %s8042_s22 = sld [smem:[#allocation4 + $0x5]] }
  0x10   :  { %6968 = vperm.xlu2 %7768, %v6882_v4   ;;  %v7515_v20 = vld [vmem:[%s15935_s1 + $0x90] ss:$2 sm:$0xff]  ;;  %v7516_v21 = vld [vmem:[%s15935_s1 + $0xa0] ss:$2 sm:$0xff]  ;;  %v7993_v26 = vstv %s21_s18  ;;  %v8003_v29 = vld [vmem:[%s15935_s1 + $0x91] ss:$2 sm:$0xff] }
  0x11   :  { %6958 = vperm.xlu1 %7767, %v6880_v5   ;;  %6948 = vperm.xlu0 %7766, %v6878_v6   ;;  %v7517_v22 = vld [vmem:[%s15935_s1 + $0xb0] ss:$2 sm:$0xff]  ;;  %v7981_v23 = vstv %s7501_s19  ;;  %v6897_v24 = vld [vmem:[%s15936_s2 + $0xa0] sm:$0xff]  ;;  %v8013_v31 = vld [vmem:[%s15935_s1 + $0xb1] ss:$2 sm:$0xff]  ;;  %v548_v43 = vmul.f32 %v7514_v19, %v7993_v26  ;;  %v549_v44 = vmul.f32 %v7515_v20, %v7993_v26  ;;  %v550_v45 = vmul.f32 %v7516_v21, %v7993_v26 }
  0x12   :  { %v7991_v25 = vld [vmem:[%s15935_s1 + $0xc0] ss:$2 sm:$0xff]  ;;  %v7995_v27 = vstv %s7502_s20  ;;  %v7998_v28 = vmul.f32 %v7514_v19, %v7981_v23  ;;  %v8019_v33 = vmul.f32 %v7515_v20, %v7981_v23  ;;  %v8022_v34 = vmul.f32 %v7516_v21, %v7981_v23  ;;  %v6896_v36 = vld [vmem:[%s15936_s2 + $0x98] sm:$0xff]  ;;  %v6895_v37 = vld [vmem:[%s15936_s2 + $0x90] sm:$0xff] }
  0x13   :  { %v8016_v32 = vmul.f32 %v7514_v19, %v7995_v27  ;;  %v8025_v35 = vmul.f32 %v7517_v22, %v7981_v23  ;;  %v935_v38 = vmul.f32 %v7515_v20, %v7995_v27  ;;  %v936_v39 = vmul.f32 %v7516_v21, %v7995_v27  ;;  %v7642_v42 = vld [vmem:[%s15935_s1 + $0x81] ss:$2 sm:$0xff]  ;;  %v8062_v59 = vld [vmem:[%s15935_s1 + $0xd0] ss:$2 sm:$0xff] }
  0x14   :  { %v937_v40 = vmul.f32 %v7517_v22, %v7995_v27  ;;  %v8040_v41 = vmul.f32 %v7991_v25, %v7995_v27  ;;  %v551_v46 = vmul.f32 %v7517_v22, %v7993_v26  ;;  %v677_v47 = vmul.f32 %v7642_v42, %v7981_v23  ;;  %v6900_v4 = vld [vmem:[%s15936_s2 + $0xb8] sm:$0xff] }
  0x15   :  { %v678_v48 = vmul.f32 %v8003_v29, %v7981_v23  ;;  %v679_v49 = vmul.f32 %v8008_v30, %v7981_v23  ;;  %v680_v50 = vmul.f32 %v8013_v31, %v7981_v23  ;;  %v15943_v51 = vrot.slane %v8016_v32, 1 }
  0x16   :  { %v1200_v52 = vrot.slane %v935_v38, 1  ;;  %v1202_v53 = vrot.slane %v936_v39, 1  ;;  %v1204_v54 = vrot.slane %v937_v40, 1  ;;  %v805_v55 = vadd.f32 %v677_v47, %v548_v43 }
  0x17   :  { %v806_v56 = vadd.f32 %v678_v48, %v549_v44  ;;  %v807_v57 = vadd.f32 %v679_v49, %v550_v45  ;;  %v808_v58 = vadd.f32 %v680_v50, %v551_v46  ;;  %v1206_v63 = vrot.slane %v8040_v41, 1  ;;  %v6903_v50 = vld [vmem:[%s15936_s2 + $0xd0] sm:$0xff]  ;;  %v7648_v41 = vld [vmem:[%s15935_s1 + $0xe1] ss:$2 sm:$0xff] }
  0x18   :  { %6983 = vperm.xlu2 %7768, %v6885_v7   ;;  %v1201_v60 = vsel %vm1182_vm0, %v15943_v51, %v1200_v52  ;;  %v1203_v61 = vsel %vm1182_vm0, %v1200_v52, %v1202_v53  ;;  %v1205_v62 = vsel %vm1182_vm0, %v1202_v53, %v1204_v54  ;;  %v8072_v3 = vmul.f32 %v7991_v25, %v7981_v23 }
  0x19   :  { %6978 = vperm.xlu1 %7767, %v6884_v8   ;;  %6973 = vperm.xlu0 %7766, %v6883_v9   ;;  %v1574_v0 = vadd.f32 %v1201_v60, %v805_v55  ;;  %v1575_v1 = vadd.f32 %v1203_v61, %v806_v56  ;;  %v1576_v2 = vadd.f32 %v1205_v62, %v807_v57  ;;  %v8081_v6 = vstv %s7986_s9  ;;  %v6899_v9 = vld [vmem:[%s15936_s2 + $0xb0] sm:$0xff]  ;;  %v6902_v56 = vld [vmem:[%s15936_s2 + $0xc8] sm:$0xff]  ;;  %v6901_v57 = vld [vmem:[%s15936_s2 + $0xc0] sm:$0xff] }
  0x1a   :  { %v1207_v5 = vsel %vm1182_vm0, %v1204_v54, %v1206_v63  ;;  %v8084_v7 = vmul.f32 %v7642_v42, %v7995_v27  ;;  %v8088_v8 = vmul.f32 %v8062_v59, %v7981_v23  ;;  %v2488_v38 = vrot.slane %v8072_v3, 1  ;;  %v6907_v3 = vld [vmem:[%s15936_s2 + $0xf0] sm:$0xff] }
  0x1b   :  { %v2090_v40 = vmul.f32 %v8003_v29, %v7993_v26  ;;  %v2092_v43 = vmul.f32 %v8013_v31, %v7993_v26  ;;  %v2985_v53 = vmul.f32 %v8003_v29, %v7995_v27  ;;  %v2986_v54 = vmul.f32 %v8008_v30, %v7995_v27 }
  0x1c   :  { %v2987_v55 = vmul.f32 %v8013_v31, %v7995_v27  ;;  %v15941_v29 = vrot.slane %v8084_v7, 1 }
  0x20   :  { %6998 = vperm.xlu2 %7768, %v6888_v10   ;;  %v6898_v10 = vld [vmem:[%s15936_s2 + $0xa8] sm:$0xff] }
  0x21   :  { %6993 = vperm.xlu1 %7767, %v6887_v11   ;;  %6988 = vperm.xlu0 %7766, %v6886_v12   ;;  %v1577_v11 = vadd.f32 %v1207_v5, %v808_v58  ;;  %v1703_v12 = vadd.f32 %v8081_v6, %v1574_v0  ;;  %v3251_v0 = vrot.slane %v2986_v54, 1  ;;  %v8170_v5 = vld [vmem:[%s15935_s1 + $0xd1] ss:$2 sm:$0xff] }
  0x23   :  { %v1706_v19 = vadd.f32 %v8081_v6, %v1577_v11 }
  0x28   :  { %7013 = vperm.xlu2 %7768, %v6891_v13   ;;  %v1704_v13 = vadd.f32 %v8081_v6, %v1575_v1  ;;  %v3253_v1 = vrot.slane %v2987_v55, 1 }
  0x29   :  { %7008 = vperm.xlu1 %7767, %v6890_v14   ;;  %7003 = vperm.xlu0 %7766, %v6889_v15   ;;  %v1705_v14 = vadd.f32 %v8081_v6, %v1576_v2  ;;  %v8100_v15 = vstv %s8033_s0 }
  0x2a   :  { %v1832_v20 = vmul.f32 %v8100_v15, %v1703_v12  ;;  %v1833_v21 = vmul.f32 %v8100_v15, %v1704_v13  ;;  %v1835_v39 = vmul.f32 %v8100_v15, %v1706_v19  ;;  %v3254_v12 = vsel %vm1182_vm0, %v3251_v0, %v3253_v1 }
  0x2b   :  { %v1834_v22 = vmul.f32 %v8100_v15, %v1705_v14 }
  0x30   :  { %7028 = vperm.xlu2 %7768, %v6894_v16   ;;  %v8103_v16 = vstv %s8042_s22 }
  0x31   :  { %7023 = vperm.xlu1 %7767, %v6893_v17   ;;  %7018 = vperm.xlu0 %7766, %v6892_v18   ;;  %v2089_v17 = vmul.f32 %v7642_v42, %v7993_v26  ;;  %v15942_v18 = vrot.slane %v7998_v28, 1  ;;  %v2091_v42 = vmul.f32 %v8008_v30, %v7993_v26  ;;  %v8134_v46 = vadd.f32 %v8103_v16, %v1832_v20 }
  0x32   :  { %v8137_v47 = vadd.f32 %v8103_v16, %v1833_v21  ;;  %v8140_v48 = vadd.f32 %v8103_v16, %v1834_v22  ;;  %v8143_v49 = vadd.f32 %v8103_v16, %v1835_v39  ;;  %v3249_v30 = vrot.slane %v2985_v53, 1 }
  0x33   :  { %v4135_v2 = vmax.f32 %v8134_v46, 0.0  ;;  %v553_v21 = vmul.f32 %v8062_v59, %v7993_v26  ;;  %v6905_v46 = vld [vmem:[%s15936_s2 + $0xe0] sm:$0xff] }
  0x34   :  { %v3252_v11 = vsel %vm1182_vm0, %v3249_v30, %v3251_v0  ;;  %v4137_v13 = vmax.f32 %v8140_v48, 0.0  ;;  %v4138_v0 = vmax.f32 %v8143_v49, 0.0 }
  0x38   :  { %7043 = vperm.xlu2 %7768, %v6897_v24   ;;  %v2482_v24 = vrot.slane %v8019_v33, 1  ;;  %v7646_v33 = vld [vmem:[%s15935_s1 + $0xc1] ss:$2 sm:$0xff] }
  0x39   :  { %7038 = vperm.xlu1 %7767, %v6896_v36   ;;  %7033 = vperm.xlu0 %7766, %v6895_v37   ;;  %v2484_v36 = vrot.slane %v8022_v34, 1  ;;  %v2486_v37 = vrot.slane %v8025_v35, 1  ;;  %v8161_v62 = vmul.f32 %v7646_v33, %v7995_v27  ;;  %v681_v22 = vmul.f32 %v7646_v33, %v7981_v23 }
  0x3a   :  { %v2483_v34 = vsel %vm1182_vm0, %v15942_v18, %v2482_v24  ;;  %v2093_v55 = vmul.f32 %v7646_v33, %v7993_v26 }
  0x3b   :  { %v2485_v35 = vsel %vm1182_vm0, %v2482_v24, %v2484_v36  ;;  %v2487_v44 = vsel %vm1182_vm0, %v2484_v36, %v2486_v37  ;;  %v2489_v45 = vsel %vm1182_vm0, %v2486_v37, %v2488_v38  ;;  %v2856_v52 = vadd.f32 %v2483_v34, %v2089_v17 }
  0x3c   :  { %v2857_v58 = vadd.f32 %v2485_v35, %v2090_v40  ;;  %v2858_v60 = vadd.f32 %v2487_v44, %v2091_v42  ;;  %v2859_v61 = vadd.f32 %v2489_v45, %v2092_v43  ;;  %v3255_v31 = vrot.slane %v8161_v62, 1  ;;  %v7520_v40 = vld [vmem:[%s15935_s1 + $0xe0] ss:$2 sm:$0xff]  ;;  %v8285_v62 = vld [vmem:[%s15935_s1 + $0x110] ss:$2 sm:$0xff] }
  0x3d   :  { %v682_v24 = vmul.f32 %v8170_v5, %v7981_v23  ;;  %v939_v42 = vmul.f32 %v8062_v59, %v7995_v27  ;;  %v6906_v43 = vld [vmem:[%s15936_s2 + $0xe8] sm:$0xff]  ;;  %v8201_v45 = vmul.f32 %v7520_v40, %v7995_v27  ;;  %v8234_v49 = vmul.f32 %v7520_v40, %v7981_v23 }
  0x3e   :  { %v3256_v14 = vsel %vm1182_vm0, %v3253_v1, %v3255_v31  ;;  %v3624_v19 = vadd.f32 %v3252_v11, %v2857_v58  ;;  %v3625_v20 = vadd.f32 %v3254_v12, %v2858_v60 }
  0x3f   :  { %v810_v44 = vadd.f32 %v682_v24, %v553_v21  ;;  %16292 = vst [vmem:[#allocation9_spill] sm:$0xff] %v8201_v45  ;;  %v15940_v54 = vrot.slane %v8201_v45, 1  ;;  %v6909_v21 = vld [vmem:[%s15936_s2 + $0x100] sm:$0xff] }
  0x40   :  { %7058 = vperm.xlu2 %7768, %v6900_v4   ;;  %v4136_v4 = vmax.f32 %v8137_v47, 0.0  ;;  %v3752_v37 = vadd.f32 %v3624_v19, %v8081_v6  ;;  %v3753_v39 = vadd.f32 %v3625_v20, %v8081_v6  ;;  %v6904_v47 = vld [vmem:[%s15936_s2 + $0xd8] sm:$0xff]  ;;  %16293 = vst [vmem:[#allocation10_spill] sm:$0xff] %v8234_v49 }
  0x41   :  { %7053 = vperm.xlu1 %7767, %v6899_v9   ;;  %7048 = vperm.xlu0 %7766, %v6898_v10   ;;  %v552_v9 = vmul.f32 %v7991_v25, %v7993_v26  ;;  %v3250_v10 = vsel %vm1182_vm0, %v15941_v29, %v3249_v30  ;;  %v3626_v25 = vadd.f32 %v3256_v14, %v2859_v61 }
  0x42   :  { %v3623_v17 = vadd.f32 %v3250_v10, %v2856_v52  ;;  %v3880_v48 = vmul.f32 %v3752_v37, %v8100_v15  ;;  %v1208_v52 = vrot.slane %v939_v42, 1  ;;  %v2094_v14 = vmul.f32 %v8170_v5, %v7993_v26 }
  0x43   :  { %v3754_v34 = vadd.f32 %v3626_v25, %v8081_v6  ;;  %v809_v35 = vadd.f32 %v681_v22, %v552_v9 }
  0x44   :  { %v3751_v36 = vadd.f32 %v3623_v17, %v8081_v6  ;;  %v4008_v58 = vadd.f32 %v3880_v48, %v8103_v16  ;;  %v1209_v61 = vsel %vm1182_vm0, %v1206_v63, %v1208_v52  ;;  %v8280_v48 = vld [vmem:[%s15935_s1 + $0x100] ss:$2 sm:$0xff] }
  0x45   :  { %v3882_v53 = vmul.f32 %v3754_v34, %v8100_v15  ;;  %v1578_v33 = vadd.f32 %v1209_v61, %v809_v35 }
  0x46   :  { %v3879_v59 = vmul.f32 %v3751_v36, %v8100_v15  ;;  %v4264_v9 = vmax.f32 %v4008_v58, 0.0  ;;  %v15939_v36 = vrot.slane %v8234_v49, 1  ;;  %v8308_v58 = vld [vmem:[%s15935_s1 + $0x130] ss:$2 sm:$0xff] }
  0x47   :  { %v4010_v30 = vadd.f32 %v3882_v53, %v8103_v16  ;;  %v1707_v63 = vadd.f32 %v8081_v6, %v1578_v33  ;;  %v6912_v53 = vld [vmem:[%s15936_s2 + $0x118] sm:$0xff]  ;;  %v557_v33 = vmul.f32 %v8285_v62, %v7993_v26 }
  0x48   :  { %7073 = vperm.xlu2 %7768, %v6903_v50   ;;  %v3881_v50 = vmul.f32 %v3753_v39, %v8100_v15  ;;  %v4392_v19 = vmax.f32 %v4136_v4, %v4264_v9  ;;  %v8254_v4 = vmul.f32 %v7648_v41, %v7995_v27 }
  0x49   :  { %7068 = vperm.xlu1 %7767, %v6902_v56   ;;  %7063 = vperm.xlu0 %7766, %v6901_v57   ;;  %v2490_v56 = vrot.slane %v8088_v8, 1  ;;  %v4007_v57 = vadd.f32 %v3879_v59, %v8103_v16  ;;  %v1211_v8 = vsel %vm1182_vm0, %v1208_v52, %v15940_v54  ;;  %v4266_v12 = vmax.f32 %v4010_v30, 0.0  ;;  %v6911_v30 = vld [vmem:[%s15936_s2 + $0x110] sm:$0xff] }
  0x4a   :  { %v4009_v60 = vadd.f32 %v3881_v50, %v8103_v16  ;;  %v1579_v11 = vadd.f32 %v1211_v8, %v810_v44  ;;  %16294 = vst [vmem:[#allocation11_spill] sm:$0xff] %v8254_v4  ;;  %v8274_v44 = vld [vmem:[%s15935_s1 + $0x101] ss:$2 sm:$0xff]  ;;  %v8295_v50 = vld [vmem:[%s15935_s1 + $0x111] ss:$2 sm:$0xff]  ;;  %v556_v52 = vmul.f32 %v8280_v48, %v7993_v26 }
  0x4b   :  { %v4263_v1 = vmax.f32 %v4007_v57, 0.0  ;;  %v2491_v25 = vsel %vm1182_vm0, %v2488_v38, %v2490_v56  ;;  %v4394_v22 = vmax.f32 %v4138_v0, %v4266_v12  ;;  %v2989_v38 = vmul.f32 %v8170_v5, %v7995_v27  ;;  %4521 = vst.msk [vmem:[#allocation2 + $0x48] sm:$0xff] %vm4511_vm1, %v4392_v19  ;;  %v6910_v0 = vld [vmem:[%s15936_s2 + $0x108] sm:$0xff]  ;;  %v8326_v8 = vld [vmem:[%s15935_s1 + $0x131] ss:$2 sm:$0xff] }
  0x4c   :  { %v4265_v10 = vmax.f32 %v4009_v60, 0.0  ;;  %v1708_v24 = vadd.f32 %v8081_v6, %v1579_v11  ;;  %v2493_v37 = vsel %vm1182_vm0, %v2490_v56, %v15939_v36  ;;  %v2860_v39 = vadd.f32 %v2491_v25, %v2093_v55  ;;  %v8313_v60 = vld [vmem:[%s15935_s1 + $0x121] ss:$2 sm:$0xff] }
  0x4d   :  { %v4391_v17 = vmax.f32 %v4135_v2, %v4263_v1  ;;  %v6908_v2 = vld [vmem:[%s15936_s2 + $0xf8] sm:$0xff]  ;;  %v2861_v40 = vadd.f32 %v2493_v37, %v2094_v14  ;;  %v3257_v42 = vrot.slane %v2989_v38, 1  ;;  %4523 = vst.msk [vmem:[#allocation2 + $0x58] sm:$0xff] %vm4511_vm1, %v4394_v22  ;;  %v685_v61 = vmul.f32 %v8274_v44, %v7981_v23 }
  0x4e   :  { %v4393_v20 = vmax.f32 %v4137_v13, %v4265_v10  ;;  %v1836_v13 = vmul.f32 %v8100_v15, %v1707_v63  ;;  %v1837_v5 = vmul.f32 %v8100_v15, %v1708_v24  ;;  %v559_v10 = vmul.f32 %v8308_v58, %v7993_v26 }
  0x4f   :  { %4520 = vst.msk [vmem:[#allocation2 + $0x40] sm:$0xff] %vm4511_vm1, %v4391_v17  ;;  %v3258_v34 = vsel %vm1182_vm0, %v3255_v31, %v3257_v42  ;;  %v8290_v31 = vld [vmem:[%s15935_s1 + $0x120] ss:$2 sm:$0xff]  ;;  %v686_v11 = vmul.f32 %v8295_v50, %v7981_v23  ;;  %v687_v17 = vmul.f32 %v8313_v60, %v7981_v23  ;;  %v8344_v19 = vmul.f32 %v8280_v48, %v7995_v27 }
  0x50   :  { %7088 = vperm.xlu2 %7768, %v6906_v43   ;;  %4522 = vst.msk [vmem:[#allocation2 + $0x50] sm:$0xff] %vm4511_vm1, %v4393_v20  ;;  %v15938_v43 = vrot.slane %v8254_v4, 1  ;;  %v1966_v55 = vadd.f32 %v8103_v16, %v1837_v5  ;;  %v558_v9 = vmul.f32 %v8290_v31, %v7993_v26  ;;  %v688_v25 = vmul.f32 %v8326_v8, %v7981_v23  ;;  %v8373_v5 = vld [vmem:[%s15935_s1 + $0x140] ss:$2 sm:$0xff] }
  0x51   :  { %7083 = vperm.xlu1 %7767, %v6905_v46   ;;  %7078 = vperm.xlu0 %7766, %v6904_v47   ;;  %v1965_v46 = vadd.f32 %v8103_v16, %v1836_v13  ;;  %v3627_v47 = vadd.f32 %v3258_v34, %v2860_v39  ;;  %16295 = vst [vmem:[#allocation12_spill] sm:$0xff] %v8344_v19 }
  0x52   :  { %v3260_v35 = vsel %vm1182_vm0, %v3257_v42, %v15938_v43  ;;  %v4140_v20 = vmax.f32 %v1966_v55, 0.0  ;;  %v943_v22 = vmul.f32 %v8285_v62, %v7995_v27  ;;  %v944_v13 = vmul.f32 %v8290_v31, %v7995_v27  ;;  %v6915_v55 = vld [vmem:[%s15936_s2 + $0x130] sm:$0xff] }
  0x53   :  { %v3628_v59 = vadd.f32 %v3260_v35, %v2861_v40  ;;  %v3755_v56 = vadd.f32 %v3627_v47, %v8081_v6  ;;  %v4139_v1 = vmax.f32 %v1965_v46, 0.0  ;;  %v945_v34 = vmul.f32 %v8308_v58, %v7995_v27 }
  0x54   :  { %v8380_v47 = vmul.f32 %v8373_v5, %v7995_v27  ;;  %v1218_v43 = vrot.slane %v944_v13, 1  ;;  %v814_v36 = vadd.f32 %v686_v11, %v557_v33 }
  0x55   :  { %v3756_v57 = vadd.f32 %v3628_v59, %v8081_v6  ;;  %v3883_v63 = vmul.f32 %v3755_v56, %v8100_v15  ;;  %v15946_v59 = vrot.slane %v8344_v19, 1  ;;  %v1220_v29 = vrot.slane %v945_v34, 1 }
  0x56   :  { %v4649_v12 = vld [vmem:[#allocation2 + $0x40] ss:$2 sm:$0xff]  ;;  %v4777_v24 = vld [vmem:[#allocation2 + $0x41] ss:$2 sm:$0xff]  ;;  %16296 = vst [vmem:[#allocation13_spill] sm:$0xff] %v8380_v47  ;;  %v15944_v18 = vrot.slane %v8380_v47, 1 }
  0x57   :  { %v8336_v41 = vld [vmem:[#allocation2 + $0x50] ss:$2 sm:$0xff]  ;;  %v3884_v14 = vmul.f32 %v3756_v57, %v8100_v15  ;;  %v4011_v38 = vadd.f32 %v3883_v63, %v8103_v16  ;;  %v8360_v37 = vld [vmem:[#allocation2 + $0x51] ss:$2 sm:$0xff]  ;;  %v8363_v39 = vmul.f32 %v4649_v12, %v7981_v23  ;;  %v4900_v35 = vmul.f32 %v4649_v12, %v7993_v26  ;;  %v6913_v63 = vld [vmem:[%s15936_s2 + $0x120] sm:$0xff] }
  0x58   :  { %7103 = vperm.xlu2 %7768, %v6909_v21   ;;  %v813_v21 = vadd.f32 %v685_v61, %v556_v52  ;;  %v8367_v40 = vmul.f32 %v8336_v41, %v7981_v23  ;;  %v4964_v52 = vmul.f32 %v4777_v24, %v7981_v23  ;;  %v1216_v57 = vrot.slane %v943_v22, 1 }
  0x59   :  { %7098 = vperm.xlu1 %7767, %v6908_v2   ;;  %7093 = vperm.xlu0 %7766, %v6907_v3   ;;  %v8351_v2 = vmul.f32 %v4649_v12, %v7995_v27  ;;  %v8355_v3 = vmul.f32 %v8336_v41, %v7995_v27  ;;  %v4012_v42 = vadd.f32 %v3884_v14, %v8103_v16  ;;  %v4267_v46 = vmax.f32 %v4011_v38, 0.0  ;;  %v6914_v12 = vld [vmem:[%s15936_s2 + $0x128] sm:$0xff] }
  0x5a   :  { %v15953_v38 = vrot.slane %v8363_v39, 1  ;;  %v5864_v22 = vrot.slane %v8367_v40, 1  ;;  %v1217_v54 = vsel %vm1182_vm0, %v15946_v59, %v1216_v57  ;;  %v5028_v51 = vadd.f32 %v4964_v52, %v4900_v35 }
  0x5b   :  { %v4268_v56 = vmax.f32 %v4012_v42, 0.0  ;;  %v15954_v61 = vrot.slane %v8351_v2, 1  ;;  %v4395_v14 = vmax.f32 %v4139_v1, %v4267_v46  ;;  %v815_v1 = vadd.f32 %v687_v17, %v558_v9 }
  0x5c   :  { %v816_v46 = vadd.f32 %v688_v25, %v559_v10  ;;  %v5667_v11 = vmul.f32 %v4777_v24, %v7993_v26  ;;  %v5865_v34 = vsel %vm1182_vm0, %v15953_v38, %v5864_v22  ;;  %v1219_v9 = vsel %vm1182_vm0, %v1216_v57, %v1218_v43 }
  0x5d   :  { %v4396_v42 = vmax.f32 %v4140_v20, %v4268_v56  ;;  %4524 = vst.msk [vmem:[#allocation2 + $0x60] sm:$0xff] %vm4511_vm1, %v4395_v14  ;;  %v1221_v10 = vsel %vm1182_vm0, %v1218_v43, %v1220_v29  ;;  %v1582_v17 = vadd.f32 %v1217_v54, %v813_v21  ;;  %v1223_v25 = vsel %vm1182_vm0, %v1220_v29, %v15944_v18  ;;  %v6917_v54 = vld [vmem:[%s15936_s2 + $0x140] sm:$0xff]  ;;  %v6916_v29 = vld [vmem:[%s15936_s2 + $0x138] sm:$0xff] }
  0x5e   :  { %v4901_v35 = vmul.f32 %v8336_v41, %v7993_v26  ;;  %v4965_v52 = vmul.f32 %v8360_v37, %v7981_v23  ;;  %v6050_v56 = vadd.f32 %v5865_v34, %v5667_v11  ;;  %v1584_v43 = vadd.f32 %v1221_v10, %v815_v1 }
  0x5f   :  { %4525 = vst.msk [vmem:[#allocation2 + $0x68] sm:$0xff] %vm4511_vm1, %v4396_v42  ;;  %v8443_v41 = vmul.f32 %v8280_v48, %v7981_v23  ;;  %v1585_v57 = vadd.f32 %v1223_v25, %v816_v46  ;;  %v2228_v48 = vmul.f32 %v8308_v58, %v7981_v23  ;;  %v8462_v46 = vmul.f32 %v8360_v37, %v7993_v26 }
  0x60   :  { %7118 = vperm.xlu2 %7768, %v6912_v53   ;;  %v8385_v53 = vmul.f32 %v4777_v24, %v7995_v27  ;;  %v8458_v1 = vadd.f32 %v4965_v52, %v4901_v35  ;;  %v1713_v11 = vadd.f32 %v8081_v6, %v1584_v43  ;;  %v2097_v52 = vmul.f32 %v8274_v44, %v7993_v26  ;;  %v7654_v43 = vld [vmem:[%s15935_s1 + $0x141] ss:$2 sm:$0xff] }
  0x61   :  { %7113 = vperm.xlu1 %7767, %v6911_v30   ;;  %7108 = vperm.xlu0 %7766, %v6910_v0   ;;  %v5225_v30 = vrot.slane %v8355_v3, 1  ;;  %v8394_v0 = vmul.f32 %v8360_v37, %v7995_v27  ;;  %16297 = vst [vmem:[#allocation14_spill] sm:$0xff] %v8443_v41  ;;  %v1714_v34 = vadd.f32 %v8081_v6, %v1585_v57 }
  0x62   :  { %v15952_v20 = vrot.slane %v8385_v53, 1  ;;  %v8474_v37 = vmul.f32 %v8373_v5, %v7981_v23  ;;  %v8521_v59 = vmul.f32 %v7654_v43, %v7995_v27 }
  0x63   :  { %v5226_v33 = vsel %vm1182_vm0, %v15954_v61, %v5225_v30  ;;  %v15955_v13 = vrot.slane %v8394_v0, 1  ;;  %v1843_v57 = vmul.f32 %v8100_v15, %v1714_v34  ;;  %v2993_v34 = vmul.f32 %v8295_v50, %v7995_v27 }
  0x64   :  { %v5411_v24 = vadd.f32 %v5226_v33, %v5028_v51  ;;  %v1583_v51 = vadd.f32 %v1219_v9, %v814_v36  ;;  %v2227_v36 = vmul.f32 %v8290_v31, %v7981_v23  ;;  %v15945_v31 = vrot.slane %v8443_v41, 1  ;;  %16299 = vst [vmem:[#allocation16_spill] sm:$0xff] %v8474_v37 }
  0x65   :  { %v6248_v21 = vsel %vm1182_vm0, %v15952_v20, %v15955_v13  ;;  %16302 = vst [vmem:[#allocation19_spill] sm:$0xff] %v8521_v59 }
  0x66   :  { %v5475_v14 = vadd.f32 %v5411_v24, %v8081_v6  ;;  %v4653_v42 = vld [vmem:[#allocation2 + $0x60] ss:$2 sm:$0xff]  ;;  %v6433_v33 = vadd.f32 %v6248_v21, %v6050_v56  ;;  %v2500_v25 = vrot.slane %v2227_v36, 1  ;;  %v2502_v24 = vrot.slane %v2228_v48, 1 }
  0x67   :  { %v8468_v58 = vmul.f32 %v4653_v42, %v7995_v27  ;;  %v8477_v10 = vmul.f32 %v4653_v42, %v7981_v23  ;;  %v15947_v56 = vrot.slane %v8474_v37, 1  ;;  %v1842_v21 = vmul.f32 %v8100_v15, %v1713_v11 }
  0x68   :  { %7133 = vperm.xlu2 %7768, %v6915_v55   ;;  %v6918_v55 = vld [vmem:[%s15936_s2 + $0x148] sm:$0xff]  ;;  %v8480_v35 = vmul.f32 %v5475_v14, %v8100_v15  ;;  %v8512_v11 = vmul.f32 %v8274_v44, %v7995_v27  ;;  %v16307_v37 = vrot.slane %v8394_v0, 1 }
  0x69   :  { %7128 = vperm.xlu1 %7767, %v6914_v12   ;;  %7123 = vperm.xlu0 %7766, %v6913_v63   ;;  %v1711_v12 = vadd.f32 %v8081_v6, %v1582_v17  ;;  %v2226_v63 = vmul.f32 %v8285_v62, %v7981_v23  ;;  %v1712_v62 = vadd.f32 %v8081_v6, %v1583_v51  ;;  %v15950_v36 = vrot.slane %v8468_v58, 1 }
  0x6a   :  { %16298 = vst [vmem:[#allocation15_spill] sm:$0xff] %v8468_v58  ;;  %v15949_v48 = vrot.slane %v8477_v10, 1  ;;  %v2505_v42 = vsel %vm1182_vm0, %v2502_v24, %v15947_v56  ;;  %v1971_v43 = vadd.f32 %v8103_v16, %v1842_v21  ;;  %v6920_v21 = vld [vmem:[%s15936_s2 + $0x158] sm:$0xff] }
  0x6b   :  { %v1840_v9 = vmul.f32 %v8100_v15, %v1711_v12  ;;  %16300 = vst [vmem:[#allocation17_spill] sm:$0xff] %v8477_v10  ;;  %v2498_v17 = vrot.slane %v2226_v63, 1  ;;  %v1841_v5 = vmul.f32 %v8100_v15, %v1712_v62  ;;  %v2503_v63 = vsel %vm1182_vm0, %v2500_v25, %v2502_v24  ;;  %v4781_v62 = vld [vmem:[#allocation2 + $0x61] ss:$2 sm:$0xff] }
  0x6c   :  { %16301 = vst [vmem:[#allocation18_spill] sm:$0xff] %v8512_v11  ;;  %v8525_v56 = vmul.f32 %v4781_v62, %v7995_v27  ;;  %v6921_v62 = vld [vmem:[%s15936_s2 + $0x160] sm:$0xff] }
  0x6d   :  { %v2499_v51 = vsel %vm1182_vm0, %v15945_v31, %v2498_v17  ;;  %v2501_v12 = vsel %vm1182_vm0, %v2498_v17, %v2500_v25  ;;  %v8505_v14 = vadd.f32 %v8103_v16, %v1840_v9  ;;  %v2994_v17 = vmul.f32 %v8313_v60, %v7995_v27 }
  0x6e   :  { %v2864_v18 = vadd.f32 %v2499_v51, %v2097_v52  ;;  %v2995_v9 = vmul.f32 %v8326_v8, %v7995_v27  ;;  %v15951_v52 = vrot.slane %v8512_v11, 1  ;;  %v3265_v51 = vrot.slane %v2993_v34, 1  ;;  %16303 = vst [vmem:[#allocation20_spill] sm:$0xff] %v8525_v56 }
  0x6f   :  { %v3267_v44 = vrot.slane %v2994_v17, 1  ;;  %v8561_v34 = vadd.f32 %v6433_v33, %v8081_v6  ;;  %v8587_v33 = vld [vmem:[%s15935_s1 + $0x161] ss:$2 sm:$0xff] }
  0x70   :  { %7148 = vperm.xlu2 %7768, %v6918_v55   ;;  %v2098_v55 = vmul.f32 %v8295_v50, %v7993_v26  ;;  %v8528_v50 = vadd.f32 %v8103_v16, %v1841_v5  ;;  %v3266_v5 = vsel %vm1182_vm0, %v15951_v52, %v3265_v51 }
  0x71   :  { %7143 = vperm.xlu1 %7767, %v6917_v54   ;;  %7138 = vperm.xlu0 %7766, %v6916_v29   ;;  %v2099_v54 = vmul.f32 %v8313_v60, %v7993_v26  ;;  %v2100_v29 = vmul.f32 %v8326_v8, %v7993_v26  ;;  %v3269_v60 = vrot.slane %v2995_v9, 1  ;;  %v5228_v8 = vsel %vm1182_vm0, %v5225_v30, %v15950_v36 }
  0x72   :  { %v2865_v25 = vadd.f32 %v2501_v12, %v2098_v55  ;;  %v15948_v55 = vrot.slane %v8521_v59, 1  ;;  %v1972_v12 = vadd.f32 %v8103_v16, %v1843_v57  ;;  %v6919_v57 = vld [vmem:[%s15936_s2 + $0x150] sm:$0xff]  ;;  %v6561_v0 = vmul.f32 %v8561_v34, %v8100_v15 }
  0x73   :  { %v2866_v31 = vadd.f32 %v2503_v63, %v2099_v54  ;;  %v2867_v24 = vadd.f32 %v2505_v42, %v2100_v29  ;;  %v5867_v54 = vsel %vm1182_vm0, %v5864_v22, %v15949_v48  ;;  %v3268_v29 = vsel %vm1182_vm0, %v3265_v51, %v3267_v44 }
  0x74   :  { %v3270_v3 = vsel %vm1182_vm0, %v3267_v44, %v3269_v60  ;;  %v3272_v30 = vsel %vm1182_vm0, %v3269_v60, %v15948_v55  ;;  %v3631_v63 = vadd.f32 %v3266_v5, %v2864_v18  ;;  %v3632_v40 = vadd.f32 %v3268_v29, %v2865_v25  ;;  %v8594_v5 = vld [vmem:[%s15935_s1 + $0x180] ss:$2 sm:$0xff] }
  0x75   :  { %v3633_v42 = vadd.f32 %v3270_v3, %v2866_v31  ;;  %v3634_v22 = vadd.f32 %v3272_v30, %v2867_v24  ;;  %v8564_v18 = vadd.f32 %v5228_v8, %v8458_v1  ;;  %v8567_v31 = vadd.f32 %v5867_v54, %v8462_v46  ;;  %v8577_v1 = vld [vmem:[%s15935_s1 + $0x160] ss:$2 sm:$0xff]  ;;  %v8582_v46 = vld [vmem:[%s15935_s1 + $0x170] ss:$2 sm:$0xff] }
  0x76   :  { %v3759_v25 = vadd.f32 %v3631_v63, %v8081_v6  ;;  %v3760_v9 = vadd.f32 %v3632_v40, %v8081_v6  ;;  %v4143_v44 = vmax.f32 %v8505_v14, 0.0  ;;  %v4144_v60 = vmax.f32 %v8528_v50, 0.0  ;;  %v8603_v14 = vld [vmem:[%s15935_s1 + $0x171] ss:$2 sm:$0xff]  ;;  %v8608_v50 = vld [vmem:[%s15935_s1 + $0x181] ss:$2 sm:$0xff] }
  0x77   :  { %v3761_v24 = vadd.f32 %v3633_v42, %v8081_v6  ;;  %v3762_v51 = vadd.f32 %v3634_v22, %v8081_v6  ;;  %v4145_v8 = vmax.f32 %v1971_v43, 0.0  ;;  %v4146_v54 = vmax.f32 %v1972_v12, 0.0  ;;  %v8613_v43 = vld [vmem:[%s15935_s1 + $0x191] ss:$2 sm:$0xff] }
  0x78   :  { %7163 = vperm.xlu2 %7768, %v6921_v62   ;;  %v3887_v29 = vmul.f32 %v3759_v25, %v8100_v15  ;;  %v3888_v3 = vmul.f32 %v3760_v9, %v8100_v15  ;;  %v562_v12 = vmul.f32 %v8577_v1, %v7993_v26  ;;  %v563_v40 = vmul.f32 %v8582_v46, %v7993_v26  ;;  %v7531_v9 = vld [vmem:[%s15935_s1 + $0x190] ss:$2 sm:$0xff] }
  0x79   :  { %7158 = vperm.xlu1 %7767, %v6920_v21   ;;  %7153 = vperm.xlu0 %7766, %v6919_v57   ;;  %v3889_v30 = vmul.f32 %v3761_v24, %v8100_v15  ;;  %v3890_v63 = vmul.f32 %v3762_v51, %v8100_v15  ;;  %v564_v42 = vmul.f32 %v8594_v5, %v7993_v26 }
  0x7a   :  { %v691_v22 = vmul.f32 %v8587_v33, %v7981_v23  ;;  %v4015_v62 = vadd.f32 %v3887_v29, %v8103_v16  ;;  %v4016_v21 = vadd.f32 %v3888_v3, %v8103_v16  ;;  %v565_v24 = vmul.f32 %v7531_v9, %v7993_v26 }
  0x7b   :  { %v4017_v57 = vadd.f32 %v3889_v30, %v8103_v16  ;;  %v4018_v25 = vadd.f32 %v3890_v63, %v8103_v16  ;;  %v692_v51 = vmul.f32 %v8603_v14, %v7981_v23  ;;  %v693_v55 = vmul.f32 %v8608_v50, %v7981_v23 }
  0x7c   :  { %v694_v29 = vmul.f32 %v8613_v43, %v7981_v23  ;;  %v4271_v3 = vmax.f32 %v4015_v62, 0.0  ;;  %v4272_v48 = vmax.f32 %v4016_v21, 0.0  ;;  %v819_v63 = vadd.f32 %v691_v22, %v562_v12  ;;  %v7532_v62 = vld [vmem:[%s15935_s1 + $0x1a0] ss:$2 sm:$0xff] }
  0x7d   :  { %v4273_v30 = vmax.f32 %v4017_v57, 0.0  ;;  %v4274_v36 = vmax.f32 %v4018_v25, 0.0  ;;  %v8639_v52 = vmul.f32 %v8577_v1, %v7995_v27  ;;  %v949_v20 = vmul.f32 %v8582_v46, %v7995_v27 }
  0x7e   :  { %v950_v38 = vmul.f32 %v8594_v5, %v7995_v27  ;;  %v4399_v61 = vmax.f32 %v4143_v44, %v4271_v3  ;;  %v4400_v13 = vmax.f32 %v4144_v60, %v4272_v48  ;;  %v951_v12 = vmul.f32 %v7531_v9, %v7995_v27 }
  0x7f   :  { %16304 = vst [vmem:[#allocation21_spill] sm:$0xff] %v8639_v52  ;;  %v4401_v17 = vmax.f32 %v4145_v8, %v4273_v30  ;;  %v4402_v59 = vmax.f32 %v4146_v54, %v4274_v36  ;;  %v8650_v22 = vmul.f32 %v7532_v62, %v7995_v27  ;;  %v15960_v21 = vrot.slane %v8639_v52, 1 }
  0x80   :  { %v1228_v57 = vrot.slane %v949_v20, 1  ;;  %v16306_v25 = vrot.slane %v8525_v56, 1  ;;  %4528 = vst.msk [vmem:[#allocation2 + $0x80] sm:$0xff] %vm4511_vm1, %v4399_v61  ;;  %v820_v36 = vadd.f32 %v692_v51, %v563_v40  ;;  %v821_v44 = vadd.f32 %v693_v55, %v564_v42 }
  0x81   :  { %16305 = vst [vmem:[#allocation22_spill] sm:$0xff] %v8650_v22  ;;  %v1230_v60 = vrot.slane %v950_v38, 1  ;;  %v822_v8 = vadd.f32 %v694_v29, %v565_v24  ;;  %v1232_v3 = vrot.slane %v951_v12, 1  ;;  %v15958_v20 = vrot.slane %v8650_v22, 1 }
  0x82   :  { %v6250_v48 = vsel %vm1182_vm0, %v16307_v37, %v16306_v25  ;;  %4529 = vst.msk [vmem:[#allocation2 + $0x88] sm:$0xff] %vm4511_vm1, %v4400_v13  ;;  %v1229_v54 = vsel %vm1182_vm0, %v15960_v21, %v1228_v57  ;;  %v5476_v37 = vadd.f32 %v8564_v18, %v8081_v6  ;;  %v8678_v34 = vmul.f32 %v8577_v1, %v7981_v23 }
  0x83   :  { %4530 = vst.msk [vmem:[#allocation2 + $0x90] sm:$0xff] %vm4511_vm1, %v4401_v17  ;;  %v1231_v61 = vsel %vm1182_vm0, %v1228_v57, %v1230_v60  ;;  %v1588_v38 = vadd.f32 %v1229_v54, %v819_v63  ;;  %v6434_v13 = vadd.f32 %v6250_v48, %v8567_v31  ;;  %v1233_v55 = vsel %vm1182_vm0, %v1230_v60, %v1232_v3 }
  0x84   :  { %4531 = vst.msk [vmem:[#allocation2 + $0x98] sm:$0xff] %vm4511_vm1, %v4402_v59  ;;  %v1235_v40 = vsel %vm1182_vm0, %v1232_v3, %v15958_v20  ;;  %v1589_v42 = vadd.f32 %v1231_v61, %v820_v36  ;;  %v1590_v18 = vadd.f32 %v1233_v55, %v821_v44  ;;  %v2232_v31 = vmul.f32 %v8582_v46, %v7981_v23 }
  0x85   :  { %16308 = vst [vmem:[#allocation23_spill] sm:$0xff] %v8678_v34  ;;  %v1591_v17 = vadd.f32 %v1235_v40, %v822_v8  ;;  %v1717_v24 = vadd.f32 %v8081_v6, %v1588_v38  ;;  %v8685_v59 = vadd.f32 %v8480_v35, %v8103_v16  ;;  %v8688_v51 = vadd.f32 %v6561_v0, %v8103_v16 }
  0x86   :  { %v5540_v29 = vmul.f32 %v5476_v37, %v8100_v15  ;;  %v2233_v1 = vmul.f32 %v8594_v5, %v7981_v23  ;;  %v6498_v30 = vadd.f32 %v6434_v13, %v8081_v6  ;;  %v2234_v63 = vmul.f32 %v7531_v9, %v7981_v23 }
  0x87   :  { %v1718_v12 = vadd.f32 %v8081_v6, %v1589_v42  ;;  %v8697_v46 = vmul.f32 %v7532_v62, %v7981_v23  ;;  %v15959_v35 = vrot.slane %v8678_v34, 1  ;;  %v1719_v57 = vadd.f32 %v8081_v6, %v1590_v18 }
  0x88   :  { %v1720_v25 = vadd.f32 %v8081_v6, %v1591_v17  ;;  %v1846_v48 = vmul.f32 %v8100_v15, %v1717_v24  ;;  %v2510_v36 = vrot.slane %v2232_v31, 1  ;;  %v8706_v9 = vadd.f32 %v5540_v29, %v8103_v16 }
  0x89   :  { %16309 = vst [vmem:[#allocation24_spill] sm:$0xff] %v8697_v46  ;;  %v2512_v60 = vrot.slane %v2233_v1, 1  ;;  %v8709_v62 = vmul.f32 %v6498_v30, %v8100_v15  ;;  %v4785_v8 = vld [vmem:[#allocation2 + $0x81] ss:$2 sm:$0xff]  ;;  %v2103_v54 = vmul.f32 %v8587_v33, %v7993_v26  ;;  %v2104_v3 = vmul.f32 %v8603_v14, %v7993_v26  ;;  %v4657_v37 = vld [vmem:[#allocation2 + $0x80] ss:$2 sm:$0xff] }
  0x8a   :  { %v2514_v0 = vrot.slane %v2234_v63, 1  ;;  %v1847_v61 = vmul.f32 %v8100_v15, %v1718_v12  ;;  %v2105_v38 = vmul.f32 %v8608_v50, %v7993_v26  ;;  %v2106_v13 = vmul.f32 %v8613_v43, %v7993_v26  ;;  %v7660_v1 = vld [vmem:[%s15935_s1 + $0x1a1] ss:$2 sm:$0xff] }
  0x8b   :  { %v15962_v55 = vrot.slane %v8697_v46, 1  ;;  %v1848_v40 = vmul.f32 %v8100_v15, %v1719_v57  ;;  %v1849_v42 = vmul.f32 %v8100_v15, %v1720_v25  ;;  %v8724_v18 = vadd.f32 %v8103_v16, %v1846_v48  ;;  %v4659_v63 = vld [vmem:[#allocation2 + $0x90] ss:$2 sm:$0xff] }
  0x8c   :  { %v2511_v17 = vsel %vm1182_vm0, %v15959_v35, %v2510_v36  ;;  %v4904_v24 = vmul.f32 %v4657_v37, %v7993_v26  ;;  %v4968_v31 = vmul.f32 %v4785_v8, %v7981_v23  ;;  %v8732_v29 = vmul.f32 %v4657_v37, %v7995_v27 }
  0x8d   :  { %v2513_v30 = vsel %vm1182_vm0, %v2510_v36, %v2512_v60  ;;  %v5671_v12 = vmul.f32 %v4785_v8, %v7993_v26  ;;  %v8740_v57 = vmul.f32 %v4657_v37, %v7981_v23  ;;  %v2515_v25 = vsel %vm1182_vm0, %v2512_v60, %v2514_v0 }
  0x8e   :  { %16310 = vst [vmem:[#allocation25_spill] sm:$0xff] %v8732_v29  ;;  %v8745_v48 = vmul.f32 %v8587_v33, %v7995_v27  ;;  %v8748_v20 = vmul.f32 %v4659_v63, %v7995_v27  ;;  %v2517_v35 = vsel %vm1182_vm0, %v2514_v0, %v15962_v55  ;;  %v2870_v36 = vadd.f32 %v2511_v17, %v2103_v54  ;;  %v4787_v17 = vld [vmem:[#allocation2 + $0x91] ss:$2 sm:$0xff] }
  0x8f   :  { %16311 = vst [vmem:[#allocation26_spill] sm:$0xff] %v8740_v57  ;;  %v2999_v21 = vmul.f32 %v8603_v14, %v7995_v27  ;;  %v3000_v37 = vmul.f32 %v8608_v50, %v7995_v27  ;;  %v3001_v60 = vmul.f32 %v8613_v43, %v7995_v27  ;;  %v8760_v33 = vmul.f32 %v7660_v1, %v7995_v27 }
  0x90   :  { %16312 = vst [vmem:[#allocation27_spill] sm:$0xff] %v8745_v48  ;;  %v15965_v5 = vrot.slane %v8745_v48, 1  ;;  %v8764_v44 = vmul.f32 %v4659_v63, %v7981_v23  ;;  %v2871_v46 = vadd.f32 %v2513_v30, %v2104_v3  ;;  %v2872_v0 = vadd.f32 %v2515_v25, %v2105_v38 }
  0x91   :  { %16313 = vst [vmem:[#allocation28_spill] sm:$0xff] %v8748_v20  ;;  %v3277_v54 = vrot.slane %v2999_v21, 1  ;;  %v2873_v55 = vadd.f32 %v2517_v35, %v2106_v13  ;;  %v3279_v14 = vrot.slane %v3000_v37, 1  ;;  %v3281_v22 = vrot.slane %v3001_v60, 1 }
  0x92   :  { %16314 = vst [vmem:[#allocation29_spill] sm:$0xff] %v8760_v33  ;;  %v15966_v50 = vrot.slane %v8760_v33, 1  ;;  %v15972_v34 = vrot.slane %v8740_v57, 1  ;;  %v8769_v43 = vmul.f32 %v4785_v8, %v7995_v27  ;;  %v1976_v1 = vadd.f32 %v8103_v16, %v1847_v61 }
  0x93   :  { %16315 = vst [vmem:[#allocation30_spill] sm:$0xff] %v8764_v44  ;;  %v3278_v63 = vsel %vm1182_vm0, %v15965_v5, %v3277_v54  ;;  %v3280_v3 = vsel %vm1182_vm0, %v3277_v54, %v3279_v14  ;;  %v3282_v21 = vsel %vm1182_vm0, %v3279_v14, %v3281_v22  ;;  %v15967_v13 = vrot.slane %v8764_v44, 1 }
  0x94   :  { %16316 = vst [vmem:[#allocation31_spill] sm:$0xff] %v8769_v43  ;;  %v3284_v35 = vsel %vm1182_vm0, %v3281_v22, %v15966_v50  ;;  %v3637_v38 = vadd.f32 %v3278_v63, %v2870_v36  ;;  %v8782_v8 = vmul.f32 %v4787_v17, %v7995_v27  ;;  %v3638_v30 = vadd.f32 %v3280_v3, %v2871_v46 }
  0x95   :  { %v3639_v61 = vadd.f32 %v3282_v21, %v2872_v0  ;;  %v15971_v25 = vrot.slane %v8732_v29, 1  ;;  %v15969_v37 = vrot.slane %v8748_v20, 1  ;;  %v3640_v60 = vadd.f32 %v3284_v35, %v2873_v55 }
  0x96   :  { %16317 = vst [vmem:[#allocation32_spill] sm:$0xff] %v8782_v8  ;;  %v3765_v54 = vadd.f32 %v3637_v38, %v8081_v6  ;;  %v5032_v14 = vadd.f32 %v4968_v31, %v4904_v24  ;;  %v1977_v5 = vadd.f32 %v8103_v16, %v1848_v40  ;;  %v3766_v22 = vadd.f32 %v3638_v30, %v8081_v6 }
  0x97   :  { %v3767_v36 = vadd.f32 %v3639_v61, %v8081_v6  ;;  %v15970_v63 = vrot.slane %v8769_v43, 1  ;;  %v1978_v17 = vadd.f32 %v8103_v16, %v1849_v42  ;;  %v3768_v46 = vadd.f32 %v3640_v60, %v8081_v6 }
  0x98   :  { %v3893_v0 = vmul.f32 %v3765_v54, %v8100_v15  ;;  %v5873_v55 = vsel %vm1182_vm0, %v15972_v34, %v15967_v13  ;;  %v15968_v40 = vrot.slane %v8782_v8, 1  ;;  %v3894_v24 = vmul.f32 %v3766_v22, %v8100_v15  ;;  %v7510_v13 = vld [vmem:[%s15935_s1 + $0x40] ss:$2 sm:$0xff] }
  0x99   :  { %v3895_v31 = vmul.f32 %v3767_v36, %v8100_v15  ;;  %v5234_v42 = vsel %vm1182_vm0, %v15971_v25, %v15969_v37  ;;  %v3896_v3 = vmul.f32 %v3768_v46, %v8100_v15  ;;  %v4149_v35 = vmax.f32 %v8724_v18, 0.0  ;;  %v8819_v46 = vld [vmem:[%s15935_s1 + $0x51] ss:$2 sm:$0xff] }
  0x9a   :  { %v4021_v21 = vadd.f32 %v3893_v0, %v8103_v16  ;;  %v4022_v38 = vadd.f32 %v3894_v24, %v8103_v16  ;;  %v4150_v61 = vmax.f32 %v1976_v1, 0.0  ;;  %v4151_v60 = vmax.f32 %v1977_v5, 0.0  ;;  %v7511_v1 = vld [vmem:[%s15935_s1 + $0x50] ss:$2 sm:$0xff] }
  0x9b   :  { %v4023_v30 = vadd.f32 %v3895_v31, %v8103_v16  ;;  %v6054_v54 = vadd.f32 %v5873_v55, %v5671_v12  ;;  %v4024_v22 = vadd.f32 %v3896_v3, %v8103_v16  ;;  %v4152_v36 = vmax.f32 %v1978_v17, 0.0  ;;  %v8832_v17 = vld [vmem:[%s15935_s1 + $0x41] ss:$2 sm:$0xff]  ;;  %v8843_v3 = vld [vmem:[%s15935_s1 + $0x71] ss:$2 sm:$0xff] }
  0x9c   :  { %v4277_v50 = vmax.f32 %v4021_v21, 0.0  ;;  %v6256_v5 = vsel %vm1182_vm0, %v15970_v63, %v15968_v40  ;;  %v4278_v18 = vmax.f32 %v4022_v38, 0.0  ;;  %v544_v0 = vmul.f32 %v7510_v13, %v7993_v26  ;;  %v8838_v31 = vld [vmem:[%s15935_s1 + $0x61] ss:$2 sm:$0xff] }
  0x9d   :  { %v4279_v12 = vmax.f32 %v4023_v30, 0.0  ;;  %v4280_v55 = vmax.f32 %v4024_v22, 0.0  ;;  %v545_v21 = vmul.f32 %v7511_v1, %v7993_v26  ;;  %v673_v38 = vmul.f32 %v8832_v17, %v7981_v23 }
  0x9e   :  { %v4405_v24 = vmax.f32 %v4149_v35, %v4277_v50  ;;  %v4406_v30 = vmax.f32 %v4150_v61, %v4278_v18  ;;  %v7512_v50 = vld [vmem:[%s15935_s1 + $0x60] ss:$2 sm:$0xff]  ;;  %v7513_v35 = vld [vmem:[%s15935_s1 + $0x70] ss:$2 sm:$0xff]  ;;  %v674_v22 = vmul.f32 %v8819_v46, %v7981_v23  ;;  %v8857_v37 = vmul.f32 %v7510_v13, %v7995_v27 }
  0x9f   :  { %v4407_v40 = vmax.f32 %v4151_v60, %v4279_v12  ;;  %v4408_v63 = vmax.f32 %v4152_v36, %v4280_v55  ;;  %v931_v61 = vmul.f32 %v7511_v1, %v7995_v27  ;;  %v932_v60 = vmul.f32 %v7512_v50, %v7995_v27 }
  0xa0   :  { %4534 = vst.msk [vmem:[#allocation2 + $0xb0] sm:$0xff] %vm4511_vm1, %v4405_v24  ;;  %v933_v18 = vmul.f32 %v7513_v35, %v7995_v27  ;;  %v546_v12 = vmul.f32 %v7512_v50, %v7993_v26  ;;  %v547_v25 = vmul.f32 %v7513_v35, %v7993_v26  ;;  %v675_v34 = vmul.f32 %v8838_v31, %v7981_v23 }
  0xa1   :  { %4535 = vst.msk [vmem:[#allocation2 + $0xb8] sm:$0xff] %vm4511_vm1, %v4406_v30  ;;  %v676_v36 = vmul.f32 %v8843_v3, %v7981_v23  ;;  %v1192_v55 = vrot.slane %v931_v61, 1  ;;  %v1194_v24 = vrot.slane %v932_v60, 1  ;;  %v6626_v8 = vadd.f32 %v8709_v62, %v8103_v16 }
  0xa2   :  { %4536 = vst.msk [vmem:[#allocation2 + $0xc0] sm:$0xff] %vm4511_vm1, %v4407_v40  ;;  %v1196_v33 = vrot.slane %v933_v18, 1  ;;  %v5415_v44 = vadd.f32 %v5234_v42, %v5032_v14  ;;  %v6437_v30 = vadd.f32 %v6256_v5, %v6054_v54  ;;  %v15983_v20 = vrot.slane %v8857_v37, 1 }
  0xa3   :  { %4537 = vst.msk [vmem:[#allocation2 + $0xc8] sm:$0xff] %vm4511_vm1, %v4408_v63  ;;  %v16318_v48 = vmax.f32 %v8688_v51, 0.0  ;;  %v16319_v52 = vmax.f32 %v8685_v59, 0.0  ;;  %v6690_v43 = vmax.f32 %v8706_v9, 0.0  ;;  %v801_v40 = vadd.f32 %v673_v38, %v544_v0 }
  0xa4   :  { %v802_v61 = vadd.f32 %v674_v22, %v545_v21  ;;  %v803_v60 = vadd.f32 %v675_v34, %v546_v12  ;;  %v804_v18 = vadd.f32 %v676_v36, %v547_v25  ;;  %v1193_v62 = vsel %vm1182_vm0, %v15983_v20, %v1192_v55 }
  0xa5   :  { %v6817_v47 = vmax.f32 %v16319_v52, %v16318_v48  ;;  %v1195_v14 = vsel %vm1182_vm0, %v1192_v55, %v1194_v24  ;;  %v1197_v63 = vsel %vm1182_vm0, %v1194_v24, %v1196_v33  ;;  %v2214_v42 = vmul.f32 %v7511_v1, %v7981_v23  ;;  %v6964_v1 = vpop.permute.xlu2 %6963 }
  0xa6   :  { %v2215_v51 = vmul.f32 %v7512_v50, %v7981_v23  ;;  %v2216_v52 = vmul.f32 %v7513_v35, %v7981_v23  ;;  %v6754_v59 = vmax.f32 %v6626_v8, 0.0  ;;  %v5479_v9 = vadd.f32 %v5415_v44, %v8081_v6 }
  0xa7   :  { %v6501_v34 = vadd.f32 %v6437_v30, %v8081_v6  ;;  %v16320_v48 = vrot.slane %v8016_v32, 1  ;;  %v1570_v54 = vadd.f32 %v1193_v62, %v801_v40  ;;  %v1571_v5 = vadd.f32 %v1195_v14, %v802_v61 }
  0xa8   :  { %v8894_v0 = vmul.f32 %v7510_v13, %v7981_v23  ;;  %v1572_v21 = vadd.f32 %v1197_v63, %v803_v60  ;;  %v2474_v50 = vrot.slane %v2214_v42, 1  ;;  %v2476_v22 = vrot.slane %v2215_v51, 1  ;;  %v4663_v24 = vld [vmem:[#allocation2 + $0xb0] ss:$2 sm:$0xff] }
  0xa9   :  { %v1199_v25 = vsel %vm1182_vm0, %v1196_v33, %v16320_v48  ;;  %v2478_v35 = vrot.slane %v2216_v52, 1  ;;  %v8896_v8 = vmul.f32 %v6964_v1, %v6817_v47  ;;  %v8898_v44 = vmax.f32 %v6690_v43, %v6754_v59  ;;  %v8906_v33 = vld [vmem:[#allocation2 + $0xb1] ss:$2 sm:$0xff] }
  0xaa   :  { %v1573_v38 = vadd.f32 %v1199_v25, %v804_v18  ;;  %v8901_v12 = vmul.f32 %v5479_v9, %v8100_v15  ;;  %v8904_v32 = vmul.f32 %v6501_v34, %v8100_v15  ;;  %v1699_v13 = vadd.f32 %v8081_v6, %v1570_v54 }
  0xab   :  { %16321 = vst [vmem:[#allocation33_spill] sm:$0xff] %v8896_v8  ;;  %v1700_v36 = vadd.f32 %v8081_v6, %v1571_v5  ;;  %v2085_v55 = vmul.f32 %v8832_v17, %v7993_v26  ;;  %v15981_v47 = vrot.slane %v8894_v0, 1  ;;  %v1701_v43 = vadd.f32 %v8081_v6, %v1572_v21 }
  0xac   :  { %16322 = vst [vmem:[#allocation34_spill] sm:$0xff] %v8898_v44  ;;  %v2086_v30 = vmul.f32 %v8819_v46, %v7993_v26  ;;  %v2087_v40 = vmul.f32 %v8838_v31, %v7993_v26  ;;  %v2088_v61 = vmul.f32 %v8843_v3, %v7993_v26  ;;  %v1702_v60 = vadd.f32 %v8081_v6, %v1573_v38 }
  0xad   :  { %v2475_v18 = vsel %vm1182_vm0, %v15981_v47, %v2474_v50  ;;  %v2477_v62 = vsel %vm1182_vm0, %v2474_v50, %v2476_v22  ;;  %v2479_v14 = vsel %vm1182_vm0, %v2476_v22, %v2478_v35  ;;  %v4907_v63 = vmul.f32 %v4663_v24, %v7993_v26 }
  0xae   :  { %v4971_v42 = vmul.f32 %v8906_v33, %v7981_v23  ;;  %v8930_v51 = vmul.f32 %v4663_v24, %v7995_v27  ;;  %v16324_v52 = vrot.slane %v7998_v28, 1  ;;  %v8936_v9 = vmul.f32 %v4663_v24, %v7981_v23 }
  0xaf   :  { %v8940_v34 = vmul.f32 %v8906_v33, %v7995_v27  ;;  %v1828_v48 = vmul.f32 %v8100_v15, %v1699_v13  ;;  %v1829_v25 = vmul.f32 %v8100_v15, %v1700_v36  ;;  %v1830_v54 = vmul.f32 %v8100_v15, %v1701_v43  ;;  %v4665_v43 = vld [vmem:[#allocation2 + $0xc0] ss:$2 sm:$0xff] }
  0xb0   :  { %16323 = vst [vmem:[#allocation35_spill] sm:$0xff] %v8930_v51  ;;  %v2481_v59 = vsel %vm1182_vm0, %v2478_v35, %v16324_v52  ;;  %v8947_v5 = vmul.f32 %v8832_v17, %v7995_v27  ;;  %v2981_v28 = vmul.f32 %v8819_v46, %v7995_v27  ;;  %v2982_v21 = vmul.f32 %v8838_v31, %v7995_v27 }
  0xb1   :  { %16325 = vst [vmem:[#allocation36_spill] sm:$0xff] %v8936_v9  ;;  %v2852_v1 = vadd.f32 %v2475_v18, %v2085_v55  ;;  %v2853_v38 = vadd.f32 %v2477_v62, %v2086_v30  ;;  %v2854_v50 = vadd.f32 %v2479_v14, %v2087_v40  ;;  %v2983_v22 = vmul.f32 %v8843_v3, %v7995_v27 }
  0xb2   :  { %16326 = vst [vmem:[#allocation37_spill] sm:$0xff] %v8940_v34  ;;  %v2855_v35 = vadd.f32 %v2481_v59, %v2088_v61  ;;  %v15982_v13 = vrot.slane %v8947_v5, 1  ;;  %v3241_v36 = vrot.slane %v2981_v28, 1  ;;  %v3243_v24 = vrot.slane %v2982_v21, 1 }
  0xb3   :  { %v8956_v17 = vadd.f32 %v4971_v42, %v4907_v63  ;;  %v1831_v52 = vmul.f32 %v8100_v15, %v1702_v60  ;;  %v1957_v46 = vadd.f32 %v8103_v16, %v1828_v48  ;;  %v3245_v47 = vrot.slane %v2983_v22, 1  ;;  %v8977_v48 = vld [vmem:[%s15935_s1 + $0x1] ss:$2 sm:$0xff]  ;;  %v8994_v22 = vld [vmem:[%s15935_s1 + $0x11] ss:$2 sm:$0xff] }
  0xb4   :  { %v8961_v31 = vmul.f32 %v4665_v43, %v7995_v27  ;;  %v3242_v3 = vsel %vm1182_vm0, %v15982_v13, %v3241_v36  ;;  %v3244_v30 = vsel %vm1182_vm0, %v3241_v36, %v3243_v24  ;;  %v1958_v40 = vadd.f32 %v8103_v16, %v1829_v25 }
  0xb5   :  { %v1959_v61 = vadd.f32 %v8103_v16, %v1830_v54  ;;  %v3246_v60 = vsel %vm1182_vm0, %v3243_v24, %v3245_v47  ;;  %v16328_v18 = vrot.slane %v8084_v7, 1  ;;  %v3619_v14 = vadd.f32 %v3242_v3, %v2852_v1  ;;  %v7507_v24 = vld [vmem:[%s15935_s1 + $0x10] ss:$2 sm:$0xff] }
  0xb6   :  { %16327 = vst [vmem:[#allocation38_spill] sm:$0xff] %v8961_v31  ;;  %v3620_v63 = vadd.f32 %v3244_v30, %v2853_v38  ;;  %v3621_v42 = vadd.f32 %v3246_v60, %v2854_v50  ;;  %v8980_v28 = vmul.f32 %v4665_v43, %v7981_v23  ;;  %v1960_v54 = vadd.f32 %v8103_v16, %v1831_v52  ;;  %v28_v50 = vld [vmem:[%s15935_s1] ss:$2 sm:$0xff] }
  0xb7   :  { %v3248_v62 = vsel %vm1182_vm0, %v3245_v47, %v16328_v18  ;;  %v4131_v21 = vmax.f32 %v1957_v46, 0.0  ;;  %v3747_v7 = vadd.f32 %v3619_v14, %v8081_v6  ;;  %v4133_v36 = vmax.f32 %v1959_v61, 0.0  ;;  %v9012_v61 = vld [vmem:[%s15935_s1 + $0x21] ss:$2 sm:$0xff]  ;;  %v9017_v18 = vld [vmem:[%s15935_s1 + $0x31] ss:$2 sm:$0xff] }
  0xb8   :  { %v3622_v59 = vadd.f32 %v3248_v62, %v2855_v35  ;;  %16329 = vst [vmem:[#allocation39_spill] sm:$0xff] %v8980_v28  ;;  %v3748_v47 = vadd.f32 %v3620_v63, %v8081_v6  ;;  %v3749_v1 = vadd.f32 %v3621_v42, %v8081_v6  ;;  %v4132_v35 = vmax.f32 %v1958_v40, 0.0  ;;  %v7508_v40 = vld [vmem:[%s15935_s1 + $0x20] ss:$2 sm:$0xff] }
  0xb9   :  { %v540_v43 = vmul.f32 %v7993_v26, %v28_v50  ;;  %v669_v52 = vmul.f32 %v8977_v48, %v7981_v23  ;;  %v3875_v46 = vmul.f32 %v3747_v7, %v8100_v15  ;;  %v4134_v62 = vmax.f32 %v1960_v54, 0.0 }
  0xba   :  { %v3750_v38 = vadd.f32 %v3622_v59, %v8081_v6  ;;  %v3876_v3 = vmul.f32 %v3748_v47, %v8100_v15  ;;  %v3877_v30 = vmul.f32 %v3749_v1, %v8100_v15  ;;  %v541_v14 = vmul.f32 %v7507_v24, %v7993_v26 }
  0xbb   :  { %v542_v63 = vmul.f32 %v7508_v40, %v7993_v26  ;;  %v670_v42 = vmul.f32 %v8994_v22, %v7981_v23  ;;  %v4003_v59 = vadd.f32 %v3875_v46, %v8103_v16  ;;  %v671_v13 = vmul.f32 %v9012_v61, %v7981_v23 }
  0xbc   :  { %v3878_v60 = vmul.f32 %v3750_v38, %v8100_v15  ;;  %v4004_v7 = vadd.f32 %v3876_v3, %v8103_v16  ;;  %v4005_v47 = vadd.f32 %v3877_v30, %v8103_v16  ;;  %v7509_v38 = vld [vmem:[%s15935_s1 + $0x30] ss:$2 sm:$0xff]  ;;  %v672_v25 = vmul.f32 %v9017_v18, %v7981_v23  ;;  %v4793_v30 = vld [vmem:[#allocation2 + $0xc1] ss:$2 sm:$0xff] }
  0xbd   :  { %v543_v54 = vmul.f32 %v7509_v38, %v7993_v26  ;;  %v797_v55 = vadd.f32 %v669_v52, %v540_v43  ;;  %v4259_v46 = vmax.f32 %v4003_v59, 0.0  ;;  %v798_v56 = vadd.f32 %v670_v42, %v541_v14 }
  0xbe   :  { %v4006_v1 = vadd.f32 %v3878_v60, %v8103_v16  ;;  %v4260_v20 = vmax.f32 %v4004_v7, 0.0  ;;  %v4261_v3 = vmax.f32 %v4005_v47, 0.0  ;;  %v926_v60 = vmul.f32 %v7995_v27, %v28_v50 }
  0xbf   :  { %v927_v10 = vmul.f32 %v7507_v24, %v7995_v27  ;;  %v928_v57 = vmul.f32 %v7508_v40, %v7995_v27  ;;  %v4387_v58 = vmax.f32 %v4131_v21, %v4259_v46  ;;  %v929_v49 = vmul.f32 %v7509_v38, %v7995_v27 }
  0xc0   :  { %v4262_v29 = vmax.f32 %v4006_v1, 0.0  ;;  %v4388_v11 = vmax.f32 %v4132_v35, %v4260_v20  ;;  %v4389_v4 = vmax.f32 %v4133_v36, %v4261_v3  ;;  %v1183_v19 = vrot.slane %v926_v60, 1 }
  0xc1   :  { %v1184_v43 = vrot.slane %v927_v10, 1  ;;  %v1186_v52 = vrot.slane %v928_v57, 1  ;;  %v15995_v59 = vrot.slane %v8961_v31, 1  ;;  %v9041_v7 = vmul.f32 %v4793_v30, %v7995_v27  ;;  %4516 = vst.msk [vmem:[#allocation2 + $0x20] sm:$0xff] %vm4511_vm1, %v4387_v58 }
  0xc2   :  { %v4390_v41 = vmax.f32 %v4134_v62, %v4262_v29  ;;  %v799_v14 = vadd.f32 %v671_v13, %v542_v63  ;;  %v800_v42 = vadd.f32 %v672_v25, %v543_v54  ;;  %4517 = vst.msk [vmem:[#allocation2 + $0x28] sm:$0xff] %vm4511_vm1, %v4388_v11  ;;  %v1188_v21 = vrot.slane %v929_v49, 1 }
  0xc3   :  { %16330 = vst [vmem:[#allocation40_spill] sm:$0xff] %v9041_v7  ;;  %v1185_v20 = vsel %vm1182_vm0, %v1183_v19, %v1184_v43  ;;  %v1187_v29 = vsel %vm1182_vm0, %v1184_v43, %v1186_v52  ;;  %v2209_v35 = vmul.f32 %v7981_v23, %v28_v50  ;;  %v2210_v36 = vmul.f32 %v7507_v24, %v7981_v23 }
  0xc4   :  { %4518 = vst.msk [vmem:[#allocation2 + $0x30] sm:$0xff] %vm4511_vm1, %v4389_v4  ;;  %v1566_v10 = vadd.f32 %v1185_v20, %v797_v55  ;;  %v1567_v57 = vadd.f32 %v1187_v29, %v798_v56  ;;  %v2211_v62 = vmul.f32 %v7508_v40, %v7981_v23  ;;  %v15994_v58 = vrot.slane %v8980_v28, 1 }
  0xc5   :  { %4519 = vst.msk [vmem:[#allocation2 + $0x38] sm:$0xff] %vm4511_vm1, %v4390_v41  ;;  %v1189_v11 = vsel %vm1182_vm0, %v1186_v52, %v1188_v21  ;;  %v16331_v19 = vrot.slane %v8857_v37, 1  ;;  %v2212_v13 = vmul.f32 %v7509_v38, %v7981_v23  ;;  %v16332_v4 = vrot.slane %v8930_v51, 1 }
  0xc6   :  { %v1568_v55 = vadd.f32 %v1189_v11, %v799_v14  ;;  %v1695_v50 = vadd.f32 %v8081_v6, %v1566_v10  ;;  %v9066_v41 = vmul.f32 %v8906_v33, %v7993_v26  ;;  %v1696_v40 = vadd.f32 %v8081_v6, %v1567_v57 }
  0xc7   :  { %v1191_v49 = vsel %vm1182_vm0, %v1188_v21, %v16331_v19  ;;  %v5240_v56 = vsel %vm1182_vm0, %v16332_v4, %v15995_v59  ;;  %v2465_v63 = vrot.slane %v2209_v35, 1  ;;  %v2466_v47 = vrot.slane %v2210_v36, 1 }
  0xc8   :  { %v1569_v25 = vadd.f32 %v1191_v49, %v800_v42  ;;  %v2468_v1 = vrot.slane %v2211_v62, 1  ;;  %v2470_v38 = vrot.slane %v2212_v13, 1  ;;  %v9072_v54 = vadd.f32 %v5240_v56, %v8956_v17 }
  0xc9   :  { %v16333_v46 = vrot.slane %v8936_v9, 1  ;;  %v1697_v3 = vadd.f32 %v8081_v6, %v1568_v55  ;;  %v2081_v30 = vmul.f32 %v8977_v48, %v7993_v26  ;;  %v4645_v60 = vld [vmem:[#allocation2 + $0x20] ss:$2 sm:$0xff]  ;;  %v1824_v52 = vmul.f32 %v8100_v15, %v1695_v50  ;;  %v4773_v42 = vld [vmem:[#allocation2 + $0x21] ss:$2 sm:$0xff] }
  0xca   :  { %v1698_v43 = vadd.f32 %v8081_v6, %v1569_v25  ;;  %v2082_v17 = vmul.f32 %v8994_v22, %v7993_v26  ;;  %v2083_v14 = vmul.f32 %v9012_v61, %v7993_v26  ;;  %v9091_v20 = vmul.f32 %v4645_v60, %v7995_v27 }
  0xcb   :  { %v9079_v33 = vsel %vm1182_vm0, %v16333_v46, %v15994_v58  ;;  %v1825_v29 = vmul.f32 %v8100_v15, %v1696_v40  ;;  %v2084_v21 = vmul.f32 %v9017_v18, %v7993_v26  ;;  %v2976_v35 = vmul.f32 %v8977_v48, %v7995_v27 }
  0xcc   :  { %v9098_v10 = vld [vmem:[#allocation2 + $0x30] ss:$2 sm:$0xff]  ;;  %v9100_v57 = vld [vmem:[#allocation2 + $0x31] ss:$2 sm:$0xff]  ;;  %v9103_v36 = vmul.f32 %v4645_v60, %v7981_v23  ;;  %v2467_v62 = vsel %vm1182_vm0, %v2465_v63, %v2466_v47  ;;  %v2469_v11 = vsel %vm1182_vm0, %v2466_v47, %v2468_v1  ;;  %v2471_v19 = vsel %vm1182_vm0, %v2468_v1, %v2470_v38 }
  0xcd   :  { %v9110_v49 = vmul.f32 %v9098_v10, %v7995_v27  ;;  %v9114_v48 = vmul.f32 %v9098_v10, %v7981_v23  ;;  %v1826_v13 = vmul.f32 %v8100_v15, %v1697_v3  ;;  %v16334_v4 = vrot.slane %v8894_v0, 1 }
  0xce   :  { %v4898_v55 = vmul.f32 %v4645_v60, %v7993_v26  ;;  %v4962_v25 = vmul.f32 %v4773_v42, %v7981_v23  ;;  %v1827_v50 = vmul.f32 %v8100_v15, %v1698_v43  ;;  %v9124_v40 = vadd.f32 %v8103_v16, %v1824_v52 }
  0xcf   :  { %v2473_v56 = vsel %vm1182_vm0, %v2470_v38, %v16334_v4  ;;  %v9129_v1 = vmul.f32 %v4773_v42, %v7995_v27  ;;  %v9133_v0 = vmul.f32 %v9100_v57, %v7995_v27  ;;  %v2977_v3 = vmul.f32 %v8994_v22, %v7995_v27 }
  0xd0   :  { %v2978_v60 = vmul.f32 %v9012_v61, %v7995_v27  ;;  %v5665_v43 = vmul.f32 %v4773_v42, %v7993_v26  ;;  %v2848_v52 = vadd.f32 %v2467_v62, %v2081_v30  ;;  %v2979_v4 = vmul.f32 %v9017_v18, %v7995_v27 }
  0xd1   :  { %v3232_v58 = vrot.slane %v2976_v35, 1  ;;  %v5026_v59 = vadd.f32 %v4962_v25, %v4898_v55  ;;  %v2849_v37 = vadd.f32 %v2469_v11, %v2082_v17  ;;  %v2850_v24 = vadd.f32 %v2471_v19, %v2083_v14 }
  0xd2   :  { %v3233_v47 = vrot.slane %v2977_v3, 1  ;;  %v15997_v63 = vrot.slane %v9129_v1, 1  ;;  %v2851_v46 = vadd.f32 %v2473_v56, %v2084_v21  ;;  %v3235_v38 = vrot.slane %v2978_v60, 1 }
  0xd3   :  { %v3237_v28 = vrot.slane %v2979_v4, 1  ;;  %v16335_v22 = vrot.slane %v9110_v49, 1  ;;  %v16336_v61 = vrot.slane %v9091_v20, 1  ;;  %v16337_v30 = vrot.slane %v9114_v48, 1 }
  0xd4   :  { %v16338_v18 = vrot.slane %v9103_v36, 1  ;;  %v15998_v17 = vrot.slane %v9133_v0, 1  ;;  %v3234_v14 = vsel %vm1182_vm0, %v3232_v58, %v3233_v47  ;;  %v3236_v21 = vsel %vm1182_vm0, %v3233_v47, %v3235_v38 }
  0xd5   :  { %v5222_v42 = vsel %vm1182_vm0, %v16336_v61, %v16335_v22  ;;  %v3238_v62 = vsel %vm1182_vm0, %v3235_v38, %v3237_v28  ;;  %v16339_v11 = vrot.slane %v8947_v5, 1  ;;  %v3615_v56 = vadd.f32 %v3234_v14, %v2848_v52  ;;  %v9202_v14 = vld [vmem:[%s15935_s1 + $0x1d0] ss:$2 sm:$0xff] }
  0xd6   :  { %v5861_v35 = vsel %vm1182_vm0, %v16338_v18, %v16337_v30  ;;  %v1954_v55 = vadd.f32 %v8103_v16, %v1825_v29  ;;  %v1955_v25 = vadd.f32 %v8103_v16, %v1826_v13  ;;  %v3616_v3 = vadd.f32 %v3236_v21, %v2849_v37 }
  0xd7   :  { %v3240_v19 = vsel %vm1182_vm0, %v3237_v28, %v16339_v11  ;;  %v3617_v60 = vadd.f32 %v3238_v62, %v2850_v24  ;;  %v5409_v4 = vadd.f32 %v5222_v42, %v5026_v59  ;;  %v6048_v22 = vadd.f32 %v5861_v35, %v5665_v43  ;;  %v9197_v35 = vld [vmem:[%s15935_s1 + $0x1c0] ss:$2 sm:$0xff] }
  0xd8   :  { %v3618_v61 = vadd.f32 %v3240_v19, %v2851_v46  ;;  %v3743_v58 = vadd.f32 %v3615_v56, %v8081_v6  ;;  %v6244_v5 = vsel %vm1182_vm0, %v15997_v63, %v15998_v17  ;;  %v1956_v28 = vadd.f32 %v8103_v16, %v1827_v50  ;;  %v9214_v56 = vld [vmem:[%s15935_s1 + $0x1e0] ss:$2 sm:$0xff] }
  0xd9   :  { %v3744_v47 = vadd.f32 %v3616_v3, %v8081_v6  ;;  %v3745_v29 = vadd.f32 %v3617_v60, %v8081_v6  ;;  %v9175_v37 = vadd.f32 %v9079_v33, %v9066_v41  ;;  %v16340_v59 = vrot.slane %v9041_v7, 1 }
  0xda   :  { %v16341_v24 = vrot.slane %v8940_v34, 1  ;;  %v3746_v38 = vadd.f32 %v3618_v61, %v8081_v6  ;;  %v3871_v46 = vmul.f32 %v3743_v58, %v8100_v15  ;;  %v4127_v52 = vmax.f32 %v9124_v40, 0.0  ;;  %v9207_v40 = vld [vmem:[%s15935_s1 + $0x1c1] ss:$2 sm:$0xff] }
  0xdb   :  { %v3872_v50 = vmul.f32 %v3744_v47, %v8100_v15  ;;  %v3873_v43 = vmul.f32 %v3745_v29, %v8100_v15  ;;  %v4128_v42 = vmax.f32 %v1954_v55, 0.0  ;;  %v9190_v41 = vadd.f32 %v5409_v4, %v8081_v6  ;;  %v9219_v55 = vld [vmem:[%s15935_s1 + $0x1d1] ss:$2 sm:$0xff]  ;;  %v9225_v4 = vld [vmem:[%s15935_s1 + $0x1e1] ss:$2 sm:$0xff] }
  0xdc   :  { %v9182_v13 = vsel %vm1182_vm0, %v16341_v24, %v16340_v59  ;;  %v6431_v33 = vadd.f32 %v6244_v5, %v6048_v22  ;;  %v3874_v30 = vmul.f32 %v3746_v38, %v8100_v15  ;;  %v3999_v18 = vadd.f32 %v3871_v46, %v8103_v16 }
  0xdd   :  { %v4000_v21 = vadd.f32 %v3872_v50, %v8103_v16  ;;  %v4001_v62 = vadd.f32 %v3873_v43, %v8103_v16  ;;  %v4129_v11 = vmax.f32 %v1955_v25, 0.0  ;;  %v4130_v19 = vmax.f32 %v1956_v28, 0.0  ;;  %v9230_v25 = vld [vmem:[%s15935_s1 + $0x1f1] ss:$2 sm:$0xff]  ;;  %v7537_v28 = vld [vmem:[%s15935_s1 + $0x1f0] ss:$2 sm:$0xff] }
  0xde   :  { %v4002_v3 = vadd.f32 %v3874_v30, %v8103_v16  ;;  %v4255_v60 = vmax.f32 %v3999_v18, 0.0  ;;  %v568_v22 = vmul.f32 %v9197_v35, %v7993_v26  ;;  %v569_v61 = vmul.f32 %v9202_v14, %v7993_v26  ;;  %v9249_v30 = vld [vmem:[%s15935_s1 + $0x200] ss:$2 sm:$0xff] }
  0xdf   :  { %v4256_v58 = vmax.f32 %v4000_v21, 0.0  ;;  %v4257_v5 = vmax.f32 %v4001_v62, 0.0  ;;  %v570_v47 = vmul.f32 %v9214_v56, %v7993_v26  ;;  %v697_v29 = vmul.f32 %v9207_v40, %v7981_v23 }
  0xe0   :  { %v4258_v59 = vmax.f32 %v4002_v3, 0.0  ;;  %v4383_v24 = vmax.f32 %v4127_v52, %v4255_v60  ;;  %v571_v38 = vmul.f32 %v7537_v28, %v7993_v26  ;;  %v698_v46 = vmul.f32 %v9219_v55, %v7981_v23  ;;  %v6924_v52 = vld [vmem:[%s15936_s2 + $0x178] sm:$0xff] }
  0xe1   :  { %v4384_v50 = vmax.f32 %v4128_v42, %v4256_v58  ;;  %v4385_v43 = vmax.f32 %v4129_v11, %v4257_v5  ;;  %v699_v18 = vmul.f32 %v9225_v4, %v7981_v23  ;;  %v700_v21 = vmul.f32 %v9230_v25, %v7981_v23  ;;  %v6923_v42 = vld [vmem:[%s15936_s2 + $0x170] sm:$0xff]  ;;  %v6922_v11 = vld [vmem:[%s15936_s2 + $0x168] sm:$0xff]  ;;  %7178 = vperm.xlu2 %7768, %v6924_v52  }
  0xe2   :  { %v4386_v62 = vmax.f32 %v4130_v19, %v4258_v59  ;;  %4512 = vst.msk [vmem:[#allocation2] sm:$0xff] %vm4511_vm1, %v4383_v24  ;;  %v9267_v3 = vmul.f32 %v9197_v35, %v7995_v27  ;;  %v955_v19 = vmul.f32 %v9202_v14, %v7995_v27  ;;  %v956_v60 = vmul.f32 %v9214_v56, %v7995_v27 }
  0xe3   :  { %4513 = vst.msk [vmem:[#allocation2 + $0x8] sm:$0xff] %vm4511_vm1, %v4384_v50  ;;  %7173 = vperm.xlu1 %7767, %v6923_v42   ;;  %v825_v58 = vadd.f32 %v697_v29, %v568_v22  ;;  %v957_v5 = vmul.f32 %v7537_v28, %v7995_v27  ;;  %v9277_v59 = vmul.f32 %v9249_v30, %v7995_v27 }
  0xe4   :  { %16342 = vst [vmem:[#allocation41_spill] sm:$0xff] %v9267_v3  ;;  %v6495_v24 = vadd.f32 %v6431_v33, %v8081_v6  ;;  %7168 = vperm.xlu0 %7766, %v6922_v11   ;;  %v16002_v63 = vrot.slane %v9267_v3, 1  ;;  %v1240_v17 = vrot.slane %v955_v19, 1  ;;  %v1242_v7 = vrot.slane %v956_v60, 1 }
  0xe5   :  { %16343 = vst [vmem:[#allocation42_spill] sm:$0xff] %v9277_v59  ;;  %v9284_v50 = vadd.f32 %v9072_v54, %v8081_v6  ;;  %v826_v22 = vadd.f32 %v698_v46, %v569_v61  ;;  %v1244_v29 = vrot.slane %v957_v5, 1  ;;  %v16001_v52 = vrot.slane %v9277_v59, 1 }
  0xe6   :  { %4514 = vst.msk [vmem:[#allocation2 + $0x10] sm:$0xff] %vm4511_vm1, %v4385_v43  ;;  %v827_v42 = vadd.f32 %v699_v18, %v570_v47  ;;  %v828_v31 = vadd.f32 %v700_v21, %v571_v38  ;;  %v1241_v33 = vsel %vm1182_vm0, %v16002_v63, %v1240_v17  ;;  %v1243_v43 = vsel %vm1182_vm0, %v1240_v17, %v1242_v7 }
  0xe7   :  { %4515 = vst.msk [vmem:[#allocation2 + $0x18] sm:$0xff] %vm4511_vm1, %v4386_v62  ;;  %v9294_v11 = vmul.f32 %v9190_v41, %v8100_v15  ;;  %v1245_v54 = vsel %vm1182_vm0, %v1242_v7, %v1244_v29  ;;  %v1247_v61 = vsel %vm1182_vm0, %v1244_v29, %v16001_v52  ;;  %v1594_v46 = vadd.f32 %v1241_v33, %v825_v58 }
  0xe8   :  { %v9301_v47 = vmul.f32 %v6495_v24, %v8100_v15  ;;  %v2109_v38 = vmul.f32 %v9207_v40, %v7993_v26  ;;  %v9307_v17 = vmul.f32 %v9197_v35, %v7981_v23  ;;  %v2238_v41 = vmul.f32 %v9202_v14, %v7981_v23 }
  0xe9   :  { %v1595_v18 = vadd.f32 %v1243_v43, %v826_v22  ;;  %v2110_v7 = vmul.f32 %v9219_v55, %v7993_v26  ;;  %v2111_v21 = vmul.f32 %v9225_v4, %v7993_v26  ;;  %v9317_v62 = vmul.f32 %v9230_v25, %v7993_v26 }
  0xea   :  { %v4641_v19 = vld [vmem:[#allocation2] ss:$2 sm:$0xff]  ;;  %v4769_v60 = vld [vmem:[#allocation2 + $0x1] ss:$2 sm:$0xff]  ;;  %v1596_v58 = vadd.f32 %v1245_v54, %v827_v42  ;;  %v1597_v5 = vadd.f32 %v1247_v61, %v828_v31  ;;  %v1723_v35 = vadd.f32 %v8081_v6, %v1594_v46  ;;  %v2239_v14 = vmul.f32 %v9214_v56, %v7981_v23 }
  0xeb   :  { %v4896_v24 = vmul.f32 %v4641_v19, %v7993_v26  ;;  %v4960_v22 = vmul.f32 %v4769_v60, %v7981_v23  ;;  %v5088_v29 = vmul.f32 %v4641_v19, %v7995_v27  ;;  %v2240_v33 = vmul.f32 %v7537_v28, %v7981_v23 }
  0xec   :  { %v5727_v42 = vmul.f32 %v4641_v19, %v7981_v23  ;;  %v6110_v31 = vmul.f32 %v4769_v60, %v7995_v27  ;;  %v2522_v61 = vrot.slane %v2238_v41, 1  ;;  %v5663_v63 = vmul.f32 %v4769_v60, %v7993_v26 }
  0xed   :  { %v5216_v46 = vrot.slane %v5088_v29, 1  ;;  %v5024_v59 = vadd.f32 %v4960_v22, %v4896_v24  ;;  %v1724_v9 = vadd.f32 %v8081_v6, %v1595_v18  ;;  %v9351_v60 = vmul.f32 %v9249_v30, %v7981_v23 }
  0xee   :  { %v9326_v43 = vld [vmem:[#allocation2 + $0x10] ss:$2 sm:$0xff]  ;;  %v9328_v52 = vld [vmem:[#allocation2 + $0x11] ss:$2 sm:$0xff]  ;;  %v5855_v3 = vrot.slane %v5727_v42, 1  ;;  %v6238_v34 = vrot.slane %v6110_v31, 1  ;;  %v1725_v24 = vadd.f32 %v8081_v6, %v1596_v58  ;;  %v1726_v22 = vadd.f32 %v8081_v6, %v1597_v5 }
  0xef   :  { %v9335_v56 = vmul.f32 %v9326_v43, %v7995_v27  ;;  %v9340_v28 = vmul.f32 %v9326_v43, %v7981_v23  ;;  %v9344_v19 = vmul.f32 %v9328_v52, %v7995_v27  ;;  %16344 = vst [vmem:[#allocation43_spill] sm:$0xff] %v9351_v60  ;;  %v1852_v42 = vmul.f32 %v8100_v15, %v1723_v35 }
  0xf0   :  { %v16345_v51 = vrot.slane %v9307_v17, 1  ;;  %v2524_v45 = vrot.slane %v2239_v14, 1  ;;  %v2526_v35 = vrot.slane %v2240_v33, 1  ;;  %v1853_v8 = vmul.f32 %v8100_v15, %v1724_v9 }
  0xf1   :  { %v16009_v41 = vrot.slane %v9335_v56, 1  ;;  %v16010_v54 = vrot.slane %v9340_v28, 1  ;;  %v16346_v58 = vrot.slane %v9344_v19, 1 }
  0xf2   :  { %v2523_v30 = vsel %vm1182_vm0, %v16345_v51, %v2522_v61  ;;  %v7666_v51 = vld [vmem:[%s15935_s1 + $0x201] ss:$2 sm:$0xff] }
  0xf3   :  { %v5218_v31 = vsel %vm1182_vm0, %v5216_v46, %v16009_v41  ;;  %v5857_v18 = vsel %vm1182_vm0, %v5855_v3, %v16010_v54  ;;  %v6240_v5 = vsel %vm1182_vm0, %v6238_v34, %v16346_v58  ;;  %v2525_v46 = vsel %vm1182_vm0, %v2522_v61, %v2524_v45 }
  0xf4   :  { %v5407_v29 = vadd.f32 %v5218_v31, %v5024_v59  ;;  %v6046_v44 = vadd.f32 %v5857_v18, %v5663_v63  ;;  %v16012_v41 = vrot.slane %v9351_v60, 1  ;;  %v9374_v3 = vmul.f32 %v9207_v40, %v7995_v27 }
  0xf5   :  { %v1854_v63 = vmul.f32 %v8100_v15, %v1725_v24  ;;  %v1855_v34 = vmul.f32 %v8100_v15, %v1726_v22  ;;  %v2527_v59 = vsel %vm1182_vm0, %v2524_v45, %v2526_v35  ;;  %v2876_v14 = vadd.f32 %v2523_v30, %v2109_v38 }
  0xf6   :  { %16347 = vst [vmem:[#allocation44_spill] sm:$0xff] %v9374_v3  ;;  %v6429_v54 = vadd.f32 %v6240_v5, %v6046_v44  ;;  %v2529_v9 = vsel %vm1182_vm0, %v2526_v35, %v16012_v41  ;;  %v3005_v40 = vmul.f32 %v9219_v55, %v7995_v27  ;;  %v3006_v44 = vmul.f32 %v9225_v4, %v7995_v27 }
  0xf7   :  { %v5471_v33 = vadd.f32 %v5407_v29, %v8081_v6  ;;  %v2877_v61 = vadd.f32 %v2525_v46, %v2110_v7  ;;  %v2878_v31 = vadd.f32 %v2527_v59, %v2111_v21  ;;  %v3007_v24 = vmul.f32 %v9230_v25, %v7995_v27 }
  0xf8   :  { %v9393_v45 = vmul.f32 %v7666_v51, %v7995_v27  ;;  %v16014_v22 = vrot.slane %v9374_v3, 1  ;;  %v3289_v18 = vrot.slane %v3005_v40, 1  ;;  %v3291_v38 = vrot.slane %v3006_v44, 1 }
  0xf9   :  { %v6493_v30 = vadd.f32 %v6429_v54, %v8081_v6  ;;  %v1981_v55 = vadd.f32 %v8103_v16, %v1852_v42  ;;  %v2879_v4 = vadd.f32 %v2529_v9, %v9317_v62  ;;  %v3293_v58 = vrot.slane %v3007_v24, 1 }
  0xfa   :  { %16348 = vst [vmem:[#allocation45_spill] sm:$0xff] %v9393_v45  ;;  %v1982_v7 = vadd.f32 %v8103_v16, %v1853_v8  ;;  %v3290_v25 = vsel %vm1182_vm0, %v16014_v22, %v3289_v18  ;;  %v3292_v21 = vsel %vm1182_vm0, %v3289_v18, %v3291_v38  ;;  %v16011_v29 = vrot.slane %v9393_v45, 1  ;;  %v16381_v45 = vld [vmem:[#allocation14_spill] sm:$0xff] }
  0xfb   :  { %v1983_v5 = vadd.f32 %v8103_v16, %v1854_v63  ;;  %v1984_v35 = vadd.f32 %v8103_v16, %v1855_v34  ;;  %v3294_v54 = vsel %vm1182_vm0, %v3291_v38, %v3293_v58  ;;  %v3643_v42 = vadd.f32 %v3290_v25, %v2876_v14 }
  0xfc   :  { %v5535_v62 = vmul.f32 %v5471_v33, %v8100_v15  ;;  %v3296_v8 = vsel %vm1182_vm0, %v3293_v58, %v16011_v29  ;;  %v3644_v46 = vadd.f32 %v3292_v21, %v2877_v61  ;;  %v3645_v51 = vadd.f32 %v3294_v54, %v2878_v31 }
  0xfd   :  { %v6557_v59 = vmul.f32 %v6493_v30, %v8100_v15  ;;  %v3646_v9 = vadd.f32 %v3296_v8, %v2879_v4  ;;  %v3771_v40 = vadd.f32 %v3643_v42, %v8081_v6  ;;  %v4155_v44 = vmax.f32 %v1981_v55, 0.0 }
  0xfe   :  { %v3772_v63 = vadd.f32 %v3644_v46, %v8081_v6  ;;  %v3773_v34 = vadd.f32 %v3645_v51, %v8081_v6  ;;  %v4899_v14 = vmul.f32 %v9098_v10, %v7993_v26  ;;  %v4963_v33 = vmul.f32 %v9100_v57, %v7981_v23 }
  0xff   :  { %v3774_v24 = vadd.f32 %v3646_v9, %v8081_v6  ;;  %v3899_v61 = vmul.f32 %v3771_v40, %v8100_v15  ;;  %v4156_v31 = vmax.f32 %v1982_v7, 0.0  ;;  %v16349_v18 = vrot.slane %v8351_v2, 1 }
 0x100   :  { %v16350_v38 = vrot.slane %v9110_v49, 1  ;;  %v3900_v55 = vmul.f32 %v3772_v63, %v8100_v15  ;;  %v3901_v4 = vmul.f32 %v3773_v34, %v8100_v15  ;;  %v5027_v58 = vadd.f32 %v4963_v33, %v4899_v14 }
 0x101   :  { %v5666_v10 = vmul.f32 %v9100_v57, %v7993_v26  ;;  %v3902_v25 = vmul.f32 %v3774_v24, %v8100_v15  ;;  %v4027_v21 = vadd.f32 %v3899_v61, %v8103_v16  ;;  %v4157_v54 = vmax.f32 %v1983_v5, 0.0 }
 0x102   :  { %v5224_v30 = vsel %vm1182_vm0, %v16350_v38, %v16349_v18  ;;  %v16351_v7 = vrot.slane %v8363_v39, 1  ;;  %v16352_v2 = vrot.slane %v9114_v48, 1  ;;  %v4028_v42 = vadd.f32 %v3900_v55, %v8103_v16 }
 0x103   :  { %v4029_v8 = vadd.f32 %v3901_v4, %v8103_v16  ;;  %v5410_v46 = vadd.f32 %v5224_v30, %v5027_v58  ;;  %v4030_v9 = vadd.f32 %v3902_v25, %v8103_v16  ;;  %v4158_v57 = vmax.f32 %v1984_v35, 0.0 }
 0x104   :  { %v5863_v49 = vsel %vm1182_vm0, %v16352_v2, %v16351_v7  ;;  %v4283_v40 = vmax.f32 %v4027_v21, 0.0  ;;  %v16353_v63 = vrot.slane %v8385_v53, 1  ;;  %v16354_v5 = vrot.slane %v9133_v0, 1 }
 0x105   :  { %v6049_v51 = vadd.f32 %v5863_v49, %v5666_v10  ;;  %v5599_v48 = vadd.f32 %v5535_v62, %v8103_v16  ;;  %v4284_v34 = vmax.f32 %v4028_v42, 0.0  ;;  %v4285_v14 = vmax.f32 %v4029_v8, 0.0  ;;  %v6925_v10 = vld [vmem:[%s15936_s2 + $0x180] sm:$0xff]  ;;  %v6969_v8 = vpop.permute.xlu2 %6968 }
 0x106   :  { %v6246_v39 = vsel %vm1182_vm0, %v16354_v5, %v16353_v63  ;;  %v4286_v24 = vmax.f32 %v4030_v9, 0.0  ;;  %v4411_v61 = vmax.f32 %v4155_v44, %v4283_v40  ;;  %v4897_v18 = vmul.f32 %v9326_v43, %v7993_v26  ;;  %7183 = vperm.xlu0 %7766, %v6925_v10   ;;  %v16361_v9 = vld [vmem:[#allocation33_spill] sm:$0xff] }
 0x107   :  { %v6432_v33 = vadd.f32 %v6246_v39, %v6049_v51  ;;  %v4961_v35 = vmul.f32 %v9328_v52, %v7981_v23  ;;  %v6621_v38 = vadd.f32 %v6557_v59, %v8103_v16  ;;  %v4412_v53 = vmax.f32 %v4156_v31, %v4284_v34  ;;  %v6927_v59 = vld [vmem:[%s15936_s2 + $0x190] sm:$0xff]  ;;  %v6926_v31 = vld [vmem:[%s15936_s2 + $0x188] sm:$0xff] }
 0x108   :  { %v4413_v30 = vmax.f32 %v4157_v54, %v4285_v14  ;;  %v5474_v0 = vadd.f32 %v5410_v46, %v8081_v6  ;;  %v4414_v55 = vmax.f32 %v4158_v57, %v4286_v24  ;;  %4540 = vst.msk [vmem:[#allocation2 + $0xe0] sm:$0xff] %vm4511_vm1, %v4411_v61  ;;  %v16355_v4 = vrot.slane %v9091_v20, 1  ;;  %7193 = vperm.xlu2 %7768, %v6927_v59   ;;  %v9521_v14 = vld [vmem:[%s15935_s1 + $0x220] ss:$2 sm:$0xff] }
 0x109   :  { %v5025_v62 = vadd.f32 %v4961_v35, %v4897_v18  ;;  %v16356_v44 = vrot.slane %v9335_v56, 1  ;;  %v5664_v43 = vmul.f32 %v9328_v52, %v7993_v26  ;;  %v9472_v20 = vadd.f32 %v8901_v12, %v8103_v16  ;;  %4541 = vst.msk [vmem:[#allocation2 + $0xe8] sm:$0xff] %vm4511_vm1, %v4412_v53  ;;  %7188 = vperm.xlu1 %7767, %v6926_v31   ;;  %v9537_v35 = vld [vmem:[%s15935_s1 + $0x230] ss:$2 sm:$0xff]  ;;  %v9547_v53 = vld [vmem:[%s15935_s1 + $0x251] ss:$2 sm:$0xff] }
 0x10a   :  { %v9476_v56 = vadd.f32 %v8904_v32, %v8103_v16  ;;  %v6496_v52 = vadd.f32 %v6432_v33, %v8081_v6  ;;  %v16357_v25 = vrot.slane %v9103_v36, 1  ;;  %v16358_v21 = vrot.slane %v9340_v28, 1  ;;  %4542 = vst.msk [vmem:[#allocation2 + $0xf0] sm:$0xff] %vm4511_vm1, %v4413_v30  ;;  %v9526_v33 = vld [vmem:[%s15935_s1 + $0x231] ss:$2 sm:$0xff] }
 0x10b   :  { %v5220_v58 = vsel %vm1182_vm0, %v16356_v44, %v16355_v4  ;;  %v6440_v7 = vadd.f32 %v9182_v13, %v9175_v37  ;;  %v16359_v2 = vrot.slane %v9129_v1, 1  ;;  %v16360_v32 = vrot.slane %v9344_v19, 1  ;;  %4543 = vst.msk [vmem:[#allocation2 + $0xf8] sm:$0xff] %vm4511_vm1, %v4414_v55  ;;  %v9558_v4 = vld [vmem:[%s15935_s1 + $0x240] ss:$2 sm:$0xff] }
 0x10c   :  { %v5859_v54 = vsel %vm1182_vm0, %v16358_v21, %v16357_v25  ;;  %v5601_v36 = vadd.f32 %v9294_v11, %v8103_v16  ;;  %v6623_v28 = vadd.f32 %v9301_v47, %v8103_v16  ;;  %v5408_v37 = vadd.f32 %v5220_v58, %v5025_v62  ;;  %v16362_v47 = vld [vmem:[#allocation34_spill] sm:$0xff] }
 0x10d   :  { %v6047_v12 = vadd.f32 %v5859_v54, %v5664_v43  ;;  %v6242_v49 = vsel %vm1182_vm0, %v16360_v32, %v16359_v2  ;;  %v5546_v13 = vmul.f32 %v9284_v50, %v8100_v15  ;;  %v6685_v1 = vmax.f32 %v5599_v48, 0.0  ;;  %v9514_v50 = vld [vmem:[%s15935_s1 + $0x221] ss:$2 sm:$0xff]  ;;  %v9563_v44 = vld [vmem:[%s15935_s1 + $0x250] ss:$2 sm:$0xff] }
 0x10e   :  { %v6749_v42 = vmax.f32 %v6621_v38, 0.0  ;;  %v5538_v19 = vmul.f32 %v5474_v0, %v8100_v15  ;;  %v6560_v46 = vmul.f32 %v6496_v52, %v8100_v15  ;;  %v9504_v11 = vsel %vm4511_vm1, %v16361_v9, 0.0  ;;  %v9542_v38 = vld [vmem:[%s15935_s1 + $0x241] ss:$2 sm:$0xff]  ;;  %v6944_v0 = vpop.permute.xlu0 %6943 }
 0x10f   :  { %v6430_v51 = vadd.f32 %v6242_v49, %v6047_v12  ;;  %v9507_v57 = vmul.f32 %v6969_v8, %v16362_v47  ;;  %v6504_v5 = vadd.f32 %v6440_v7, %v8081_v6  ;;  %v6687_v39 = vmax.f32 %v5601_v36, 0.0 }
 0x110   :  { %v6751_v48 = vmax.f32 %v6623_v28, 0.0  ;;  %v5472_v34 = vadd.f32 %v5408_v37, %v8081_v6  ;;  %v9529_v24 = vadd.f32 %v5546_v13, %v8103_v16  ;;  %v6813_v61 = vmax.f32 %v6685_v1, %v6749_v42  ;;  %v4797_v36 = vld [vmem:[#allocation2 + $0xe1] ss:$2 sm:$0xff]  ;;  %v9601_v1 = vld [vmem:[%s15935_s1 + $0x260] ss:$2 sm:$0xff] }
 0x111   :  { %v9532_v18 = vadd.f32 %v5538_v19, %v8103_v16  ;;  %v574_v30 = vmul.f32 %v9521_v14, %v7993_v26  ;;  %v9552_v55 = vadd.f32 %v6560_v46, %v8103_v16  ;;  %v6494_v62 = vadd.f32 %v6430_v51, %v8081_v6  ;;  %v4669_v9 = vld [vmem:[#allocation2 + $0xe0] ss:$2 sm:$0xff] }
 0x112   :  { %v575_v58 = vmul.f32 %v9537_v35, %v7993_v26  ;;  %v703_v43 = vmul.f32 %v9514_v50, %v7981_v23  ;;  %v576_v59 = vmul.f32 %v9558_v4, %v7993_v26  ;;  %v577_v31 = vmul.f32 %v9563_v44, %v7993_v26  ;;  %v4799_v29 = vld [vmem:[#allocation2 + $0xf1] ss:$2 sm:$0xff] }
 0x113   :  { %v704_v10 = vmul.f32 %v9526_v33, %v7981_v23  ;;  %v9577_v52 = vmul.f32 %v9521_v14, %v7995_v27  ;;  %v5536_v25 = vmul.f32 %v5472_v34, %v8100_v15  ;;  %v705_v21 = vmul.f32 %v9542_v38, %v7981_v23 }
 0x114   :  { %v706_v54 = vmul.f32 %v9547_v53, %v7981_v23  ;;  %v961_v7 = vmul.f32 %v9537_v35, %v7995_v27  ;;  %v9587_v12 = vmul.f32 %v6504_v5, %v8100_v15  ;;  %v9589_v2 = vmax.f32 %v6687_v39, %v6751_v48 }
 0x115   :  { %16363 = vst [vmem:[#allocation33_spill] sm:$0xff] %v9577_v52  ;;  %v9591_v32 = vmul.f32 %v6944_v0, %v6813_v61  ;;  %v962_v49 = vmul.f32 %v9558_v4, %v7995_v27  ;;  %v6558_v13 = vmul.f32 %v6494_v62, %v8100_v15  ;;  %v831_v42 = vadd.f32 %v703_v43, %v574_v30  ;;  %v4671_v62 = vld [vmem:[#allocation2 + $0xf0] ss:$2 sm:$0xff] }
 0x116   :  { %v832_v19 = vadd.f32 %v704_v10, %v575_v58  ;;  %v963_v8 = vmul.f32 %v9563_v44, %v7995_v27  ;;  %v9607_v46 = vmul.f32 %v9601_v1, %v7995_v27  ;;  %v16013_v51 = vrot.slane %v9577_v52, 1 }
 0x117   :  { %v5600_v47 = vadd.f32 %v5536_v25, %v8103_v16  ;;  %v833_v5 = vadd.f32 %v705_v21, %v576_v59  ;;  %v834_v39 = vadd.f32 %v706_v54, %v577_v31  ;;  %v1252_v48 = vrot.slane %v961_v7, 1 }
 0x118   :  { %16364 = vst [vmem:[#allocation34_spill] sm:$0xff] %v9607_v46  ;;  %v4910_v34 = vmul.f32 %v4669_v9, %v7993_v26  ;;  %v4974_v61 = vmul.f32 %v4797_v36, %v7981_v23  ;;  %v9614_v30 = vmul.f32 %v4669_v9, %v7995_v27  ;;  %v1254_v0 = vrot.slane %v962_v49, 1 }
 0x119   :  { %v6622_v58 = vadd.f32 %v6558_v13, %v8103_v16  ;;  %v1253_v43 = vsel %vm1182_vm0, %v16013_v51, %v1252_v48  ;;  %v1256_v10 = vrot.slane %v963_v8, 1  ;;  %v16015_v59 = vrot.slane %v9607_v46, 1 }
 0x11a   :  { %16365 = vst [vmem:[#allocation46_spill] sm:$0xff] %v9614_v30  ;;  %v9622_v31 = vmul.f32 %v4797_v36, %v7993_v26  ;;  %v9625_v25 = vmul.f32 %v4669_v9, %v7981_v23  ;;  %v1255_v21 = vsel %vm1182_vm0, %v1252_v48, %v1254_v0  ;;  %v1600_v54 = vadd.f32 %v1253_v43, %v831_v42 }
 0x11b   :  { %v9629_v7 = vmul.f32 %v4797_v36, %v7995_v27  ;;  %v1257_v49 = vsel %vm1182_vm0, %v1254_v0, %v1256_v10  ;;  %v1259_v13 = vsel %vm1182_vm0, %v1256_v10, %v16015_v59  ;;  %v1601_v8 = vadd.f32 %v1255_v21, %v832_v19 }
 0x11c   :  { %16366 = vst [vmem:[#allocation47_spill] sm:$0xff] %v9625_v25  ;;  %v9636_v41 = vmul.f32 %v4671_v62, %v7995_v27  ;;  %v9639_v9 = vmul.f32 %v4671_v62, %v7981_v23  ;;  %v6686_v51 = vmax.f32 %v5600_v47, 0.0  ;;  %v1602_v48 = vadd.f32 %v1257_v49, %v833_v5 }
 0x11d   :  { %16367 = vst [vmem:[#allocation48_spill] sm:$0xff] %v9629_v7  ;;  %v6750_v42 = vmax.f32 %v6622_v58, 0.0  ;;  %v1603_v43 = vadd.f32 %v1259_v13, %v834_v39  ;;  %v1729_v36 = vadd.f32 %v8081_v6, %v1600_v54  ;;  %v1730_v0 = vadd.f32 %v8081_v6, %v1601_v8 }
 0x11e   :  { %16368 = vst [vmem:[#allocation49_spill] sm:$0xff] %v9636_v41  ;;  %v9643_v22 = vadd.f32 %v4974_v61, %v4910_v34  ;;  %v1731_v21 = vadd.f32 %v8081_v6, %v1602_v48  ;;  %v9649_v59 = vmul.f32 %v4799_v29, %v7995_v27  ;;  %v2115_v29 = vmul.f32 %v9514_v50, %v7993_v26 }
 0x11f   :  { %16369 = vst [vmem:[#allocation50_spill] sm:$0xff] %v9639_v9  ;;  %v1732_v47 = vadd.f32 %v8081_v6, %v1603_v43  ;;  %v1858_v5 = vmul.f32 %v8100_v15, %v1729_v36  ;;  %v1859_v39 = vmul.f32 %v8100_v15, %v1730_v0  ;;  %v6814_v54 = vmax.f32 %v6686_v51, %v6750_v42 }
 0x120   :  { %16370 = vst [vmem:[#allocation51_spill] sm:$0xff] %v9649_v59  ;;  %v1860_v58 = vmul.f32 %v8100_v15, %v1731_v21  ;;  %v2116_v13 = vmul.f32 %v9526_v33, %v7993_v26  ;;  %v2117_v43 = vmul.f32 %v9542_v38, %v7993_v26  ;;  %v9673_v51 = vmul.f32 %v9521_v14, %v7981_v23 }
 0x121   :  { %v1861_v49 = vmul.f32 %v8100_v15, %v1732_v47  ;;  %v9664_v8 = vadd.f32 %v8103_v16, %v1858_v5  ;;  %v9667_v48 = vadd.f32 %v8103_v16, %v1859_v39  ;;  %v2244_v36 = vmul.f32 %v9537_v35, %v7981_v23  ;;  %v7672_v47 = vld [vmem:[%s15935_s1 + $0x261] ss:$2 sm:$0xff] }
 0x122   :  { %16371 = vst [vmem:[#allocation52_spill] sm:$0xff] %v9673_v51  ;;  %v9676_v42 = vadd.f32 %v8103_v16, %v1860_v58  ;;  %v2245_v0 = vmul.f32 %v9558_v4, %v7981_v23  ;;  %v2246_v21 = vmul.f32 %v9563_v44, %v7981_v23  ;;  %v2118_v14 = vmul.f32 %v9547_v53, %v7993_v26  ;;  %v6949_v4 = vpop.permute.xlu0 %6948 }
 0x123   :  { %v9691_v5 = vmul.f32 %v9601_v1, %v7981_v23  ;;  %v16016_v39 = vrot.slane %v9673_v51, 1  ;;  %v9696_v35 = vmul.f32 %v9514_v50, %v7995_v27  ;;  %v2534_v58 = vrot.slane %v2244_v36, 1 }
 0x124   :  { %v2536_v44 = vrot.slane %v2245_v0, 1  ;;  %v2538_v40 = vrot.slane %v2246_v21, 1  ;;  %v3011_v63 = vmul.f32 %v9526_v33, %v7995_v27  ;;  %v9701_v61 = vadd.f32 %v8103_v16, %v1861_v49 }
 0x125   :  { %16372 = vst [vmem:[#allocation53_spill] sm:$0xff] %v9691_v5  ;;  %v16018_v28 = vrot.slane %v9691_v5, 1  ;;  %v3012_v1 = vmul.f32 %v9542_v38, %v7995_v27  ;;  %v3013_v37 = vmul.f32 %v9547_v53, %v7995_v27  ;;  %v2535_v50 = vsel %vm1182_vm0, %v16016_v39, %v2534_v58 }
 0x126   :  { %16373 = vst [vmem:[#allocation54_spill] sm:$0xff] %v9696_v35  ;;  %v2537_v36 = vsel %vm1182_vm0, %v2534_v58, %v2536_v44  ;;  %v2539_v0 = vsel %vm1182_vm0, %v2536_v44, %v2538_v40  ;;  %v9714_v33 = vmul.f32 %v7672_v47, %v7995_v27  ;;  %v9716_v49 = vmul.f32 %v6949_v4, %v6814_v54 }
 0x127   :  { %v2541_v38 = vsel %vm1182_vm0, %v2538_v40, %v16018_v28  ;;  %v2882_v21 = vadd.f32 %v2535_v50, %v2115_v29  ;;  %v2883_v19 = vadd.f32 %v2537_v36, %v2116_v13  ;;  %v2884_v53 = vadd.f32 %v2539_v0, %v2117_v43 }
 0x128   :  { %16374 = vst [vmem:[#allocation55_spill] sm:$0xff] %v9714_v33  ;;  %v2885_v34 = vadd.f32 %v2541_v38, %v2118_v14  ;;  %v16019_v10 = vrot.slane %v9696_v35, 1  ;;  %v3301_v39 = vrot.slane %v3011_v63, 1  ;;  %v3303_v62 = vrot.slane %v3012_v1, 1  ;;  %v7649_v63 = vld [vmem:[%s15935_s1 + $0xf1] ss:$2 sm:$0xff] }
 0x129   :  { %v3305_v58 = vrot.slane %v3013_v37, 1  ;;  %v16017_v44 = vrot.slane %v9714_v33, 1  ;;  %v4161_v47 = vmax.f32 %v9664_v8, 0.0  ;;  %v4162_v4 = vmax.f32 %v9667_v48, 0.0  ;;  %v16379_v35 = vld [vmem:[#allocation10_spill] sm:$0xff] }
 0x12a   :  { %v3302_v54 = vsel %vm1182_vm0, %v16019_v10, %v3301_v39  ;;  %v4163_v40 = vmax.f32 %v9676_v42, 0.0  ;;  %v4164_v29 = vmax.f32 %v9701_v61, 0.0  ;;  %v3304_v37 = vsel %vm1182_vm0, %v3301_v39, %v3303_v62  ;;  %v7521_v61 = vld [vmem:[%s15935_s1 + $0xf0] ss:$2 sm:$0xff]  ;;  %v7773_v42 = vld [vmem:[%s15935_s1 + $0xe0] ss:$2 sm:$0xff] }
 0x12b   :  { %v3306_v13 = vsel %vm1182_vm0, %v3303_v62, %v3305_v58  ;;  %v3308_v8 = vsel %vm1182_vm0, %v3305_v58, %v16017_v44  ;;  %v3649_v43 = vadd.f32 %v3302_v54, %v2882_v21  ;;  %v3650_v14 = vadd.f32 %v3304_v37, %v2883_v19  ;;  %v7774_v19 = vld [vmem:[%s15935_s1 + $0xe1] ss:$2 sm:$0xff] }
 0x12c   :  { %v3651_v1 = vadd.f32 %v3306_v13, %v2884_v53  ;;  %v3652_v48 = vadd.f32 %v3308_v8, %v2885_v34  ;;  %v554_v39 = vmul.f32 %v7773_v42, %v7993_v26  ;;  %v555_v50 = vmul.f32 %v7521_v61, %v7993_v26 }
 0x12d   :  { %v3777_v62 = vadd.f32 %v3649_v43, %v8081_v6  ;;  %v683_v34 = vmul.f32 %v7774_v19, %v7981_v23  ;;  %v684_v36 = vmul.f32 %v7649_v63, %v7981_v23  ;;  %v3778_v0 = vadd.f32 %v3650_v14, %v8081_v6 }
 0x12e   :  { %v3779_v38 = vadd.f32 %v3651_v1, %v8081_v6  ;;  %v3780_v21 = vadd.f32 %v3652_v48, %v8081_v6  ;;  %v941_v53 = vmul.f32 %v7521_v61, %v7995_v27  ;;  %v2095_v13 = vmul.f32 %v7774_v19, %v7993_v26 }
 0x12f   :  { %v3905_v58 = vmul.f32 %v3777_v62, %v8100_v15  ;;  %v811_v54 = vadd.f32 %v683_v34, %v554_v39  ;;  %v812_v37 = vadd.f32 %v684_v36, %v555_v50  ;;  %v3906_v8 = vmul.f32 %v3778_v0, %v8100_v15  ;;  %v6954_v62 = vpop.permute.xlu1 %6953  ;;  %v16375_v34 = vld [vmem:[#allocation9_spill] sm:$0xff] }
 0x130   :  { %v3907_v43 = vmul.f32 %v3779_v38, %v8100_v15  ;;  %v3908_v42 = vmul.f32 %v3780_v21, %v8100_v15  ;;  %v1212_v44 = vrot.slane %v941_v53, 1  ;;  %v2096_v1 = vmul.f32 %v7649_v63, %v7993_v26  ;;  %v16377_v21 = vld [vmem:[#allocation12_spill] sm:$0xff] }
 0x131   :  { %v4033_v14 = vadd.f32 %v3905_v58, %v8103_v16  ;;  %v2224_v48 = vmul.f32 %v7521_v61, %v7981_v23  ;;  %v2991_v28 = vmul.f32 %v7649_v63, %v7995_v27  ;;  %v4034_v39 = vadd.f32 %v3906_v8, %v8103_v16 }
 0x132   :  { %v4035_v50 = vadd.f32 %v3907_v43, %v8103_v16  ;;  %v4036_v19 = vadd.f32 %v3908_v42, %v8103_v16  ;;  %v16376_v36 = vrot.slane %v16375_v34, 1  ;;  %v16378_v53 = vrot.slane %v16377_v21, 1 }
 0x133   :  { %v4289_v38 = vmax.f32 %v4033_v14, 0.0  ;;  %v2494_v61 = vrot.slane %v2224_v48, 1  ;;  %v4290_v33 = vmax.f32 %v4034_v39, 0.0  ;;  %v16380_v42 = vrot.slane %v16379_v35, 1 }
 0x134   :  { %v1213_v0 = vsel %vm1182_vm0, %v16376_v36, %v1212_v44  ;;  %v1215_v58 = vsel %vm1182_vm0, %v1212_v44, %v16378_v53  ;;  %v4291_v63 = vmax.f32 %v4035_v50, 0.0  ;;  %v4292_v5 = vmax.f32 %v4036_v19, 0.0  ;;  %v16389_v19 = vld [vmem:[#allocation18_spill] sm:$0xff] }
 0x135   :  { %v1580_v10 = vadd.f32 %v1213_v0, %v811_v54  ;;  %v1581_v46 = vadd.f32 %v1215_v58, %v812_v37  ;;  %v4417_v8 = vmax.f32 %v4161_v47, %v4289_v38  ;;  %v2495_v34 = vsel %vm1182_vm0, %v16380_v42, %v2494_v61 }
 0x136   :  { %v16382_v36 = vrot.slane %v16381_v45, 1  ;;  %v4418_v21 = vmax.f32 %v4162_v4, %v4290_v33  ;;  %v4419_v51 = vmax.f32 %v4163_v40, %v4291_v63  ;;  %v4420_v44 = vmax.f32 %v4164_v29, %v4292_v5  ;;  %v16387_v29 = vld [vmem:[#allocation11_spill] sm:$0xff] }
 0x137   :  { %v1709_v43 = vadd.f32 %v8081_v6, %v1580_v10  ;;  %v1710_v54 = vadd.f32 %v8081_v6, %v1581_v46  ;;  %v16026_v48 = vrot.slane %v9649_v59, 1  ;;  %4546 = vst.msk [vmem:[#allocation2 + $0x110] sm:$0xff] %vm4511_vm1, %v4417_v8  ;;  %v2862_v47 = vadd.f32 %v2495_v34, %v2095_v13  ;;  %v6959_v42 = vpop.permute.xlu1 %6958 }
 0x138   :  { %v2497_v14 = vsel %vm1182_vm0, %v2494_v61, %v16382_v36  ;;  %v3261_v10 = vrot.slane %v2991_v28, 1  ;;  %v16383_v35 = vrot.slane %v9636_v41, 1  ;;  %v16384_v39 = vrot.slane %v9614_v30, 1  ;;  %4547 = vst.msk [vmem:[#allocation2 + $0x118] sm:$0xff] %vm4511_vm1, %v4418_v21 }
 0x139   :  { %v2863_v37 = vadd.f32 %v2497_v14, %v2096_v1  ;;  %v16385_v50 = vrot.slane %v9639_v9, 1  ;;  %v16386_v33 = vrot.slane %v9625_v25, 1  ;;  %v7326_v46 = vsel %vm4511_vm1, %v9716_v49, 0.0  ;;  %4548 = vst.msk [vmem:[#allocation2 + $0x120] sm:$0xff] %vm4511_vm1, %v4419_v51 }
 0x13a   :  { %v5246_v45 = vsel %vm1182_vm0, %v16384_v39, %v16383_v35  ;;  %v1838_v4 = vmul.f32 %v8100_v15, %v1709_v43  ;;  %v9800_v28 = vadd.f32 %v9587_v12, %v8103_v16  ;;  %v7263_v40 = vmul.f32 %v6954_v62, %v9589_v2  ;;  %4549 = vst.msk [vmem:[#allocation2 + $0x128] sm:$0xff] %vm4511_vm1, %v4420_v44 }
 0x13b   :  { %v5885_v5 = vsel %vm1182_vm0, %v16386_v33, %v16385_v50  ;;  %v16388_v13 = vrot.slane %v16387_v29, 1  ;;  %v16390_v0 = vrot.slane %v16389_v19, 1  ;;  %v7325_v38 = vsel %vm4511_vm1, %v9591_v32, 0.0  ;;  %v9864_v50 = vld [vmem:[%s15935_s1 + $0x2a0] ss:$2 sm:$0xff] }
 0x13c   :  { %v1839_v12 = vmul.f32 %v8100_v15, %v1710_v54  ;;  %v5421_v2 = vadd.f32 %v5246_v45, %v9643_v22  ;;  %v6060_v51 = vadd.f32 %v5885_v5, %v9622_v31  ;;  %v16391_v62 = vmax.f32 %v9552_v55, 0.0  ;;  %v9869_v33 = vld [vmem:[%s15935_s1 + $0x281] ss:$2 sm:$0xff]  ;;  %v9874_v5 = vld [vmem:[%s15935_s1 + $0x291] ss:$2 sm:$0xff] }
 0x13d   :  { %v3262_v1 = vsel %vm1182_vm0, %v16388_v13, %v3261_v10  ;;  %v3264_v49 = vsel %vm1182_vm0, %v3261_v10, %v16390_v0  ;;  %v16392_v61 = vmax.f32 %v9532_v18, 0.0  ;;  %v7327_v8 = vadd.f32 %v7326_v46, %v7325_v38  ;;  %v9882_v13 = vld [vmem:[%s15935_s1 + $0x2b0] ss:$2 sm:$0xff] }
 0x13e   :  { %v3629_v53 = vadd.f32 %v3262_v1, %v2862_v47  ;;  %v3630_v58 = vadd.f32 %v3264_v49, %v2863_v37  ;;  %v16393_v32 = vrot.slane %v9629_v7, 1  ;;  %v1967_v34 = vadd.f32 %v8103_v16, %v1838_v4 }
 0x13f   :  { %v6816_v63 = vmax.f32 %v16392_v61, %v16391_v62  ;;  %v9830_v55 = vsel %vm4511_vm1, %v9507_v57, 0.0  ;;  %v16394_v18 = vmax.f32 %v9476_v56, 0.0  ;;  %v16395_v31 = vmax.f32 %v9472_v20, 0.0  ;;  %v9847_v56 = vld [vmem:[%s15935_s1 + $0x280] ss:$2 sm:$0xff] }
 0x140   :  { %v6268_v43 = vsel %vm1182_vm0, %v16393_v32, %v16026_v48  ;;  %v3757_v36 = vadd.f32 %v3629_v53, %v8081_v6  ;;  %v3758_v22 = vadd.f32 %v3630_v58, %v8081_v6  ;;  %v7328_v54 = vsel %vm4511_vm1, %v7263_v40, 0.0  ;;  %v9852_v20 = vld [vmem:[%s15935_s1 + $0x290] ss:$2 sm:$0xff]  ;;  %v7775_v40 = vld [vmem:[#allocation2 + $0x60] ss:$2 sm:$0xff] }
 0x141   :  { %v9836_v14 = vmax.f32 %v16395_v31, %v16394_v18  ;;  %v1968_v47 = vadd.f32 %v8103_v16, %v1839_v12  ;;  %v9855_v57 = vadd.f32 %v5421_v2, %v8081_v6  ;;  %v9857_v35 = vadd.f32 %v6268_v43, %v6060_v51  ;;  %v4675_v46 = vld [vmem:[#allocation2 + $0x110] ss:$2 sm:$0xff]  ;;  %v4677_v0 = vld [vmem:[#allocation2 + $0x120] ss:$2 sm:$0xff]  ;;  %v4803_v61 = vld [vmem:[#allocation2 + $0x111] ss:$2 sm:$0xff] }
 0x142   :  { %v3885_v37 = vmul.f32 %v3757_v36, %v8100_v15  ;;  %v3886_v10 = vmul.f32 %v3758_v22, %v8100_v15  ;;  %v7264_v39 = vmul.f32 %v6959_v42, %v6816_v63  ;;  %v9859_v45 = vadd.f32 %v7328_v54, %v7327_v8  ;;  %v4805_v42 = vld [vmem:[#allocation2 + $0x121] ss:$2 sm:$0xff]  ;;  %v9913_v36 = vld [vmem:[%s15935_s1 + $0x2c0] ss:$2 sm:$0xff] }
 0x143   :  { %v4141_v4 = vmax.f32 %v1967_v34, 0.0  ;;  %v9877_v29 = vmul.f32 %v7775_v40, %v7993_v26  ;;  %v580_v1 = vmul.f32 %v9847_v56, %v7993_v26  ;;  %v581_v19 = vmul.f32 %v9852_v20, %v7993_v26 }
 0x144   :  { %v4013_v49 = vadd.f32 %v3885_v37, %v8103_v16  ;;  %v4014_v38 = vadd.f32 %v3886_v10, %v8103_v16  ;;  %v582_v12 = vmul.f32 %v9864_v50, %v7993_v26  ;;  %v583_v53 = vmul.f32 %v9882_v13, %v7993_v26  ;;  %v9927_v37 = vld [vmem:[%s15935_s1 + $0x2a1] ss:$2 sm:$0xff]  ;;  %v9932_v10 = vld [vmem:[%s15935_s1 + $0x2b1] ss:$2 sm:$0xff] }
 0x145   :  { %v9895_v58 = vmul.f32 %v4675_v46, %v7995_v27  ;;  %v4142_v2 = vmax.f32 %v1968_v47, 0.0  ;;  %v709_v51 = vmul.f32 %v9869_v33, %v7981_v23  ;;  %v710_v62 = vmul.f32 %v9874_v5, %v7981_v23 }
 0x146   :  { %v9902_v63 = vmul.f32 %v4677_v0, %v7995_v27  ;;  %v9905_v8 = vmul.f32 %v4675_v46, %v7981_v23  ;;  %v9908_v32 = vmul.f32 %v4677_v0, %v7981_v23  ;;  %v4269_v43 = vmax.f32 %v4013_v49, 0.0 }
 0x147   :  { %16396 = vst [vmem:[#allocation9_spill] sm:$0xff] %v9895_v58  ;;  %v4270_v34 = vmax.f32 %v4014_v38, 0.0  ;;  %v9917_v22 = vmul.f32 %v9847_v56, %v7995_v27  ;;  %v967_v18 = vmul.f32 %v9852_v20, %v7995_v27  ;;  %v968_v31 = vmul.f32 %v9864_v50, %v7995_v27 }
 0x148   :  { %16397 = vst [vmem:[#allocation12_spill] sm:$0xff] %v9902_v63  ;;  %v4913_v54 = vmul.f32 %v4675_v46, %v7993_v26  ;;  %v4397_v47 = vmax.f32 %v4141_v4, %v4269_v43  ;;  %v969_v40 = vmul.f32 %v9882_v13, %v7995_v27  ;;  %v9938_v0 = vmul.f32 %v9913_v36, %v7995_v27  ;;  %v7776_v43 = vld [vmem:[#allocation2 + $0x61] ss:$2 sm:$0xff] }
 0x149   :  { %16398 = vst [vmem:[#allocation10_spill] sm:$0xff] %v9905_v8  ;;  %v4977_v46 = vmul.f32 %v4803_v61, %v7981_v23  ;;  %v9943_v49 = vmul.f32 %v4803_v61, %v7995_v27  ;;  %v4398_v38 = vmax.f32 %v4142_v2, %v4270_v34  ;;  %v9949_v44 = vmul.f32 %v4805_v42, %v7995_v27  ;;  %v6930_v42 = vld [vmem:[%s15936_s2 + $0x1a8] sm:$0xff] }
 0x14a   :  { %16399 = vst [vmem:[#allocation14_spill] sm:$0xff] %v9908_v32  ;;  %v711_v4 = vmul.f32 %v9927_v37, %v7981_v23  ;;  %v712_v59 = vmul.f32 %v9932_v10, %v7981_v23  ;;  %v1264_v34 = vrot.slane %v967_v18, 1  ;;  %v4966_v48 = vmul.f32 %v7776_v43, %v7981_v23  ;;  %7208 = vperm.xlu2 %7768, %v6930_v42  }
 0x14b   :  { %16400 = vst [vmem:[#allocation11_spill] sm:$0xff] %v9917_v22  ;;  %v1266_v21 = vrot.slane %v968_v31, 1  ;;  %v1268_v9 = vrot.slane %v969_v40, 1  ;;  %v16036_v2 = vrot.slane %v9938_v0, 1  ;;  %v7330_v18 = vsel %vm4511_vm1, %v7264_v39, 0.0 }
 0x14c   :  { %16401 = vst [vmem:[#allocation18_spill] sm:$0xff] %v9938_v0  ;;  %v5041_v41 = vadd.f32 %v4977_v46, %v4913_v54  ;;  %v5680_v60 = vmul.f32 %v4803_v61, %v7993_v26  ;;  %v837_v52 = vadd.f32 %v709_v51, %v580_v1  ;;  %v16404_v7 = vrot.slane %v9902_v63, 1 }
 0x14d   :  { %16402 = vst [vmem:[#allocation56_spill] sm:$0xff] %v9943_v49  ;;  %v16405_v25 = vrot.slane %v9895_v58, 1  ;;  %v16406_v3 = vrot.slane %v9908_v32, 1  ;;  %v16407_v31 = vrot.slane %v9905_v8, 1  ;;  %v16038_v39 = vrot.slane %v9943_v49, 1  ;;  %v6931_v32 = vld [vmem:[%s15936_s2 + $0x1b0] sm:$0xff] }
 0x14e   :  { %16403 = vst [vmem:[#allocation57_spill] sm:$0xff] %v9949_v44  ;;  %v16037_v54 = vrot.slane %v9949_v44, 1  ;;  %v838_v61 = vadd.f32 %v710_v62, %v581_v19  ;;  %v839_v46 = vadd.f32 %v711_v4, %v582_v12  ;;  %v840_v1 = vadd.f32 %v712_v59, %v583_v53  ;;  %v6933_v44 = vld [vmem:[%s15936_s2 + $0x1c0] sm:$0xff] }
 0x14f   :  { %4526 = vst.msk [vmem:[#allocation2 + $0x70] sm:$0xff] %vm4511_vm1, %v4397_v47  ;;  %v6929_v47 = vld [vmem:[%s15936_s2 + $0x1a0] sm:$0xff]  ;;  %v5252_v30 = vsel %vm1182_vm0, %v16405_v25, %v16404_v7  ;;  %v5891_v40 = vsel %vm1182_vm0, %v16407_v31, %v16406_v3  ;;  %v16408_v51 = vrot.slane %v9917_v22, 1  ;;  %v9988_v25 = vmul.f32 %v9855_v57, %v8100_v15 }
 0x150   :  { %4527 = vst.msk [vmem:[#allocation2 + $0x78] sm:$0xff] %vm4511_vm1, %v4398_v38  ;;  %v6928_v38 = vld [vmem:[%s15936_s2 + $0x198] sm:$0xff]  ;;  %7203 = vperm.xlu1 %7767, %v6929_v47   ;;  %v1267_v7 = vsel %vm1182_vm0, %v1264_v34, %v1266_v21  ;;  %v1269_v3 = vsel %vm1182_vm0, %v1266_v21, %v1268_v9  ;;  %v1271_v47 = vsel %vm1182_vm0, %v1268_v9, %v16036_v2 }
 0x151   :  { %7198 = vperm.xlu0 %7766, %v6928_v38   ;;  %v1265_v42 = vsel %vm1182_vm0, %v16408_v51, %v1264_v34  ;;  %v9997_v19 = vadd.f32 %v9857_v35, %v8081_v6  ;;  %v10000_v59 = vadd.f32 %v7330_v18, %v9859_v45  ;;  %v5424_v12 = vadd.f32 %v5252_v30, %v5041_v41  ;;  %v16409_v51 = vld [vmem:[#allocation15_spill] sm:$0xff] }
 0x152   :  { %v6063_v53 = vadd.f32 %v5891_v40, %v5680_v60  ;;  %v6274_v57 = vsel %vm1182_vm0, %v16038_v39, %v16037_v54  ;;  %v5030_v4 = vadd.f32 %v4966_v48, %v9877_v29  ;;  %v5669_v9 = vmul.f32 %v7776_v43, %v7993_v26  ;;  %7223 = vperm.xlu2 %7768, %v6933_v44  }
 0x153   :  { %v1606_v34 = vadd.f32 %v1265_v42, %v837_v52  ;;  %v1607_v38 = vadd.f32 %v1267_v7, %v838_v61  ;;  %v1608_v45 = vadd.f32 %v1269_v3, %v839_v46  ;;  %v1609_v18 = vadd.f32 %v1271_v47, %v840_v1 }
 0x154   :  { %v10015_v40 = vadd.f32 %v5424_v12, %v8081_v6  ;;  %v10017_v48 = vadd.f32 %v6274_v57, %v6063_v53  ;;  %v2121_v46 = vmul.f32 %v9869_v33, %v7993_v26  ;;  %v2122_v1 = vmul.f32 %v9874_v5, %v7993_v26  ;;  %v16411_v57 = vld [vmem:[#allocation26_spill] sm:$0xff] }
 0x155   :  { %v16410_v42 = vrot.slane %v16409_v51, 1  ;;  %v1735_v3 = vadd.f32 %v8081_v6, %v1606_v34  ;;  %v1736_v47 = vadd.f32 %v8081_v6, %v1607_v38  ;;  %v1737_v12 = vadd.f32 %v8081_v6, %v1608_v45  ;;  %v16416_v38 = vld [vmem:[#allocation20_spill] sm:$0xff] }
 0x156   :  { %v16417_v54 = vrot.slane %v16416_v38, 1 }
 0x157   :  { %v4655_v21 = vld [vmem:[#allocation2 + $0x70] ss:$2 sm:$0xff]  ;;  %v4783_v62 = vld [vmem:[#allocation2 + $0x71] ss:$2 sm:$0xff]  ;;  %v1866_v38 = vmul.f32 %v8100_v15, %v1737_v12 }
 0x158   :  { %v5095_v35 = vmul.f32 %v4655_v21, %v7995_v27  ;;  %v4903_v41 = vmul.f32 %v4655_v21, %v7993_v26  ;;  %v4967_v60 = vmul.f32 %v4783_v62, %v7981_v23  ;;  %v5734_v30 = vmul.f32 %v4655_v21, %v7981_v23 }
 0x159   :  { %v6117_v31 = vmul.f32 %v4783_v62, %v7995_v27  ;;  %v5670_v52 = vmul.f32 %v4783_v62, %v7993_v26  ;;  %v16412_v21 = vrot.slane %v16411_v57, 1  ;;  %7213 = vperm.xlu0 %7766, %v6931_v32  }
 0x15a   :  { %v5229_v29 = vrot.slane %v5095_v35, 1  ;;  %v5868_v43 = vrot.slane %v5734_v30, 1  ;;  %v5031_v53 = vadd.f32 %v4967_v60, %v4903_v41  ;;  %v1738_v35 = vadd.f32 %v8081_v6, %v1609_v18  ;;  %v16418_v41 = vld [vmem:[#allocation25_spill] sm:$0xff] }
 0x15b   :  { %v6251_v61 = vrot.slane %v6117_v31, 1  ;;  %v10036_v30 = vmul.f32 %v9847_v56, %v7981_v23  ;;  %v16419_v60 = vrot.slane %v16418_v41, 1 }
 0x15c   :  { %v5230_v7 = vsel %vm1182_vm0, %v16410_v42, %v5229_v29  ;;  %v5871_v62 = vsel %vm1182_vm0, %v5868_v43, %v16412_v21  ;;  %v16414_v42 = vld [vmem:[#allocation17_spill] sm:$0xff]  ;;  %v16420_v21 = vld [vmem:[#allocation31_spill] sm:$0xff] }
 0x15d   :  { %16413 = vst [vmem:[#allocation15_spill] sm:$0xff] %v10036_v30  ;;  %v6053_v31 = vadd.f32 %v5871_v62, %v5670_v52  ;;  %v5413_v51 = vadd.f32 %v5230_v7, %v5030_v4  ;;  %v16415_v2 = vrot.slane %v16414_v42, 1  ;;  %v6252_v45 = vsel %vm1182_vm0, %v16417_v54, %v6251_v61 }
 0x15e   :  { %v5232_v57 = vsel %vm1182_vm0, %v5229_v29, %v16419_v60  ;;  %v16421_v18 = vrot.slane %v16420_v21, 1  ;;  %v2250_v4 = vmul.f32 %v9852_v20, %v7981_v23  ;;  %v2252_v54 = vmul.f32 %v9882_v13, %v7981_v23 }
 0x15f   :  { %v5869_v34 = vsel %vm1182_vm0, %v16415_v2, %v5868_v43  ;;  %v5477_v52 = vadd.f32 %v5413_v51, %v8081_v6  ;;  %v1864_v2 = vmul.f32 %v8100_v15, %v1735_v3  ;;  %v2251_v43 = vmul.f32 %v9864_v50, %v7981_v23 }
 0x160   :  { %v6254_v39 = vsel %vm1182_vm0, %v6251_v61, %v16421_v18  ;;  %v6052_v56 = vadd.f32 %v5869_v34, %v5669_v9  ;;  %v1865_v29 = vmul.f32 %v8100_v15, %v1736_v47  ;;  %v10061_v61 = vmul.f32 %v9913_v36, %v7981_v23 }
 0x161   :  { %v16042_v9 = vrot.slane %v10036_v30, 1  ;;  %v5414_v20 = vadd.f32 %v5232_v57, %v5031_v53  ;;  %v6436_v62 = vadd.f32 %v6254_v39, %v6053_v31  ;;  %v2546_v51 = vrot.slane %v2250_v4, 1  ;;  %v7678_v57 = vld [vmem:[%s15935_s1 + $0x2c1] ss:$2 sm:$0xff] }
 0x162   :  { %v6435_v7 = vadd.f32 %v6252_v45, %v6052_v56  ;;  %16422 = vst [vmem:[#allocation26_spill] sm:$0xff] %v10061_v61  ;;  %v2548_v42 = vrot.slane %v2251_v43, 1  ;;  %v5541_v3 = vmul.f32 %v5477_v52, %v8100_v15  ;;  %v2550_v34 = vrot.slane %v2252_v54, 1 }
 0x163   :  { %v16040_v13 = vrot.slane %v10061_v61, 1  ;;  %v2123_v47 = vmul.f32 %v9927_v37, %v7993_v26  ;;  %v2124_v36 = vmul.f32 %v9932_v10, %v7993_v26  ;;  %v2547_v39 = vsel %vm1182_vm0, %v16042_v9, %v2546_v51  ;;  %v10330_v61 = vld [vmem:[%s15935_s1 + $0x320] ss:$2 sm:$0xff] }
 0x164   :  { %v6499_v50 = vadd.f32 %v6435_v7, %v8081_v6  ;;  %v1867_v31 = vmul.f32 %v8100_v15, %v1738_v35  ;;  %v10078_v45 = vadd.f32 %v8103_v16, %v1864_v2  ;;  %v2549_v41 = vsel %vm1182_vm0, %v2546_v51, %v2548_v42 }
 0x165   :  { %v5478_v12 = vadd.f32 %v5414_v20, %v8081_v6  ;;  %v6500_v60 = vadd.f32 %v6436_v62, %v8081_v6  ;;  %v10087_v21 = vadd.f32 %v8103_v16, %v1865_v29  ;;  %v2551_v18 = vsel %vm1182_vm0, %v2548_v42, %v2550_v34 }
 0x166   :  { %v6563_v53 = vmul.f32 %v6499_v50, %v8100_v15  ;;  %v10091_v35 = vadd.f32 %v5541_v3, %v8103_v16  ;;  %v2553_v56 = vsel %vm1182_vm0, %v2550_v34, %v16040_v13  ;;  %v2888_v4 = vadd.f32 %v2547_v39, %v2121_v46 }
 0x167   :  { %v10098_v52 = vmul.f32 %v9869_v33, %v7995_v27  ;;  %v2889_v2 = vadd.f32 %v2549_v41, %v2122_v1  ;;  %v3017_v43 = vmul.f32 %v9874_v5, %v7995_v27  ;;  %v3018_v54 = vmul.f32 %v9927_v37, %v7995_v27 }
 0x168   :  { %v3019_v7 = vmul.f32 %v9932_v10, %v7995_v27  ;;  %v10107_v29 = vadd.f32 %v6563_v53, %v8103_v16  ;;  %v2890_v20 = vadd.f32 %v2551_v18, %v2123_v47  ;;  %v10110_v46 = vmul.f32 %v7678_v57, %v7995_v27  ;;  %v7655_v18 = vld [vmem:[%s15935_s1 + $0x151] ss:$2 sm:$0xff] }
 0x169   :  { %16423 = vst [vmem:[#allocation17_spill] sm:$0xff] %v10098_v52  ;;  %v16041_v33 = vrot.slane %v10098_v52, 1  ;;  %v2891_v62 = vadd.f32 %v2553_v56, %v2124_v36  ;;  %v3313_v1 = vrot.slane %v3017_v43, 1  ;;  %v3315_v51 = vrot.slane %v3018_v54, 1 }
 0x16a   :  { %16424 = vst [vmem:[#allocation20_spill] sm:$0xff] %v10110_v46  ;;  %v3317_v42 = vrot.slane %v3019_v7, 1  ;;  %v5542_v5 = vmul.f32 %v5478_v12, %v8100_v15  ;;  %v1995_v37 = vadd.f32 %v8103_v16, %v1866_v38  ;;  %v1996_v3 = vadd.f32 %v8103_v16, %v1867_v31 }
 0x16b   :  { %v16039_v10 = vrot.slane %v10110_v46, 1  ;;  %v6564_v50 = vmul.f32 %v6500_v60, %v8100_v15  ;;  %v3314_v34 = vsel %vm1182_vm0, %v16041_v33, %v3313_v1  ;;  %v3316_v47 = vsel %vm1182_vm0, %v3313_v1, %v3315_v51  ;;  %v7778_v1 = vld [vmem:[%s15935_s1 + $0x141] ss:$2 sm:$0xff] }
 0x16c   :  { %v3318_v36 = vsel %vm1182_vm0, %v3315_v51, %v3317_v42  ;;  %v6691_v39 = vmax.f32 %v10091_v35, 0.0  ;;  %v3655_v53 = vadd.f32 %v3314_v34, %v2888_v4  ;;  %v3656_v31 = vadd.f32 %v3316_v47, %v2889_v2  ;;  %v7527_v4 = vld [vmem:[%s15935_s1 + $0x150] ss:$2 sm:$0xff]  ;;  %v7777_v2 = vld [vmem:[%s15935_s1 + $0x140] ss:$2 sm:$0xff] }
 0x16d   :  { %v3320_v38 = vsel %vm1182_vm0, %v3317_v42, %v16039_v10  ;;  %v6755_v41 = vmax.f32 %v10107_v29, 0.0  ;;  %v3657_v12 = vadd.f32 %v3318_v36, %v2890_v20  ;;  %v4167_v57 = vmax.f32 %v10078_v45, 0.0 }
 0x16e   :  { %v3658_v60 = vadd.f32 %v3320_v38, %v2891_v62  ;;  %v3783_v56 = vadd.f32 %v3655_v53, %v8081_v6  ;;  %v3784_v35 = vadd.f32 %v3656_v31, %v8081_v6  ;;  %v4168_v43 = vmax.f32 %v10087_v21, 0.0 }
 0x16f   :  { %v560_v45 = vmul.f32 %v7777_v2, %v7993_v26  ;;  %v3785_v54 = vadd.f32 %v3657_v12, %v8081_v6  ;;  %v4169_v29 = vmax.f32 %v1995_v37, 0.0  ;;  %v561_v20 = vmul.f32 %v7527_v4, %v7993_v26 }
 0x170   :  { %v3786_v7 = vadd.f32 %v3658_v60, %v8081_v6  ;;  %v3911_v62 = vmul.f32 %v3783_v56, %v8100_v15  ;;  %v3912_v21 = vmul.f32 %v3784_v35, %v8100_v15  ;;  %v689_v51 = vmul.f32 %v7778_v1, %v7981_v23 }
 0x171   :  { %v690_v42 = vmul.f32 %v7655_v18, %v7981_v23  ;;  %v3913_v34 = vmul.f32 %v3785_v54, %v8100_v15  ;;  %v4170_v36 = vmax.f32 %v1996_v3, 0.0  ;;  %v947_v37 = vmul.f32 %v7527_v4, %v7995_v27 }
 0x172   :  { %v3914_v47 = vmul.f32 %v3786_v7, %v8100_v15  ;;  %v4039_v38 = vadd.f32 %v3911_v62, %v8103_v16  ;;  %v4040_v53 = vadd.f32 %v3912_v21, %v8103_v16  ;;  %v817_v31 = vadd.f32 %v689_v51, %v560_v45  ;;  %v16425_v62 = vld [vmem:[#allocation13_spill] sm:$0xff] }
 0x173   :  { %v818_v12 = vadd.f32 %v690_v42, %v561_v20  ;;  %v4041_v60 = vadd.f32 %v3913_v34, %v8103_v16  ;;  %v1224_v35 = vrot.slane %v947_v37, 1  ;;  %v2101_v2 = vmul.f32 %v7778_v1, %v7993_v26  ;;  %v16427_v20 = vld [vmem:[#allocation21_spill] sm:$0xff] }
 0x174   :  { %v4042_v56 = vadd.f32 %v3914_v47, %v8103_v16  ;;  %v4295_v10 = vmax.f32 %v4039_v38, 0.0  ;;  %v4296_v54 = vmax.f32 %v4040_v53, 0.0  ;;  %v2102_v7 = vmul.f32 %v7655_v18, %v7993_v26 }
 0x175   :  { %v2230_v3 = vmul.f32 %v7527_v4, %v7981_v23  ;;  %v4297_v13 = vmax.f32 %v4041_v60, 0.0  ;;  %v16426_v9 = vrot.slane %v16425_v62, 1  ;;  %v16428_v21 = vrot.slane %v16427_v20, 1 }
 0x176   :  { %v4298_v33 = vmax.f32 %v4042_v56, 0.0  ;;  %v4423_v42 = vmax.f32 %v4167_v57, %v4295_v10  ;;  %v4424_v34 = vmax.f32 %v4168_v43, %v4296_v54  ;;  %v2997_v46 = vmul.f32 %v7655_v18, %v7995_v27  ;;  %v16429_v10 = vld [vmem:[#allocation16_spill] sm:$0xff]  ;;  %v16433_v54 = vld [vmem:[#allocation19_spill] sm:$0xff] }
 0x177   :  { %v1225_v45 = vsel %vm1182_vm0, %v16426_v9, %v1224_v35  ;;  %v1227_v51 = vsel %vm1182_vm0, %v1224_v35, %v16428_v21  ;;  %v4425_v37 = vmax.f32 %v4169_v29, %v4297_v13  ;;  %v2506_v53 = vrot.slane %v2230_v3, 1  ;;  %v6974_v29 = vpop.permute.xlu0 %6973  ;;  %v6984_v21 = vpop.permute.xlu2 %6983 }
 0x178   :  { %v1586_v47 = vadd.f32 %v1225_v45, %v817_v31  ;;  %v1587_v1 = vadd.f32 %v1227_v51, %v818_v12  ;;  %v4426_v38 = vmax.f32 %v4170_v36, %v4298_v33  ;;  %v5606_v4 = vadd.f32 %v5542_v5, %v8103_v16  ;;  %4552 = vst.msk [vmem:[#allocation2 + $0x140] sm:$0xff] %vm4511_vm1, %v4423_v42  ;;  %v16431_v33 = vld [vmem:[#allocation23_spill] sm:$0xff] }
 0x179   :  { %v6628_v60 = vadd.f32 %v6564_v50, %v8103_v16  ;;  %v6819_v35 = vmax.f32 %v6691_v39, %v6755_v41  ;;  %4553 = vst.msk [vmem:[#allocation2 + $0x148] sm:$0xff] %vm4511_vm1, %v4424_v34  ;;  %v16430_v57 = vrot.slane %v16429_v10, 1  ;;  %v16432_v43 = vrot.slane %v16431_v33, 1  ;;  %v10241_v10 = vld [vmem:[%s15935_s1 + $0x300] ss:$2 sm:$0xff] }
 0x17a   :  { %v1715_v9 = vadd.f32 %v8081_v6, %v1586_v47  ;;  %v1716_v56 = vadd.f32 %v8081_v6, %v1587_v1  ;;  %v3273_v5 = vrot.slane %v2997_v46, 1  ;;  %v10183_v50 = vadd.f32 %v9988_v25, %v8103_v16  ;;  %4554 = vst.msk [vmem:[#allocation2 + $0x150] sm:$0xff] %vm4511_vm1, %v4425_v37  ;;  %v16435_v25 = vld [vmem:[#allocation27_spill] sm:$0xff] }
 0x17b   :  { %v2507_v13 = vsel %vm1182_vm0, %v16430_v57, %v2506_v53  ;;  %v2509_v18 = vsel %vm1182_vm0, %v2506_v53, %v16432_v43  ;;  %v6571_v31 = vmul.f32 %v9997_v19, %v8100_v15  ;;  %4555 = vst.msk [vmem:[#allocation2 + $0x158] sm:$0xff] %vm4511_vm1, %v4426_v38  ;;  %v16434_v46 = vrot.slane %v16433_v54, 1  ;;  %v7779_v43 = vld [vmem:[#allocation2 + $0x90] ss:$2 sm:$0xff] }
 0x17c   :  { %v1844_v39 = vmul.f32 %v8100_v15, %v1715_v9  ;;  %v2868_v41 = vadd.f32 %v2507_v13, %v2101_v2  ;;  %v2869_v36 = vadd.f32 %v2509_v18, %v2102_v7  ;;  %v1845_v12 = vmul.f32 %v8100_v15, %v1716_v56 }
 0x17d   :  { %v3274_v3 = vsel %vm1182_vm0, %v16434_v46, %v3273_v5  ;;  %v16436_v62 = vrot.slane %v16435_v25, 1  ;;  %v5552_v20 = vmul.f32 %v10015_v40, %v8100_v15  ;;  %v7333_v2 = vadd.f32 %v9504_v11, %v10000_v59  ;;  %v10272_v46 = vld [vmem:[%s15935_s1 + $0x2f1] ss:$2 sm:$0xff]  ;;  %v10277_v25 = vld [vmem:[%s15935_s1 + $0x301] ss:$2 sm:$0xff] }
 0x17e   :  { %v3635_v7 = vadd.f32 %v3274_v3, %v2868_v41  ;;  %v6510_v51 = vadd.f32 %v10017_v48, %v8081_v6  ;;  %v6692_v42 = vmax.f32 %v5606_v4, 0.0  ;;  %v6756_v34 = vmax.f32 %v6628_v60, 0.0 }
 0x17f   :  { %v3276_v45 = vsel %vm1182_vm0, %v3273_v5, %v16436_v62  ;;  %v7267_v47 = vmul.f32 %v6974_v29, %v6819_v35  ;;  %v10204_v1 = vmul.f32 %v6984_v21, %v9836_v14  ;;  %v1973_v37 = vadd.f32 %v8103_v16, %v1844_v39  ;;  %v10236_v35 = vld [vmem:[%s15935_s1 + $0x2f0] ss:$2 sm:$0xff]  ;;  %v10262_v29 = vld [vmem:[%s15935_s1 + $0x2e1] ss:$2 sm:$0xff]  ;;  %v10282_v62 = vld [vmem:[%s15935_s1 + $0x311] ss:$2 sm:$0xff] }
 0x180   :  { %v3636_v19 = vadd.f32 %v3276_v45, %v2869_v36  ;;  %v3763_v38 = vadd.f32 %v3635_v7, %v8081_v6  ;;  %v16437_v11 = vmax.f32 %v9800_v28, 0.0  ;;  %v16438_v59 = vmax.f32 %v9529_v24, 0.0  ;;  %v10231_v24 = vld [vmem:[%s15935_s1 + $0x2e0] ss:$2 sm:$0xff]  ;;  %v10257_v5 = vld [vmem:[%s15935_s1 + $0x310] ss:$2 sm:$0xff] }
 0x181   :  { %v10216_v48 = vadd.f32 %v6571_v31, %v8103_v16  ;;  %v1974_v14 = vadd.f32 %v8103_v16, %v1845_v12  ;;  %v10221_v60 = vadd.f32 %v5552_v20, %v8103_v16  ;;  %v10224_v9 = vadd.f32 %v9830_v55, %v7333_v2  ;;  %v4681_v33 = vld [vmem:[#allocation2 + $0x140] ss:$2 sm:$0xff]  ;;  %v7780_v12 = vld [vmem:[#allocation2 + $0x91] ss:$2 sm:$0xff]  ;;  %v4809_v7 = vld [vmem:[#allocation2 + $0x141] ss:$2 sm:$0xff] }
 0x182   :  { %v3764_v40 = vadd.f32 %v3636_v19, %v8081_v6  ;;  %v10213_v53 = vmax.f32 %v16438_v59, %v16437_v11  ;;  %v3891_v56 = vmul.f32 %v3763_v38, %v8100_v15  ;;  %v10244_v55 = vmul.f32 %v6510_v51, %v8100_v15  ;;  %v4683_v39 = vld [vmem:[#allocation2 + $0x150] ss:$2 sm:$0xff] }
 0x183   :  { %v10246_v57 = vmax.f32 %v6692_v42, %v6756_v34  ;;  %v10249_v13 = vsel %vm4511_vm1, %v7267_v47, 0.0  ;;  %v10252_v18 = vmul.f32 %v7779_v43, %v7993_v26  ;;  %v4147_v31 = vmax.f32 %v1973_v37, 0.0  ;;  %v4811_v34 = vld [vmem:[#allocation2 + $0x151] ss:$2 sm:$0xff] }
 0x184   :  { %v3892_v28 = vmul.f32 %v3764_v40, %v8100_v15  ;;  %v4019_v41 = vadd.f32 %v3891_v56, %v8103_v16  ;;  %v10267_v54 = vmul.f32 %v7780_v12, %v7981_v23  ;;  %v4148_v3 = vmax.f32 %v1974_v14, 0.0 }
 0x185   :  { %v586_v45 = vmul.f32 %v10231_v24, %v7993_v26  ;;  %v587_v20 = vmul.f32 %v10236_v35, %v7993_v26  ;;  %v588_v2 = vmul.f32 %v10241_v10, %v7993_v26  ;;  %v10291_v19 = vmul.f32 %v4681_v33, %v7981_v23 }
 0x186   :  { %v4020_v36 = vadd.f32 %v3892_v28, %v8103_v16  ;;  %v10294_v21 = vmul.f32 %v4683_v39, %v7981_v23  ;;  %v4275_v51 = vmax.f32 %v4019_v41, 0.0  ;;  %v589_v42 = vmul.f32 %v10257_v5, %v7993_v26 }
 0x187   :  { %v715_v37 = vmul.f32 %v10262_v29, %v7981_v23  ;;  %v10302_v38 = vmul.f32 %v10231_v24, %v7995_v27  ;;  %v973_v40 = vmul.f32 %v10236_v35, %v7995_v27  ;;  %v716_v59 = vmul.f32 %v10272_v46, %v7981_v23 }
 0x188   :  { %16439 = vst [vmem:[#allocation25_spill] sm:$0xff] %v10294_v21  ;;  %v4276_v47 = vmax.f32 %v4020_v36, 0.0  ;;  %v4403_v11 = vmax.f32 %v4147_v31, %v4275_v51  ;;  %v717_v14 = vmul.f32 %v10277_v25, %v7981_v23  ;;  %v718_v56 = vmul.f32 %v10282_v62, %v7981_v23  ;;  %v6979_v31 = vpop.permute.xlu1 %6978 }
 0x189   :  { %16440 = vst [vmem:[#allocation31_spill] sm:$0xff] %v10302_v38  ;;  %v10313_v28 = vmul.f32 %v4681_v33, %v7995_v27  ;;  %v10316_v43 = vmul.f32 %v4683_v39, %v7995_v27  ;;  %v10319_v41 = vmul.f32 %v4809_v7, %v7995_v27  ;;  %v10324_v4 = vmul.f32 %v4811_v34, %v7995_v27 }
 0x18a   :  { %v4404_v36 = vmax.f32 %v4148_v3, %v4276_v47  ;;  %4532 = vst.msk [vmem:[#allocation2 + $0xa0] sm:$0xff] %vm4511_vm1, %v4403_v11  ;;  %v974_v39 = vmul.f32 %v10241_v10, %v7995_v27  ;;  %v975_v3 = vmul.f32 %v10257_v5, %v7995_v27  ;;  %v10339_v47 = vmul.f32 %v10330_v61, %v7995_v27 }
 0x18b   :  { %16441 = vst [vmem:[#allocation13_spill] sm:$0xff] %v10316_v43  ;;  %v1276_v11 = vrot.slane %v973_v40, 1  ;;  %v4916_v51 = vmul.f32 %v4681_v33, %v7993_v26  ;;  %v4980_v0 = vmul.f32 %v4809_v7, %v7981_v23  ;;  %v843_v63 = vadd.f32 %v715_v37, %v586_v45 }
 0x18c   :  { %16442 = vst [vmem:[#allocation21_spill] sm:$0xff] %v10324_v4  ;;  %v1278_v34 = vrot.slane %v974_v39, 1  ;;  %v16058_v40 = vrot.slane %v10313_v28, 1  ;;  %v16057_v33 = vrot.slane %v10316_v43, 1  ;;  %v5683_v52 = vmul.f32 %v4809_v7, %v7993_v26 }
 0x18d   :  { %4533 = vst.msk [vmem:[#allocation2 + $0xa8] sm:$0xff] %vm4511_vm1, %v4404_v36  ;;  %v6932_v36 = vld [vmem:[%s15936_s2 + $0x1b8] sm:$0xff]  ;;  %v1280_v30 = vrot.slane %v975_v3, 1  ;;  %v16444_v22 = vrot.slane %v10294_v21, 1  ;;  %v16445_v49 = vrot.slane %v10291_v19, 1  ;;  %v16055_v45 = vrot.slane %v10324_v4, 1 }
 0x18e   :  { %16443 = vst [vmem:[#allocation16_spill] sm:$0xff] %v10339_v47  ;;  %7218 = vperm.xlu1 %7767, %v6932_v36   ;;  %v16056_v37 = vrot.slane %v10339_v47, 1  ;;  %v10365_v39 = vmul.f32 %v6979_v31, %v10246_v57  ;;  %v10369_v44 = vadd.f32 %v10249_v13, %v10224_v9  ;;  %v844_v7 = vadd.f32 %v716_v59, %v587_v20 }
 0x18f   :  { %v5897_v8 = vsel %vm1182_vm0, %v16445_v49, %v16444_v22  ;;  %v16446_v3 = vrot.slane %v10302_v38, 1  ;;  %v5044_v22 = vadd.f32 %v4980_v0, %v4916_v51  ;;  %v5672_v49 = vmul.f32 %v7780_v12, %v7993_v26 }
 0x190   :  { %v845_v58 = vadd.f32 %v717_v14, %v588_v2  ;;  %v1279_v32 = vsel %vm1182_vm0, %v1276_v11, %v1278_v34  ;;  %v5258_v57 = vsel %vm1182_vm0, %v16058_v40, %v16057_v33  ;;  %v6066_v31 = vadd.f32 %v5897_v8, %v5683_v52  ;;  %v16448_v40 = vld [vmem:[#allocation35_spill] sm:$0xff] }
 0x191   :  { %v1277_v36 = vsel %vm1182_vm0, %v16446_v3, %v1276_v11  ;;  %v5033_v9 = vadd.f32 %v10267_v54, %v10252_v18  ;;  %v1281_v13 = vsel %vm1182_vm0, %v1278_v34, %v1280_v30  ;;  %v16447_v0 = vrot.slane %v10319_v41, 1 }
 0x192   :  { %v846_v59 = vadd.f32 %v718_v56, %v589_v42  ;;  %v1283_v14 = vsel %vm1182_vm0, %v1280_v30, %v16056_v37  ;;  %v1612_v51 = vadd.f32 %v1277_v36, %v843_v63  ;;  %v1613_v54 = vadd.f32 %v1279_v32, %v844_v7  ;;  %v16450_v32 = vld [vmem:[#allocation28_spill] sm:$0xff] }
 0x193   :  { %v6280_v12 = vsel %vm1182_vm0, %v16447_v0, %v16055_v45  ;;  %v10395_v34 = vadd.f32 %v5258_v57, %v5044_v22  ;;  %v1614_v0 = vadd.f32 %v1281_v13, %v845_v58  ;;  %v16449_v7 = vrot.slane %v16448_v40, 1 }
 0x194   :  { %v4661_v20 = vld [vmem:[#allocation2 + $0xa0] ss:$2 sm:$0xff]  ;;  %v4789_v2 = vld [vmem:[#allocation2 + $0xa1] ss:$2 sm:$0xff]  ;;  %v10399_v42 = vadd.f32 %v6280_v12, %v6066_v31  ;;  %v1615_v37 = vadd.f32 %v1283_v14, %v846_v59  ;;  %v1741_v33 = vadd.f32 %v8081_v6, %v1612_v51  ;;  %v16451_v57 = vrot.slane %v16450_v32, 1 }
 0x195   :  { %v4906_v8 = vmul.f32 %v4661_v20, %v7993_v26  ;;  %v4970_v52 = vmul.f32 %v4789_v2, %v7981_v23  ;;  %v5098_v18 = vmul.f32 %v4661_v20, %v7995_v27  ;;  %v5737_v11 = vmul.f32 %v4661_v20, %v7981_v23  ;;  %v16453_v12 = vld [vmem:[#allocation36_spill] sm:$0xff]  ;;  %v16455_v14 = vld [vmem:[#allocation37_spill] sm:$0xff] }
 0x196   :  { %v6120_v3 = vmul.f32 %v4789_v2, %v7995_v27  ;;  %v5673_v63 = vmul.f32 %v4789_v2, %v7993_v26  ;;  %v1742_v58 = vadd.f32 %v8081_v6, %v1613_v54  ;;  %v10412_v31 = vmul.f32 %v10231_v24, %v7981_v23 }
 0x197   :  { %v5034_v56 = vadd.f32 %v4970_v52, %v4906_v8  ;;  %v5235_v45 = vrot.slane %v5098_v18, 1  ;;  %v5874_v30 = vrot.slane %v5737_v11, 1  ;;  %v16454_v2 = vrot.slane %v16453_v12, 1 }
 0x198   :  { %v6257_v36 = vrot.slane %v6120_v3, 1  ;;  %16452 = vst [vmem:[#allocation23_spill] sm:$0xff] %v10412_v31  ;;  %v16456_v51 = vrot.slane %v16455_v14, 1  ;;  %v1743_v8 = vadd.f32 %v8081_v6, %v1614_v0  ;;  %v16459_v3 = vld [vmem:[#allocation32_spill] sm:$0xff]  ;;  %v1744_v32 = vadd.f32 %v8081_v6, %v1615_v37 }
 0x199   :  { %v5238_v22 = vsel %vm1182_vm0, %v5235_v45, %v16449_v7  ;;  %v5236_v20 = vsel %vm1182_vm0, %v16451_v57, %v5235_v45  ;;  %v5877_v59 = vsel %vm1182_vm0, %v5874_v30, %v16454_v2  ;;  %v16457_v45 = vld [vmem:[#allocation30_spill] sm:$0xff]  ;;  %v16460_v24 = vrot.slane %v16459_v3, 1 }
 0x19a   :  { %v5417_v13 = vadd.f32 %v5238_v22, %v5034_v56  ;;  %v6260_v40 = vsel %vm1182_vm0, %v6257_v36, %v16456_v51  ;;  %v6056_v52 = vadd.f32 %v5877_v59, %v5673_v63  ;;  %v5416_v18 = vadd.f32 %v5236_v20, %v5033_v9 }
 0x19b   :  { %v16458_v11 = vrot.slane %v16457_v45, 1  ;;  %v6258_v56 = vsel %vm1182_vm0, %v16460_v24, %v6257_v36  ;;  %v2127_v57 = vmul.f32 %v10262_v29, %v7993_v26  ;;  %v1870_v0 = vmul.f32 %v8100_v15, %v1741_v33 }
 0x19c   :  { %v5481_v7 = vadd.f32 %v5417_v13, %v8081_v6  ;;  %v6439_v12 = vadd.f32 %v6260_v40, %v6056_v52  ;;  %v1871_v9 = vmul.f32 %v8100_v15, %v1742_v58  ;;  %v2256_v63 = vmul.f32 %v10236_v35, %v7981_v23 }
 0x19d   :  { %v5875_v54 = vsel %vm1182_vm0, %v16458_v11, %v5874_v30  ;;  %v1872_v20 = vmul.f32 %v8100_v15, %v1743_v8  ;;  %v2257_v36 = vmul.f32 %v10241_v10, %v7981_v23  ;;  %v2258_v37 = vmul.f32 %v10257_v5, %v7981_v23  ;;  %v7684_v11 = vld [vmem:[%s15935_s1 + $0x321] ss:$2 sm:$0xff] }
 0x19e   :  { %v6055_v22 = vadd.f32 %v5875_v54, %v5672_v49  ;;  %v6503_v49 = vadd.f32 %v6439_v12, %v8081_v6  ;;  %v5480_v13 = vadd.f32 %v5416_v18, %v8081_v6  ;;  %v10444_v33 = vmul.f32 %v10330_v61, %v7981_v23 }
 0x19f   :  { %v16062_v58 = vrot.slane %v10412_v31, 1  ;;  %v5545_v35 = vmul.f32 %v5481_v7, %v8100_v15  ;;  %v2558_v59 = vrot.slane %v2256_v63, 1  ;;  %v2560_v14 = vrot.slane %v2257_v36, 1 }
 0x1a0   :  { %v6438_v30 = vadd.f32 %v6258_v56, %v6055_v22  ;;  %16461 = vst [vmem:[#allocation19_spill] sm:$0xff] %v10444_v33  ;;  %v6567_v10 = vmul.f32 %v6503_v49, %v8100_v15  ;;  %v2128_v5 = vmul.f32 %v10272_v46, %v7993_v26  ;;  %v2562_v51 = vrot.slane %v2258_v37, 1 }
 0x1a1   :  { %v16060_v40 = vrot.slane %v10444_v33, 1  ;;  %v1873_v8 = vmul.f32 %v8100_v15, %v1744_v32  ;;  %v10455_v61 = vadd.f32 %v8103_v16, %v1870_v0  ;;  %v2129_v52 = vmul.f32 %v10277_v25, %v7993_v26  ;;  %v6936_v33 = vld [vmem:[%s15936_s2 + $0x1d8] sm:$0xff] }
 0x1a2   :  { %v6502_v2 = vadd.f32 %v6438_v30, %v8081_v6  ;;  %v2130_v18 = vmul.f32 %v10282_v62, %v7993_v26  ;;  %v5544_v45 = vmul.f32 %v5480_v13, %v8100_v15  ;;  %v10466_v54 = vadd.f32 %v8103_v16, %v1871_v9  ;;  %7238 = vperm.xlu2 %7768, %v6936_v33  }
 0x1a3   :  { %v10469_v3 = vadd.f32 %v8103_v16, %v1872_v20  ;;  %v2559_v24 = vsel %vm1182_vm0, %v16062_v58, %v2558_v59  ;;  %v10475_v56 = vadd.f32 %v5545_v35, %v8103_v16  ;;  %v2561_v22 = vsel %vm1182_vm0, %v2558_v59, %v2560_v14 }
 0x1a4   :  { %v6566_v7 = vmul.f32 %v6502_v2, %v8100_v15  ;;  %v2563_v32 = vsel %vm1182_vm0, %v2560_v14, %v2562_v51  ;;  %v10481_v12 = vadd.f32 %v6567_v10, %v8103_v16  ;;  %v2565_v0 = vsel %vm1182_vm0, %v2562_v51, %v16060_v40 }
 0x1a5   :  { %v10488_v9 = vmul.f32 %v10262_v29, %v7995_v27  ;;  %v3023_v63 = vmul.f32 %v10272_v46, %v7995_v27  ;;  %v2894_v30 = vadd.f32 %v2559_v24, %v2127_v57  ;;  %v3024_v20 = vmul.f32 %v10277_v25, %v7995_v27 }
 0x1a6   :  { %v3025_v36 = vmul.f32 %v10282_v62, %v7995_v27  ;;  %v10497_v37 = vmul.f32 %v7684_v11, %v7995_v27  ;;  %v2895_v49 = vadd.f32 %v2561_v22, %v2128_v5  ;;  %v2896_v13 = vadd.f32 %v2563_v32, %v2129_v52  ;;  %v7661_v22 = vld [vmem:[%s15935_s1 + $0x1b1] ss:$2 sm:$0xff] }
 0x1a7   :  { %16462 = vst [vmem:[#allocation27_spill] sm:$0xff] %v10488_v9  ;;  %v16061_v35 = vrot.slane %v10488_v9, 1  ;;  %v3325_v2 = vrot.slane %v3023_v63, 1  ;;  %v2897_v29 = vadd.f32 %v2565_v0, %v2130_v18  ;;  %v3327_v59 = vrot.slane %v3024_v20, 1  ;;  %v7781_v63 = vld [vmem:[%s15935_s1 + $0x1a0] ss:$2 sm:$0xff] }
 0x1a8   :  { %16463 = vst [vmem:[#allocation35_spill] sm:$0xff] %v10497_v37  ;;  %v3329_v14 = vrot.slane %v3025_v36, 1  ;;  %v16059_v46 = vrot.slane %v10497_v37, 1  ;;  %v10503_v25 = vadd.f32 %v5544_v45, %v8103_v16  ;;  %v2002_v62 = vadd.f32 %v8103_v16, %v1873_v8 }
 0x1a9   :  { %v3326_v10 = vsel %vm1182_vm0, %v16061_v35, %v3325_v2  ;;  %v10510_v5 = vadd.f32 %v6566_v7, %v8103_v16  ;;  %v3328_v51 = vsel %vm1182_vm0, %v3325_v2, %v3327_v59  ;;  %v6759_v45 = vmax.f32 %v10481_v12, 0.0  ;;  %v7782_v2 = vld [vmem:[%s15935_s1 + $0x1a1] ss:$2 sm:$0xff] }
 0x1aa   :  { %v3330_v52 = vsel %vm1182_vm0, %v3327_v59, %v3329_v14  ;;  %v3332_v18 = vsel %vm1182_vm0, %v3329_v14, %v16059_v46  ;;  %v3661_v11 = vadd.f32 %v3326_v10, %v2894_v30  ;;  %v3662_v24 = vadd.f32 %v3328_v51, %v2895_v49 }
 0x1ab   :  { %v3663_v8 = vadd.f32 %v3330_v52, %v2896_v13  ;;  %v3664_v32 = vadd.f32 %v3332_v18, %v2897_v29  ;;  %v4173_v7 = vmax.f32 %v10455_v61, 0.0  ;;  %v4174_v0 = vmax.f32 %v10466_v54, 0.0  ;;  %v7533_v61 = vld [vmem:[%s15935_s1 + $0x1b0] ss:$2 sm:$0xff] }
 0x1ac   :  { %v566_v20 = vmul.f32 %v7781_v63, %v7993_v26  ;;  %v3789_v12 = vadd.f32 %v3661_v11, %v8081_v6  ;;  %v3790_v30 = vadd.f32 %v3662_v24, %v8081_v6  ;;  %v4175_v49 = vmax.f32 %v10469_v3, 0.0 }
 0x1ad   :  { %v3791_v36 = vadd.f32 %v3663_v8, %v8081_v6  ;;  %v3792_v54 = vadd.f32 %v3664_v32, %v8081_v6  ;;  %v567_v13 = vmul.f32 %v7533_v61, %v7993_v26  ;;  %v695_v29 = vmul.f32 %v7782_v2, %v7981_v23 }
 0x1ae   :  { %v696_v59 = vmul.f32 %v7661_v22, %v7981_v23  ;;  %v3917_v14 = vmul.f32 %v3789_v12, %v8100_v15  ;;  %v3918_v3 = vmul.f32 %v3790_v30, %v8100_v15  ;;  %v4176_v51 = vmax.f32 %v2002_v62, 0.0 }
 0x1af   :  { %v3919_v10 = vmul.f32 %v3791_v36, %v8100_v15  ;;  %v3920_v52 = vmul.f32 %v3792_v54, %v8100_v15  ;;  %v823_v18 = vadd.f32 %v695_v29, %v566_v20  ;;  %v953_v24 = vmul.f32 %v7533_v61, %v7995_v27 }
 0x1b0   :  { %v824_v11 = vadd.f32 %v696_v59, %v567_v13  ;;  %v4045_v8 = vadd.f32 %v3917_v14, %v8103_v16  ;;  %v4046_v32 = vadd.f32 %v3918_v3, %v8103_v16  ;;  %v2107_v46 = vmul.f32 %v7782_v2, %v7993_v26  ;;  %v16464_v14 = vld [vmem:[#allocation22_spill] sm:$0xff] }
 0x1b1   :  { %v4047_v63 = vadd.f32 %v3919_v10, %v8103_v16  ;;  %v4048_v12 = vadd.f32 %v3920_v52, %v8103_v16  ;;  %v1236_v30 = vrot.slane %v953_v24, 1  ;;  %v2108_v36 = vmul.f32 %v7661_v22, %v7993_v26  ;;  %v16466_v10 = vld [vmem:[#allocation41_spill] sm:$0xff] }
 0x1b2   :  { %v2236_v62 = vmul.f32 %v7533_v61, %v7981_v23  ;;  %v4301_v54 = vmax.f32 %v4045_v8, 0.0  ;;  %v4302_v20 = vmax.f32 %v4046_v32, 0.0  ;;  %v3003_v29 = vmul.f32 %v7661_v22, %v7995_v27  ;;  %v16468_v32 = vld [vmem:[#allocation24_spill] sm:$0xff] }
 0x1b3   :  { %v4303_v13 = vmax.f32 %v4047_v63, 0.0  ;;  %v4304_v59 = vmax.f32 %v4048_v12, 0.0  ;;  %v16465_v40 = vrot.slane %v16464_v14, 1  ;;  %v16467_v35 = vrot.slane %v16466_v10, 1 }
 0x1b4   :  { %v2518_v52 = vrot.slane %v2236_v62, 1  ;;  %v4429_v24 = vmax.f32 %v4173_v7, %v4301_v54  ;;  %v4430_v58 = vmax.f32 %v4174_v0, %v4302_v20  ;;  %v16469_v63 = vrot.slane %v16468_v32, 1  ;;  %v6994_v62 = vpop.permute.xlu1 %6993 }
 0x1b5   :  { %v1237_v3 = vsel %vm1182_vm0, %v16465_v40, %v1236_v30  ;;  %v1239_v2 = vsel %vm1182_vm0, %v1236_v30, %v16467_v35  ;;  %v4431_v57 = vmax.f32 %v4175_v49, %v4303_v13  ;;  %v4432_v61 = vmax.f32 %v4176_v51, %v4304_v59 }
 0x1b6   :  { %v1592_v37 = vadd.f32 %v1237_v3, %v823_v18  ;;  %v1593_v8 = vadd.f32 %v1239_v2, %v824_v11  ;;  %v2519_v22 = vsel %vm1182_vm0, %v16469_v63, %v2518_v52  ;;  %v16470_v12 = vrot.slane %v9307_v17, 1  ;;  %4558 = vst.msk [vmem:[#allocation2 + $0x170] sm:$0xff] %vm4511_vm1, %v4429_v24  ;;  %v6999_v3 = vpop.permute.xlu2 %6998 }
 0x1b7   :  { %v2874_v35 = vadd.f32 %v2519_v22, %v2107_v46  ;;  %v3285_v7 = vrot.slane %v3003_v29, 1  ;;  %v16471_v0 = vmax.f32 %v10475_v56, 0.0  ;;  %v6694_v51 = vmax.f32 %v10503_v25, 0.0  ;;  %4559 = vst.msk [vmem:[#allocation2 + $0x178] sm:$0xff] %vm4511_vm1, %v4430_v58  ;;  %v16472_v46 = vld [vmem:[#allocation29_spill] sm:$0xff]  ;;  %v16474_v25 = vld [vmem:[#allocation44_spill] sm:$0xff] }
 0x1b8   :  { %v2521_v14 = vsel %vm1182_vm0, %v2518_v52, %v16470_v12  ;;  %v1721_v40 = vadd.f32 %v8081_v6, %v1592_v37  ;;  %v6758_v18 = vmax.f32 %v10510_v5, 0.0  ;;  %v1722_v17 = vadd.f32 %v8081_v6, %v1593_v8  ;;  %4560 = vst.msk [vmem:[#allocation2 + $0x180] sm:$0xff] %vm4511_vm1, %v4431_v57 }
 0x1b9   :  { %v2875_v30 = vadd.f32 %v2521_v14, %v2108_v36  ;;  %v6823_v49 = vmax.f32 %v16471_v0, %v6759_v45  ;;  %v10576_v11 = vadd.f32 %v10244_v55, %v8103_v16  ;;  %v16473_v56 = vrot.slane %v16472_v46, 1  ;;  %4561 = vst.msk [vmem:[#allocation2 + $0x188] sm:$0xff] %vm4511_vm1, %v4432_v61  ;;  %v6989_v61 = vpop.permute.xlu0 %6988 }
 0x1ba   :  { %v1850_v37 = vmul.f32 %v8100_v15, %v1721_v40  ;;  %v16475_v36 = vrot.slane %v16474_v25, 1  ;;  %v7338_v58 = vsel %vm4511_vm1, %v10365_v39, 0.0  ;;  %v1851_v55 = vmul.f32 %v8100_v15, %v1722_v17  ;;  %v10624_v40 = vld [vmem:[%s15935_s1 + $0x340] ss:$2 sm:$0xff]  ;;  %v10658_v25 = vld [vmem:[%s15935_s1 + $0x351] ss:$2 sm:$0xff] }
 0x1bb   :  { %v3286_v45 = vsel %vm1182_vm0, %v16473_v56, %v3285_v7  ;;  %v6763_v57 = vmax.f32 %v10216_v48, 0.0  ;;  %v7339_v13 = vadd.f32 %v7338_v58, %v10369_v44  ;;  %v5491_v29 = vadd.f32 %v10395_v34, %v8081_v6  ;;  %v10665_v58 = vld [vmem:[%s15935_s1 + $0x361] ss:$2 sm:$0xff] }
 0x1bc   :  { %v3288_v5 = vsel %vm1182_vm0, %v3285_v7, %v16475_v36  ;;  %v3641_v54 = vadd.f32 %v3286_v45, %v2874_v35  ;;  %v6513_v59 = vadd.f32 %v10399_v42, %v8081_v6  ;;  %v7271_v10 = vmul.f32 %v6994_v62, %v6823_v49  ;;  %v10629_v35 = vld [vmem:[%s15935_s1 + $0x350] ss:$2 sm:$0xff]  ;;  %v7783_v49 = vld [vmem:[#allocation2 + $0xc0] ss:$2 sm:$0xff] }
 0x1bd   :  { %v3642_v20 = vadd.f32 %v3288_v5, %v2875_v30  ;;  %v6822_v2 = vmax.f32 %v6694_v51, %v6758_v18  ;;  %v7340_v24 = vsel %vm4511_vm1, %v10204_v1, 0.0  ;;  %v10601_v48 = vmul.f32 %v6999_v3, %v10213_v53  ;;  %v10642_v18 = vld [vmem:[#allocation2 + $0xc1] ss:$2 sm:$0xff]  ;;  %v10651_v62 = vld [vmem:[%s15935_s1 + $0x360] ss:$2 sm:$0xff] }
 0x1be   :  { %v3769_v39 = vadd.f32 %v3641_v54, %v8081_v6  ;;  %v1979_v34 = vadd.f32 %v8103_v16, %v1850_v37  ;;  %v1980_v8 = vadd.f32 %v8103_v16, %v1851_v55  ;;  %v16476_v22 = vmax.f32 %v10183_v50, 0.0  ;;  %v10634_v50 = vld [vmem:[%s15935_s1 + $0x341] ss:$2 sm:$0xff]  ;;  %v4687_v0 = vld [vmem:[#allocation2 + $0x170] ss:$2 sm:$0xff] }
 0x1bf   :  { %v3770_v52 = vadd.f32 %v3642_v20, %v8081_v6  ;;  %v10614_v1 = vmul.f32 %v5491_v29, %v8100_v15  ;;  %v10617_v53 = vmul.f32 %v6513_v59, %v8100_v15  ;;  %v10619_v14 = vadd.f32 %v7340_v24, %v7339_v13 }
 0x1c0   :  { %v3897_v32 = vmul.f32 %v3769_v39, %v8100_v15  ;;  %v10611_v12 = vmax.f32 %v16476_v22, %v6763_v57  ;;  %v10637_v30 = vsel %vm4511_vm1, %v7271_v10, 0.0  ;;  %v7270_v7 = vmul.f32 %v6989_v61, %v6822_v2  ;;  %v4689_v37 = vld [vmem:[#allocation2 + $0x180] ss:$2 sm:$0xff]  ;;  %v4815_v57 = vld [vmem:[#allocation2 + $0x171] ss:$2 sm:$0xff] }
 0x1c1   :  { %v3898_v63 = vmul.f32 %v3770_v52, %v8100_v15  ;;  %v10640_v51 = vmul.f32 %v7783_v49, %v7993_v26  ;;  %v10646_v17 = vmul.f32 %v10642_v18, %v7981_v23  ;;  %v4153_v45 = vmax.f32 %v1979_v34, 0.0  ;;  %v10694_v61 = vld [vmem:[%s15935_s1 + $0x370] ss:$2 sm:$0xff] }
 0x1c2   :  { %v4025_v46 = vadd.f32 %v3897_v32, %v8103_v16  ;;  %v592_v36 = vmul.f32 %v10624_v40, %v7993_v26  ;;  %v4154_v5 = vmax.f32 %v1980_v8, 0.0  ;;  %v593_v55 = vmul.f32 %v10629_v35, %v7993_v26 }
 0x1c3   :  { %v4026_v56 = vadd.f32 %v3898_v63, %v8103_v16  ;;  %v594_v54 = vmul.f32 %v10651_v62, %v7993_v26  ;;  %v721_v20 = vmul.f32 %v10634_v50, %v7981_v23  ;;  %v10674_v13 = vmul.f32 %v4687_v0, %v7995_v27  ;;  %v4817_v63 = vld [vmem:[#allocation2 + $0x181] ss:$2 sm:$0xff] }
 0x1c4   :  { %v10677_v29 = vmul.f32 %v4689_v37, %v7995_v27  ;;  %v10680_v59 = vmul.f32 %v4687_v0, %v7981_v23  ;;  %v4281_v3 = vmax.f32 %v4025_v46, 0.0  ;;  %v10683_v10 = vmul.f32 %v4689_v37, %v7981_v23  ;;  %v10707_v46 = vld [vmem:[%s15935_s1 + $0x380] ss:$2 sm:$0xff] }
 0x1c5   :  { %v4282_v2 = vmax.f32 %v4026_v56, 0.0  ;;  %v722_v39 = vmul.f32 %v10658_v25, %v7981_v23  ;;  %v10689_v52 = vmul.f32 %v10624_v40, %v7995_v27  ;;  %v723_v34 = vmul.f32 %v10665_v58, %v7981_v23 }
 0x1c6   :  { %16477 = vst [vmem:[#allocation28_spill] sm:$0xff] %v10677_v29  ;;  %v4409_v24 = vmax.f32 %v4153_v45, %v4281_v3  ;;  %v979_v8 = vmul.f32 %v10629_v35, %v7995_v27  ;;  %v980_v32 = vmul.f32 %v10651_v62, %v7995_v27  ;;  %v4919_v22 = vmul.f32 %v4687_v0, %v7993_v26  ;;  %v10718_v0 = vld [vmem:[%s15935_s1 + $0x371] ss:$2 sm:$0xff] }
 0x1c7   :  { %16478 = vst [vmem:[#allocation36_spill] sm:$0xff] %v10680_v59  ;;  %v4983_v49 = vmul.f32 %v4815_v57, %v7981_v23  ;;  %v4410_v37 = vmax.f32 %v4154_v5, %v4282_v2  ;;  %v981_v56 = vmul.f32 %v10694_v61, %v7995_v27  ;;  %v10722_v5 = vmul.f32 %v10707_v46, %v7995_v27  ;;  %v6935_v2 = vld [vmem:[%s15936_s2 + $0x1d0] sm:$0xff] }
 0x1c8   :  { %16479 = vst [vmem:[#allocation37_spill] sm:$0xff] %v10683_v10  ;;  %v1288_v45 = vrot.slane %v979_v8, 1  ;;  %v1290_v3 = vrot.slane %v980_v32, 1  ;;  %v10728_v44 = vmul.f32 %v4815_v57, %v7995_v27  ;;  %v595_v8 = vmul.f32 %v10694_v61, %v7993_v26  ;;  %7233 = vperm.xlu1 %7767, %v6935_v2  }
 0x1c9   :  { %16480 = vst [vmem:[#allocation30_spill] sm:$0xff] %v10689_v52  ;;  %v1292_v32 = vrot.slane %v981_v56, 1  ;;  %v7342_v42 = vsel %vm4511_vm1, %v7270_v7, 0.0  ;;  %v724_v47 = vmul.f32 %v10718_v0, %v7981_v23  ;;  %v849_v4 = vadd.f32 %v721_v20, %v592_v36 }
 0x1ca   :  { %4538 = vst.msk [vmem:[#allocation2 + $0xd0] sm:$0xff] %vm4511_vm1, %v4409_v24  ;;  %v10731_v24 = vmul.f32 %v4817_v63, %v7995_v27  ;;  %v5047_v63 = vadd.f32 %v4983_v49, %v4919_v22  ;;  %v16484_v21 = vrot.slane %v10677_v29, 1  ;;  %v16485_v43 = vrot.slane %v10674_v13, 1 }
 0x1cb   :  { %16481 = vst [vmem:[#allocation32_spill] sm:$0xff] %v10722_v5  ;;  %v5686_v31 = vmul.f32 %v4815_v57, %v7993_v26  ;;  %v850_v38 = vadd.f32 %v722_v39, %v593_v55  ;;  %v16072_v56 = vrot.slane %v10722_v5, 1  ;;  %v16486_v7 = vrot.slane %v10683_v10, 1 }
 0x1cc   :  { %4539 = vst.msk [vmem:[#allocation2 + $0xd8] sm:$0xff] %vm4511_vm1, %v4410_v37  ;;  %v6934_v37 = vld [vmem:[%s15936_s2 + $0x1c8] sm:$0xff]  ;;  %v5264_v9 = vsel %vm1182_vm0, %v16485_v43, %v16484_v21  ;;  %v16487_v33 = vrot.slane %v10680_v59, 1  ;;  %v851_v49 = vadd.f32 %v723_v34, %v594_v54  ;;  %v16488_v36 = vrot.slane %v10689_v52, 1 }
 0x1cd   :  { %16482 = vst [vmem:[#allocation22_spill] sm:$0xff] %v10728_v44  ;;  %7228 = vperm.xlu0 %7766, %v6934_v37   ;;  %v1291_v2 = vsel %vm1182_vm0, %v1288_v45, %v1290_v3  ;;  %v10764_v21 = vadd.f32 %v7342_v42, %v10619_v14  ;;  %v16074_v43 = vrot.slane %v10728_v44, 1  ;;  %v16073_v55 = vrot.slane %v10731_v24, 1 }
 0x1ce   :  { %16483 = vst [vmem:[#allocation41_spill] sm:$0xff] %v10731_v24  ;;  %v5903_v22 = vsel %vm1182_vm0, %v16487_v33, %v16486_v7  ;;  %v1289_v20 = vsel %vm1182_vm0, %v16488_v36, %v1288_v45  ;;  %v1293_v57 = vsel %vm1182_vm0, %v1290_v3, %v1292_v32  ;;  %v10769_v39 = vadd.f32 %v5264_v9, %v5047_v63 }
 0x1cf   :  { %v5036_v54 = vadd.f32 %v10646_v17, %v10640_v51  ;;  %v5675_v34 = vmul.f32 %v10642_v18, %v7993_v26  ;;  %v852_v37 = vadd.f32 %v724_v47, %v595_v8  ;;  %v10775_v7 = vadd.f32 %v5903_v22, %v5686_v31 }
 0x1d0   :  { %v1295_v14 = vsel %vm1182_vm0, %v1292_v32, %v16072_v56  ;;  %v1618_v33 = vadd.f32 %v1289_v20, %v849_v4  ;;  %v1619_v36 = vadd.f32 %v1291_v2, %v850_v38  ;;  %v1620_v17 = vadd.f32 %v1293_v57, %v851_v49  ;;  %v16489_v57 = vld [vmem:[#allocation46_spill] sm:$0xff] }
 0x1d1   :  { %v10788_v47 = vsel %vm1182_vm0, %v16074_v43, %v16073_v55  ;;  %v2133_v4 = vmul.f32 %v10634_v50, %v7993_v26  ;;  %v1621_v63 = vadd.f32 %v1295_v14, %v852_v37  ;;  %v16490_v56 = vrot.slane %v16489_v57, 1  ;;  %v16491_v55 = vld [vmem:[#allocation38_spill] sm:$0xff]  ;;  %v16493_v14 = vld [vmem:[#allocation47_spill] sm:$0xff]  ;;  %v16500_v57 = vld [vmem:[#allocation40_spill] sm:$0xff] }
 0x1d2   :  { %v1747_v20 = vadd.f32 %v8081_v6, %v1618_v33  ;;  %v1748_v2 = vadd.f32 %v8081_v6, %v1619_v36  ;;  %v16492_v43 = vrot.slane %v16491_v55, 1 }
 0x1d3   :  { %v4667_v45 = vld [vmem:[#allocation2 + $0xd0] ss:$2 sm:$0xff]  ;;  %v4795_v42 = vld [vmem:[#allocation2 + $0xd1] ss:$2 sm:$0xff] }
 0x1d4   :  { %v4909_v9 = vmul.f32 %v4667_v45, %v7993_v26  ;;  %v4973_v3 = vmul.f32 %v4795_v42, %v7981_v23  ;;  %v5101_v51 = vmul.f32 %v4667_v45, %v7995_v27  ;;  %v5740_v31 = vmul.f32 %v4667_v45, %v7981_v23 }
 0x1d5   :  { %v6123_v18 = vmul.f32 %v4795_v42, %v7995_v27  ;;  %v5676_v32 = vmul.f32 %v4795_v42, %v7993_v26  ;;  %v2134_v42 = vmul.f32 %v10658_v25, %v7993_v26 }
 0x1d6   :  { %v5037_v38 = vadd.f32 %v4973_v3, %v4909_v9  ;;  %v5241_v8 = vrot.slane %v5101_v51, 1  ;;  %v5880_v22 = vrot.slane %v5740_v31, 1  ;;  %v1749_v9 = vadd.f32 %v8081_v6, %v1620_v17  ;;  %v16495_v51 = vld [vmem:[#allocation48_spill] sm:$0xff] }
 0x1d7   :  { %v6263_v49 = vrot.slane %v6123_v18, 1  ;;  %v16494_v3 = vrot.slane %v16493_v14, 1  ;;  %v16496_v36 = vrot.slane %v16495_v51, 1  ;;  %v16498_v18 = vld [vmem:[#allocation39_spill] sm:$0xff]  ;;  %v1876_v51 = vmul.f32 %v8100_v15, %v1747_v20 }
 0x1d8   :  { %v5244_v45 = vsel %vm1182_vm0, %v5241_v8, %v16490_v56  ;;  %v5242_v5 = vsel %vm1182_vm0, %v16492_v43, %v5241_v8  ;;  %v10814_v56 = vmul.f32 %v10624_v40, %v7981_v23  ;;  %v16499_v17 = vrot.slane %v16498_v18, 1 }
 0x1d9   :  { %v5420_v37 = vadd.f32 %v5244_v45, %v5037_v38  ;;  %v5883_v33 = vsel %vm1182_vm0, %v5880_v22, %v16494_v3  ;;  %v6266_v31 = vsel %vm1182_vm0, %v6263_v49, %v16496_v36  ;;  %v5419_v43 = vadd.f32 %v5242_v5, %v5036_v54 }
 0x1da   :  { %16497 = vst [vmem:[#allocation24_spill] sm:$0xff] %v10814_v56  ;;  %v6059_v55 = vadd.f32 %v5883_v33, %v5676_v32  ;;  %v5881_v8 = vsel %vm1182_vm0, %v16499_v17, %v5880_v22  ;;  %v16501_v38 = vrot.slane %v16500_v57, 1  ;;  %v1750_v3 = vadd.f32 %v8081_v6, %v1621_v63  ;;  %v7690_v57 = vld [vmem:[%s15935_s1 + $0x381] ss:$2 sm:$0xff] }
 0x1db   :  { %v6058_v14 = vadd.f32 %v5881_v8, %v5675_v34  ;;  %v1877_v36 = vmul.f32 %v8100_v15, %v1748_v2  ;;  %v5483_v40 = vadd.f32 %v5419_v43, %v8081_v6  ;;  %v2262_v5 = vmul.f32 %v10629_v35, %v7981_v23 }
 0x1dc   :  { %v6264_v45 = vsel %vm1182_vm0, %v16501_v38, %v6263_v49  ;;  %v6442_v24 = vadd.f32 %v6266_v31, %v6059_v55  ;;  %v2263_v54 = vmul.f32 %v10651_v62, %v7981_v23  ;;  %v1878_v22 = vmul.f32 %v8100_v15, %v1749_v9 }
 0x1dd   :  { %v6441_v32 = vadd.f32 %v6264_v45, %v6058_v14  ;;  %v2264_v34 = vmul.f32 %v10694_v61, %v7981_v23  ;;  %v10835_v63 = vmul.f32 %v10707_v46, %v7981_v23  ;;  %v5484_v49 = vadd.f32 %v5420_v37, %v8081_v6 }
 0x1de   :  { %v6506_v20 = vadd.f32 %v6442_v24, %v8081_v6  ;;  %v16080_v2 = vrot.slane %v10814_v56, 1  ;;  %v2570_v35 = vrot.slane %v2262_v5, 1  ;;  %v5547_v33 = vmul.f32 %v5483_v40, %v8100_v15 }
 0x1df   :  { %16502 = vst [vmem:[#allocation29_spill] sm:$0xff] %v10835_v63  ;;  %v6505_v62 = vadd.f32 %v6441_v32, %v8081_v6  ;;  %v2572_v31 = vrot.slane %v2263_v54, 1  ;;  %v2574_v9 = vrot.slane %v2264_v34, 1  ;;  %v1879_v55 = vmul.f32 %v8100_v15, %v1750_v3 }
 0x1e0   :  { %v2135_v61 = vmul.f32 %v10665_v58, %v7993_v26  ;;  %v2136_v46 = vmul.f32 %v10718_v0, %v7993_v26  ;;  %v16078_v37 = vrot.slane %v10835_v63, 1  ;;  %v10850_v43 = vadd.f32 %v8103_v16, %v1876_v51  ;;  %v6937_v63 = vld [vmem:[%s15936_s2 + $0x1e0] sm:$0xff] }
 0x1e1   :  { %v6569_v24 = vmul.f32 %v6505_v62, %v8100_v15  ;;  %v10853_v18 = vadd.f32 %v8103_v16, %v1877_v36  ;;  %v2571_v17 = vsel %vm1182_vm0, %v16080_v2, %v2570_v35  ;;  %v5548_v8 = vmul.f32 %v5484_v49, %v8100_v15  ;;  %7243 = vperm.xlu0 %7766, %v6937_v63  }
 0x1e2   :  { %v10863_v38 = vadd.f32 %v8103_v16, %v1878_v22  ;;  %v2573_v45 = vsel %vm1182_vm0, %v2570_v35, %v2572_v31  ;;  %v2575_v14 = vsel %vm1182_vm0, %v2572_v31, %v2574_v9  ;;  %v6570_v3 = vmul.f32 %v6506_v20, %v8100_v15 }
 0x1e3   :  { %v5611_v51 = vadd.f32 %v5547_v33, %v8103_v16  ;;  %v6633_v36 = vadd.f32 %v6569_v24, %v8103_v16  ;;  %v2577_v40 = vsel %vm1182_vm0, %v2574_v9, %v16078_v37  ;;  %v2900_v5 = vadd.f32 %v2571_v17, %v2133_v4  ;;  %v16507_v37 = vld [vmem:[#allocation33_spill] sm:$0xff] }
 0x1e4   :  { %v10875_v54 = vmul.f32 %v10634_v50, %v7995_v27  ;;  %v3029_v32 = vmul.f32 %v10658_v25, %v7995_v27  ;;  %v3030_v22 = vmul.f32 %v10665_v58, %v7995_v27  ;;  %v2901_v34 = vadd.f32 %v2573_v45, %v2134_v42 }
 0x1e5   :  { %v2902_v49 = vadd.f32 %v2575_v14, %v2135_v61  ;;  %v3031_v20 = vmul.f32 %v10718_v0, %v7995_v27  ;;  %v10884_v35 = vmul.f32 %v7690_v57, %v7995_v27  ;;  %v2903_v33 = vadd.f32 %v2577_v40, %v2136_v46 }
 0x1e6   :  { %16503 = vst [vmem:[#allocation44_spill] sm:$0xff] %v10875_v54  ;;  %v16079_v4 = vrot.slane %v10875_v54, 1  ;;  %v3337_v62 = vrot.slane %v3029_v32, 1  ;;  %v3339_v50 = vrot.slane %v3030_v22, 1  ;;  %v6697_v31 = vmax.f32 %v5611_v51, 0.0 }
 0x1e7   :  { %16504 = vst [vmem:[#allocation46_spill] sm:$0xff] %v10884_v35  ;;  %v6761_v9 = vmax.f32 %v6633_v36, 0.0  ;;  %v3341_v24 = vrot.slane %v3031_v20, 1  ;;  %v16077_v25 = vrot.slane %v10884_v35, 1  ;;  %v10889_v58 = vadd.f32 %v5548_v8, %v8103_v16  ;;  %v7667_v36 = vld [vmem:[%s15935_s1 + $0x211] ss:$2 sm:$0xff] }
 0x1e8   :  { %v2008_v42 = vadd.f32 %v8103_v16, %v1879_v55  ;;  %v3338_v0 = vsel %vm1182_vm0, %v16079_v4, %v3337_v62  ;;  %v3340_v61 = vsel %vm1182_vm0, %v3337_v62, %v3339_v50  ;;  %v10897_v46 = vadd.f32 %v6570_v3, %v8103_v16  ;;  %v7785_v22 = vld [vmem:[%s15935_s1 + $0x200] ss:$2 sm:$0xff] }
 0x1e9   :  { %v3342_v17 = vsel %vm1182_vm0, %v3339_v50, %v3341_v24  ;;  %v3344_v57 = vsel %vm1182_vm0, %v3341_v24, %v16077_v25  ;;  %v3667_v45 = vadd.f32 %v3338_v0, %v2900_v5  ;;  %v3668_v8 = vadd.f32 %v3340_v61, %v2901_v34  ;;  %v7786_v50 = vld [vmem:[%s15935_s1 + $0x201] ss:$2 sm:$0xff] }
 0x1ea   :  { %v3669_v14 = vadd.f32 %v3342_v17, %v2902_v49  ;;  %v3670_v51 = vadd.f32 %v3344_v57, %v2903_v33  ;;  %v4179_v55 = vmax.f32 %v10850_v43, 0.0  ;;  %v10907_v40 = vmax.f32 %v6697_v31, %v6761_v9  ;;  %v7539_v33 = vld [vmem:[%s15935_s1 + $0x210] ss:$2 sm:$0xff] }
 0x1eb   :  { %v3795_v3 = vadd.f32 %v3667_v45, %v8081_v6  ;;  %v4180_v32 = vmax.f32 %v10853_v18, 0.0  ;;  %v572_v5 = vmul.f32 %v7785_v22, %v7993_v26  ;;  %v3796_v34 = vadd.f32 %v3668_v8, %v8081_v6 }
 0x1ec   :  { %v3797_v43 = vadd.f32 %v3669_v14, %v8081_v6  ;;  %v3798_v49 = vadd.f32 %v3670_v51, %v8081_v6  ;;  %v4181_v20 = vmax.f32 %v10863_v38, 0.0  ;;  %v573_v62 = vmul.f32 %v7539_v33, %v7993_v26 }
 0x1ed   :  { %v3923_v18 = vmul.f32 %v3795_v3, %v8100_v15  ;;  %v701_v31 = vmul.f32 %v7786_v50, %v7981_v23  ;;  %v702_v9 = vmul.f32 %v7667_v36, %v7981_v23  ;;  %v3924_v24 = vmul.f32 %v3796_v34, %v8100_v15 }
 0x1ee   :  { %v3925_v38 = vmul.f32 %v3797_v43, %v8100_v15  ;;  %v3926_v0 = vmul.f32 %v3798_v49, %v8100_v15  ;;  %v4182_v61 = vmax.f32 %v2008_v42, 0.0  ;;  %v959_v8 = vmul.f32 %v7539_v33, %v7995_v27 }
 0x1ef   :  { %v4051_v17 = vadd.f32 %v3923_v18, %v8103_v16  ;;  %v829_v57 = vadd.f32 %v701_v31, %v572_v5  ;;  %v830_v45 = vadd.f32 %v702_v9, %v573_v62  ;;  %v4052_v14 = vadd.f32 %v3924_v24, %v8103_v16  ;;  %v16505_v9 = vld [vmem:[#allocation42_spill] sm:$0xff] }
 0x1f0   :  { %v4053_v51 = vadd.f32 %v3925_v38, %v8103_v16  ;;  %v4054_v3 = vadd.f32 %v3926_v0, %v8103_v16  ;;  %v2113_v22 = vmul.f32 %v7786_v50, %v7993_v26  ;;  %v1248_v25 = vrot.slane %v959_v8, 1 }
 0x1f1   :  { %v4307_v34 = vmax.f32 %v4051_v17, 0.0  ;;  %v2114_v43 = vmul.f32 %v7667_v36, %v7993_v26  ;;  %v2242_v42 = vmul.f32 %v7539_v33, %v7981_v23  ;;  %v4308_v49 = vmax.f32 %v4052_v14, 0.0  ;;  %v16509_v14 = vld [vmem:[#allocation43_spill] sm:$0xff] }
 0x1f2   :  { %v4309_v18 = vmax.f32 %v4053_v51, 0.0  ;;  %v4310_v5 = vmax.f32 %v4054_v3, 0.0  ;;  %v3009_v62 = vmul.f32 %v7667_v36, %v7995_v27  ;;  %v16506_v24 = vrot.slane %v16505_v9, 1  ;;  %v16511_v36 = vld [vmem:[#allocation52_spill] sm:$0xff] }
 0x1f3   :  { %v4435_v31 = vmax.f32 %v4179_v55, %v4307_v34  ;;  %v16508_v0 = vrot.slane %v16507_v37, 1  ;;  %v2530_v17 = vrot.slane %v2242_v42, 1  ;;  %v4436_v8 = vmax.f32 %v4180_v32, %v4308_v49  ;;  %v16513_v49 = vld [vmem:[#allocation45_spill] sm:$0xff] }
 0x1f4   :  { %v1249_v38 = vsel %vm1182_vm0, %v16506_v24, %v1248_v25  ;;  %v4437_v4 = vmax.f32 %v4181_v20, %v4309_v18  ;;  %v4438_v2 = vmax.f32 %v4182_v61, %v4310_v5  ;;  %v16510_v51 = vrot.slane %v16509_v14, 1 }
 0x1f5   :  { %v1251_v50 = vsel %vm1182_vm0, %v1248_v25, %v16508_v0  ;;  %v1598_v35 = vadd.f32 %v1249_v38, %v829_v57  ;;  %4564 = vst.msk [vmem:[#allocation2 + $0x1a0] sm:$0xff] %vm4511_vm1, %v4435_v31  ;;  %v16512_v3 = vrot.slane %v16511_v36, 1  ;;  %v3297_v9 = vrot.slane %v3009_v62, 1  ;;  %v7004_v25 = vpop.permute.xlu0 %7003  ;;  %v7014_v57 = vpop.permute.xlu2 %7013 }
 0x1f6   :  { %v1599_v33 = vadd.f32 %v1251_v50, %v830_v45  ;;  %v2531_v55 = vsel %vm1182_vm0, %v16510_v51, %v2530_v17  ;;  %v7345_v37 = vadd.f32 %v10637_v30, %v10764_v21  ;;  %4565 = vst.msk [vmem:[#allocation2 + $0x1a8] sm:$0xff] %vm4511_vm1, %v4436_v8  ;;  %v5494_v45 = vadd.f32 %v10769_v39, %v8081_v6  ;;  %v16515_v30 = vld [vmem:[#allocation54_spill] sm:$0xff] }
 0x1f7   :  { %v2533_v34 = vsel %vm1182_vm0, %v2530_v17, %v16512_v3  ;;  %v1727_v32 = vadd.f32 %v8081_v6, %v1598_v35  ;;  %v2880_v20 = vadd.f32 %v2531_v55, %v2113_v22  ;;  %4566 = vst.msk [vmem:[#allocation2 + $0x1b0] sm:$0xff] %vm4511_vm1, %v4437_v4  ;;  %v16514_v18 = vrot.slane %v16513_v49, 1  ;;  %v11017_v55 = vld [vmem:[%s15935_s1 + $0x3a0] ss:$2 sm:$0xff]  ;;  %v11041_v49 = vld [vmem:[%s15935_s1 + $0x3b0] ss:$2 sm:$0xff] }
 0x1f8   :  { %v2881_v61 = vadd.f32 %v2533_v34, %v2114_v43  ;;  %v1728_v42 = vadd.f32 %v8081_v6, %v1599_v33  ;;  %v16516_v21 = vrot.slane %v16515_v30, 1  ;;  %v6452_v35 = vadd.f32 %v10788_v47, %v10775_v7  ;;  %4567 = vst.msk [vmem:[#allocation2 + $0x1b8] sm:$0xff] %vm4511_vm1, %v4438_v2  ;;  %v7787_v34 = vld [vmem:[#allocation2 + $0xf0] ss:$2 sm:$0xff] }
 0x1f9   :  { %v3298_v5 = vsel %vm1182_vm0, %v16514_v18, %v3297_v9  ;;  %v1856_v22 = vmul.f32 %v8100_v15, %v1727_v32  ;;  %v6698_v4 = vmax.f32 %v10889_v58, 0.0  ;;  %v6762_v31 = vmax.f32 %v10897_v46, 0.0 }
 0x1fa   :  { %v3300_v62 = vsel %vm1182_vm0, %v3297_v9, %v16516_v21  ;;  %v3647_v39 = vadd.f32 %v3298_v5, %v2880_v20  ;;  %v7273_v24 = vmul.f32 %v7004_v25, %v10907_v40  ;;  %v1857_v38 = vmul.f32 %v8100_v15, %v1728_v42  ;;  %v11052_v21 = vld [vmem:[%s15935_s1 + $0x3c0] ss:$2 sm:$0xff] }
 0x1fb   :  { %v3648_v43 = vadd.f32 %v3300_v62, %v2881_v61  ;;  %v7346_v0 = vsel %vm4511_vm1, %v10601_v48, 0.0  ;;  %v10979_v50 = vmul.f32 %v7014_v57, %v10611_v12  ;;  %v16517_v2 = vmax.f32 %v10576_v11, 0.0  ;;  %v11057_v62 = vld [vmem:[%s15935_s1 + $0x3a1] ss:$2 sm:$0xff] }
 0x1fc   :  { %v3775_v7 = vadd.f32 %v3647_v39, %v8081_v6  ;;  %v16518_v58 = vmax.f32 %v10221_v60, 0.0  ;;  %v10991_v46 = vadd.f32 %v10614_v1, %v8103_v16  ;;  %v10995_v48 = vadd.f32 %v10617_v53, %v8103_v16 }
 0x1fd   :  { %v3776_v47 = vadd.f32 %v3648_v43, %v8081_v6  ;;  %v1985_v12 = vadd.f32 %v8103_v16, %v1856_v22  ;;  %v10998_v40 = vadd.f32 %v7346_v0, %v7345_v37  ;;  %v1986_v8 = vadd.f32 %v8103_v16, %v1857_v38  ;;  %v4693_v51 = vld [vmem:[#allocation2 + $0x1a0] ss:$2 sm:$0xff]  ;;  %v4821_v36 = vld [vmem:[#allocation2 + $0x1a1] ss:$2 sm:$0xff]  ;;  %v11025_v37 = vld [vmem:[#allocation2 + $0xf1] ss:$2 sm:$0xff] }
 0x1fe   :  { %v10987_v17 = vmax.f32 %v16518_v58, %v16517_v2  ;;  %v3903_v11 = vmul.f32 %v3775_v7, %v8100_v15  ;;  %v11004_v33 = vmul.f32 %v5494_v45, %v8100_v15  ;;  %v11007_v1 = vadd.f32 %v6452_v35, %v8081_v6  ;;  %v11073_v7 = vld [vmem:[%s15935_s1 + $0x3b1] ss:$2 sm:$0xff] }
 0x1ff   :  { %v3904_v60 = vmul.f32 %v3776_v47, %v8100_v15  ;;  %v11009_v14 = vmax.f32 %v6698_v4, %v6762_v31  ;;  %v11012_v53 = vsel %vm4511_vm1, %v7273_v24, 0.0  ;;  %v11020_v3 = vmul.f32 %v4693_v51, %v7995_v27  ;;  %v4695_v20 = vld [vmem:[#allocation2 + $0x1b0] ss:$2 sm:$0xff]  ;;  %v4823_v22 = vld [vmem:[#allocation2 + $0x1b1] ss:$2 sm:$0xff] }
 0x200   :  { %v11023_v9 = vmul.f32 %v7787_v34, %v7993_v26  ;;  %v11029_v25 = vmul.f32 %v11025_v37, %v7981_v23  ;;  %v598_v32 = vmul.f32 %v11017_v55, %v7993_v26  ;;  %v11034_v61 = vmul.f32 %v4693_v51, %v7981_v23  ;;  %v11067_v24 = vld [vmem:[%s15935_s1 + $0x3d0] ss:$2 sm:$0xff] }
 0x201   :  { %16519 = vst [vmem:[#allocation38_spill] sm:$0xff] %v11020_v3  ;;  %v4031_v57 = vadd.f32 %v3903_v11, %v8103_v16  ;;  %v4032_v45 = vadd.f32 %v3904_v60, %v8103_v16  ;;  %v4159_v42 = vmax.f32 %v1985_v12, 0.0  ;;  %v11044_v18 = vmul.f32 %v4695_v20, %v7995_v27  ;;  %v6939_v60 = vld [vmem:[%s15936_s2 + $0x1f0] sm:$0xff] }
 0x202   :  { %v11047_v5 = vmul.f32 %v4695_v20, %v7981_v23  ;;  %v4160_v30 = vmax.f32 %v1986_v8, 0.0  ;;  %v599_v35 = vmul.f32 %v11041_v49, %v7993_v26  ;;  %v4922_v39 = vmul.f32 %v4693_v51, %v7993_v26  ;;  %v11092_v20 = vld [vmem:[%s15935_s1 + $0x3c1] ss:$2 sm:$0xff]  ;;  %7253 = vperm.xlu2 %7768, %v6939_v60  }
 0x203   :  { %16520 = vst [vmem:[#allocation47_spill] sm:$0xff] %v11044_v18  ;;  %v4986_v43 = vmul.f32 %v4821_v36, %v7981_v23  ;;  %v16083_v4 = vrot.slane %v11020_v3, 1  ;;  %v4287_v31 = vmax.f32 %v4031_v57, 0.0  ;;  %v16082_v38 = vrot.slane %v11044_v18, 1  ;;  %v6938_v18 = vld [vmem:[%s15936_s2 + $0x1e8] sm:$0xff] }
 0x204   :  { %16521 = vst [vmem:[#allocation48_spill] sm:$0xff] %v11047_v5  ;;  %v4288_v0 = vmax.f32 %v4032_v45, 0.0  ;;  %v600_v47 = vmul.f32 %v11052_v21, %v7993_v26  ;;  %v601_v2 = vmul.f32 %v11067_v24, %v7993_v26  ;;  %v11081_v12 = vmul.f32 %v4821_v36, %v7995_v27  ;;  %7248 = vperm.xlu1 %7767, %v6938_v18  }
 0x205   :  { %v4415_v8 = vmax.f32 %v4159_v42, %v4287_v31  ;;  %v727_v11 = vmul.f32 %v11057_v62, %v7981_v23  ;;  %v11087_v51 = vmul.f32 %v4823_v22, %v7995_v27  ;;  %v11096_v57 = vmul.f32 %v11017_v55, %v7995_v27 }
 0x206   :  { %v4416_v34 = vmax.f32 %v4160_v30, %v4288_v0  ;;  %v5050_v45 = vadd.f32 %v4986_v43, %v4922_v39  ;;  %v5270_v42 = vsel %vm1182_vm0, %v16083_v4, %v16082_v38  ;;  %v11107_v30 = vld [vmem:[%s15935_s1 + $0x3e0] ss:$2 sm:$0xff]  ;;  %v728_v22 = vmul.f32 %v11073_v7, %v7981_v23  ;;  %v11117_v39 = vld [vmem:[%s15935_s1 + $0x3d1] ss:$2 sm:$0xff]  ;;  %v7009_v4 = vpop.permute.xlu1 %7008 }
 0x207   :  { %16522 = vst [vmem:[#allocation39_spill] sm:$0xff] %v11087_v51  ;;  %v985_v31 = vmul.f32 %v11041_v49, %v7995_v27  ;;  %v986_v43 = vmul.f32 %v11052_v21, %v7995_v27  ;;  %v987_v0 = vmul.f32 %v11067_v24, %v7995_v27  ;;  %v729_v38 = vmul.f32 %v11092_v20, %v7981_v23 }
 0x208   :  { %16523 = vst [vmem:[#allocation40_spill] sm:$0xff] %v11096_v57  ;;  %v16526_v58 = vrot.slane %v11034_v61, 1  ;;  %v16096_v3 = vrot.slane %v11087_v51, 1  ;;  %v5433_v52 = vadd.f32 %v5270_v42, %v5050_v45  ;;  %v730_v44 = vmul.f32 %v11117_v39, %v7981_v23 }
 0x209   :  { %4544 = vst.msk [vmem:[#allocation2 + $0x100] sm:$0xff] %vm4511_vm1, %v4415_v8  ;;  %v11125_v8 = vmul.f32 %v11107_v30, %v7995_v27  ;;  %v1300_v10 = vrot.slane %v985_v31, 1  ;;  %v1302_v54 = vrot.slane %v986_v43, 1  ;;  %v1304_v56 = vrot.slane %v987_v0, 1 }
 0x20a   :  { %4545 = vst.msk [vmem:[#allocation2 + $0x108] sm:$0xff] %vm4511_vm1, %v4416_v34  ;;  %v5689_v34 = vmul.f32 %v4821_v36, %v7993_v26  ;;  %v16525_v36 = vrot.slane %v11047_v5, 1  ;;  %v855_v59 = vadd.f32 %v727_v11, %v598_v32  ;;  %v11152_v5 = vmul.f32 %v11007_v1, %v8100_v15 }
 0x20b   :  { %16524 = vst [vmem:[#allocation42_spill] sm:$0xff] %v11125_v8  ;;  %v16095_v31 = vrot.slane %v11125_v8, 1  ;;  %v16527_v18 = vrot.slane %v11096_v57, 1  ;;  %v11162_v63 = vadd.f32 %v11012_v53, %v10998_v40  ;;  %v857_v32 = vadd.f32 %v729_v38, %v600_v47 }
 0x20c   :  { %v5909_v29 = vsel %vm1182_vm0, %v16526_v58, %v16525_v36  ;;  %v11155_v58 = vmul.f32 %v7009_v4, %v11009_v14  ;;  %v856_v36 = vadd.f32 %v728_v22, %v599_v35  ;;  %v1303_v11 = vsel %vm1182_vm0, %v1300_v10, %v1302_v54 }
 0x20d   :  { %v1301_v60 = vsel %vm1182_vm0, %v16527_v18, %v1300_v10  ;;  %v6072_v45 = vadd.f32 %v5909_v29, %v5689_v34  ;;  %v16528_v1 = vrot.slane %v11081_v12, 1  ;;  %v5039_v35 = vadd.f32 %v11029_v25, %v11023_v9 }
 0x20e   :  { %v5678_v4 = vmul.f32 %v11025_v37, %v7993_v26  ;;  %v1305_v42 = vsel %vm1182_vm0, %v1302_v54, %v1304_v56  ;;  %v11176_v40 = vadd.f32 %v5433_v52, %v8081_v6  ;;  %v858_v10 = vadd.f32 %v730_v44, %v601_v2 }
 0x20f   :  { %v6292_v14 = vsel %vm1182_vm0, %v16528_v1, %v16096_v3  ;;  %v1307_v38 = vsel %vm1182_vm0, %v1304_v56, %v16095_v31  ;;  %v1624_v47 = vadd.f32 %v1301_v60, %v855_v59  ;;  %v1625_v37 = vadd.f32 %v1303_v11, %v856_v36 }
 0x210   :  { %v11184_v43 = vadd.f32 %v6292_v14, %v6072_v45  ;;  %v1626_v0 = vadd.f32 %v1305_v42, %v857_v32  ;;  %v2139_v59 = vmul.f32 %v11057_v62, %v7993_v26  ;;  %v1627_v60 = vadd.f32 %v1307_v38, %v858_v10  ;;  %v16529_v45 = vld [vmem:[#allocation9_spill] sm:$0xff]  ;;  %v16535_v38 = vld [vmem:[#allocation56_spill] sm:$0xff] }
 0x211   :  { %v4673_v29 = vld [vmem:[#allocation2 + $0x100] ss:$2 sm:$0xff]  ;;  %v4801_v53 = vld [vmem:[#allocation2 + $0x101] ss:$2 sm:$0xff]  ;;  %v2140_v36 = vmul.f32 %v11073_v7, %v7993_v26  ;;  %v16530_v11 = vrot.slane %v16529_v45, 1  ;;  %v1753_v42 = vadd.f32 %v8081_v6, %v1624_v47  ;;  %v16539_v47 = vld [vmem:[#allocation51_spill] sm:$0xff] }
 0x212   :  { %v4912_v22 = vmul.f32 %v4673_v29, %v7993_v26  ;;  %v4976_v9 = vmul.f32 %v4801_v53, %v7981_v23  ;;  %v5104_v25 = vmul.f32 %v4673_v29, %v7995_v27  ;;  %v5743_v52 = vmul.f32 %v4673_v29, %v7981_v23  ;;  %v16531_v14 = vld [vmem:[#allocation49_spill] sm:$0xff] }
 0x213   :  { %v6126_v54 = vmul.f32 %v4801_v53, %v7995_v27  ;;  %v5679_v34 = vmul.f32 %v4801_v53, %v7993_v26  ;;  %v16532_v29 = vrot.slane %v16531_v14, 1  ;;  %v1754_v53 = vadd.f32 %v8081_v6, %v1625_v37  ;;  %v16537_v14 = vld [vmem:[#allocation50_spill] sm:$0xff] }
 0x214   :  { %v5040_v44 = vadd.f32 %v4976_v9, %v4912_v22  ;;  %v5247_v2 = vrot.slane %v5104_v25, 1  ;;  %v5886_v56 = vrot.slane %v5743_v52, 1  ;;  %v16533_v9 = vld [vmem:[#allocation10_spill] sm:$0xff]  ;;  %v16536_v52 = vrot.slane %v16535_v38, 1 }
 0x215   :  { %v6269_v18 = vrot.slane %v6126_v54, 1  ;;  %v16534_v25 = vrot.slane %v16533_v9, 1  ;;  %v1755_v45 = vadd.f32 %v8081_v6, %v1626_v0  ;;  %v16538_v3 = vrot.slane %v16537_v14, 1 }
 0x216   :  { %v5250_v1 = vsel %vm1182_vm0, %v5247_v2, %v16530_v11  ;;  %v5248_v32 = vsel %vm1182_vm0, %v16532_v29, %v5247_v2  ;;  %v16540_v29 = vrot.slane %v16539_v47, 1  ;;  %v1756_v9 = vadd.f32 %v8081_v6, %v1627_v60 }
 0x217   :  { %v5423_v22 = vadd.f32 %v5250_v1, %v5040_v44  ;;  %v5889_v10 = vsel %vm1182_vm0, %v5886_v56, %v16534_v25  ;;  %v6272_v54 = vsel %vm1182_vm0, %v6269_v18, %v16536_v52  ;;  %v5422_v31 = vadd.f32 %v5248_v32, %v5039_v35 }
 0x218   :  { %v6062_v11 = vadd.f32 %v5889_v10, %v5679_v34  ;;  %v5887_v2 = vsel %vm1182_vm0, %v16538_v3, %v5886_v56  ;;  %v6270_v37 = vsel %vm1182_vm0, %v16540_v29, %v6269_v18  ;;  %v11218_v25 = vmul.f32 %v11017_v55, %v7981_v23 }
 0x219   :  { %v5487_v44 = vadd.f32 %v5423_v22, %v8081_v6  ;;  %v6061_v1 = vadd.f32 %v5887_v2, %v5678_v4  ;;  %v5486_v35 = vadd.f32 %v5422_v31, %v8081_v6  ;;  %v1882_v34 = vmul.f32 %v8100_v15, %v1753_v42 }
 0x21a   :  { %16541 = vst [vmem:[#allocation33_spill] sm:$0xff] %v11218_v25  ;;  %v6445_v0 = vadd.f32 %v6272_v54, %v6062_v11  ;;  %v1883_v3 = vmul.f32 %v8100_v15, %v1754_v53  ;;  %v1884_v32 = vmul.f32 %v8100_v15, %v1755_v45  ;;  %v2268_v18 = vmul.f32 %v11041_v49, %v7981_v23 }
 0x21b   :  { %v6444_v56 = vadd.f32 %v6270_v37, %v6061_v1  ;;  %v2269_v4 = vmul.f32 %v11052_v21, %v7981_v23  ;;  %v5551_v60 = vmul.f32 %v5487_v44, %v8100_v15  ;;  %v2270_v31 = vmul.f32 %v11067_v24, %v7981_v23  ;;  %v7696_v1 = vld [vmem:[%s15935_s1 + $0x3e1] ss:$2 sm:$0xff] }
 0x21c   :  { %v6509_v55 = vadd.f32 %v6445_v0, %v8081_v6  ;;  %v11234_v42 = vmul.f32 %v11107_v30, %v7981_v23  ;;  %v5550_v53 = vmul.f32 %v5486_v35, %v8100_v15  ;;  %v16100_v49 = vrot.slane %v11218_v25, 1 }
 0x21d   :  { %v6508_v22 = vadd.f32 %v6444_v56, %v8081_v6  ;;  %v2582_v10 = vrot.slane %v2268_v18, 1  ;;  %v2141_v38 = vmul.f32 %v11092_v20, %v7993_v26  ;;  %v2584_v52 = vrot.slane %v2269_v4, 1 }
 0x21e   :  { %16542 = vst [vmem:[#allocation43_spill] sm:$0xff] %v11234_v42  ;;  %v6573_v21 = vmul.f32 %v6509_v55, %v8100_v15  ;;  %v2586_v54 = vrot.slane %v2270_v31, 1  ;;  %v1885_v45 = vmul.f32 %v8100_v15, %v1756_v9  ;;  %v2142_v30 = vmul.f32 %v11117_v39, %v7993_v26 }
 0x21f   :  { %v6572_v24 = vmul.f32 %v6508_v22, %v8100_v15  ;;  %v16098_v11 = vrot.slane %v11234_v42, 1  ;;  %v11248_v14 = vadd.f32 %v8103_v16, %v1882_v34  ;;  %v11251_v2 = vadd.f32 %v8103_v16, %v1883_v3 }
 0x220   :  { %v11254_v47 = vadd.f32 %v8103_v16, %v1884_v32  ;;  %v2583_v29 = vsel %vm1182_vm0, %v16100_v49, %v2582_v10  ;;  %v11260_v37 = vadd.f32 %v5551_v60, %v8103_v16  ;;  %v11263_v44 = vadd.f32 %v5550_v53, %v8103_v16 }
 0x221   :  { %v2585_v9 = vsel %vm1182_vm0, %v2582_v10, %v2584_v52  ;;  %v2587_v0 = vsel %vm1182_vm0, %v2584_v52, %v2586_v54  ;;  %v11271_v35 = vadd.f32 %v6573_v21, %v8103_v16  ;;  %v11274_v34 = vadd.f32 %v6572_v24, %v8103_v16 }
 0x222   :  { %v2589_v3 = vsel %vm1182_vm0, %v2586_v54, %v16098_v11  ;;  %v11281_v56 = vmul.f32 %v11057_v62, %v7995_v27  ;;  %v2906_v32 = vadd.f32 %v2583_v29, %v2139_v59  ;;  %v3035_v18 = vmul.f32 %v11073_v7, %v7995_v27  ;;  %v16545_v11 = vld [vmem:[#allocation34_spill] sm:$0xff] }
 0x223   :  { %v3036_v4 = vmul.f32 %v11092_v20, %v7995_v27  ;;  %v3037_v60 = vmul.f32 %v11117_v39, %v7995_v27  ;;  %v2907_v55 = vadd.f32 %v2585_v9, %v2140_v36  ;;  %v2908_v31 = vadd.f32 %v2587_v0, %v2141_v38 }
 0x224   :  { %16543 = vst [vmem:[#allocation52_spill] sm:$0xff] %v11281_v56  ;;  %v11290_v53 = vmul.f32 %v7696_v1, %v7995_v27  ;;  %v16099_v22 = vrot.slane %v11281_v56, 1  ;;  %v2909_v10 = vadd.f32 %v2589_v3, %v2142_v30  ;;  %v3349_v62 = vrot.slane %v3035_v18, 1 }
 0x225   :  { %v3351_v21 = vrot.slane %v3036_v4, 1  ;;  %v3353_v59 = vrot.slane %v3037_v60, 1  ;;  %v6701_v52 = vmax.f32 %v11260_v37, 0.0  ;;  %v6700_v7 = vmax.f32 %v11263_v44, 0.0 }
 0x226   :  { %16544 = vst [vmem:[#allocation45_spill] sm:$0xff] %v11290_v53  ;;  %v2014_v20 = vadd.f32 %v8103_v16, %v1885_v45  ;;  %v16097_v54 = vrot.slane %v11290_v53, 1  ;;  %v6765_v39 = vmax.f32 %v11271_v35, 0.0  ;;  %v3350_v36 = vsel %vm1182_vm0, %v16099_v22, %v3349_v62  ;;  %v7673_v35 = vld [vmem:[%s15935_s1 + $0x271] ss:$2 sm:$0xff] }
 0x227   :  { %v3352_v38 = vsel %vm1182_vm0, %v3349_v62, %v3351_v21  ;;  %v3354_v24 = vsel %vm1182_vm0, %v3351_v21, %v3353_v59  ;;  %v6764_v30 = vmax.f32 %v11274_v34, 0.0  ;;  %v3673_v37 = vadd.f32 %v3350_v36, %v2906_v32  ;;  %v7545_v32 = vld [vmem:[%s15935_s1 + $0x270] ss:$2 sm:$0xff] }
 0x228   :  { %v3356_v29 = vsel %vm1182_vm0, %v3353_v59, %v16097_v54  ;;  %v3674_v45 = vadd.f32 %v3352_v38, %v2907_v55  ;;  %v3675_v44 = vadd.f32 %v3354_v24, %v2908_v31  ;;  %v4185_v9 = vmax.f32 %v11248_v14, 0.0  ;;  %v7789_v14 = vld [vmem:[%s15935_s1 + $0x260] ss:$2 sm:$0xff] }
 0x229   :  { %v3676_v1 = vadd.f32 %v3356_v29, %v2909_v10  ;;  %v4186_v0 = vmax.f32 %v11251_v2, 0.0  ;;  %v3801_v3 = vadd.f32 %v3673_v37, %v8081_v6  ;;  %v4187_v18 = vmax.f32 %v11254_v47, 0.0  ;;  %v7790_v47 = vld [vmem:[%s15935_s1 + $0x261] ss:$2 sm:$0xff] }
 0x22a   :  { %v3802_v34 = vadd.f32 %v3674_v45, %v8081_v6  ;;  %v578_v2 = vmul.f32 %v7789_v14, %v7993_v26  ;;  %v3803_v4 = vadd.f32 %v3675_v44, %v8081_v6  ;;  %v579_v55 = vmul.f32 %v7545_v32, %v7993_v26 }
 0x22b   :  { %v3804_v60 = vadd.f32 %v3676_v1, %v8081_v6  ;;  %v707_v31 = vmul.f32 %v7790_v47, %v7981_v23  ;;  %v3929_v10 = vmul.f32 %v3801_v3, %v8100_v15  ;;  %v4188_v21 = vmax.f32 %v2014_v20, 0.0 }
 0x22c   :  { %v3930_v62 = vmul.f32 %v3802_v34, %v8100_v15  ;;  %v708_v59 = vmul.f32 %v7673_v35, %v7981_v23  ;;  %v3931_v36 = vmul.f32 %v3803_v4, %v8100_v15  ;;  %v965_v29 = vmul.f32 %v7545_v32, %v7995_v27 }
 0x22d   :  { %v3932_v38 = vmul.f32 %v3804_v60, %v8100_v15  ;;  %v835_v24 = vadd.f32 %v707_v31, %v578_v2  ;;  %v4057_v37 = vadd.f32 %v3929_v10, %v8103_v16  ;;  %v2119_v1 = vmul.f32 %v7790_v47, %v7993_v26  ;;  %v16547_v47 = vld [vmem:[#allocation11_spill] sm:$0xff] }
 0x22e   :  { %v4058_v45 = vadd.f32 %v3930_v62, %v8103_v16  ;;  %v836_v44 = vadd.f32 %v708_v59, %v579_v55  ;;  %v4059_v3 = vadd.f32 %v3931_v36, %v8103_v16  ;;  %v1260_v34 = vrot.slane %v965_v29, 1 }
 0x22f   :  { %v4060_v20 = vadd.f32 %v3932_v38, %v8103_v16  ;;  %v2120_v14 = vmul.f32 %v7673_v35, %v7993_v26  ;;  %v4313_v4 = vmax.f32 %v4057_v37, 0.0  ;;  %v2248_v2 = vmul.f32 %v7545_v32, %v7981_v23 }
 0x230   :  { %v4314_v54 = vmax.f32 %v4058_v45, 0.0  ;;  %v3015_v60 = vmul.f32 %v7673_v35, %v7995_v27  ;;  %v4315_v31 = vmax.f32 %v4059_v3, 0.0  ;;  %v16546_v62 = vrot.slane %v16545_v11, 1 }
 0x231   :  { %v4316_v10 = vmax.f32 %v4060_v20, 0.0  ;;  %v16548_v59 = vrot.slane %v16547_v47, 1  ;;  %v4441_v38 = vmax.f32 %v4185_v9, %v4313_v4  ;;  %v2542_v53 = vrot.slane %v2248_v2, 1  ;;  %v16549_v20 = vld [vmem:[#allocation53_spill] sm:$0xff]  ;;  %v16551_v9 = vld [vmem:[#allocation15_spill] sm:$0xff] }
 0x232   :  { %v1261_v55 = vsel %vm1182_vm0, %v16546_v62, %v1260_v34  ;;  %v4442_v29 = vmax.f32 %v4186_v0, %v4314_v54  ;;  %v4443_v37 = vmax.f32 %v4187_v18, %v4315_v31  ;;  %v3309_v32 = vrot.slane %v3015_v60, 1  ;;  %v7029_v62 = vpop.permute.xlu2 %7028 }
 0x233   :  { %v1263_v36 = vsel %vm1182_vm0, %v1260_v34, %v16548_v59  ;;  %v1604_v22 = vadd.f32 %v1261_v55, %v835_v24  ;;  %v4444_v45 = vmax.f32 %v4188_v21, %v4316_v10  ;;  %v6829_v42 = vmax.f32 %v6701_v52, %v6765_v39  ;;  %4570 = vst.msk [vmem:[#allocation2 + $0x1d0] sm:$0xff] %vm4511_vm1, %v4441_v38  ;;  %v16553_v21 = vld [vmem:[#allocation55_spill] sm:$0xff] }
 0x234   :  { %v1605_v49 = vadd.f32 %v1263_v36, %v836_v44  ;;  %v6828_v35 = vmax.f32 %v6700_v7, %v6764_v30  ;;  %4571 = vst.msk [vmem:[#allocation2 + $0x1d8] sm:$0xff] %vm4511_vm1, %v4442_v29  ;;  %v16550_v34 = vrot.slane %v16549_v20, 1  ;;  %v16552_v0 = vrot.slane %v16551_v9, 1  ;;  %v16555_v7 = vld [vmem:[#allocation17_spill] sm:$0xff]  ;;  %v7024_v30 = vpop.permute.xlu1 %7023  ;;  %v7019_v44 = vpop.permute.xlu0 %7018 }
 0x235   :  { %v1733_v11 = vadd.f32 %v8081_v6, %v1604_v22  ;;  %v16554_v24 = vrot.slane %v16553_v21, 1  ;;  %v16556_v39 = vrot.slane %v16555_v7, 1  ;;  %4572 = vst.msk [vmem:[#allocation2 + $0x1e0] sm:$0xff] %vm4511_vm1, %v4443_v37  ;;  %v11371_v31 = vadd.f32 %v11004_v33, %v8103_v16  ;;  %v7791_v21 = vld [vmem:[#allocation2 + $0x120] ss:$2 sm:$0xff] }
 0x236   :  { %v1734_v3 = vadd.f32 %v8081_v6, %v1605_v49  ;;  %v2543_v54 = vsel %vm1182_vm0, %v16550_v34, %v2542_v53  ;;  %v2545_v18 = vsel %vm1182_vm0, %v2542_v53, %v16552_v0  ;;  %v6705_v49 = vmax.f32 %v10991_v46, 0.0  ;;  %4573 = vst.msk [vmem:[#allocation2 + $0x1e8] sm:$0xff] %vm4511_vm1, %v4444_v45  ;;  %v11418_v34 = vld [vmem:[%s15935_s1 + $0x400] ss:$2 sm:$0xff] }
 0x237   :  { %v3310_v52 = vsel %vm1182_vm0, %v16554_v24, %v3309_v32  ;;  %v3312_v22 = vsel %vm1182_vm0, %v3309_v32, %v16556_v39  ;;  %v1862_v4 = vmul.f32 %v8100_v15, %v1733_v11  ;;  %v2886_v2 = vadd.f32 %v2543_v54, %v2119_v1  ;;  %v7792_v39 = vld [vmem:[#allocation2 + $0x121] ss:$2 sm:$0xff] }
 0x238   :  { %v2887_v60 = vadd.f32 %v2545_v18, %v2120_v14  ;;  %v6769_v53 = vmax.f32 %v10995_v48, 0.0  ;;  %v7350_v10 = vsel %vm4511_vm1, %v11155_v58, 0.0  ;;  %v1863_v46 = vmul.f32 %v8100_v15, %v1734_v3 }
 0x239   :  { %v11379_v55 = vadd.f32 %v11152_v5, %v8103_v16  ;;  %v7351_v1 = vadd.f32 %v7350_v10, %v11162_v63  ;;  %v3653_v14 = vadd.f32 %v3310_v52, %v2886_v2  ;;  %v5561_v33 = vmul.f32 %v11176_v40, %v8100_v15  ;;  %v11426_v52 = vld [vmem:[%s15935_s1 + $0x410] ss:$2 sm:$0xff] }
 0x23a   :  { %v3654_v48 = vadd.f32 %v3312_v22, %v2887_v60  ;;  %v6519_v47 = vadd.f32 %v11184_v43, %v8081_v6  ;;  %v7277_v58 = vmul.f32 %v7024_v30, %v6829_v42  ;;  %v7276_v59 = vmul.f32 %v7019_v44, %v6828_v35  ;;  %v11437_v30 = vld [vmem:[%s15935_s1 + $0x411] ss:$2 sm:$0xff] }
 0x23b   :  { %v7352_v36 = vsel %vm4511_vm1, %v10979_v50, 0.0  ;;  %v1991_v38 = vadd.f32 %v8103_v16, %v1862_v4  ;;  %v3781_v5 = vadd.f32 %v3653_v14, %v8081_v6  ;;  %v11392_v63 = vmul.f32 %v7029_v62, %v10987_v17  ;;  %v4699_v20 = vld [vmem:[#allocation2 + $0x1d0] ss:$2 sm:$0xff]  ;;  %v4827_v2 = vld [vmem:[#allocation2 + $0x1d1] ss:$2 sm:$0xff] }
 0x23c   :  { %v3782_v29 = vadd.f32 %v3654_v48, %v8081_v6  ;;  %v11394_v37 = vmax.f32 %v6705_v49, %v6769_v53  ;;  %v1992_v43 = vadd.f32 %v8103_v16, %v1863_v46  ;;  %v11399_v45 = vadd.f32 %v7352_v36, %v7351_v1  ;;  %v11432_v49 = vld [vmem:[%s15935_s1 + $0x401] ss:$2 sm:$0xff]  ;;  %v11458_v14 = vld [vmem:[%s15935_s1 + $0x420] ss:$2 sm:$0xff] }
 0x23d   :  { %v3909_v50 = vmul.f32 %v3781_v5, %v8100_v15  ;;  %v11404_v35 = vadd.f32 %v5561_v33, %v8103_v16  ;;  %v11407_v17 = vmul.f32 %v6519_v47, %v8100_v15  ;;  %v11410_v11 = vsel %vm4511_vm1, %v7277_v58, 0.0  ;;  %v4701_v54 = vld [vmem:[#allocation2 + $0x1e0] ss:$2 sm:$0xff]  ;;  %v11469_v58 = vld [vmem:[%s15935_s1 + $0x430] ss:$2 sm:$0xff] }
 0x23e   :  { %v3910_v32 = vmul.f32 %v3782_v29, %v8100_v15  ;;  %v11413_v3 = vsel %vm4511_vm1, %v7276_v59, 0.0  ;;  %v4165_v18 = vmax.f32 %v1991_v38, 0.0  ;;  %v4914_v24 = vmul.f32 %v7791_v21, %v7993_v26  ;;  %v4829_v5 = vld [vmem:[#allocation2 + $0x1e1] ss:$2 sm:$0xff]  ;;  %v11498_v21 = vld [vmem:[%s15935_s1 + $0x431] ss:$2 sm:$0xff] }
 0x23f   :  { %v4037_v9 = vadd.f32 %v3909_v50, %v8103_v16  ;;  %v4166_v7 = vmax.f32 %v1992_v43, 0.0  ;;  %v4978_v22 = vmul.f32 %v7792_v39, %v7981_v23  ;;  %v604_v44 = vmul.f32 %v11418_v34, %v7993_v26 }
 0x240   :  { %v4038_v0 = vadd.f32 %v3910_v32, %v8103_v16  ;;  %v605_v4 = vmul.f32 %v11426_v52, %v7993_v26  ;;  %v11444_v60 = vmul.f32 %v4699_v20, %v7995_v27  ;;  %v11447_v53 = vmul.f32 %v4701_v54, %v7995_v27  ;;  %v11482_v32 = vld [vmem:[%s15935_s1 + $0x440] ss:$2 sm:$0xff] }
 0x241   :  { %v11450_v10 = vmul.f32 %v4699_v20, %v7981_v23  ;;  %v4293_v46 = vmax.f32 %v4037_v9, 0.0  ;;  %v11453_v62 = vmul.f32 %v4701_v54, %v7981_v23  ;;  %v11462_v48 = vmul.f32 %v11418_v34, %v7995_v27  ;;  %v11487_v54 = vld [vmem:[%s15935_s1 + $0x421] ss:$2 sm:$0xff] }
 0x242   :  { %16557 = vst [vmem:[#allocation54_spill] sm:$0xff] %v11444_v60  ;;  %v4294_v1 = vmax.f32 %v4038_v0, 0.0  ;;  %v991_v33 = vmul.f32 %v11426_v52, %v7995_v27  ;;  %v606_v59 = vmul.f32 %v11458_v14, %v7993_v26  ;;  %v733_v36 = vmul.f32 %v11432_v49, %v7981_v23  ;;  %v6940_v0 = vld [vmem:[%s15936_s2 + $0x1f8] sm:$0x3f] }
 0x243   :  { %16558 = vst [vmem:[#allocation9_spill] sm:$0xff] %v11447_v53  ;;  %v4421_v47 = vmax.f32 %v4165_v18, %v4293_v46  ;;  %v734_v38 = vmul.f32 %v11437_v30, %v7981_v23  ;;  %v4925_v29 = vmul.f32 %v4699_v20, %v7993_v26  ;;  %v4989_v43 = vmul.f32 %v4827_v2, %v7981_v23 }
 0x244   :  { %16559 = vst [vmem:[#allocation49_spill] sm:$0xff] %v11450_v10  ;;  %v4422_v50 = vmax.f32 %v4166_v7, %v4294_v1  ;;  %v992_v9 = vmul.f32 %v11458_v14, %v7995_v27  ;;  %v993_v7 = vmul.f32 %v11469_v58, %v7995_v27  ;;  %v11506_v1 = vmul.f32 %v11482_v32, %v7995_v27 }
 0x245   :  { %16560 = vst [vmem:[#allocation10_spill] sm:$0xff] %v11453_v62  ;;  %v1312_v42 = vrot.slane %v991_v33, 1  ;;  %v11513_v18 = vmul.f32 %v4829_v5, %v7995_v27  ;;  %v5053_v20 = vadd.f32 %v4989_v43, %v4925_v29  ;;  %7258 = vperm.xlu0 %7766, %v6940_v0   ;;  %v735_v40 = vmul.f32 %v11487_v54, %v7981_v23 }
 0x246   :  { %16561 = vst [vmem:[#allocation56_spill] sm:$0xff] %v11462_v48  ;;  %v1314_v46 = vrot.slane %v992_v9, 1  ;;  %v736_v33 = vmul.f32 %v11498_v21, %v7981_v23  ;;  %v861_v8 = vadd.f32 %v733_v36, %v604_v44  ;;  %v16565_v5 = vrot.slane %v11447_v53, 1 }
 0x247   :  { %4550 = vst.msk [vmem:[#allocation2 + $0x130] sm:$0xff] %vm4511_vm1, %v4421_v47  ;;  %v11510_v47 = vmul.f32 %v4827_v2, %v7995_v27  ;;  %v16566_v51 = vrot.slane %v11444_v60, 1  ;;  %v5692_v25 = vmul.f32 %v4827_v2, %v7993_v26  ;;  %v1316_v57 = vrot.slane %v993_v7, 1 }
 0x248   :  { %4551 = vst.msk [vmem:[#allocation2 + $0x138] sm:$0xff] %vm4511_vm1, %v4422_v50  ;;  %v607_v50 = vmul.f32 %v11469_v58, %v7993_v26  ;;  %v11533_v29 = vadd.f32 %v11413_v3, %v11399_v45  ;;  %v16567_v43 = vrot.slane %v11453_v62, 1  ;;  %v16568_v0 = vrot.slane %v11450_v10, 1 }
 0x249   :  { %16562 = vst [vmem:[#allocation50_spill] sm:$0xff] %v11506_v1  ;;  %v5276_v56 = vsel %vm1182_vm0, %v16566_v51, %v16565_v5  ;;  %v862_v36 = vadd.f32 %v734_v38, %v605_v4  ;;  %v16569_v53 = vrot.slane %v11462_v48, 1  ;;  %v16112_v7 = vrot.slane %v11513_v18, 1 }
 0x24a   :  { %16563 = vst [vmem:[#allocation51_spill] sm:$0xff] %v11510_v47  ;;  %v5915_v44 = vsel %vm1182_vm0, %v16568_v0, %v16567_v43  ;;  %v5042_v5 = vadd.f32 %v4978_v22, %v4914_v24  ;;  %v1315_v9 = vsel %vm1182_vm0, %v1312_v42, %v1314_v46  ;;  %v11546_v45 = vadd.f32 %v5276_v56, %v5053_v20 }
 0x24b   :  { %16564 = vst [vmem:[#allocation34_spill] sm:$0xff] %v11513_v18  ;;  %v1313_v51 = vsel %vm1182_vm0, %v16569_v53, %v1312_v42  ;;  %v5681_v3 = vmul.f32 %v7792_v39, %v7993_v26  ;;  %v863_v62 = vadd.f32 %v735_v40, %v606_v59  ;;  %v864_v10 = vadd.f32 %v736_v33, %v607_v50 }
 0x24c   :  { %v11549_v60 = vadd.f32 %v5915_v44, %v5692_v25  ;;  %v1317_v43 = vsel %vm1182_vm0, %v1314_v46, %v1316_v57  ;;  %v16570_v53 = vrot.slane %v11506_v1, 1  ;;  %v1630_v2 = vadd.f32 %v1313_v51, %v861_v8 }
 0x24d   :  { %v1631_v39 = vadd.f32 %v1315_v9, %v862_v36  ;;  %v16571_v25 = vrot.slane %v11510_v47, 1  ;;  %v1632_v50 = vadd.f32 %v1317_v43, %v863_v62  ;;  %v16572_v51 = vrot.slane %v10313_v28, 1 }
 0x24e   :  { %v1319_v0 = vsel %vm1182_vm0, %v1316_v57, %v16570_v53  ;;  %v2145_v57 = vmul.f32 %v11432_v49, %v7993_v26  ;;  %v1759_v36 = vadd.f32 %v8081_v6, %v1630_v2  ;;  %v16575_v62 = vrot.slane %v10291_v19, 1 }
 0x24f   :  { %v4679_v4 = vld [vmem:[#allocation2 + $0x130] ss:$2 sm:$0xff]  ;;  %v4807_v38 = vld [vmem:[#allocation2 + $0x131] ss:$2 sm:$0xff]  ;;  %v11563_v40 = vsel %vm1182_vm0, %v16571_v25, %v16112_v7  ;;  %v1633_v44 = vadd.f32 %v1319_v0, %v864_v10  ;;  %v1760_v1 = vadd.f32 %v8081_v6, %v1631_v39  ;;  %v16576_v2 = vrot.slane %v10319_v41, 1 }
 0x250   :  { %v4915_v24 = vmul.f32 %v4679_v4, %v7993_v26  ;;  %v4979_v56 = vmul.f32 %v4807_v38, %v7981_v23  ;;  %v5107_v42 = vmul.f32 %v4679_v4, %v7995_v27  ;;  %v5746_v22 = vmul.f32 %v4679_v4, %v7981_v23  ;;  %v16573_v4 = vld [vmem:[#allocation12_spill] sm:$0xff] }
 0x251   :  { %v6129_v59 = vmul.f32 %v4807_v38, %v7995_v27  ;;  %v5682_v46 = vmul.f32 %v4807_v38, %v7993_v26  ;;  %v16574_v25 = vrot.slane %v16573_v4, 1  ;;  %v11588_v43 = vmul.f32 %v11418_v34, %v7981_v23 }
 0x252   :  { %v5043_v8 = vadd.f32 %v4979_v56, %v4915_v24  ;;  %v5253_v20 = vrot.slane %v5107_v42, 1  ;;  %v5892_v33 = vrot.slane %v5746_v22, 1  ;;  %v2146_v24 = vmul.f32 %v11437_v30, %v7993_v26  ;;  %v16578_v42 = vld [vmem:[#allocation14_spill] sm:$0xff] }
 0x253   :  { %v6275_v9 = vrot.slane %v6129_v59, 1  ;;  %16577 = vst [vmem:[#allocation11_spill] sm:$0xff] %v11588_v43  ;;  %v16579_v39 = vrot.slane %v16578_v42, 1  ;;  %v16580_v59 = vld [vmem:[#allocation57_spill] sm:$0xff]  ;;  %v1762_v41 = vadd.f32 %v8081_v6, %v1633_v44 }
 0x254   :  { %v5256_v53 = vsel %vm1182_vm0, %v5253_v20, %v16572_v51  ;;  %v5254_v7 = vsel %vm1182_vm0, %v16574_v25, %v5253_v20  ;;  %v5895_v10 = vsel %vm1182_vm0, %v5892_v33, %v16575_v62  ;;  %v1761_v51 = vadd.f32 %v8081_v6, %v1632_v50 }
 0x255   :  { %v5426_v38 = vadd.f32 %v5256_v53, %v5043_v8  ;;  %v6278_v28 = vsel %vm1182_vm0, %v6275_v9, %v16576_v2  ;;  %v6065_v0 = vadd.f32 %v5895_v10, %v5682_v46  ;;  %v5425_v56 = vadd.f32 %v5254_v7, %v5042_v5 }
 0x256   :  { %v5893_v22 = vsel %vm1182_vm0, %v16579_v39, %v5892_v33  ;;  %v16581_v8 = vrot.slane %v16580_v59, 1  ;;  %v1888_v53 = vmul.f32 %v8100_v15, %v1759_v36  ;;  %v2274_v7 = vmul.f32 %v11426_v52, %v7981_v23  ;;  %v7702_v39 = vld [vmem:[%s15935_s1 + $0x441] ss:$2 sm:$0xff] }
 0x257   :  { %v6064_v20 = vadd.f32 %v5893_v22, %v5681_v3  ;;  %v6448_v4 = vadd.f32 %v6278_v28, %v6065_v0  ;;  %v5489_v34 = vadd.f32 %v5425_v56, %v8081_v6  ;;  %v2275_v5 = vmul.f32 %v11458_v14, %v7981_v23 }
 0x258   :  { %v6276_v19 = vsel %vm1182_vm0, %v16581_v8, %v6275_v9  ;;  %v1889_v33 = vmul.f32 %v8100_v15, %v1760_v1  ;;  %v2276_v3 = vmul.f32 %v11469_v58, %v7981_v23  ;;  %v11609_v50 = vmul.f32 %v11482_v32, %v7981_v23 }
 0x259   :  { %v6447_v46 = vadd.f32 %v6276_v19, %v6064_v20  ;;  %v5490_v9 = vadd.f32 %v5426_v38, %v8081_v6  ;;  %v6512_v44 = vadd.f32 %v6448_v4, %v8081_v6  ;;  %v16117_v36 = vrot.slane %v11588_v43, 1 }
 0x25a   :  { %16582 = vst [vmem:[#allocation53_spill] sm:$0xff] %v11609_v50  ;;  %v2594_v52 = vrot.slane %v2274_v7, 1  ;;  %v5553_v25 = vmul.f32 %v5489_v34, %v8100_v15  ;;  %v2596_v62 = vrot.slane %v2275_v5, 1  ;;  %v2598_v1 = vrot.slane %v2276_v3, 1 }
 0x25b   :  { %v6511_v14 = vadd.f32 %v6447_v46, %v8081_v6  ;;  %v2147_v58 = vmul.f32 %v11487_v54, %v7993_v26  ;;  %v2148_v32 = vmul.f32 %v11498_v21, %v7993_v26  ;;  %v16115_v10 = vrot.slane %v11609_v50, 1 }
 0x25c   :  { %v2595_v38 = vsel %vm1182_vm0, %v16117_v36, %v2594_v52  ;;  %v1890_v28 = vmul.f32 %v8100_v15, %v1761_v51  ;;  %v1891_v0 = vmul.f32 %v8100_v15, %v1762_v41  ;;  %v11628_v56 = vadd.f32 %v8103_v16, %v1888_v53 }
 0x25d   :  { %v6575_v2 = vmul.f32 %v6511_v14, %v8100_v15  ;;  %v5554_v42 = vmul.f32 %v5490_v9, %v8100_v15  ;;  %v11635_v22 = vadd.f32 %v8103_v16, %v1889_v33  ;;  %v2597_v59 = vsel %vm1182_vm0, %v2594_v52, %v2596_v62 }
 0x25e   :  { %v2599_v8 = vsel %vm1182_vm0, %v2596_v62, %v2598_v1  ;;  %v6576_v19 = vmul.f32 %v6512_v44, %v8100_v15  ;;  %v11641_v20 = vadd.f32 %v5553_v25, %v8103_v16  ;;  %v2601_v51 = vsel %vm1182_vm0, %v2598_v1, %v16115_v10 }
 0x25f   :  { %v2912_v41 = vadd.f32 %v2595_v38, %v2145_v57  ;;  %v11647_v53 = vadd.f32 %v6575_v2, %v8103_v16  ;;  %v11651_v4 = vmul.f32 %v11432_v49, %v7995_v27  ;;  %v3041_v34 = vmul.f32 %v11437_v30, %v7995_v27 }
 0x260   :  { %v3042_v7 = vmul.f32 %v11487_v54, %v7995_v27  ;;  %v2913_v5 = vadd.f32 %v2597_v59, %v2146_v24  ;;  %v2914_v46 = vadd.f32 %v2599_v8, %v2147_v58  ;;  %v3043_v33 = vmul.f32 %v11498_v21, %v7995_v27 }
 0x261   :  { %16583 = vst [vmem:[#allocation15_spill] sm:$0xff] %v11651_v4  ;;  %v11660_v57 = vmul.f32 %v7702_v39, %v7995_v27  ;;  %v2915_v3 = vadd.f32 %v2601_v51, %v2148_v32  ;;  %v16116_v9 = vrot.slane %v11651_v4, 1  ;;  %v3361_v44 = vrot.slane %v3041_v34, 1  ;;  %v7679_v39 = vld [vmem:[%s15935_s1 + $0x2d1] ss:$2 sm:$0xff] }
 0x262   :  { %v3363_v49 = vrot.slane %v3042_v7, 1  ;;  %v2019_v52 = vadd.f32 %v8103_v16, %v1890_v28  ;;  %v2020_v30 = vadd.f32 %v8103_v16, %v1891_v0  ;;  %v3365_v25 = vrot.slane %v3043_v33, 1 }
 0x263   :  { %16584 = vst [vmem:[#allocation55_spill] sm:$0xff] %v11660_v57  ;;  %v16114_v54 = vrot.slane %v11660_v57, 1  ;;  %v11667_v24 = vadd.f32 %v5554_v42, %v8103_v16  ;;  %v11670_v21 = vadd.f32 %v6576_v19, %v8103_v16  ;;  %v3362_v14 = vsel %vm1182_vm0, %v16116_v9, %v3361_v44 }
 0x264   :  { %v3364_v62 = vsel %vm1182_vm0, %v3361_v44, %v3363_v49  ;;  %v6703_v1 = vmax.f32 %v11641_v20, 0.0  ;;  %v3366_v58 = vsel %vm1182_vm0, %v3363_v49, %v3365_v25  ;;  %v3679_v38 = vadd.f32 %v3362_v14, %v2912_v41  ;;  %v7793_v20 = vld [vmem:[%s15935_s1 + $0x2c0] ss:$2 sm:$0xff] }
 0x265   :  { %v3368_v32 = vsel %vm1182_vm0, %v3365_v25, %v16114_v54  ;;  %v6767_v2 = vmax.f32 %v11647_v53, 0.0  ;;  %v3680_v28 = vadd.f32 %v3364_v62, %v2913_v5  ;;  %v3681_v0 = vadd.f32 %v3366_v58, %v2914_v46  ;;  %v7551_v5 = vld [vmem:[%s15935_s1 + $0x2d0] ss:$2 sm:$0xff]  ;;  %v7794_v46 = vld [vmem:[%s15935_s1 + $0x2c1] ss:$2 sm:$0xff] }
 0x266   :  { %v3682_v42 = vadd.f32 %v3368_v32, %v2915_v3  ;;  %v3807_v59 = vadd.f32 %v3679_v38, %v8081_v6  ;;  %v4191_v8 = vmax.f32 %v11628_v56, 0.0  ;;  %v4192_v19 = vmax.f32 %v11635_v22, 0.0 }
 0x267   :  { %v584_v51 = vmul.f32 %v7793_v20, %v7993_v26  ;;  %v3808_v41 = vadd.f32 %v3680_v28, %v8081_v6  ;;  %v3809_v53 = vadd.f32 %v3681_v0, %v8081_v6  ;;  %v4193_v7 = vmax.f32 %v2019_v52, 0.0 }
 0x268   :  { %v3810_v34 = vadd.f32 %v3682_v42, %v8081_v6  ;;  %v3935_v56 = vmul.f32 %v3807_v59, %v8100_v15  ;;  %v585_v22 = vmul.f32 %v7551_v5, %v7993_v26  ;;  %v713_v33 = vmul.f32 %v7794_v46, %v7981_v23 }
 0x269   :  { %v714_v3 = vmul.f32 %v7679_v39, %v7981_v23  ;;  %v3936_v44 = vmul.f32 %v3808_v41, %v8100_v15  ;;  %v3937_v49 = vmul.f32 %v3809_v53, %v8100_v15  ;;  %v4194_v25 = vmax.f32 %v2020_v30, 0.0 }
 0x26a   :  { %v3938_v52 = vmul.f32 %v3810_v34, %v8100_v15  ;;  %v4063_v14 = vadd.f32 %v3935_v56, %v8103_v16  ;;  %v841_v62 = vadd.f32 %v713_v33, %v584_v51  ;;  %v971_v32 = vmul.f32 %v7551_v5, %v7995_v27  ;;  %v16585_v33 = vld [vmem:[#allocation18_spill] sm:$0xff] }
 0x26b   :  { %v842_v58 = vadd.f32 %v714_v3, %v585_v22  ;;  %v4064_v38 = vadd.f32 %v3936_v44, %v8103_v16  ;;  %v4065_v28 = vadd.f32 %v3937_v49, %v8103_v16  ;;  %v2125_v42 = vmul.f32 %v7794_v46, %v7993_v26  ;;  %v16587_v49 = vld [vmem:[#allocation31_spill] sm:$0xff] }
 0x26c   :  { %v4066_v0 = vadd.f32 %v3938_v52, %v8103_v16  ;;  %v4319_v59 = vmax.f32 %v4063_v14, 0.0  ;;  %v1272_v20 = vrot.slane %v971_v32, 1  ;;  %v2126_v41 = vmul.f32 %v7679_v39, %v7993_v26 }
 0x26d   :  { %v2254_v30 = vmul.f32 %v7551_v5, %v7981_v23  ;;  %v4320_v53 = vmax.f32 %v4064_v38, 0.0  ;;  %v4321_v34 = vmax.f32 %v4065_v28, 0.0  ;;  %v3021_v56 = vmul.f32 %v7679_v39, %v7995_v27  ;;  %v16589_v38 = vld [vmem:[#allocation26_spill] sm:$0xff] }
 0x26e   :  { %v4322_v51 = vmax.f32 %v4066_v0, 0.0  ;;  %v4447_v22 = vmax.f32 %v4191_v8, %v4319_v59  ;;  %v16586_v3 = vrot.slane %v16585_v33, 1  ;;  %v16588_v52 = vrot.slane %v16587_v49, 1  ;;  %v16591_v8 = vld [vmem:[#allocation23_spill] sm:$0xff] }
 0x26f   :  { %v2554_v14 = vrot.slane %v2254_v30, 1  ;;  %v4448_v32 = vmax.f32 %v4192_v19, %v4320_v53  ;;  %v4449_v54 = vmax.f32 %v4193_v7, %v4321_v34  ;;  %v16590_v28 = vrot.slane %v16589_v38, 1  ;;  %v16593_v30 = vld [vmem:[#allocation20_spill] sm:$0xff] }
 0x270   :  { %v1273_v44 = vsel %vm1182_vm0, %v16586_v3, %v1272_v20  ;;  %v1275_v46 = vsel %vm1182_vm0, %v1272_v20, %v16588_v52  ;;  %v4450_v10 = vmax.f32 %v4194_v25, %v4322_v51  ;;  %4576 = vst.msk [vmem:[#allocation2 + $0x200] sm:$0xff] %vm4511_vm1, %v4447_v22  ;;  %v16592_v0 = vrot.slane %v16591_v8, 1  ;;  %v16595_v51 = vld [vmem:[#allocation27_spill] sm:$0xff]  ;;  %v11796_v8 = vld [vmem:[%s15935_s1 + $0x480] ss:$2 sm:$0xff] }
 0x271   :  { %v1610_v9 = vadd.f32 %v1273_v44, %v841_v62  ;;  %v1611_v5 = vadd.f32 %v1275_v46, %v842_v58  ;;  %v2555_v39 = vsel %vm1182_vm0, %v16590_v28, %v2554_v14  ;;  %v3321_v33 = vrot.slane %v3021_v56, 1  ;;  %4577 = vst.msk [vmem:[#allocation2 + $0x208] sm:$0xff] %vm4511_vm1, %v4448_v32  ;;  %v7034_v58 = vpop.permute.xlu0 %7033  ;;  %v7044_v56 = vpop.permute.xlu2 %7043 }
 0x272   :  { %v2557_v59 = vsel %vm1182_vm0, %v2554_v14, %v16592_v0  ;;  %v6831_v3 = vmax.f32 %v6703_v1, %v6767_v2  ;;  %v2892_v7 = vadd.f32 %v2555_v39, %v2125_v42  ;;  %v7357_v62 = vadd.f32 %v11410_v11, %v11533_v29  ;;  %4578 = vst.msk [vmem:[#allocation2 + $0x210] sm:$0xff] %vm4511_vm1, %v4449_v54  ;;  %v11791_v39 = vld [vmem:[%s15935_s1 + $0x470] ss:$2 sm:$0xff]  ;;  %v11801_v0 = vld [vmem:[%s15935_s1 + $0x461] ss:$2 sm:$0xff] }
 0x273   :  { %v1739_v19 = vadd.f32 %v8081_v6, %v1610_v9  ;;  %v2893_v25 = vadd.f32 %v2557_v59, %v2126_v41  ;;  %v1740_v20 = vadd.f32 %v8081_v6, %v1611_v5  ;;  %v16594_v53 = vrot.slane %v16593_v30, 1  ;;  %4579 = vst.msk [vmem:[#allocation2 + $0x218] sm:$0xff] %vm4511_vm1, %v4450_v10 }
 0x274   :  { %v16596_v1 = vrot.slane %v16595_v51, 1  ;;  %v5500_v9 = vadd.f32 %v11546_v45, %v8081_v6  ;;  %v6458_v42 = vadd.f32 %v11563_v40, %v11549_v60  ;;  %v6704_v41 = vmax.f32 %v11667_v24, 0.0  ;;  %v11827_v51 = vld [vmem:[%s15935_s1 + $0x481] ss:$2 sm:$0xff] }
 0x275   :  { %v3322_v34 = vsel %vm1182_vm0, %v16594_v53, %v3321_v33  ;;  %v1868_v11 = vmul.f32 %v8100_v15, %v1739_v19  ;;  %v6768_v22 = vmax.f32 %v11670_v21, 0.0  ;;  %v1869_v44 = vmul.f32 %v8100_v15, %v1740_v20 }
 0x276   :  { %v3324_v2 = vsel %vm1182_vm0, %v3321_v33, %v16596_v1  ;;  %v3659_v29 = vadd.f32 %v3322_v34, %v2892_v7  ;;  %v7358_v49 = vsel %vm4511_vm1, %v11392_v63, 0.0  ;;  %v7279_v52 = vmul.f32 %v7034_v58, %v6831_v3  ;;  %v7795_v3 = vld [vmem:[#allocation2 + $0x150] ss:$2 sm:$0xff]  ;;  %v11809_v7 = vld [vmem:[#allocation2 + $0x151] ss:$2 sm:$0xff] }
 0x277   :  { %v3660_v54 = vadd.f32 %v3324_v2, %v2893_v25  ;;  %v11756_v46 = vmul.f32 %v7044_v56, %v11394_v37  ;;  %v16597_v14 = vmax.f32 %v11379_v55, 0.0  ;;  %v16598_v60 = vmax.f32 %v11371_v31, 0.0  ;;  %v11776_v31 = vld [vmem:[%s15935_s1 + $0x460] ss:$2 sm:$0xff] }
 0x278   :  { %v3787_v45 = vadd.f32 %v3659_v29, %v8081_v6  ;;  %v11766_v24 = vadd.f32 %v11407_v17, %v8103_v16  ;;  %v1997_v63 = vadd.f32 %v8103_v16, %v1868_v11  ;;  %v1998_v32 = vadd.f32 %v8103_v16, %v1869_v44  ;;  %v4705_v33 = vld [vmem:[#allocation2 + $0x200] ss:$2 sm:$0xff]  ;;  %v4833_v2 = vld [vmem:[#allocation2 + $0x201] ss:$2 sm:$0xff]  ;;  %v11840_v29 = vld [vmem:[%s15935_s1 + $0x490] ss:$2 sm:$0xff] }
 0x279   :  { %v3788_v10 = vadd.f32 %v3660_v54, %v8081_v6  ;;  %v11762_v40 = vmax.f32 %v16598_v60, %v16597_v14  ;;  %v11779_v55 = vmul.f32 %v5500_v9, %v8100_v15  ;;  %v11782_v17 = vadd.f32 %v6458_v42, %v8081_v6 }
 0x27a   :  { %v3915_v5 = vmul.f32 %v3787_v45, %v8100_v15  ;;  %v11784_v38 = vmax.f32 %v6704_v41, %v6768_v22  ;;  %v11786_v28 = vadd.f32 %v7358_v49, %v7357_v62  ;;  %v11804_v59 = vsel %vm4511_vm1, %v7279_v52, 0.0  ;;  %v11818_v62 = vld [vmem:[%s15935_s1 + $0x471] ss:$2 sm:$0xff]  ;;  %v4707_v20 = vld [vmem:[#allocation2 + $0x210] ss:$2 sm:$0xff] }
 0x27b   :  { %v3916_v37 = vmul.f32 %v3788_v10, %v8100_v15  ;;  %v11807_v19 = vmul.f32 %v7795_v3, %v7993_v26  ;;  %v11813_v25 = vmul.f32 %v11809_v7, %v7981_v23  ;;  %v610_v58 = vmul.f32 %v11776_v31, %v7993_v26  ;;  %v4835_v49 = vld [vmem:[#allocation2 + $0x211] ss:$2 sm:$0xff] }
 0x27c   :  { %v4043_v30 = vadd.f32 %v3915_v5, %v8103_v16  ;;  %v4171_v34 = vmax.f32 %v1997_v63, 0.0  ;;  %v611_v1 = vmul.f32 %v11791_v39, %v7993_v26  ;;  %v11832_v56 = vmul.f32 %v4705_v33, %v7995_v27 }
 0x27d   :  { %v4044_v53 = vadd.f32 %v3916_v37, %v8103_v16  ;;  %v11835_v9 = vmul.f32 %v4707_v20, %v7995_v27  ;;  %v4172_v11 = vmax.f32 %v1998_v32, 0.0  ;;  %v612_v54 = vmul.f32 %v11796_v8, %v7993_v26 }
 0x27e   :  { %v11845_v42 = vmul.f32 %v4705_v33, %v7981_v23  ;;  %v11848_v41 = vmul.f32 %v4707_v20, %v7981_v23  ;;  %v4299_v22 = vmax.f32 %v4043_v30, 0.0  ;;  %v613_v44 = vmul.f32 %v11840_v29, %v7993_v26  ;;  %v11868_v30 = vld [vmem:[%s15935_s1 + $0x491] ss:$2 sm:$0xff] }
 0x27f   :  { %16599 = vst [vmem:[#allocation17_spill] sm:$0xff] %v11835_v9  ;;  %v4300_v52 = vmax.f32 %v4044_v53, 0.0  ;;  %v739_v45 = vmul.f32 %v11801_v0, %v7981_v23  ;;  %v740_v10 = vmul.f32 %v11818_v62, %v7981_v23  ;;  %v741_v14 = vmul.f32 %v11827_v51, %v7981_v23 }
 0x280   :  { %16600 = vst [vmem:[#allocation12_spill] sm:$0xff] %v11848_v41  ;;  %v4928_v60 = vmul.f32 %v4705_v33, %v7993_v26  ;;  %v4992_v63 = vmul.f32 %v4833_v2, %v7981_v23  ;;  %v11861_v32 = vmul.f32 %v4833_v2, %v7995_v27  ;;  %v4427_v5 = vmax.f32 %v4171_v34, %v4299_v22  ;;  %v7039_v33 = vpop.permute.xlu1 %7038 }
 0x281   :  { %v4428_v20 = vmax.f32 %v4172_v11, %v4300_v52  ;;  %v11872_v53 = vmul.f32 %v11776_v31, %v7995_v27  ;;  %v11877_v34 = vmul.f32 %v4835_v49, %v7995_v27  ;;  %v11883_v11 = vld [vmem:[%s15935_s1 + $0x4a0] ss:$2 sm:$0xff]  ;;  %v997_v22 = vmul.f32 %v11791_v39, %v7995_v27 }
 0x282   :  { %4556 = vst.msk [vmem:[#allocation2 + $0x160] sm:$0xff] %vm4511_vm1, %v4427_v5  ;;  %v998_v52 = vmul.f32 %v11796_v8, %v7995_v27  ;;  %v999_v21 = vmul.f32 %v11840_v29, %v7995_v27  ;;  %v11894_v49 = vmul.f32 %v11883_v11, %v7995_v27  ;;  %v5056_v36 = vadd.f32 %v4992_v63, %v4928_v60 }
 0x283   :  { %16601 = vst [vmem:[#allocation14_spill] sm:$0xff] %v11872_v53  ;;  %v742_v37 = vmul.f32 %v11868_v30, %v7981_v23  ;;  %v867_v3 = vadd.f32 %v739_v45, %v610_v58  ;;  %v1324_v57 = vrot.slane %v997_v22, 1  ;;  %v16605_v50 = vrot.slane %v11832_v56, 1 }
 0x284   :  { %16602 = vst [vmem:[#allocation57_spill] sm:$0xff] %v11877_v34  ;;  %v5695_v4 = vmul.f32 %v4833_v2, %v7993_v26  ;;  %v1326_v43 = vrot.slane %v998_v52, 1  ;;  %v1328_v48 = vrot.slane %v999_v21, 1  ;;  %v16606_v47 = vrot.slane %v11848_v41, 1 }
 0x285   :  { %4557 = vst.msk [vmem:[#allocation2 + $0x168] sm:$0xff] %vm4511_vm1, %v4428_v20  ;;  %v16604_v20 = vrot.slane %v11835_v9, 1  ;;  %v16607_v5 = vrot.slane %v11845_v42, 1  ;;  %v16125_v58 = vrot.slane %v11877_v34, 1  ;;  %v11915_v22 = vmul.f32 %v11782_v17, %v8100_v15 }
 0x286   :  { %16603 = vst [vmem:[#allocation18_spill] sm:$0xff] %v11894_v49  ;;  %v868_v21 = vadd.f32 %v740_v10, %v611_v1  ;;  %v16608_v2 = vrot.slane %v11872_v53, 1  ;;  %v1327_v45 = vsel %vm1182_vm0, %v1324_v57, %v1326_v43  ;;  %v5045_v17 = vadd.f32 %v11813_v25, %v11807_v19 }
 0x287   :  { %v5282_v18 = vsel %vm1182_vm0, %v16605_v50, %v16604_v20  ;;  %v5921_v60 = vsel %vm1182_vm0, %v16607_v5, %v16606_v47  ;;  %v11918_v50 = vmul.f32 %v7039_v33, %v11784_v38  ;;  %v11925_v47 = vadd.f32 %v11804_v59, %v11786_v28 }
 0x288   :  { %v1325_v52 = vsel %vm1182_vm0, %v16608_v2, %v1324_v57  ;;  %v5439_v5 = vadd.f32 %v5282_v18, %v5056_v36  ;;  %v869_v20 = vadd.f32 %v741_v14, %v612_v54  ;;  %v6078_v63 = vadd.f32 %v5921_v60, %v5695_v4 }
 0x289   :  { %v5684_v38 = vmul.f32 %v11809_v7, %v7993_v26  ;;  %v1329_v1 = vsel %vm1182_vm0, %v1326_v43, %v1328_v48  ;;  %v16609_v10 = vrot.slane %v11861_v32, 1  ;;  %v870_v36 = vadd.f32 %v742_v37, %v613_v44 }
 0x28a   :  { %v16610_v57 = vrot.slane %v11894_v49, 1  ;;  %v1636_v54 = vadd.f32 %v1325_v52, %v867_v3  ;;  %v1637_v25 = vadd.f32 %v1327_v45, %v868_v21  ;;  %v11945_v14 = vadd.f32 %v5439_v5, %v8081_v6 }
 0x28b   :  { %v6304_v28 = vsel %vm1182_vm0, %v16609_v10, %v16125_v58  ;;  %v1638_v44 = vadd.f32 %v1329_v1, %v869_v20  ;;  %v2151_v45 = vmul.f32 %v11801_v0, %v7993_v26  ;;  %v16611_v21 = vrot.slane %v10674_v13, 1 }
 0x28c   :  { %v4685_v59 = vld [vmem:[#allocation2 + $0x160] ss:$2 sm:$0xff]  ;;  %v4813_v18 = vld [vmem:[#allocation2 + $0x161] ss:$2 sm:$0xff]  ;;  %v1331_v4 = vsel %vm1182_vm0, %v1328_v48, %v16610_v57  ;;  %v11949_v37 = vadd.f32 %v6304_v28, %v6078_v63  ;;  %v1765_v63 = vadd.f32 %v8081_v6, %v1636_v54  ;;  %v1766_v1 = vadd.f32 %v8081_v6, %v1637_v25 }
 0x28d   :  { %v4918_v19 = vmul.f32 %v4685_v59, %v7993_v26  ;;  %v4982_v7 = vmul.f32 %v4813_v18, %v7981_v23  ;;  %v5110_v43 = vmul.f32 %v4685_v59, %v7995_v27  ;;  %v5749_v33 = vmul.f32 %v4685_v59, %v7981_v23  ;;  %v16612_v59 = vld [vmem:[#allocation13_spill] sm:$0xff] }
 0x28e   :  { %v6132_v60 = vmul.f32 %v4813_v18, %v7995_v27  ;;  %v5685_v3 = vmul.f32 %v4813_v18, %v7993_v26  ;;  %v1639_v57 = vadd.f32 %v1331_v4, %v870_v36  ;;  %v16613_v58 = vrot.slane %v16612_v59, 1  ;;  %v16614_v18 = vld [vmem:[#allocation36_spill] sm:$0xff]  ;;  %v16616_v4 = vld [vmem:[#allocation22_spill] sm:$0xff]  ;;  %v16620_v54 = vld [vmem:[#allocation21_spill] sm:$0xff] }
 0x28f   :  { %v5046_v2 = vadd.f32 %v4982_v7, %v4918_v19  ;;  %v5259_v48 = vrot.slane %v5110_v43, 1  ;;  %v5898_v52 = vrot.slane %v5749_v33, 1  ;;  %v16615_v19 = vrot.slane %v16614_v18, 1 }
 0x290   :  { %v6281_v10 = vrot.slane %v6132_v60, 1  ;;  %v16617_v7 = vrot.slane %v16616_v4, 1  ;;  %v1767_v13 = vadd.f32 %v8081_v6, %v1638_v44  ;;  %v2152_v18 = vmul.f32 %v11818_v62, %v7993_v26 }
 0x291   :  { %v5262_v5 = vsel %vm1182_vm0, %v5259_v48, %v16611_v21  ;;  %v5260_v20 = vsel %vm1182_vm0, %v16613_v58, %v5259_v48  ;;  %v5901_v36 = vsel %vm1182_vm0, %v5898_v52, %v16615_v19  ;;  %v16618_v21 = vld [vmem:[#allocation25_spill] sm:$0xff]  ;;  %v16621_v48 = vrot.slane %v16620_v54, 1 }
 0x292   :  { %v5429_v28 = vadd.f32 %v5262_v5, %v5046_v2  ;;  %v6284_v43 = vsel %vm1182_vm0, %v6281_v10, %v16617_v7  ;;  %v6068_v33 = vadd.f32 %v5901_v36, %v5685_v3  ;;  %v5428_v60 = vadd.f32 %v5260_v20, %v5045_v17 }
 0x293   :  { %v16619_v59 = vrot.slane %v16618_v21, 1  ;;  %v6282_v25 = vsel %vm1182_vm0, %v16621_v48, %v6281_v10  ;;  %v11980_v19 = vmul.f32 %v11776_v31, %v7981_v23  ;;  %v1768_v3 = vadd.f32 %v8081_v6, %v1639_v57 }
 0x294   :  { %v5493_v2 = vadd.f32 %v5429_v28, %v8081_v6  ;;  %v6451_v44 = vadd.f32 %v6284_v43, %v6068_v33  ;;  %v5492_v17 = vadd.f32 %v5428_v60, %v8081_v6  ;;  %v1895_v10 = vmul.f32 %v8100_v15, %v1766_v1 }
 0x295   :  { %v5899_v58 = vsel %vm1182_vm0, %v16619_v59, %v5898_v52  ;;  %16622 = vst [vmem:[#allocation31_spill] sm:$0xff] %v11980_v19  ;;  %v1894_v52 = vmul.f32 %v8100_v15, %v1765_v63  ;;  %v2281_v28 = vmul.f32 %v11796_v8, %v7981_v23  ;;  %v1896_v31 = vmul.f32 %v8100_v15, %v1767_v13 }
 0x296   :  { %v6067_v5 = vadd.f32 %v5899_v58, %v5684_v38  ;;  %v2280_v38 = vmul.f32 %v11791_v39, %v7981_v23  ;;  %v5557_v36 = vmul.f32 %v5493_v2, %v8100_v15  ;;  %v2282_v4 = vmul.f32 %v11840_v29, %v7981_v23 }
 0x297   :  { %v11996_v57 = vmul.f32 %v11883_v11, %v7981_v23  ;;  %v6515_v63 = vadd.f32 %v6451_v44, %v8081_v6  ;;  %v16129_v39 = vrot.slane %v11980_v19, 1  ;;  %v5556_v8 = vmul.f32 %v5492_v17, %v8100_v15 }
 0x298   :  { %v6450_v20 = vadd.f32 %v6282_v25, %v6067_v5  ;;  %v2606_v7 = vrot.slane %v2280_v38, 1  ;;  %v2153_v43 = vmul.f32 %v11827_v51, %v7993_v26  ;;  %v2608_v13 = vrot.slane %v2281_v28, 1  ;;  %v7708_v5 = vld [vmem:[%s15935_s1 + $0x4a1] ss:$2 sm:$0xff] }
 0x299   :  { %16623 = vst [vmem:[#allocation26_spill] sm:$0xff] %v11996_v57  ;;  %v2610_v33 = vrot.slane %v2282_v4, 1  ;;  %v1897_v60 = vmul.f32 %v8100_v15, %v1768_v3  ;;  %v2154_v11 = vmul.f32 %v11868_v30, %v7993_v26  ;;  %v16127_v21 = vrot.slane %v11996_v57, 1 }
 0x29a   :  { %v6514_v1 = vadd.f32 %v6450_v20, %v8081_v6  ;;  %v12010_v59 = vadd.f32 %v8103_v16, %v1894_v52  ;;  %v12013_v58 = vadd.f32 %v8103_v16, %v1895_v10  ;;  %v12016_v54 = vadd.f32 %v8103_v16, %v1896_v31 }
 0x29b   :  { %v2607_v48 = vsel %vm1182_vm0, %v16129_v39, %v2606_v7  ;;  %v12022_v25 = vadd.f32 %v5557_v36, %v8103_v16  ;;  %v6579_v2 = vmul.f32 %v6515_v63, %v8100_v15  ;;  %v2609_v44 = vsel %vm1182_vm0, %v2606_v7, %v2608_v13  ;;  %v16626_v39 = vld [vmem:[#allocation16_spill] sm:$0xff] }
 0x29c   :  { %v6578_v29 = vmul.f32 %v6514_v1, %v8100_v15  ;;  %v2611_v17 = vsel %vm1182_vm0, %v2608_v13, %v2610_v33  ;;  %v12031_v3 = vadd.f32 %v5556_v8, %v8103_v16  ;;  %v2613_v20 = vsel %vm1182_vm0, %v2610_v33, %v16127_v21 }
 0x29d   :  { %v12041_v10 = vmul.f32 %v11801_v0, %v7995_v27  ;;  %v2918_v38 = vadd.f32 %v2607_v48, %v2151_v45  ;;  %v3047_v28 = vmul.f32 %v11818_v62, %v7995_v27  ;;  %v3048_v36 = vmul.f32 %v11827_v51, %v7995_v27 }
 0x29e   :  { %v12034_v52 = vadd.f32 %v6578_v29, %v8103_v16  ;;  %v3049_v31 = vmul.f32 %v11868_v30, %v7995_v27  ;;  %v2919_v4 = vadd.f32 %v2609_v44, %v2152_v18  ;;  %v2920_v63 = vadd.f32 %v2611_v17, %v2153_v43 }
 0x29f   :  { %16624 = vst [vmem:[#allocation23_spill] sm:$0xff] %v12041_v10  ;;  %v12050_v1 = vmul.f32 %v7708_v5, %v7995_v27  ;;  %v16128_v7 = vrot.slane %v12041_v10, 1  ;;  %v2921_v8 = vadd.f32 %v2613_v20, %v2154_v11  ;;  %v3373_v0 = vrot.slane %v3047_v28, 1  ;;  %v7685_v28 = vld [vmem:[%s15935_s1 + $0x331] ss:$2 sm:$0xff] }
 0x2a0   :  { %v3375_v13 = vrot.slane %v3048_v36, 1  ;;  %v3377_v45 = vrot.slane %v3049_v31, 1  ;;  %v12054_v33 = vadd.f32 %v6579_v2, %v8103_v16  ;;  %v2026_v51 = vadd.f32 %v8103_v16, %v1897_v60 }
 0x2a1   :  { %16625 = vst [vmem:[#allocation20_spill] sm:$0xff] %v12050_v1  ;;  %v16126_v30 = vrot.slane %v12050_v1, 1  ;;  %v6706_v18 = vmax.f32 %v12031_v3, 0.0  ;;  %v3374_v43 = vsel %vm1182_vm0, %v16128_v7, %v3373_v0  ;;  %v6770_v48 = vmax.f32 %v12034_v52, 0.0 }
 0x2a2   :  { %v3376_v29 = vsel %vm1182_vm0, %v3373_v0, %v3375_v13  ;;  %v3378_v11 = vsel %vm1182_vm0, %v3375_v13, %v3377_v45  ;;  %v3685_v5 = vadd.f32 %v3374_v43, %v2918_v38  ;;  %v4197_v3 = vmax.f32 %v12010_v59, 0.0  ;;  %v7557_v38 = vld [vmem:[%s15935_s1 + $0x330] ss:$2 sm:$0xff]  ;;  %v7797_v59 = vld [vmem:[%s15935_s1 + $0x320] ss:$2 sm:$0xff] }
 0x2a3   :  { %v3380_v2 = vsel %vm1182_vm0, %v3377_v45, %v16126_v30  ;;  %v3686_v60 = vadd.f32 %v3376_v29, %v2919_v4  ;;  %v3687_v44 = vadd.f32 %v3378_v11, %v2920_v63  ;;  %v4198_v20 = vmax.f32 %v12013_v58, 0.0 }
 0x2a4   :  { %v3688_v17 = vadd.f32 %v3380_v2, %v2921_v8  ;;  %v3813_v36 = vadd.f32 %v3685_v5, %v8081_v6  ;;  %v4199_v31 = vmax.f32 %v12016_v54, 0.0  ;;  %v590_v58 = vmul.f32 %v7797_v59, %v7993_v26  ;;  %v7798_v54 = vld [vmem:[%s15935_s1 + $0x321] ss:$2 sm:$0xff] }
 0x2a5   :  { %v3814_v52 = vadd.f32 %v3686_v60, %v8081_v6  ;;  %v3815_v4 = vadd.f32 %v3687_v44, %v8081_v6  ;;  %v591_v8 = vmul.f32 %v7557_v38, %v7993_v26  ;;  %v719_v0 = vmul.f32 %v7798_v54, %v7981_v23 }
 0x2a6   :  { %v3816_v63 = vadd.f32 %v3688_v17, %v8081_v6  ;;  %v3941_v13 = vmul.f32 %v3813_v36, %v8100_v15  ;;  %v4200_v43 = vmax.f32 %v2026_v51, 0.0  ;;  %v720_v29 = vmul.f32 %v7685_v28, %v7981_v23 }
 0x2a7   :  { %v3942_v45 = vmul.f32 %v3814_v52, %v8100_v15  ;;  %v3943_v11 = vmul.f32 %v3815_v4, %v8100_v15  ;;  %v847_v5 = vadd.f32 %v719_v0, %v590_v58  ;;  %v977_v60 = vmul.f32 %v7557_v38, %v7995_v27 }
 0x2a8   :  { %v3944_v2 = vmul.f32 %v3816_v63, %v8100_v15  ;;  %v4069_v44 = vadd.f32 %v3941_v13, %v8103_v16  ;;  %v848_v59 = vadd.f32 %v720_v29, %v591_v8  ;;  %v2131_v30 = vmul.f32 %v7798_v54, %v7993_v26  ;;  %v16628_v54 = vld [vmem:[#allocation30_spill] sm:$0xff] }
 0x2a9   :  { %v4070_v17 = vadd.f32 %v3942_v45, %v8103_v16  ;;  %v4071_v36 = vadd.f32 %v3943_v11, %v8103_v16  ;;  %v1284_v52 = vrot.slane %v977_v60, 1  ;;  %v2132_v21 = vmul.f32 %v7685_v28, %v7993_v26 }
 0x2aa   :  { %v4072_v51 = vadd.f32 %v3944_v2, %v8103_v16  ;;  %v4325_v4 = vmax.f32 %v4069_v44, 0.0  ;;  %v2260_v58 = vmul.f32 %v7557_v38, %v7981_v23  ;;  %v3027_v63 = vmul.f32 %v7685_v28, %v7995_v27 }
 0x2ab   :  { %v4326_v7 = vmax.f32 %v4070_v17, 0.0  ;;  %v4327_v0 = vmax.f32 %v4071_v36, 0.0  ;;  %v16627_v45 = vrot.slane %v16626_v39, 1  ;;  %v16629_v29 = vrot.slane %v16628_v54, 1 }
 0x2ac   :  { %v4328_v13 = vmax.f32 %v4072_v51, 0.0  ;;  %v4453_v2 = vmax.f32 %v4197_v3, %v4325_v4  ;;  %v2566_v57 = vrot.slane %v2260_v58, 1  ;;  %v3333_v38 = vrot.slane %v3027_v63, 1  ;;  %v7049_v4 = vpop.permute.xlu0 %7048 }
 0x2ad   :  { %v1285_v8 = vsel %vm1182_vm0, %v16627_v45, %v1284_v52  ;;  %v1287_v11 = vsel %vm1182_vm0, %v1284_v52, %v16629_v29  ;;  %v4454_v60 = vmax.f32 %v4198_v20, %v4326_v7  ;;  %v4455_v44 = vmax.f32 %v4199_v31, %v4327_v0  ;;  %v16630_v52 = vld [vmem:[#allocation19_spill] sm:$0xff]  ;;  %v16632_v20 = vld [vmem:[#allocation24_spill] sm:$0xff] }
 0x2ae   :  { %v1616_v62 = vadd.f32 %v1285_v8, %v847_v5  ;;  %v1617_v1 = vadd.f32 %v1287_v11, %v848_v59  ;;  %v4456_v17 = vmax.f32 %v4200_v43, %v4328_v13  ;;  %v6771_v28 = vmax.f32 %v12054_v33, 0.0  ;;  %4582 = vst.msk [vmem:[#allocation2 + $0x230] sm:$0xff] %vm4511_vm1, %v4453_v2  ;;  %v16634_v5 = vld [vmem:[#allocation35_spill] sm:$0xff]  ;;  %v7059_v13 = vpop.permute.xlu2 %7058 }
 0x2af   :  { %v6834_v36 = vmax.f32 %v6706_v18, %v6770_v48  ;;  %4583 = vst.msk [vmem:[#allocation2 + $0x238] sm:$0xff] %vm4511_vm1, %v4454_v60  ;;  %v16631_v3 = vrot.slane %v16630_v52, 1  ;;  %v16633_v31 = vrot.slane %v16632_v20, 1  ;;  %v16635_v59 = vrot.slane %v16634_v5, 1  ;;  %v16636_v18 = vld [vmem:[#allocation44_spill] sm:$0xff] }
 0x2b0   :  { %v1745_v39 = vadd.f32 %v8081_v6, %v1616_v62  ;;  %v1746_v51 = vadd.f32 %v8081_v6, %v1617_v1  ;;  %v16637_v48 = vrot.slane %v16636_v18, 1  ;;  %v6775_v1 = vmax.f32 %v11766_v24, 0.0  ;;  %4584 = vst.msk [vmem:[#allocation2 + $0x240] sm:$0xff] %vm4511_vm1, %v4455_v44  ;;  %v7054_v44 = vpop.permute.xlu1 %7053  ;;  %v12180_v52 = vld [vmem:[%s15935_s1 + $0x4d0] ss:$2 sm:$0xff] }
 0x2b1   :  { %v2567_v7 = vsel %vm1182_vm0, %v16631_v3, %v2566_v57  ;;  %v2569_v43 = vsel %vm1182_vm0, %v2566_v57, %v16633_v31  ;;  %v3334_v33 = vsel %vm1182_vm0, %v16635_v59, %v3333_v38  ;;  %v12133_v57 = vadd.f32 %v11779_v55, %v8103_v16  ;;  %4585 = vst.msk [vmem:[#allocation2 + $0x248] sm:$0xff] %vm4511_vm1, %v4456_v17  ;;  %v12196_v59 = vld [vmem:[%s15935_s1 + $0x4e0] ss:$2 sm:$0xff] }
 0x2b2   :  { %v3336_v62 = vsel %vm1182_vm0, %v3333_v38, %v16637_v48  ;;  %v1874_v58 = vmul.f32 %v8100_v15, %v1745_v39  ;;  %v2898_v63 = vadd.f32 %v2567_v7, %v2131_v30  ;;  %v2899_v0 = vadd.f32 %v2569_v43, %v2132_v21  ;;  %v7799_v43 = vld [vmem:[#allocation2 + $0x180] ss:$2 sm:$0xff] }
 0x2b3   :  { %v12137_v45 = vadd.f32 %v11915_v22, %v8103_v16  ;;  %v7362_v8 = vsel %vm4511_vm1, %v11918_v50, 0.0  ;;  %v1875_v24 = vmul.f32 %v8100_v15, %v1746_v51  ;;  %v5567_v21 = vmul.f32 %v11945_v14, %v8100_v15 }
 0x2b4   :  { %v7363_v54 = vadd.f32 %v7362_v8, %v11925_v47  ;;  %v3665_v30 = vadd.f32 %v3334_v33, %v2898_v63  ;;  %v3666_v29 = vadd.f32 %v3336_v62, %v2899_v0  ;;  %v7364_v55 = vsel %vm4511_vm1, %v11756_v46, 0.0  ;;  %v12213_v0 = vld [vmem:[%s15935_s1 + $0x4d1] ss:$2 sm:$0xff] }
 0x2b5   :  { %v6525_v22 = vadd.f32 %v11949_v37, %v8081_v6  ;;  %v16638_v11 = vmax.f32 %v12022_v25, 0.0  ;;  %v7282_v2 = vmul.f32 %v7049_v4, %v6834_v36  ;;  %v12153_v60 = vmul.f32 %v7059_v13, %v11762_v40  ;;  %v12218_v13 = vld [vmem:[%s15935_s1 + $0x4e1] ss:$2 sm:$0xff] }
 0x2b6   :  { %v2003_v47 = vadd.f32 %v8103_v16, %v1874_v58  ;;  %v3793_v14 = vadd.f32 %v3665_v30, %v8081_v6  ;;  %v3794_v17 = vadd.f32 %v3666_v29, %v8081_v6  ;;  %v16639_v38 = vmax.f32 %v11404_v35, 0.0  ;;  %v12175_v35 = vld [vmem:[%s15935_s1 + $0x4c0] ss:$2 sm:$0xff]  ;;  %v4711_v31 = vld [vmem:[#allocation2 + $0x230] ss:$2 sm:$0xff] }
 0x2b7   :  { %v6835_v50 = vmax.f32 %v16638_v11, %v6771_v28  ;;  %v2004_v28 = vadd.f32 %v8103_v16, %v1875_v24  ;;  %v12166_v40 = vadd.f32 %v5567_v21, %v8103_v16  ;;  %v12168_v36 = vadd.f32 %v7364_v55, %v7363_v54  ;;  %v4839_v54 = vld [vmem:[#allocation2 + $0x231] ss:$2 sm:$0xff] }
 0x2b8   :  { %v12160_v46 = vmax.f32 %v16639_v38, %v6775_v1  ;;  %v3921_v39 = vmul.f32 %v3793_v14, %v8100_v15  ;;  %v3922_v51 = vmul.f32 %v3794_v17, %v8100_v15  ;;  %v12183_v3 = vmul.f32 %v6525_v22, %v8100_v15  ;;  %v4713_v33 = vld [vmem:[#allocation2 + $0x240] ss:$2 sm:$0xff]  ;;  %v12203_v1 = vld [vmem:[%s15935_s1 + $0x4c1] ss:$2 sm:$0xff]  ;;  %v12245_v14 = vld [vmem:[%s15935_s1 + $0x4f0] ss:$2 sm:$0xff] }
 0x2b9   :  { %v12185_v7 = vmul.f32 %v7054_v44, %v6835_v50  ;;  %v12188_v20 = vsel %vm4511_vm1, %v7282_v2, 0.0  ;;  %v12191_v5 = vmul.f32 %v7799_v43, %v7993_v26  ;;  %v4177_v62 = vmax.f32 %v2003_v47, 0.0 }
 0x2ba   :  { %v4049_v18 = vadd.f32 %v3921_v39, %v8103_v16  ;;  %v4050_v48 = vadd.f32 %v3922_v51, %v8103_v16  ;;  %v616_v4 = vmul.f32 %v12175_v35, %v7993_v26  ;;  %v12208_v58 = vmul.f32 %v4711_v31, %v7995_v27  ;;  %v7800_v51 = vld [vmem:[#allocation2 + $0x181] ss:$2 sm:$0xff] }
 0x2bb   :  { %v4178_v63 = vmax.f32 %v2004_v28, 0.0  ;;  %v617_v8 = vmul.f32 %v12180_v52, %v7993_v26  ;;  %v618_v24 = vmul.f32 %v12196_v59, %v7993_v26  ;;  %v12225_v21 = vmul.f32 %v4713_v33, %v7995_v27  ;;  %v4841_v28 = vld [vmem:[#allocation2 + $0x241] ss:$2 sm:$0xff] }
 0x2bc   :  { %16640 = vst [vmem:[#allocation27_spill] sm:$0xff] %v12208_v58  ;;  %v12228_v30 = vmul.f32 %v4711_v31, %v7981_v23  ;;  %v12231_v29 = vmul.f32 %v4713_v33, %v7981_v23  ;;  %v4305_v55 = vmax.f32 %v4049_v18, 0.0  ;;  %v4306_v22 = vmax.f32 %v4050_v48, 0.0 }
 0x2bd   :  { %16641 = vst [vmem:[#allocation13_spill] sm:$0xff] %v12225_v21  ;;  %v745_v11 = vmul.f32 %v12203_v1, %v7981_v23  ;;  %v12237_v50 = vmul.f32 %v12175_v35, %v7995_v27  ;;  %v1003_v2 = vmul.f32 %v12180_v52, %v7995_v27  ;;  %v4931_v44 = vmul.f32 %v4711_v31, %v7993_v26  ;;  %v12256_v31 = vld [vmem:[%s15935_s1 + $0x500] ss:$2 sm:$0xff] }
 0x2be   :  { %16642 = vst [vmem:[#allocation36_spill] sm:$0xff] %v12228_v30  ;;  %v4433_v47 = vmax.f32 %v4177_v62, %v4305_v55  ;;  %v746_v17 = vmul.f32 %v12213_v0, %v7981_v23  ;;  %v747_v38 = vmul.f32 %v12218_v13, %v7981_v23  ;;  %v4995_v39 = vmul.f32 %v4839_v54, %v7981_v23 }
 0x2bf   :  { %16643 = vst [vmem:[#allocation22_spill] sm:$0xff] %v12231_v29  ;;  %v4434_v43 = vmax.f32 %v4178_v63, %v4306_v22  ;;  %v1004_v33 = vmul.f32 %v12196_v59, %v7995_v27  ;;  %v12267_v63 = vld [vmem:[%s15935_s1 + $0x4f1] ss:$2 sm:$0xff]  ;;  %v1005_v55 = vmul.f32 %v12245_v14, %v7995_v27  ;;  %v12274_v22 = vmul.f32 %v12256_v31, %v7995_v27 }
 0x2c0   :  { %16644 = vst [vmem:[#allocation25_spill] sm:$0xff] %v12237_v50  ;;  %v1336_v25 = vrot.slane %v1003_v2, 1  ;;  %v12281_v62 = vmul.f32 %v4841_v28, %v7995_v27  ;;  %v4984_v18 = vmul.f32 %v7800_v51, %v7981_v23  ;;  %v5059_v34 = vadd.f32 %v4995_v39, %v4931_v44 }
 0x2c1   :  { %4562 = vst.msk [vmem:[#allocation2 + $0x190] sm:$0xff] %vm4511_vm1, %v4433_v47  ;;  %v1338_v48 = vrot.slane %v1004_v33, 1  ;;  %v12278_v47 = vmul.f32 %v4839_v54, %v7995_v27  ;;  %v1340_v49 = vrot.slane %v1005_v55, 1  ;;  %v748_v41 = vmul.f32 %v12267_v63, %v7981_v23 }
 0x2c2   :  { %4563 = vst.msk [vmem:[#allocation2 + $0x198] sm:$0xff] %vm4511_vm1, %v4434_v43  ;;  %v619_v43 = vmul.f32 %v12245_v14, %v7993_v26  ;;  %v873_v37 = vadd.f32 %v745_v11, %v616_v4  ;;  %v16648_v2 = vrot.slane %v12225_v21, 1  ;;  %v16649_v33 = vrot.slane %v12208_v58, 1 }
 0x2c3   :  { %16645 = vst [vmem:[#allocation21_spill] sm:$0xff] %v12274_v22  ;;  %v5698_v28 = vmul.f32 %v4839_v54, %v7993_v26  ;;  %v874_v10 = vadd.f32 %v746_v17, %v617_v8  ;;  %v16140_v19 = vrot.slane %v12274_v22, 1  ;;  %v16650_v44 = vrot.slane %v12231_v29, 1 }
 0x2c4   :  { %16646 = vst [vmem:[#allocation16_spill] sm:$0xff] %v12278_v47  ;;  %v5288_v9 = vsel %vm1182_vm0, %v16649_v33, %v16648_v2  ;;  %v16651_v39 = vrot.slane %v12228_v30, 1  ;;  %v875_v53 = vadd.f32 %v747_v38, %v618_v24  ;;  %v16652_v4 = vrot.slane %v12237_v50, 1 }
 0x2c5   :  { %16647 = vst [vmem:[#allocation30_spill] sm:$0xff] %v12281_v62  ;;  %v1339_v21 = vsel %vm1182_vm0, %v1336_v25, %v1338_v48  ;;  %v12306_v2 = vadd.f32 %v12188_v20, %v12168_v36  ;;  %v1341_v17 = vsel %vm1182_vm0, %v1338_v48, %v1340_v49  ;;  %v12311_v33 = vadd.f32 %v5288_v9, %v5059_v34 }
 0x2c6   :  { %v5927_v55 = vsel %vm1182_vm0, %v16651_v39, %v16650_v44  ;;  %v1337_v11 = vsel %vm1182_vm0, %v16652_v4, %v1336_v25  ;;  %v5048_v24 = vadd.f32 %v4984_v18, %v12191_v5  ;;  %v5687_v38 = vmul.f32 %v7800_v51, %v7993_v26 }
 0x2c7   :  { %v876_v44 = vadd.f32 %v748_v41, %v619_v43  ;;  %v12315_v39 = vadd.f32 %v5927_v55, %v5698_v28  ;;  %v1343_v36 = vsel %vm1182_vm0, %v1340_v49, %v16140_v19  ;;  %v1642_v20 = vadd.f32 %v1337_v11, %v873_v37  ;;  %v16657_v19 = vld [vmem:[#allocation28_spill] sm:$0xff] }
 0x2c8   :  { %v1643_v8 = vadd.f32 %v1339_v21, %v874_v10  ;;  %v1644_v5 = vadd.f32 %v1341_v17, %v875_v53  ;;  %v16653_v51 = vrot.slane %v12281_v62, 1  ;;  %v16654_v41 = vrot.slane %v12278_v47, 1 }
 0x2c9   :  { %v4691_v25 = vld [vmem:[#allocation2 + $0x190] ss:$2 sm:$0xff]  ;;  %v4819_v4 = vld [vmem:[#allocation2 + $0x191] ss:$2 sm:$0xff]  ;;  %v2157_v10 = vmul.f32 %v12203_v1, %v7993_v26  ;;  %v1645_v28 = vadd.f32 %v1343_v36, %v876_v44  ;;  %v1771_v11 = vadd.f32 %v8081_v6, %v1642_v20  ;;  %v16658_v22 = vrot.slane %v16657_v19, 1 }
 0x2ca   :  { %v4921_v54 = vmul.f32 %v4691_v25, %v7993_v26  ;;  %v4985_v9 = vmul.f32 %v4819_v4, %v7981_v23  ;;  %v5113_v34 = vmul.f32 %v4691_v25, %v7995_v27  ;;  %v12328_v18 = vsel %vm1182_vm0, %v16654_v41, %v16653_v51  ;;  %v16655_v51 = vld [vmem:[#allocation38_spill] sm:$0xff] }
 0x2cb   :  { %v5752_v48 = vmul.f32 %v4691_v25, %v7981_v23  ;;  %v6135_v49 = vmul.f32 %v4819_v4, %v7995_v27  ;;  %v5688_v43 = vmul.f32 %v4819_v4, %v7993_v26  ;;  %v1772_v17 = vadd.f32 %v8081_v6, %v1643_v8 }
 0x2cc   :  { %v5049_v37 = vadd.f32 %v4985_v9, %v4921_v54  ;;  %v5265_v21 = vrot.slane %v5113_v34, 1  ;;  %v16656_v41 = vrot.slane %v16655_v51, 1  ;;  %v1773_v54 = vadd.f32 %v8081_v6, %v1644_v5 }
 0x2cd   :  { %v5904_v53 = vrot.slane %v5752_v48, 1  ;;  %v6287_v55 = vrot.slane %v6135_v49, 1  ;;  %v2158_v4 = vmul.f32 %v12213_v0, %v7993_v26  ;;  %v16659_v36 = vrot.slane %v11034_v61, 1  ;;  %v16662_v48 = vld [vmem:[#allocation37_spill] sm:$0xff] }
 0x2ce   :  { %v5268_v25 = vsel %vm1182_vm0, %v5265_v21, %v16656_v41  ;;  %v5266_v62 = vsel %vm1182_vm0, %v16658_v22, %v5265_v21  ;;  %v16660_v8 = vrot.slane %v11081_v12, 1  ;;  %v12354_v34 = vmul.f32 %v12175_v35, %v7981_v23  ;;  %v16664_v21 = vld [vmem:[#allocation41_spill] sm:$0xff] }
 0x2cf   :  { %v5432_v44 = vadd.f32 %v5268_v25, %v5049_v37  ;;  %v5907_v20 = vsel %vm1182_vm0, %v5904_v53, %v16659_v36  ;;  %v5431_v22 = vadd.f32 %v5266_v62, %v5048_v24  ;;  %v16663_v5 = vrot.slane %v16662_v48, 1 }
 0x2d0   :  { %v6290_v9 = vsel %vm1182_vm0, %v6287_v55, %v16660_v8  ;;  %16661 = vst [vmem:[#allocation19_spill] sm:$0xff] %v12354_v34  ;;  %v6071_v19 = vadd.f32 %v5907_v20, %v5688_v43  ;;  %v16665_v37 = vrot.slane %v16664_v21, 1  ;;  %v1774_v41 = vadd.f32 %v8081_v6, %v1645_v28  ;;  %v7714_v21 = vld [vmem:[%s15935_s1 + $0x501] ss:$2 sm:$0xff] }
 0x2d1   :  { %v5905_v49 = vsel %vm1182_vm0, %v16663_v5, %v5904_v53  ;;  %v1900_v12 = vmul.f32 %v8100_v15, %v1771_v11  ;;  %v1901_v25 = vmul.f32 %v8100_v15, %v1772_v17  ;;  %v5495_v35 = vadd.f32 %v5431_v22, %v8081_v6 }
 0x2d2   :  { %v6288_v61 = vsel %vm1182_vm0, %v16665_v37, %v6287_v55  ;;  %v6070_v51 = vadd.f32 %v5905_v49, %v5687_v38  ;;  %v6454_v36 = vadd.f32 %v6290_v9, %v6071_v19  ;;  %v2286_v62 = vmul.f32 %v12180_v52, %v7981_v23 }
 0x2d3   :  { %v2287_v24 = vmul.f32 %v12196_v59, %v7981_v23  ;;  %v1902_v53 = vmul.f32 %v8100_v15, %v1773_v54  ;;  %v2288_v38 = vmul.f32 %v12245_v14, %v7981_v23  ;;  %v12375_v28 = vmul.f32 %v12256_v31, %v7981_v23 }
 0x2d4   :  { %v6453_v43 = vadd.f32 %v6288_v61, %v6070_v51  ;;  %v5496_v55 = vadd.f32 %v5432_v44, %v8081_v6  ;;  %v6518_v11 = vadd.f32 %v6454_v36, %v8081_v6  ;;  %v16146_v17 = vrot.slane %v12354_v34, 1 }
 0x2d5   :  { %16666 = vst [vmem:[#allocation24_spill] sm:$0xff] %v12375_v28  ;;  %v2618_v52 = vrot.slane %v2286_v62, 1  ;;  %v5559_v20 = vmul.f32 %v5495_v35, %v8100_v15  ;;  %v2620_v8 = vrot.slane %v2287_v24, 1  ;;  %v2622_v54 = vrot.slane %v2288_v38, 1 }
 0x2d6   :  { %v6517_v59 = vadd.f32 %v6453_v43, %v8081_v6  ;;  %v1903_v9 = vmul.f32 %v8100_v15, %v1774_v41  ;;  %v2159_v14 = vmul.f32 %v12218_v13, %v7993_v26  ;;  %v2160_v31 = vmul.f32 %v12267_v63, %v7993_v26 }
 0x2d7   :  { %v16144_v44 = vrot.slane %v12375_v28, 1  ;;  %v12390_v22 = vadd.f32 %v8103_v16, %v1900_v12  ;;  %v12393_v48 = vadd.f32 %v8103_v16, %v1901_v25  ;;  %v2619_v5 = vsel %vm1182_vm0, %v16146_v17, %v2618_v52 }
 0x2d8   :  { %v6581_v19 = vmul.f32 %v6517_v59, %v8100_v15  ;;  %v5560_v49 = vmul.f32 %v5496_v55, %v8100_v15  ;;  %v12403_v37 = vadd.f32 %v8103_v16, %v1902_v53  ;;  %v2621_v61 = vsel %vm1182_vm0, %v2618_v52, %v2620_v8 }
 0x2d9   :  { %v2623_v51 = vsel %vm1182_vm0, %v2620_v8, %v2622_v54  ;;  %v6582_v41 = vmul.f32 %v6518_v11, %v8100_v15  ;;  %v5623_v12 = vadd.f32 %v5559_v20, %v8103_v16  ;;  %v2625_v36 = vsel %vm1182_vm0, %v2622_v54, %v16144_v44 }
 0x2da   :  { %v6645_v25 = vadd.f32 %v6581_v19, %v8103_v16  ;;  %v2924_v35 = vadd.f32 %v2619_v5, %v2157_v10  ;;  %v12415_v62 = vmul.f32 %v12203_v1, %v7995_v27  ;;  %v3053_v24 = vmul.f32 %v12213_v0, %v7995_v27 }
 0x2db   :  { %v3054_v43 = vmul.f32 %v12218_v13, %v7995_v27  ;;  %v2925_v53 = vadd.f32 %v2621_v61, %v2158_v4  ;;  %v2926_v38 = vadd.f32 %v2623_v51, %v2159_v14  ;;  %v3055_v55 = vmul.f32 %v12267_v63, %v7995_v27 }
 0x2dc   :  { %16667 = vst [vmem:[#allocation35_spill] sm:$0xff] %v12415_v62  ;;  %v12424_v11 = vmul.f32 %v7714_v21, %v7995_v27  ;;  %v2927_v52 = vadd.f32 %v2625_v36, %v2160_v31  ;;  %v16145_v10 = vrot.slane %v12415_v62, 1  ;;  %v3385_v20 = vrot.slane %v3053_v24, 1  ;;  %v7801_v24 = vld [vmem:[%s15935_s1 + $0x380] ss:$2 sm:$0xff] }
 0x2dd   :  { %v3387_v1 = vrot.slane %v3054_v43, 1  ;;  %v6709_v59 = vmax.f32 %v5623_v12, 0.0  ;;  %v6773_v8 = vmax.f32 %v6645_v25, 0.0  ;;  %v3389_v54 = vrot.slane %v3055_v55, 1  ;;  %v7691_v12 = vld [vmem:[%s15935_s1 + $0x391] ss:$2 sm:$0xff] }
 0x2de   :  { %16668 = vst [vmem:[#allocation44_spill] sm:$0xff] %v12424_v11  ;;  %v16143_v0 = vrot.slane %v12424_v11, 1  ;;  %v12429_v13 = vadd.f32 %v5560_v49, %v8103_v16  ;;  %v2032_v4 = vadd.f32 %v8103_v16, %v1903_v9  ;;  %v3386_v63 = vsel %vm1182_vm0, %v16145_v10, %v3385_v20  ;;  %v7563_v55 = vld [vmem:[%s15935_s1 + $0x390] ss:$2 sm:$0xff] }
 0x2df   :  { %v3388_v14 = vsel %vm1182_vm0, %v3385_v20, %v3387_v1  ;;  %v12437_v31 = vadd.f32 %v6582_v41, %v8103_v16  ;;  %v3390_v19 = vsel %vm1182_vm0, %v3387_v1, %v3389_v54  ;;  %v3691_v21 = vadd.f32 %v3386_v63, %v2924_v35  ;;  %v7802_v20 = vld [vmem:[%s15935_s1 + $0x381] ss:$2 sm:$0xff] }
 0x2e0   :  { %v3392_v5 = vsel %vm1182_vm0, %v3389_v54, %v16143_v0  ;;  %v3692_v49 = vadd.f32 %v3388_v14, %v2925_v53  ;;  %v3693_v61 = vadd.f32 %v3390_v19, %v2926_v38  ;;  %v4203_v9 = vmax.f32 %v12390_v22, 0.0  ;;  %v16671_v0 = vld [vmem:[#allocation40_spill] sm:$0xff] }
 0x2e1   :  { %v3694_v51 = vadd.f32 %v3392_v5, %v2927_v52  ;;  %v12447_v25 = vmax.f32 %v6709_v59, %v6773_v8  ;;  %v3819_v41 = vadd.f32 %v3691_v21, %v8081_v6  ;;  %v4204_v36 = vmax.f32 %v12393_v48, 0.0 }
 0x2e2   :  { %v596_v35 = vmul.f32 %v7801_v24, %v7993_v26  ;;  %v3820_v43 = vadd.f32 %v3692_v49, %v8081_v6  ;;  %v3821_v22 = vadd.f32 %v3693_v61, %v8081_v6  ;;  %v4205_v38 = vmax.f32 %v12403_v37, 0.0 }
 0x2e3   :  { %v3822_v53 = vadd.f32 %v3694_v51, %v8081_v6  ;;  %v3947_v48 = vmul.f32 %v3819_v41, %v8100_v15  ;;  %v597_v52 = vmul.f32 %v7563_v55, %v7993_v26  ;;  %v725_v1 = vmul.f32 %v7802_v20, %v7981_v23 }
 0x2e4   :  { %v726_v59 = vmul.f32 %v7691_v12, %v7981_v23  ;;  %v3948_v8 = vmul.f32 %v3820_v43, %v8100_v15  ;;  %v3949_v37 = vmul.f32 %v3821_v22, %v8100_v15  ;;  %v4206_v63 = vmax.f32 %v2032_v4, 0.0 }
 0x2e5   :  { %v3950_v54 = vmul.f32 %v3822_v53, %v8100_v15  ;;  %v4075_v14 = vadd.f32 %v3947_v48, %v8103_v16  ;;  %v853_v19 = vadd.f32 %v725_v1, %v596_v35  ;;  %v983_v21 = vmul.f32 %v7563_v55, %v7995_v27 }
 0x2e6   :  { %v854_v5 = vadd.f32 %v726_v59, %v597_v52  ;;  %v4076_v49 = vadd.f32 %v3948_v8, %v8103_v16  ;;  %v4077_v61 = vadd.f32 %v3949_v37, %v8103_v16  ;;  %v2137_v41 = vmul.f32 %v7802_v20, %v7993_v26  ;;  %v16669_v59 = vld [vmem:[#allocation32_spill] sm:$0xff] }
 0x2e7   :  { %v4078_v51 = vadd.f32 %v3950_v54, %v8103_v16  ;;  %v4331_v24 = vmax.f32 %v4075_v14, 0.0  ;;  %v1296_v43 = vrot.slane %v983_v21, 1  ;;  %v2138_v22 = vmul.f32 %v7691_v12, %v7993_v26 }
 0x2e8   :  { %v2266_v4 = vmul.f32 %v7563_v55, %v7981_v23  ;;  %v4332_v53 = vmax.f32 %v4076_v49, 0.0  ;;  %v4333_v48 = vmax.f32 %v4077_v61, 0.0  ;;  %v3033_v52 = vmul.f32 %v7691_v12, %v7995_v27  ;;  %v16673_v49 = vld [vmem:[#allocation29_spill] sm:$0xff] }
 0x2e9   :  { %v4334_v35 = vmax.f32 %v4078_v51, 0.0  ;;  %v4459_v1 = vmax.f32 %v4203_v9, %v4331_v24  ;;  %v16670_v8 = vrot.slane %v16669_v59, 1  ;;  %v16672_v54 = vrot.slane %v16671_v0, 1  ;;  %v16675_v12 = vld [vmem:[#allocation33_spill] sm:$0xff] }
 0x2ea   :  { %v2578_v14 = vrot.slane %v2266_v4, 1  ;;  %v4460_v21 = vmax.f32 %v4204_v36, %v4332_v53  ;;  %v4461_v44 = vmax.f32 %v4205_v38, %v4333_v48  ;;  %v16674_v61 = vrot.slane %v16673_v49, 1  ;;  %v16677_v4 = vld [vmem:[#allocation46_spill] sm:$0xff] }
 0x2eb   :  { %v1297_v37 = vsel %vm1182_vm0, %v16670_v8, %v1296_v43  ;;  %v1299_v20 = vsel %vm1182_vm0, %v1296_v43, %v16672_v54  ;;  %v4462_v10 = vmax.f32 %v4206_v63, %v4334_v35  ;;  %4588 = vst.msk [vmem:[#allocation2 + $0x260] sm:$0xff] %vm4511_vm1, %v4459_v1  ;;  %v16676_v51 = vrot.slane %v16675_v12, 1  ;;  %v7064_v43 = vpop.permute.xlu0 %7063  ;;  %v16679_v35 = vld [vmem:[#allocation52_spill] sm:$0xff]  ;;  %v7069_v12 = vpop.permute.xlu1 %7068 }
 0x2ec   :  { %v1622_v17 = vadd.f32 %v1297_v37, %v853_v19  ;;  %v1623_v55 = vadd.f32 %v1299_v20, %v854_v5  ;;  %v2579_v9 = vsel %vm1182_vm0, %v16674_v61, %v2578_v14  ;;  %v3345_v59 = vrot.slane %v3033_v52, 1  ;;  %4589 = vst.msk [vmem:[#allocation2 + $0x268] sm:$0xff] %vm4511_vm1, %v4460_v21  ;;  %v7074_v37 = vpop.permute.xlu2 %7073 }
 0x2ed   :  { %v2581_v24 = vsel %vm1182_vm0, %v2578_v14, %v16676_v51  ;;  %v6464_v0 = vadd.f32 %v12328_v18, %v12315_v39  ;;  %v2904_v38 = vadd.f32 %v2579_v9, %v2137_v41  ;;  %v6710_v19 = vmax.f32 %v12429_v13, 0.0  ;;  %4590 = vst.msk [vmem:[#allocation2 + $0x270] sm:$0xff] %vm4511_vm1, %v4461_v44 }
 0x2ee   :  { %v1751_v36 = vadd.f32 %v8081_v6, %v1622_v17  ;;  %v2905_v63 = vadd.f32 %v2581_v24, %v2138_v22  ;;  %v1752_v5 = vadd.f32 %v8081_v6, %v1623_v55  ;;  %v16678_v53 = vrot.slane %v16677_v4, 1  ;;  %4591 = vst.msk [vmem:[#allocation2 + $0x278] sm:$0xff] %vm4511_vm1, %v4462_v10 }
 0x2ef   :  { %v16680_v52 = vrot.slane %v16679_v35, 1  ;;  %v6774_v18 = vmax.f32 %v12437_v31, 0.0  ;;  %v12512_v44 = vadd.f32 %v12183_v3, %v8103_v16  ;;  %v7368_v22 = vsel %vm4511_vm1, %v12185_v7, 0.0 }
 0x2f0   :  { %v3346_v48 = vsel %vm1182_vm0, %v16678_v53, %v3345_v59  ;;  %v1880_v17 = vmul.f32 %v8100_v15, %v1751_v36  ;;  %v7285_v1 = vmul.f32 %v7064_v43, %v12447_v25  ;;  %v1881_v8 = vmul.f32 %v8100_v15, %v1752_v5 }
 0x2f1   :  { %v3348_v39 = vsel %vm1182_vm0, %v3345_v59, %v16680_v52  ;;  %v3671_v41 = vadd.f32 %v3346_v48, %v2904_v38  ;;  %v7369_v31 = vadd.f32 %v7368_v22, %v12306_v2  ;;  %v5506_v10 = vadd.f32 %v12311_v33, %v8081_v6  ;;  %v7803_v48 = vld [vmem:[#allocation2 + $0x1b0] ss:$2 sm:$0xff]  ;;  %v12578_v52 = vld [vmem:[%s15935_s1 + $0x531] ss:$2 sm:$0xff] }
 0x2f2   :  { %v3672_v13 = vadd.f32 %v3348_v39, %v2905_v63  ;;  %v6528_v3 = vadd.f32 %v6464_v0, %v8081_v6  ;;  %v2009_v14 = vadd.f32 %v8103_v16, %v1880_v17  ;;  %v6838_v21 = vmax.f32 %v6710_v19, %v6774_v18  ;;  %v12563_v63 = vld [vmem:[%s15935_s1 + $0x540] ss:$2 sm:$0xff]  ;;  %v12568_v19 = vld [vmem:[%s15935_s1 + $0x521] ss:$2 sm:$0xff]  ;;  %v7804_v17 = vld [vmem:[#allocation2 + $0x1b1] ss:$2 sm:$0xff] }
 0x2f3   :  { %v3799_v54 = vadd.f32 %v3671_v41, %v8081_v6  ;;  %v2010_v7 = vadd.f32 %v8103_v16, %v1881_v8  ;;  %v7370_v2 = vsel %vm4511_vm1, %v12153_v60, 0.0  ;;  %v12531_v33 = vmul.f32 %v7074_v37, %v12160_v46  ;;  %v12548_v46 = vld [vmem:[%s15935_s1 + $0x520] ss:$2 sm:$0xff]  ;;  %v12583_v39 = vld [vmem:[%s15935_s1 + $0x541] ss:$2 sm:$0xff] }
 0x2f4   :  { %v3800_v20 = vadd.f32 %v3672_v13, %v8081_v6  ;;  %v16681_v49 = vmax.f32 %v12137_v45, 0.0  ;;  %v16682_v61 = vmax.f32 %v12133_v57, 0.0  ;;  %v7372_v51 = vsel %vm4511_vm1, %v7285_v1, 0.0  ;;  %v12553_v57 = vld [vmem:[%s15935_s1 + $0x530] ss:$2 sm:$0xff] }
 0x2f5   :  { %v3927_v25 = vmul.f32 %v3799_v54, %v8100_v15  ;;  %v12543_v0 = vmul.f32 %v5506_v10, %v8100_v15  ;;  %v7371_v60 = vadd.f32 %v7370_v2, %v7369_v31  ;;  %v12556_v45 = vmul.f32 %v6528_v3, %v8100_v15  ;;  %v12589_v13 = vld [vmem:[%s15935_s1 + $0x550] ss:$2 sm:$0xff]  ;;  %v12594_v22 = vld [vmem:[%s15935_s1 + $0x551] ss:$2 sm:$0xff]  ;;  %v4717_v37 = vld [vmem:[#allocation2 + $0x260] ss:$2 sm:$0xff] }
 0x2f6   :  { %v3928_v55 = vmul.f32 %v3800_v20, %v8100_v15  ;;  %v12537_v9 = vmax.f32 %v16682_v61, %v16681_v49  ;;  %v4183_v38 = vmax.f32 %v2009_v14, 0.0  ;;  %v12570_v5 = vmul.f32 %v7069_v12, %v6838_v21  ;;  %v4719_v31 = vld [vmem:[#allocation2 + $0x270] ss:$2 sm:$0xff] }
 0x2f7   :  { %v4055_v43 = vadd.f32 %v3927_v25, %v8103_v16  ;;  %v12572_v4 = vadd.f32 %v7372_v51, %v7371_v60  ;;  %v4184_v53 = vmax.f32 %v2010_v7, 0.0  ;;  %v4923_v35 = vmul.f32 %v7803_v48, %v7993_v26  ;;  %v4847_v51 = vld [vmem:[#allocation2 + $0x271] ss:$2 sm:$0xff] }
 0x2f8   :  { %v4056_v36 = vadd.f32 %v3928_v55, %v8103_v16  ;;  %v4987_v41 = vmul.f32 %v7804_v17, %v7981_v23  ;;  %v622_v1 = vmul.f32 %v12548_v46, %v7993_v26  ;;  %v623_v8 = vmul.f32 %v12553_v57, %v7993_v26  ;;  %v4845_v55 = vld [vmem:[#allocation2 + $0x261] ss:$2 sm:$0xff] }
 0x2f9   :  { %v4311_v18 = vmax.f32 %v4055_v43, 0.0  ;;  %v624_v54 = vmul.f32 %v12563_v63, %v7993_v26  ;;  %v625_v20 = vmul.f32 %v12589_v13, %v7993_v26  ;;  %v751_v3 = vmul.f32 %v12568_v19, %v7981_v23 }
 0x2fa   :  { %v4312_v10 = vmax.f32 %v4056_v36, 0.0  ;;  %v12607_v14 = vmul.f32 %v4717_v37, %v7995_v27  ;;  %v752_v7 = vmul.f32 %v12578_v52, %v7981_v23  ;;  %v753_v25 = vmul.f32 %v12583_v39, %v7981_v23 }
 0x2fb   :  { %v4439_v21 = vmax.f32 %v4183_v38, %v4311_v18  ;;  %v12614_v2 = vmul.f32 %v4719_v31, %v7995_v27  ;;  %v754_v61 = vmul.f32 %v12594_v22, %v7981_v23  ;;  %v12620_v12 = vmul.f32 %v12548_v46, %v7995_v27  ;;  %v12633_v38 = vld [vmem:[%s15935_s1 + $0x560] ss:$2 sm:$0xff] }
 0x2fc   :  { %v4440_v49 = vmax.f32 %v4184_v53, %v4312_v10  ;;  %v4934_v60 = vmul.f32 %v4717_v37, %v7993_v26  ;;  %v12624_v43 = vmul.f32 %v4717_v37, %v7981_v23  ;;  %v12627_v36 = vmul.f32 %v4719_v31, %v7981_v23 }
 0x2fd   :  { %16683 = vst [vmem:[#allocation38_spill] sm:$0xff] %v12614_v2  ;;  %v1009_v53 = vmul.f32 %v12553_v57, %v7995_v27  ;;  %v1010_v48 = vmul.f32 %v12563_v63, %v7995_v27  ;;  %v1011_v18 = vmul.f32 %v12589_v13, %v7995_v27  ;;  %v12644_v37 = vmul.f32 %v12633_v38, %v7995_v27 }
 0x2fe   :  { %16684 = vst [vmem:[#allocation28_spill] sm:$0xff] %v12620_v12  ;;  %v4998_v10 = vmul.f32 %v4845_v55, %v7981_v23  ;;  %v12650_v24 = vmul.f32 %v4845_v55, %v7995_v27  ;;  %v12654_v11 = vmul.f32 %v4847_v51, %v7995_v27  ;;  %v16156_v34 = vrot.slane %v12627_v36, 1 }
 0x2ff   :  { %16685 = vst [vmem:[#allocation37_spill] sm:$0xff] %v12627_v36  ;;  %v1350_v28 = vrot.slane %v1010_v48, 1  ;;  %v1352_v29 = vrot.slane %v1011_v18, 1  ;;  %v879_v31 = vadd.f32 %v751_v3, %v622_v1  ;;  %v16157_v50 = vrot.slane %v12644_v37, 1 }
 0x300   :  { %4568 = vst.msk [vmem:[#allocation2 + $0x1c0] sm:$0xff] %vm4511_vm1, %v4439_v21  ;;  %v5051_v47 = vadd.f32 %v4987_v41, %v4923_v35  ;;  %v5690_v21 = vmul.f32 %v7804_v17, %v7993_v26  ;;  %v880_v30 = vadd.f32 %v752_v7, %v623_v8  ;;  %v5062_v58 = vadd.f32 %v4998_v10, %v4934_v60 }
 0x301   :  { %4569 = vst.msk [vmem:[#allocation2 + $0x1c8] sm:$0xff] %vm4511_vm1, %v4440_v49  ;;  %v1348_v49 = vrot.slane %v1009_v53, 1  ;;  %v16689_v53 = vrot.slane %v12620_v12, 1  ;;  %v5701_v51 = vmul.f32 %v4845_v55, %v7993_v26  ;;  %v881_v48 = vadd.f32 %v753_v25, %v624_v54 }
 0x302   :  { %16686 = vst [vmem:[#allocation41_spill] sm:$0xff] %v12644_v37  ;;  %v16690_v62 = vrot.slane %v12614_v2, 1  ;;  %v16691_v1 = vrot.slane %v12607_v14, 1  ;;  %v1353_v41 = vsel %vm1182_vm0, %v1350_v28, %v1352_v29  ;;  %v16692_v8 = vrot.slane %v12624_v43, 1 }
 0x303   :  { %16687 = vst [vmem:[#allocation32_spill] sm:$0xff] %v12650_v24  ;;  %v1349_v59 = vsel %vm1182_vm0, %v16689_v53, %v1348_v49  ;;  %v1351_v18 = vsel %vm1182_vm0, %v1348_v49, %v1350_v28  ;;  %v882_v55 = vadd.f32 %v754_v61, %v625_v20  ;;  %v1355_v60 = vsel %vm1182_vm0, %v1352_v29, %v16157_v50 }
 0x304   :  { %16688 = vst [vmem:[#allocation40_spill] sm:$0xff] %v12654_v11  ;;  %v5294_v3 = vsel %vm1182_vm0, %v16691_v1, %v16690_v62  ;;  %v5933_v54 = vsel %vm1182_vm0, %v16692_v8, %v16156_v34  ;;  %v1648_v62 = vadd.f32 %v1349_v59, %v879_v31  ;;  %v1649_v53 = vadd.f32 %v1351_v18, %v880_v30  ;;  %v16693_v30 = vld [vmem:[#allocation54_spill] sm:$0xff] }
 0x305   :  { %v12684_v1 = vadd.f32 %v5294_v3, %v5062_v58  ;;  %v1650_v34 = vadd.f32 %v1353_v41, %v881_v48  ;;  %v12688_v20 = vadd.f32 %v5933_v54, %v5701_v51  ;;  %v1651_v50 = vadd.f32 %v1355_v60, %v882_v55  ;;  %v16695_v3 = vld [vmem:[#allocation47_spill] sm:$0xff] }
 0x306   :  { %v2163_v37 = vmul.f32 %v12568_v19, %v7993_v26  ;;  %v16694_v58 = vrot.slane %v16693_v30, 1  ;;  %v1777_v51 = vadd.f32 %v8081_v6, %v1648_v62  ;;  %v1778_v41 = vadd.f32 %v8081_v6, %v1649_v53  ;;  %v16699_v60 = vld [vmem:[#allocation51_spill] sm:$0xff] }
 0x307   :  { %v16703_v62 = vld [vmem:[#allocation39_spill] sm:$0xff] }
 0x308   :  { %v4697_v7 = vld [vmem:[#allocation2 + $0x1c0] ss:$2 sm:$0xff]  ;;  %v4825_v25 = vld [vmem:[#allocation2 + $0x1c1] ss:$2 sm:$0xff] }
 0x309   :  { %v4924_v10 = vmul.f32 %v4697_v7, %v7993_v26  ;;  %v4988_v49 = vmul.f32 %v4825_v25, %v7981_v23  ;;  %v5116_v28 = vmul.f32 %v4697_v7, %v7995_v27  ;;  %v5755_v35 = vmul.f32 %v4697_v7, %v7981_v23 }
 0x30a   :  { %v6138_v8 = vmul.f32 %v4825_v25, %v7995_v27  ;;  %v5691_v29 = vmul.f32 %v4825_v25, %v7993_v26  ;;  %v16696_v7 = vrot.slane %v16695_v3, 1  ;;  %v16697_v25 = vld [vmem:[#allocation49_spill] sm:$0xff] }
 0x30b   :  { %v5052_v61 = vadd.f32 %v4988_v49, %v4924_v10  ;;  %v5271_v17 = vrot.slane %v5116_v28, 1  ;;  %v5910_v59 = vrot.slane %v5755_v35, 1  ;;  %v16698_v35 = vrot.slane %v16697_v25, 1 }
 0x30c   :  { %v6293_v31 = vrot.slane %v6138_v8, 1  ;;  %v16700_v10 = vrot.slane %v16699_v60, 1  ;;  %v1779_v28 = vadd.f32 %v8081_v6, %v1650_v34  ;;  %v2164_v25 = vmul.f32 %v12578_v52, %v7993_v26 }
 0x30d   :  { %v5274_v18 = vsel %vm1182_vm0, %v5271_v17, %v16694_v58  ;;  %v5272_v48 = vsel %vm1182_vm0, %v16696_v7, %v5271_v17  ;;  %v5913_v55 = vsel %vm1182_vm0, %v5910_v59, %v16698_v35  ;;  %v16701_v58 = vld [vmem:[#allocation48_spill] sm:$0xff]  ;;  %v16704_v7 = vrot.slane %v16703_v62, 1 }
 0x30e   :  { %v5435_v54 = vadd.f32 %v5274_v18, %v5052_v61  ;;  %v6296_v49 = vsel %vm1182_vm0, %v6293_v31, %v16700_v10  ;;  %v6074_v8 = vadd.f32 %v5913_v55, %v5691_v29  ;;  %v5434_v30 = vadd.f32 %v5272_v48, %v5051_v47 }
 0x30f   :  { %v16702_v3 = vrot.slane %v16701_v58, 1  ;;  %v6294_v53 = vsel %vm1182_vm0, %v16704_v7, %v6293_v31  ;;  %v12719_v35 = vmul.f32 %v12548_v46, %v7981_v23  ;;  %v1780_v29 = vadd.f32 %v8081_v6, %v1651_v50 }
 0x310   :  { %v5499_v61 = vadd.f32 %v5435_v54, %v8081_v6  ;;  %v6457_v34 = vadd.f32 %v6296_v49, %v6074_v8  ;;  %v5498_v47 = vadd.f32 %v5434_v30, %v8081_v6  ;;  %v1907_v31 = vmul.f32 %v8100_v15, %v1778_v41 }
 0x311   :  { %v5911_v17 = vsel %vm1182_vm0, %v16702_v3, %v5910_v59  ;;  %16705 = vst [vmem:[#allocation29_spill] sm:$0xff] %v12719_v35  ;;  %v1906_v59 = vmul.f32 %v8100_v15, %v1777_v51  ;;  %v2293_v54 = vmul.f32 %v12563_v63, %v7981_v23  ;;  %v1908_v46 = vmul.f32 %v8100_v15, %v1779_v28 }
 0x312   :  { %v6073_v18 = vadd.f32 %v5911_v17, %v5690_v21  ;;  %v2292_v21 = vmul.f32 %v12553_v57, %v7981_v23  ;;  %v5563_v55 = vmul.f32 %v5499_v61, %v8100_v15  ;;  %v2294_v60 = vmul.f32 %v12589_v13, %v7981_v23 }
 0x313   :  { %v12735_v50 = vmul.f32 %v12633_v38, %v7981_v23  ;;  %v6521_v51 = vadd.f32 %v6457_v34, %v8081_v6  ;;  %v16162_v57 = vrot.slane %v12719_v35, 1  ;;  %v5562_v63 = vmul.f32 %v5498_v47, %v8100_v15 }
 0x314   :  { %v6456_v48 = vadd.f32 %v6294_v53, %v6073_v18  ;;  %v2630_v10 = vrot.slane %v2292_v21, 1  ;;  %v2165_v49 = vmul.f32 %v12583_v39, %v7993_v26  ;;  %v2632_v28 = vrot.slane %v2293_v54, 1  ;;  %v7720_v18 = vld [vmem:[%s15935_s1 + $0x561] ss:$2 sm:$0xff] }
 0x315   :  { %16706 = vst [vmem:[#allocation33_spill] sm:$0xff] %v12735_v50  ;;  %v2634_v8 = vrot.slane %v2294_v60, 1  ;;  %v1909_v30 = vmul.f32 %v8100_v15, %v1780_v29  ;;  %v2166_v38 = vmul.f32 %v12594_v22, %v7993_v26  ;;  %v16160_v58 = vrot.slane %v12735_v50, 1 }
 0x316   :  { %v6520_v41 = vadd.f32 %v6456_v48, %v8081_v6  ;;  %v12749_v3 = vadd.f32 %v8103_v16, %v1906_v59  ;;  %v12752_v17 = vadd.f32 %v8103_v16, %v1907_v31  ;;  %v12755_v62 = vadd.f32 %v8103_v16, %v1908_v46 }
 0x317   :  { %v2631_v7 = vsel %vm1182_vm0, %v16162_v57, %v2630_v10  ;;  %v12761_v53 = vadd.f32 %v5563_v55, %v8103_v16  ;;  %v6585_v61 = vmul.f32 %v6521_v51, %v8100_v15  ;;  %v2633_v34 = vsel %vm1182_vm0, %v2630_v10, %v2632_v28  ;;  %v16709_v57 = vld [vmem:[#allocation42_spill] sm:$0xff] }
 0x318   :  { %v6584_v13 = vmul.f32 %v6520_v41, %v8100_v15  ;;  %v2635_v47 = vsel %vm1182_vm0, %v2632_v28, %v2634_v8  ;;  %v12770_v29 = vadd.f32 %v5562_v63, %v8103_v16  ;;  %v2637_v48 = vsel %vm1182_vm0, %v2634_v8, %v16160_v58 }
 0x319   :  { %v12780_v31 = vmul.f32 %v12568_v19, %v7995_v27  ;;  %v2930_v21 = vadd.f32 %v2631_v7, %v2163_v37  ;;  %v3059_v54 = vmul.f32 %v12578_v52, %v7995_v27  ;;  %v3060_v55 = vmul.f32 %v12583_v39, %v7995_v27 }
 0x31a   :  { %v12773_v59 = vadd.f32 %v6584_v13, %v8103_v16  ;;  %v3061_v46 = vmul.f32 %v12594_v22, %v7995_v27  ;;  %v2931_v60 = vadd.f32 %v2633_v34, %v2164_v25  ;;  %v2932_v51 = vadd.f32 %v2635_v47, %v2165_v49 }
 0x31b   :  { %16707 = vst [vmem:[#allocation46_spill] sm:$0xff] %v12780_v31  ;;  %v12789_v41 = vmul.f32 %v7720_v18, %v7995_v27  ;;  %v16161_v10 = vrot.slane %v12780_v31, 1  ;;  %v2933_v63 = vadd.f32 %v2637_v48, %v2166_v38  ;;  %v3397_v19 = vrot.slane %v3059_v54, 1  ;;  %v7697_v54 = vld [vmem:[%s15935_s1 + $0x3f1] ss:$2 sm:$0xff] }
 0x31c   :  { %v3399_v28 = vrot.slane %v3060_v55, 1  ;;  %v3401_v37 = vrot.slane %v3061_v46, 1  ;;  %v12793_v8 = vadd.f32 %v6585_v61, %v8103_v16  ;;  %v2038_v39 = vadd.f32 %v8103_v16, %v1909_v30 }
 0x31d   :  { %16708 = vst [vmem:[#allocation52_spill] sm:$0xff] %v12789_v41  ;;  %v16159_v22 = vrot.slane %v12789_v41, 1  ;;  %v6712_v25 = vmax.f32 %v12770_v29, 0.0  ;;  %v3398_v49 = vsel %vm1182_vm0, %v16161_v10, %v3397_v19  ;;  %v6776_v7 = vmax.f32 %v12773_v59, 0.0 }
 0x31e   :  { %v3400_v13 = vsel %vm1182_vm0, %v3397_v19, %v3399_v28  ;;  %v3402_v38 = vsel %vm1182_vm0, %v3399_v28, %v3401_v37  ;;  %v3697_v18 = vadd.f32 %v3398_v49, %v2930_v21  ;;  %v4209_v29 = vmax.f32 %v12749_v3, 0.0  ;;  %v7569_v21 = vld [vmem:[%s15935_s1 + $0x3f0] ss:$2 sm:$0xff]  ;;  %v7805_v3 = vld [vmem:[%s15935_s1 + $0x3e0] ss:$2 sm:$0xff] }
 0x31f   :  { %v3404_v61 = vsel %vm1182_vm0, %v3401_v37, %v16159_v22  ;;  %v3698_v30 = vadd.f32 %v3400_v13, %v2931_v60  ;;  %v3699_v34 = vadd.f32 %v3402_v38, %v2932_v51  ;;  %v4210_v48 = vmax.f32 %v12752_v17, 0.0 }
 0x320   :  { %v3700_v47 = vadd.f32 %v3404_v61, %v2933_v63  ;;  %v3825_v55 = vadd.f32 %v3697_v18, %v8081_v6  ;;  %v4211_v46 = vmax.f32 %v12755_v62, 0.0  ;;  %v602_v17 = vmul.f32 %v7805_v3, %v7993_v26  ;;  %v7806_v62 = vld [vmem:[%s15935_s1 + $0x3e1] ss:$2 sm:$0xff] }
 0x321   :  { %v3826_v59 = vadd.f32 %v3698_v30, %v8081_v6  ;;  %v3827_v60 = vadd.f32 %v3699_v34, %v8081_v6  ;;  %v603_v63 = vmul.f32 %v7569_v21, %v7993_v26  ;;  %v731_v19 = vmul.f32 %v7806_v62, %v7981_v23 }
 0x322   :  { %v3828_v51 = vadd.f32 %v3700_v47, %v8081_v6  ;;  %v3953_v28 = vmul.f32 %v3825_v55, %v8100_v15  ;;  %v4212_v49 = vmax.f32 %v2038_v39, 0.0  ;;  %v732_v13 = vmul.f32 %v7697_v54, %v7981_v23 }
 0x323   :  { %v3954_v37 = vmul.f32 %v3826_v59, %v8100_v15  ;;  %v3955_v38 = vmul.f32 %v3827_v60, %v8100_v15  ;;  %v859_v18 = vadd.f32 %v731_v19, %v602_v17  ;;  %v989_v30 = vmul.f32 %v7569_v21, %v7995_v27 }
 0x324   :  { %v3956_v61 = vmul.f32 %v3828_v51, %v8100_v15  ;;  %v4081_v34 = vadd.f32 %v3953_v28, %v8103_v16  ;;  %v860_v3 = vadd.f32 %v732_v13, %v603_v63  ;;  %v2143_v22 = vmul.f32 %v7806_v62, %v7993_v26  ;;  %v16711_v62 = vld [vmem:[#allocation56_spill] sm:$0xff] }
 0x325   :  { %v4082_v47 = vadd.f32 %v3954_v37, %v8103_v16  ;;  %v4083_v55 = vadd.f32 %v3955_v38, %v8103_v16  ;;  %v1308_v59 = vrot.slane %v989_v30, 1  ;;  %v2144_v58 = vmul.f32 %v7697_v54, %v7993_v26 }
 0x326   :  { %v4084_v39 = vadd.f32 %v3956_v61, %v8103_v16  ;;  %v4337_v60 = vmax.f32 %v4081_v34, 0.0  ;;  %v2272_v17 = vmul.f32 %v7569_v21, %v7981_v23  ;;  %v3039_v51 = vmul.f32 %v7697_v54, %v7995_v27 }
 0x327   :  { %v4338_v10 = vmax.f32 %v4082_v47, 0.0  ;;  %v4339_v19 = vmax.f32 %v4083_v55, 0.0  ;;  %v16710_v37 = vrot.slane %v16709_v57, 1  ;;  %v16712_v13 = vrot.slane %v16711_v62, 1 }
 0x328   :  { %v4340_v28 = vmax.f32 %v4084_v39, 0.0  ;;  %v4465_v61 = vmax.f32 %v4209_v29, %v4337_v60  ;;  %v2590_v50 = vrot.slane %v2272_v17, 1  ;;  %v3357_v21 = vrot.slane %v3039_v51, 1  ;;  %v7079_v51 = vpop.permute.xlu0 %7078 }
 0x329   :  { %v1309_v63 = vsel %vm1182_vm0, %v16710_v37, %v1308_v59  ;;  %v1311_v38 = vsel %vm1182_vm0, %v1308_v59, %v16712_v13  ;;  %v4466_v30 = vmax.f32 %v4210_v48, %v4338_v10  ;;  %v4467_v34 = vmax.f32 %v4211_v46, %v4339_v19  ;;  %v16713_v59 = vld [vmem:[#allocation43_spill] sm:$0xff]  ;;  %v7089_v37 = vpop.permute.xlu2 %7088 }
 0x32a   :  { %v1628_v52 = vadd.f32 %v1309_v63, %v859_v18  ;;  %v1629_v41 = vadd.f32 %v1311_v38, %v860_v3  ;;  %v4468_v47 = vmax.f32 %v4212_v49, %v4340_v28  ;;  %v6777_v54 = vmax.f32 %v12793_v8, 0.0  ;;  %4594 = vst.msk [vmem:[#allocation2 + $0x290] sm:$0xff] %vm4511_vm1, %v4465_v61  ;;  %v16715_v48 = vld [vmem:[#allocation11_spill] sm:$0xff]  ;;  %v16717_v18 = vld [vmem:[#allocation45_spill] sm:$0xff] }
 0x32b   :  { %v6840_v55 = vmax.f32 %v6712_v25, %v6776_v7  ;;  %4595 = vst.msk [vmem:[#allocation2 + $0x298] sm:$0xff] %vm4511_vm1, %v4466_v30  ;;  %v16714_v29 = vrot.slane %v16713_v59, 1  ;;  %v16716_v46 = vrot.slane %v16715_v48, 1  ;;  %v16718_v3 = vrot.slane %v16717_v18, 1  ;;  %v16719_v25 = vld [vmem:[#allocation15_spill] sm:$0xff] }
 0x32c   :  { %v1757_v57 = vadd.f32 %v8081_v6, %v1628_v52  ;;  %v1758_v39 = vadd.f32 %v8081_v6, %v1629_v41  ;;  %v16720_v7 = vrot.slane %v16719_v25, 1  ;;  %v16721_v41 = vrot.slane %v12654_v11, 1  ;;  %4596 = vst.msk [vmem:[#allocation2 + $0x2a0] sm:$0xff] %vm4511_vm1, %v4467_v34 }
 0x32d   :  { %v2591_v10 = vsel %vm1182_vm0, %v16714_v29, %v2590_v50  ;;  %v2593_v49 = vsel %vm1182_vm0, %v2590_v50, %v16716_v46  ;;  %v3358_v8 = vsel %vm1182_vm0, %v16718_v3, %v3357_v21  ;;  %v16722_v60 = vrot.slane %v12650_v24, 1  ;;  %4597 = vst.msk [vmem:[#allocation2 + $0x2a8] sm:$0xff] %vm4511_vm1, %v4468_v47 }
 0x32e   :  { %v3360_v52 = vsel %vm1182_vm0, %v3357_v21, %v16720_v7  ;;  %v1886_v19 = vmul.f32 %v8100_v15, %v1757_v57  ;;  %v2910_v50 = vadd.f32 %v2591_v10, %v2143_v22  ;;  %v2911_v28 = vadd.f32 %v2593_v49, %v2144_v58  ;;  %v7084_v57 = vpop.permute.xlu1 %7083  ;;  %v12940_v7 = vld [vmem:[%s15935_s1 + $0x5a0] ss:$2 sm:$0xff] }
 0x32f   :  { %v6316_v17 = vsel %vm1182_vm0, %v16722_v60, %v16721_v41  ;;  %v12876_v63 = vadd.f32 %v12543_v0, %v8103_v16  ;;  %v12880_v62 = vadd.f32 %v12556_v45, %v8103_v16  ;;  %v7374_v13 = vsel %vm4511_vm1, %v12570_v5, 0.0 }
 0x330   :  { %v1887_v38 = vmul.f32 %v8100_v15, %v1758_v39  ;;  %v7375_v61 = vadd.f32 %v7374_v13, %v12572_v4  ;;  %v5509_v58 = vadd.f32 %v12684_v1, %v8081_v6  ;;  %v3677_v22 = vadd.f32 %v3358_v8, %v2910_v50  ;;  %v7807_v8 = vld [vmem:[#allocation2 + $0x1e0] ss:$2 sm:$0xff]  ;;  %v12962_v13 = vld [vmem:[%s15935_s1 + $0x5a1] ss:$2 sm:$0xff] }
 0x331   :  { %v3678_v30 = vadd.f32 %v3360_v52, %v2911_v28  ;;  %v7376_v0 = vsel %vm4511_vm1, %v12531_v33, 0.0  ;;  %v6467_v45 = vadd.f32 %v6316_v17, %v12688_v20  ;;  %v16723_v34 = vmax.f32 %v12761_v53, 0.0 }
 0x332   :  { %v7288_v5 = vmul.f32 %v7079_v51, %v6840_v55  ;;  %v12895_v47 = vmul.f32 %v7089_v37, %v12537_v9  ;;  %v2015_v4 = vadd.f32 %v8103_v16, %v1886_v19  ;;  %v3805_v39 = vadd.f32 %v3677_v22, %v8081_v6  ;;  %v4723_v3 = vld [vmem:[#allocation2 + $0x290] ss:$2 sm:$0xff]  ;;  %v12947_v51 = vld [vmem:[%s15935_s1 + $0x581] ss:$2 sm:$0xff]  ;;  %v12957_v37 = vld [vmem:[%s15935_s1 + $0x591] ss:$2 sm:$0xff] }
 0x333   :  { %v6841_v21 = vmax.f32 %v16723_v34, %v6777_v54  ;;  %v3806_v1 = vadd.f32 %v3678_v30, %v8081_v6  ;;  %v16724_v59 = vmax.f32 %v12512_v44, 0.0  ;;  %v16725_v33 = vmax.f32 %v12166_v40, 0.0  ;;  %v12919_v40 = vld [vmem:[%s15935_s1 + $0x580] ss:$2 sm:$0xff]  ;;  %v12924_v44 = vld [vmem:[%s15935_s1 + $0x590] ss:$2 sm:$0xff] }
 0x334   :  { %v2016_v9 = vadd.f32 %v8103_v16, %v1887_v38  ;;  %v12910_v54 = vmul.f32 %v5509_v58, %v8100_v15  ;;  %v12912_v55 = vadd.f32 %v7376_v0, %v7375_v61  ;;  %v3933_v10 = vmul.f32 %v3805_v39, %v8100_v15  ;;  %v4725_v52 = vld [vmem:[#allocation2 + $0x2a0] ss:$2 sm:$0xff]  ;;  %v4851_v58 = vld [vmem:[#allocation2 + $0x291] ss:$2 sm:$0xff] }
 0x335   :  { %v12904_v29 = vmax.f32 %v16725_v33, %v16724_v59  ;;  %v3934_v48 = vmul.f32 %v3806_v1, %v8100_v15  ;;  %v12927_v46 = vadd.f32 %v6467_v45, %v8081_v6  ;;  %v12929_v49 = vmul.f32 %v7084_v57, %v6841_v21  ;;  %v12989_v1 = vld [vmem:[%s15935_s1 + $0x5b0] ss:$2 sm:$0xff] }
 0x336   :  { %v12932_v18 = vsel %vm4511_vm1, %v7288_v5, 0.0  ;;  %v12935_v25 = vmul.f32 %v7807_v8, %v7993_v26  ;;  %v4061_v41 = vadd.f32 %v3933_v10, %v8103_v16  ;;  %v4189_v17 = vmax.f32 %v2015_v4, 0.0 }
 0x337   :  { %v4062_v60 = vadd.f32 %v3934_v48, %v8103_v16  ;;  %v628_v19 = vmul.f32 %v12919_v40, %v7993_v26  ;;  %v12952_v50 = vmul.f32 %v4723_v3, %v7995_v27  ;;  %v4190_v28 = vmax.f32 %v2016_v9, 0.0  ;;  %v4853_v9 = vld [vmem:[#allocation2 + $0x2a1] ss:$2 sm:$0xff] }
 0x338   :  { %v629_v38 = vmul.f32 %v12924_v44, %v7993_v26  ;;  %v630_v61 = vmul.f32 %v12940_v7, %v7993_v26  ;;  %v12969_v22 = vmul.f32 %v4725_v52, %v7995_v27  ;;  %v12972_v30 = vmul.f32 %v4723_v3, %v7981_v23  ;;  %v7808_v48 = vld [vmem:[#allocation2 + $0x1e1] ss:$2 sm:$0xff] }
 0x339   :  { %16726 = vst [vmem:[#allocation54_spill] sm:$0xff] %v12952_v50  ;;  %v12975_v0 = vmul.f32 %v4725_v52, %v7981_v23  ;;  %v4317_v45 = vmax.f32 %v4061_v41, 0.0  ;;  %v4318_v34 = vmax.f32 %v4062_v60, 0.0  ;;  %v757_v21 = vmul.f32 %v12947_v51, %v7981_v23 }
 0x33a   :  { %16727 = vst [vmem:[#allocation47_spill] sm:$0xff] %v12969_v22  ;;  %v12981_v5 = vmul.f32 %v12919_v40, %v7995_v27  ;;  %v1015_v57 = vmul.f32 %v12924_v44, %v7995_v27  ;;  %v4937_v4 = vmul.f32 %v4723_v3, %v7993_v26  ;;  %v758_v59 = vmul.f32 %v12957_v37, %v7981_v23  ;;  %v13000_v3 = vld [vmem:[%s15935_s1 + $0x5c0] ss:$2 sm:$0xff] }
 0x33b   :  { %16728 = vst [vmem:[#allocation49_spill] sm:$0xff] %v12975_v0  ;;  %v4445_v39 = vmax.f32 %v4189_v17, %v4317_v45  ;;  %v759_v33 = vmul.f32 %v12962_v13, %v7981_v23  ;;  %v5001_v10 = vmul.f32 %v4851_v58, %v7981_v23  ;;  %v4446_v8 = vmax.f32 %v4190_v28, %v4318_v34  ;;  %v13011_v28 = vld [vmem:[%s15935_s1 + $0x5b1] ss:$2 sm:$0xff] }
 0x33c   :  { %16729 = vst [vmem:[#allocation51_spill] sm:$0xff] %v12981_v5  ;;  %v1016_v52 = vmul.f32 %v12940_v7, %v7995_v27  ;;  %v1017_v45 = vmul.f32 %v12989_v1, %v7995_v27  ;;  %v13018_v34 = vmul.f32 %v13000_v3, %v7995_v27  ;;  %v1360_v53 = vrot.slane %v1015_v57, 1 }
 0x33d   :  { %4574 = vst.msk [vmem:[#allocation2 + $0x1f0] sm:$0xff] %vm4511_vm1, %v4445_v39  ;;  %v13022_v39 = vmul.f32 %v4851_v58, %v7995_v27  ;;  %v13025_v17 = vmul.f32 %v4853_v9, %v7995_v27  ;;  %v4990_v41 = vmul.f32 %v7808_v48, %v7981_v23  ;;  %v5065_v2 = vadd.f32 %v5001_v10, %v4937_v4 }
 0x33e   :  { %4575 = vst.msk [vmem:[#allocation2 + $0x1f8] sm:$0xff] %vm4511_vm1, %v4446_v8  ;;  %v1362_v60 = vrot.slane %v1016_v52, 1  ;;  %v1364_v11 = vrot.slane %v1017_v45, 1  ;;  %v631_v8 = vmul.f32 %v12989_v1, %v7993_v26  ;;  %v760_v36 = vmul.f32 %v13011_v28, %v7981_v23 }
 0x33f   :  { %16730 = vst [vmem:[#allocation48_spill] sm:$0xff] %v13018_v34  ;;  %v885_v20 = vadd.f32 %v757_v21, %v628_v19  ;;  %v16733_v57 = vrot.slane %v12969_v22, 1  ;;  %v16734_v52 = vrot.slane %v12952_v50, 1  ;;  %v5704_v9 = vmul.f32 %v4851_v58, %v7993_v26 }
 0x340   :  { %16731 = vst [vmem:[#allocation39_spill] sm:$0xff] %v13022_v39  ;;  %v886_v35 = vadd.f32 %v758_v59, %v629_v38  ;;  %v16173_v12 = vrot.slane %v13018_v34, 1  ;;  %v16735_v4 = vrot.slane %v12975_v0, 1  ;;  %v16736_v10 = vrot.slane %v12972_v30, 1 }
 0x341   :  { %16732 = vst [vmem:[#allocation42_spill] sm:$0xff] %v13025_v17  ;;  %v5300_v31 = vsel %vm1182_vm0, %v16734_v52, %v16733_v57  ;;  %v887_v24 = vadd.f32 %v759_v33, %v630_v61  ;;  %v16737_v19 = vrot.slane %v12981_v5, 1  ;;  %v1363_v22 = vsel %vm1182_vm0, %v1360_v53, %v1362_v60 }
 0x342   :  { %v5939_v45 = vsel %vm1182_vm0, %v16736_v10, %v16735_v4  ;;  %v13050_v57 = vadd.f32 %v12932_v18, %v12912_v55  ;;  %v1365_v59 = vsel %vm1182_vm0, %v1362_v60, %v1364_v11  ;;  %v13055_v52 = vadd.f32 %v5300_v31, %v5065_v2 }
 0x343   :  { %v1361_v21 = vsel %vm1182_vm0, %v16737_v19, %v1360_v53  ;;  %v5054_v61 = vadd.f32 %v4990_v41, %v12935_v25  ;;  %v5693_v33 = vmul.f32 %v7808_v48, %v7993_v26  ;;  %v888_v4 = vadd.f32 %v760_v36, %v631_v8 }
 0x344   :  { %v13059_v10 = vadd.f32 %v5939_v45, %v5704_v9  ;;  %v1367_v55 = vsel %vm1182_vm0, %v1364_v11, %v16173_v12  ;;  %v1654_v18 = vadd.f32 %v1361_v21, %v885_v20  ;;  %v1655_v38 = vadd.f32 %v1363_v22, %v886_v35 }
 0x345   :  { %v4703_v53 = vld [vmem:[#allocation2 + $0x1f0] ss:$2 sm:$0xff]  ;;  %v4831_v19 = vld [vmem:[#allocation2 + $0x1f1] ss:$2 sm:$0xff]  ;;  %v1656_v25 = vadd.f32 %v1365_v59, %v887_v24  ;;  %v16738_v48 = vrot.slane %v13025_v17, 1  ;;  %v16739_v36 = vrot.slane %v13022_v39, 1  ;;  %v2169_v35 = vmul.f32 %v12947_v51, %v7993_v26 }
 0x346   :  { %v4927_v58 = vmul.f32 %v4703_v53, %v7993_v26  ;;  %v4991_v2 = vmul.f32 %v4831_v19, %v7981_v23  ;;  %v5119_v31 = vmul.f32 %v4703_v53, %v7995_v27  ;;  %v5758_v60 = vmul.f32 %v4703_v53, %v7981_v23 }
 0x347   :  { %v13072_v41 = vsel %vm1182_vm0, %v16739_v36, %v16738_v48  ;;  %v6141_v11 = vmul.f32 %v4831_v19, %v7995_v27  ;;  %v5694_v8 = vmul.f32 %v4831_v19, %v7993_v26  ;;  %v1657_v9 = vadd.f32 %v1367_v55, %v888_v4  ;;  %v16741_v36 = vld [vmem:[#allocation9_spill] sm:$0xff] }
 0x348   :  { %v5055_v20 = vadd.f32 %v4991_v2, %v4927_v58  ;;  %v5277_v22 = vrot.slane %v5119_v31, 1  ;;  %v5916_v24 = vrot.slane %v5758_v60, 1  ;;  %v1783_v21 = vadd.f32 %v8081_v6, %v1654_v18  ;;  %v16746_v60 = vld [vmem:[#allocation10_spill] sm:$0xff] }
 0x349   :  { %v6299_v45 = vrot.slane %v6141_v11, 1  ;;  %v1784_v59 = vadd.f32 %v8081_v6, %v1655_v38  ;;  %v16740_v48 = vrot.slane %v11832_v56, 1  ;;  %v16742_v12 = vrot.slane %v16741_v36, 1 }
 0x34a   :  { %v1785_v58 = vadd.f32 %v8081_v6, %v1656_v25  ;;  %v2170_v19 = vmul.f32 %v12957_v37, %v7993_v26  ;;  %v16743_v55 = vrot.slane %v11845_v42, 1  ;;  %v16744_v38 = vrot.slane %v11861_v32, 1 }
 0x34b   :  { %v5280_v53 = vsel %vm1182_vm0, %v5277_v22, %v16740_v48  ;;  %v5278_v34 = vsel %vm1182_vm0, %v16742_v12, %v5277_v22  ;;  %v13098_v2 = vmul.f32 %v12919_v40, %v7981_v23  ;;  %v16747_v25 = vrot.slane %v16746_v60, 1  ;;  %v16748_v22 = vld [vmem:[#allocation34_spill] sm:$0xff] }
 0x34c   :  { %v5438_v4 = vadd.f32 %v5280_v53, %v5055_v20  ;;  %v5919_v18 = vsel %vm1182_vm0, %v5916_v24, %v16743_v55  ;;  %v6302_v56 = vsel %vm1182_vm0, %v6299_v45, %v16744_v38  ;;  %v5437_v12 = vadd.f32 %v5278_v34, %v5054_v61 }
 0x34d   :  { %16745 = vst [vmem:[#allocation56_spill] sm:$0xff] %v13098_v2  ;;  %v6077_v31 = vadd.f32 %v5919_v18, %v5694_v8  ;;  %v5917_v11 = vsel %vm1182_vm0, %v16747_v25, %v5916_v24  ;;  %v16749_v20 = vrot.slane %v16748_v22, 1  ;;  %v1786_v53 = vadd.f32 %v8081_v6, %v1657_v9  ;;  %v7726_v22 = vld [vmem:[%s15935_s1 + $0x5c1] ss:$2 sm:$0xff] }
 0x34e   :  { %v6076_v48 = vadd.f32 %v5917_v11, %v5693_v33  ;;  %v1912_v32 = vmul.f32 %v8100_v15, %v1783_v21  ;;  %v1913_v36 = vmul.f32 %v8100_v15, %v1784_v59  ;;  %v5501_v40 = vadd.f32 %v5437_v12, %v8081_v6 }
 0x34f   :  { %v6300_v42 = vsel %vm1182_vm0, %v16749_v20, %v6299_v45  ;;  %v6460_v55 = vadd.f32 %v6302_v56, %v6077_v31  ;;  %v2298_v34 = vmul.f32 %v12924_v44, %v7981_v23  ;;  %v2299_v61 = vmul.f32 %v12940_v7, %v7981_v23 }
 0x350   :  { %v6459_v8 = vadd.f32 %v6300_v42, %v6076_v48  ;;  %v1914_v24 = vmul.f32 %v8100_v15, %v1785_v58  ;;  %v2300_v33 = vmul.f32 %v12989_v1, %v7981_v23  ;;  %v13119_v9 = vmul.f32 %v13000_v3, %v7981_v23 }
 0x351   :  { %v5502_v45 = vadd.f32 %v5438_v4, %v8081_v6  ;;  %v6524_v21 = vadd.f32 %v6460_v55, %v8081_v6  ;;  %v16178_v59 = vrot.slane %v13098_v2, 1  ;;  %v2642_v44 = vrot.slane %v2298_v34, 1 }
 0x352   :  { %16750 = vst [vmem:[#allocation43_spill] sm:$0xff] %v13119_v9  ;;  %v5565_v18 = vmul.f32 %v5501_v40, %v8100_v15  ;;  %v6523_v7 = vadd.f32 %v6459_v8, %v8081_v6  ;;  %v2644_v38 = vrot.slane %v2299_v61, 1  ;;  %v2646_v58 = vrot.slane %v2300_v33, 1 }
 0x353   :  { %v1915_v56 = vmul.f32 %v8100_v15, %v1786_v53  ;;  %v2171_v1 = vmul.f32 %v12962_v13, %v7993_v26  ;;  %v2172_v3 = vmul.f32 %v13011_v28, %v7993_v26  ;;  %v16176_v4 = vrot.slane %v13119_v9, 1 }
 0x354   :  { %v6587_v31 = vmul.f32 %v6523_v7, %v8100_v15  ;;  %v13134_v12 = vadd.f32 %v8103_v16, %v1912_v32  ;;  %v13137_v60 = vadd.f32 %v8103_v16, %v1913_v36  ;;  %v2643_v25 = vsel %vm1182_vm0, %v16178_v59, %v2642_v44 }
 0x355   :  { %v5566_v11 = vmul.f32 %v5502_v45, %v8100_v15  ;;  %v13147_v20 = vadd.f32 %v8103_v16, %v1914_v24  ;;  %v2645_v42 = vsel %vm1182_vm0, %v2642_v44, %v2644_v38  ;;  %v2647_v48 = vsel %vm1182_vm0, %v2644_v38, %v2646_v58 }
 0x356   :  { %v6588_v53 = vmul.f32 %v6524_v21, %v8100_v15  ;;  %v5629_v32 = vadd.f32 %v5565_v18, %v8103_v16  ;;  %v6651_v36 = vadd.f32 %v6587_v31, %v8103_v16  ;;  %v2649_v55 = vsel %vm1182_vm0, %v2646_v58, %v16176_v4 }
 0x357   :  { %v2936_v40 = vadd.f32 %v2643_v25, %v2169_v35  ;;  %v13159_v34 = vmul.f32 %v12947_v51, %v7995_v27  ;;  %v3065_v61 = vmul.f32 %v12957_v37, %v7995_v27  ;;  %v3066_v8 = vmul.f32 %v12962_v13, %v7995_v27 }
 0x358   :  { %v2937_v24 = vadd.f32 %v2645_v42, %v2170_v19  ;;  %v2938_v33 = vadd.f32 %v2647_v48, %v2171_v1  ;;  %v3067_v45 = vmul.f32 %v13011_v28, %v7995_v27  ;;  %v13168_v21 = vmul.f32 %v7726_v22, %v7995_v27 }
 0x359   :  { %16751 = vst [vmem:[#allocation11_spill] sm:$0xff] %v13159_v34  ;;  %v2939_v44 = vadd.f32 %v2649_v55, %v2172_v3  ;;  %v16177_v35 = vrot.slane %v13159_v34, 1  ;;  %v3409_v18 = vrot.slane %v3065_v61, 1  ;;  %v3411_v51 = vrot.slane %v3066_v8, 1  ;;  %v7809_v61 = vld [vmem:[%s15935_s1 + $0x440] ss:$2 sm:$0xff] }
 0x35a   :  { %16752 = vst [vmem:[#allocation45_spill] sm:$0xff] %v13168_v21  ;;  %v6715_v7 = vmax.f32 %v5629_v32, 0.0  ;;  %v6779_v38 = vmax.f32 %v6651_v36, 0.0  ;;  %v3413_v58 = vrot.slane %v3067_v45, 1  ;;  %v16175_v37 = vrot.slane %v13168_v21, 1 }
 0x35b   :  { %v13173_v13 = vadd.f32 %v5566_v11, %v8103_v16  ;;  %v2044_v19 = vadd.f32 %v8103_v16, %v1915_v56  ;;  %v3410_v28 = vsel %vm1182_vm0, %v16177_v35, %v3409_v18  ;;  %v3412_v1 = vsel %vm1182_vm0, %v3409_v18, %v3411_v51  ;;  %v7703_v32 = vld [vmem:[%s15935_s1 + $0x451] ss:$2 sm:$0xff]  ;;  %v7575_v45 = vld [vmem:[%s15935_s1 + $0x450] ss:$2 sm:$0xff]  ;;  %v7810_v18 = vld [vmem:[%s15935_s1 + $0x441] ss:$2 sm:$0xff] }
 0x35c   :  { %v13181_v3 = vadd.f32 %v6588_v53, %v8103_v16  ;;  %v3414_v31 = vsel %vm1182_vm0, %v3411_v51, %v3413_v58  ;;  %v3416_v25 = vsel %vm1182_vm0, %v3413_v58, %v16175_v37  ;;  %v3703_v22 = vadd.f32 %v3410_v28, %v2936_v40  ;;  %v16755_v37 = vld [vmem:[#allocation14_spill] sm:$0xff] }
 0x35d   :  { %v3704_v11 = vadd.f32 %v3412_v1, %v2937_v24  ;;  %v3705_v42 = vadd.f32 %v3414_v31, %v2938_v33  ;;  %v3706_v48 = vadd.f32 %v3416_v25, %v2939_v44  ;;  %v4215_v56 = vmax.f32 %v13134_v12, 0.0 }
 0x35e   :  { %v13191_v36 = vmax.f32 %v6715_v7, %v6779_v38  ;;  %v3831_v53 = vadd.f32 %v3703_v22, %v8081_v6  ;;  %v4216_v55 = vmax.f32 %v13137_v60, 0.0  ;;  %v608_v40 = vmul.f32 %v7809_v61, %v7993_v26 }
 0x35f   :  { %v3832_v8 = vadd.f32 %v3704_v11, %v8081_v6  ;;  %v3833_v12 = vadd.f32 %v3705_v42, %v8081_v6  ;;  %v3834_v24 = vadd.f32 %v3706_v48, %v8081_v6  ;;  %v4217_v33 = vmax.f32 %v13147_v20, 0.0 }
 0x360   :  { %v3959_v60 = vmul.f32 %v3831_v53, %v8100_v15  ;;  %v609_v44 = vmul.f32 %v7575_v45, %v7993_v26  ;;  %v737_v51 = vmul.f32 %v7810_v18, %v7981_v23  ;;  %v738_v7 = vmul.f32 %v7703_v32, %v7981_v23 }
 0x361   :  { %v3960_v38 = vmul.f32 %v3832_v8, %v8100_v15  ;;  %v3961_v20 = vmul.f32 %v3833_v12, %v8100_v15  ;;  %v3962_v58 = vmul.f32 %v3834_v24, %v8100_v15  ;;  %v4218_v28 = vmax.f32 %v2044_v19, 0.0 }
 0x362   :  { %v4087_v1 = vadd.f32 %v3959_v60, %v8103_v16  ;;  %v865_v31 = vadd.f32 %v737_v51, %v608_v40  ;;  %v866_v25 = vadd.f32 %v738_v7, %v609_v44  ;;  %v995_v22 = vmul.f32 %v7575_v45, %v7995_v27  ;;  %v16753_v7 = vld [vmem:[#allocation50_spill] sm:$0xff] }
 0x363   :  { %v4088_v11 = vadd.f32 %v3960_v38, %v8103_v16  ;;  %v4089_v42 = vadd.f32 %v3961_v20, %v8103_v16  ;;  %v4090_v48 = vadd.f32 %v3962_v58, %v8103_v16  ;;  %v2149_v53 = vmul.f32 %v7810_v18, %v7993_v26 }
 0x364   :  { %v4343_v61 = vmax.f32 %v4087_v1, 0.0  ;;  %v1320_v8 = vrot.slane %v995_v22, 1  ;;  %v2150_v12 = vmul.f32 %v7703_v32, %v7993_v26  ;;  %v2278_v19 = vmul.f32 %v7575_v45, %v7981_v23 }
 0x365   :  { %v4344_v24 = vmax.f32 %v4088_v11, 0.0  ;;  %v4345_v60 = vmax.f32 %v4089_v42, 0.0  ;;  %v4346_v40 = vmax.f32 %v4090_v48, 0.0  ;;  %v3045_v44 = vmul.f32 %v7703_v32, %v7995_v27  ;;  %v16757_v11 = vld [vmem:[#allocation53_spill] sm:$0xff]  ;;  %v16759_v32 = vld [vmem:[#allocation31_spill] sm:$0xff] }
 0x366   :  { %v4471_v51 = vmax.f32 %v4215_v56, %v4343_v61  ;;  %v16754_v38 = vrot.slane %v16753_v7, 1  ;;  %v16756_v58 = vrot.slane %v16755_v37, 1  ;;  %v2602_v1 = vrot.slane %v2278_v19, 1  ;;  %v16761_v19 = vld [vmem:[#allocation55_spill] sm:$0xff] }
 0x367   :  { %v4472_v22 = vmax.f32 %v4216_v55, %v4344_v24  ;;  %v4473_v4 = vmax.f32 %v4217_v33, %v4345_v60  ;;  %v4474_v35 = vmax.f32 %v4218_v28, %v4346_v40  ;;  %v16758_v42 = vrot.slane %v16757_v11, 1  ;;  %v16763_v40 = vld [vmem:[#allocation23_spill] sm:$0xff] }
 0x368   :  { %v1321_v20 = vsel %vm1182_vm0, %v16754_v38, %v1320_v8  ;;  %v1323_v18 = vsel %vm1182_vm0, %v1320_v8, %v16756_v58  ;;  %4600 = vst.msk [vmem:[#allocation2 + $0x2c0] sm:$0xff] %vm4511_vm1, %v4471_v51  ;;  %v16760_v48 = vrot.slane %v16759_v32, 1  ;;  %v3369_v7 = vrot.slane %v3045_v44, 1  ;;  %v7094_v8 = vpop.permute.xlu0 %7093 }
 0x369   :  { %v1634_v59 = vadd.f32 %v1321_v20, %v865_v31  ;;  %v1635_v45 = vadd.f32 %v1323_v18, %v866_v25  ;;  %v2603_v56 = vsel %vm1182_vm0, %v16758_v42, %v2602_v1  ;;  %v6470_v37 = vadd.f32 %v13072_v41, %v13059_v10  ;;  %4601 = vst.msk [vmem:[#allocation2 + $0x2c8] sm:$0xff] %vm4511_vm1, %v4472_v22  ;;  %v7104_v20 = vpop.permute.xlu2 %7103  ;;  %v7099_v42 = vpop.permute.xlu1 %7098 }
 0x36a   :  { %v2605_v61 = vsel %vm1182_vm0, %v2602_v1, %v16760_v48  ;;  %v2916_v33 = vadd.f32 %v2603_v56, %v2149_v53  ;;  %v6716_v31 = vmax.f32 %v13173_v13, 0.0  ;;  %4602 = vst.msk [vmem:[#allocation2 + $0x2d0] sm:$0xff] %vm4511_vm1, %v4473_v4  ;;  %v16762_v24 = vrot.slane %v16761_v19, 1 }
 0x36b   :  { %v1763_v55 = vadd.f32 %v8081_v6, %v1634_v59  ;;  %v2917_v28 = vadd.f32 %v2605_v61, %v2150_v12  ;;  %v1764_v25 = vadd.f32 %v8081_v6, %v1635_v45  ;;  %v16764_v44 = vrot.slane %v16763_v40, 1  ;;  %4603 = vst.msk [vmem:[#allocation2 + $0x2d8] sm:$0xff] %vm4511_vm1, %v4474_v35  ;;  %v13330_v40 = vld [vmem:[%s15935_s1 + $0x5f1] ss:$2 sm:$0xff] }
 0x36c   :  { %v3370_v60 = vsel %vm1182_vm0, %v16762_v24, %v3369_v7  ;;  %v6780_v41 = vmax.f32 %v13181_v3, 0.0  ;;  %v13256_v4 = vadd.f32 %v12910_v54, %v8103_v16  ;;  %v7380_v12 = vsel %vm4511_vm1, %v12929_v49, 0.0  ;;  %v13320_v24 = vld [vmem:[%s15935_s1 + $0x610] ss:$2 sm:$0xff] }
 0x36d   :  { %v3372_v10 = vsel %vm1182_vm0, %v3369_v7, %v16764_v44  ;;  %v1892_v59 = vmul.f32 %v8100_v15, %v1763_v55  ;;  %v3683_v53 = vadd.f32 %v3370_v60, %v2916_v33  ;;  %v7291_v51 = vmul.f32 %v7094_v8, %v13191_v36  ;;  %v13308_v33 = vld [vmem:[%s15935_s1 + $0x600] ss:$2 sm:$0xff]  ;;  %v13325_v60 = vld [vmem:[%s15935_s1 + $0x5e1] ss:$2 sm:$0xff] }
 0x36e   :  { %v3684_v13 = vadd.f32 %v3372_v10, %v2917_v28  ;;  %v1893_v38 = vmul.f32 %v8100_v15, %v1764_v25  ;;  %v6595_v3 = vmul.f32 %v12927_v46, %v8100_v15  ;;  %v7381_v35 = vadd.f32 %v7380_v12, %v13050_v57  ;;  %v7811_v10 = vld [vmem:[#allocation2 + $0x210] ss:$2 sm:$0xff]  ;;  %v13340_v12 = vld [vmem:[%s15935_s1 + $0x601] ss:$2 sm:$0xff] }
 0x36f   :  { %v3811_v58 = vadd.f32 %v3683_v53, %v8081_v6  ;;  %v5512_v54 = vadd.f32 %v13055_v52, %v8081_v6  ;;  %v6534_v1 = vadd.f32 %v6470_v37, %v8081_v6  ;;  %v2021_v49 = vadd.f32 %v8103_v16, %v1892_v59  ;;  %v7812_v59 = vld [vmem:[#allocation2 + $0x211] ss:$2 sm:$0xff] }
 0x370   :  { %v3812_v18 = vadd.f32 %v3684_v13, %v8081_v6  ;;  %v6844_v36 = vmax.f32 %v6716_v31, %v6780_v41  ;;  %v2022_v22 = vadd.f32 %v8103_v16, %v1893_v38  ;;  %v7382_v57 = vsel %vm4511_vm1, %v12895_v47, 0.0  ;;  %v4729_v38 = vld [vmem:[#allocation2 + $0x2c0] ss:$2 sm:$0xff] }
 0x371   :  { %v3939_v45 = vmul.f32 %v3811_v58, %v8100_v15  ;;  %v13277_v11 = vmul.f32 %v7104_v20, %v12904_v29  ;;  %v7384_v52 = vsel %vm4511_vm1, %v7291_v51, 0.0  ;;  %v16765_v56 = vmax.f32 %v12880_v62, 0.0  ;;  %v13303_v62 = vld [vmem:[%s15935_s1 + $0x5f0] ss:$2 sm:$0xff]  ;;  %v13345_v51 = vld [vmem:[%s15935_s1 + $0x611] ss:$2 sm:$0xff] }
 0x372   :  { %v3940_v46 = vmul.f32 %v3812_v18, %v8100_v15  ;;  %v16766_v32 = vmax.f32 %v12876_v63, 0.0  ;;  %v13287_v61 = vadd.f32 %v6595_v3, %v8103_v16  ;;  %v7383_v37 = vadd.f32 %v7382_v57, %v7381_v35  ;;  %v13298_v63 = vld [vmem:[%s15935_s1 + $0x5e0] ss:$2 sm:$0xff]  ;;  %v4731_v20 = vld [vmem:[#allocation2 + $0x2d0] ss:$2 sm:$0xff] }
 0x373   :  { %v13291_v47 = vmul.f32 %v5512_v54, %v8100_v15  ;;  %v4067_v29 = vadd.f32 %v3939_v45, %v8103_v16  ;;  %v4195_v55 = vmax.f32 %v2021_v49, 0.0  ;;  %v13311_v28 = vmul.f32 %v6534_v1, %v8100_v15 }
 0x374   :  { %v13284_v48 = vmax.f32 %v16766_v32, %v16765_v56  ;;  %v4068_v8 = vadd.f32 %v3940_v46, %v8103_v16  ;;  %v13313_v31 = vmul.f32 %v7099_v42, %v6844_v36  ;;  %v13315_v25 = vadd.f32 %v7384_v52, %v7383_v37  ;;  %v4859_v52 = vld [vmem:[#allocation2 + $0x2d1] ss:$2 sm:$0xff] }
 0x375   :  { %v4196_v19 = vmax.f32 %v2022_v22, 0.0  ;;  %v4323_v44 = vmax.f32 %v4067_v29, 0.0  ;;  %v4929_v41 = vmul.f32 %v7811_v10, %v7993_v26  ;;  %v4993_v53 = vmul.f32 %v7812_v59, %v7981_v23  ;;  %v4857_v22 = vld [vmem:[#allocation2 + $0x2c1] ss:$2 sm:$0xff]  ;;  %v13378_v29 = vld [vmem:[%s15935_s1 + $0x620] ss:$2 sm:$0xff] }
 0x376   :  { %v13335_v13 = vmul.f32 %v7812_v59, %v7993_v26  ;;  %v4324_v3 = vmax.f32 %v4068_v8, 0.0  ;;  %v634_v35 = vmul.f32 %v13298_v63, %v7993_v26  ;;  %v635_v58 = vmul.f32 %v13303_v62, %v7993_v26 }
 0x377   :  { %v636_v18 = vmul.f32 %v13308_v33, %v7993_v26  ;;  %v4451_v54 = vmax.f32 %v4195_v55, %v4323_v44  ;;  %v637_v1 = vmul.f32 %v13320_v24, %v7993_v26  ;;  %v763_v49 = vmul.f32 %v13325_v60, %v7981_v23 }
 0x378   :  { %v764_v36 = vmul.f32 %v13330_v40, %v7981_v23  ;;  %v4452_v45 = vmax.f32 %v4196_v19, %v4324_v3  ;;  %v765_v46 = vmul.f32 %v13340_v12, %v7981_v23  ;;  %v766_v57 = vmul.f32 %v13345_v51, %v7981_v23 }
 0x379   :  { %v13365_v42 = vmul.f32 %v13298_v63, %v7995_v27  ;;  %v4940_v56 = vmul.f32 %v4729_v38, %v7993_v26  ;;  %v13369_v32 = vmul.f32 %v4729_v38, %v7981_v23  ;;  %v13372_v37 = vmul.f32 %v4731_v20, %v7981_v23  ;;  %4580 = vst.msk [vmem:[#allocation2 + $0x220] sm:$0xff] %vm4511_vm1, %v4451_v54 }
 0x37a   :  { %v1021_v8 = vmul.f32 %v13303_v62, %v7995_v27  ;;  %4581 = vst.msk [vmem:[#allocation2 + $0x228] sm:$0xff] %vm4511_vm1, %v4452_v45  ;;  %v1022_v55 = vmul.f32 %v13308_v33, %v7995_v27  ;;  %v1023_v19 = vmul.f32 %v13320_v24, %v7995_v27  ;;  %v13389_v44 = vmul.f32 %v13378_v29, %v7995_v27 }
 0x37b   :  { %16767 = vst [vmem:[#allocation15_spill] sm:$0xff] %v13365_v42  ;;  %v5004_v59 = vmul.f32 %v4857_v22, %v7981_v23  ;;  %v13394_v3 = vmul.f32 %v4729_v38, %v7995_v27  ;;  %v13397_v54 = vmul.f32 %v4731_v20, %v7995_v27  ;;  %v13400_v7 = vmul.f32 %v4857_v22, %v7995_v27 }
 0x37c   :  { %16768 = vst [vmem:[#allocation9_spill] sm:$0xff] %v13372_v37  ;;  %v1372_v45 = vrot.slane %v1021_v8, 1  ;;  %v13403_v21 = vmul.f32 %v4859_v52, %v7995_v27  ;;  %v1374_v9 = vrot.slane %v1022_v55, 1  ;;  %v1376_v17 = vrot.slane %v1023_v19, 1 }
 0x37d   :  { %16769 = vst [vmem:[#allocation10_spill] sm:$0xff] %v13389_v44  ;;  %v16189_v10 = vrot.slane %v13372_v37, 1  ;;  %v891_v34 = vadd.f32 %v763_v49, %v634_v35  ;;  %v16188_v38 = vrot.slane %v13389_v44, 1  ;;  %v5707_v2 = vmul.f32 %v4857_v22, %v7993_v26 }
 0x37e   :  { %16770 = vst [vmem:[#allocation34_spill] sm:$0xff] %v13394_v3  ;;  %v5057_v20 = vadd.f32 %v4993_v53, %v4929_v41  ;;  %v892_v5 = vadd.f32 %v764_v36, %v635_v58  ;;  %v16774_v8 = vrot.slane %v13365_v42, 1  ;;  %v16191_v52 = vrot.slane %v13394_v3, 1 }
 0x37f   :  { %16771 = vst [vmem:[#allocation50_spill] sm:$0xff] %v13397_v54  ;;  %v16190_v55 = vrot.slane %v13397_v54, 1  ;;  %v893_v19 = vadd.f32 %v765_v46, %v636_v18  ;;  %v1375_v0 = vsel %vm1182_vm0, %v1372_v45, %v1374_v9  ;;  %v13415_v50 = vadd.f32 %v5004_v59, %v4940_v56 }
 0x380   :  { %16772 = vst [vmem:[#allocation14_spill] sm:$0xff] %v13400_v7  ;;  %v1373_v39 = vsel %vm1182_vm0, %v16774_v8, %v1372_v45  ;;  %v16195_v35 = vrot.slane %v13400_v7, 1  ;;  %v16194_v49 = vrot.slane %v13403_v21, 1  ;;  %v1377_v41 = vsel %vm1182_vm0, %v1374_v9, %v1376_v17 }
 0x381   :  { %16773 = vst [vmem:[#allocation53_spill] sm:$0xff] %v13403_v21  ;;  %v16775_v53 = vrot.slane %v13369_v32, 1  ;;  %v4709_v36 = vld [vmem:[#allocation2 + $0x220] ss:$2 sm:$0xff]  ;;  %v4837_v22 = vld [vmem:[#allocation2 + $0x221] ss:$2 sm:$0xff]  ;;  %v894_v8 = vadd.f32 %v766_v57, %v637_v1  ;;  %v1379_v18 = vsel %vm1182_vm0, %v1376_v17, %v16188_v38  ;;  %v1660_v46 = vadd.f32 %v1373_v39, %v891_v34 }
 0x382   :  { %v4930_v56 = vmul.f32 %v4709_v36, %v7993_v26  ;;  %v4994_v59 = vmul.f32 %v4837_v22, %v7981_v23  ;;  %v5122_v9 = vmul.f32 %v4709_v36, %v7995_v27  ;;  %v1661_v45 = vadd.f32 %v1375_v0, %v892_v5 }
 0x383   :  { %v5945_v58 = vsel %vm1182_vm0, %v16775_v53, %v16189_v10  ;;  %v13436_v53 = vsel %vm1182_vm0, %v16191_v52, %v16190_v55  ;;  %v5761_v1 = vmul.f32 %v4709_v36, %v7981_v23  ;;  %v6144_v57 = vmul.f32 %v4837_v22, %v7995_v27  ;;  %v16776_v36 = vld [vmem:[#allocation27_spill] sm:$0xff] }
 0x384   :  { %v1662_v17 = vadd.f32 %v1377_v41, %v893_v19  ;;  %v13440_v39 = vadd.f32 %v5945_v58, %v5707_v2  ;;  %v5058_v34 = vadd.f32 %v4994_v59, %v4930_v56  ;;  %v5283_v38 = vrot.slane %v5122_v9, 1  ;;  %v16778_v2 = vld [vmem:[#allocation17_spill] sm:$0xff]  ;;  %v16780_v9 = vld [vmem:[#allocation36_spill] sm:$0xff] }
 0x385   :  { %v5697_v10 = vmul.f32 %v4837_v22, %v7993_v26  ;;  %v13448_v0 = vsel %vm1182_vm0, %v16195_v35, %v16194_v49  ;;  %v5922_v5 = vrot.slane %v5761_v1, 1  ;;  %v6305_v55 = vrot.slane %v6144_v57, 1  ;;  %v16782_v1 = vld [vmem:[#allocation16_spill] sm:$0xff] }
 0x386   :  { %v1663_v52 = vadd.f32 %v1379_v18, %v894_v8  ;;  %v16777_v44 = vrot.slane %v16776_v36, 1  ;;  %v16779_v41 = vrot.slane %v16778_v2, 1  ;;  %v1789_v22 = vadd.f32 %v8081_v6, %v1660_v46  ;;  %v16784_v2 = vld [vmem:[#allocation12_spill] sm:$0xff]  ;;  %v16786_v46 = vld [vmem:[#allocation57_spill] sm:$0xff] }
 0x387   :  { %v1790_v56 = vadd.f32 %v8081_v6, %v1661_v45  ;;  %v16781_v21 = vrot.slane %v16780_v9, 1  ;;  %v16783_v57 = vrot.slane %v16782_v1, 1  ;;  %v1791_v18 = vadd.f32 %v8081_v6, %v1662_v17 }
 0x388   :  { %v5286_v19 = vsel %vm1182_vm0, %v5283_v38, %v16777_v44  ;;  %v5284_v58 = vsel %vm1182_vm0, %v16779_v41, %v5283_v38  ;;  %v16785_v35 = vrot.slane %v16784_v2, 1  ;;  %v16787_v41 = vrot.slane %v16786_v46, 1 }
 0x389   :  { %v5441_v59 = vadd.f32 %v5286_v19, %v5058_v34  ;;  %v5925_v49 = vsel %vm1182_vm0, %v5922_v5, %v16781_v21  ;;  %v6308_v8 = vsel %vm1182_vm0, %v6305_v55, %v16783_v57  ;;  %v5440_v36 = vadd.f32 %v5284_v58, %v5057_v20 }
 0x38a   :  { %v6080_v44 = vadd.f32 %v5925_v49, %v5697_v10  ;;  %v5923_v38 = vsel %vm1182_vm0, %v16785_v35, %v5922_v5  ;;  %v6306_v45 = vsel %vm1182_vm0, %v16787_v41, %v6305_v55  ;;  %v2175_v21 = vmul.f32 %v13325_v60, %v7993_v26 }
 0x38b   :  { %v6079_v34 = vadd.f32 %v5923_v38, %v13335_v13  ;;  %v2176_v19 = vmul.f32 %v13330_v40, %v7993_v26  ;;  %v13478_v10 = vmul.f32 %v13298_v63, %v7981_v23  ;;  %v5504_v49 = vadd.f32 %v5440_v36, %v8081_v6 }
 0x38c   :  { %v6463_v20 = vadd.f32 %v6308_v8, %v6080_v44  ;;  %v1792_v35 = vadd.f32 %v8081_v6, %v1663_v52  ;;  %v1918_v17 = vmul.f32 %v8100_v15, %v1789_v22  ;;  %v1919_v13 = vmul.f32 %v8100_v15, %v1790_v56 }
 0x38d   :  { %16788 = vst [vmem:[#allocation31_spill] sm:$0xff] %v13478_v10  ;;  %v6462_v55 = vadd.f32 %v6306_v45, %v6079_v34  ;;  %v2304_v5 = vmul.f32 %v13303_v62, %v7981_v23  ;;  %v2305_v58 = vmul.f32 %v13308_v33, %v7981_v23  ;;  %v5505_v9 = vadd.f32 %v5441_v59, %v8081_v6 }
 0x38e   :  { %v1920_v63 = vmul.f32 %v8100_v15, %v1791_v18  ;;  %v2306_v1 = vmul.f32 %v13320_v24, %v7981_v23  ;;  %v13494_v52 = vmul.f32 %v13378_v29, %v7981_v23  ;;  %v6527_v22 = vadd.f32 %v6463_v20, %v8081_v6  ;;  %v7732_v20 = vld [vmem:[%s15935_s1 + $0x621] ss:$2 sm:$0xff] }
 0x38f   :  { %v6526_v56 = vadd.f32 %v6462_v55, %v8081_v6  ;;  %v16199_v62 = vrot.slane %v13478_v10, 1  ;;  %v2654_v57 = vrot.slane %v2304_v5, 1  ;;  %v5568_v33 = vmul.f32 %v5504_v49, %v8100_v15 }
 0x390   :  { %16789 = vst [vmem:[#allocation55_spill] sm:$0xff] %v13494_v52  ;;  %v2177_v59 = vmul.f32 %v13340_v12, %v7993_v26  ;;  %v2656_v8 = vrot.slane %v2305_v58, 1  ;;  %v2658_v18 = vrot.slane %v2306_v1, 1  ;;  %v1921_v44 = vmul.f32 %v8100_v15, %v1792_v35 }
 0x391   :  { %v6590_v24 = vmul.f32 %v6526_v56, %v8100_v15  ;;  %v2178_v29 = vmul.f32 %v13345_v51, %v7993_v26  ;;  %v16197_v36 = vrot.slane %v13494_v52, 1  ;;  %v13508_v2 = vadd.f32 %v8103_v16, %v1918_v17 }
 0x392   :  { %v13511_v38 = vadd.f32 %v8103_v16, %v1919_v13  ;;  %v13514_v46 = vadd.f32 %v8103_v16, %v1920_v63  ;;  %v2655_v41 = vsel %vm1182_vm0, %v16199_v62, %v2654_v57  ;;  %v5569_v45 = vmul.f32 %v5505_v9, %v8100_v15  ;;  %v16792_v62 = vld [vmem:[#allocation18_spill] sm:$0xff] }
 0x393   :  { %v6591_v34 = vmul.f32 %v6527_v22, %v8100_v15  ;;  %v2657_v49 = vsel %vm1182_vm0, %v2654_v57, %v2656_v8  ;;  %v2659_v35 = vsel %vm1182_vm0, %v2656_v8, %v2658_v18  ;;  %v13527_v17 = vadd.f32 %v5568_v33, %v8103_v16 }
 0x394   :  { %v13530_v55 = vadd.f32 %v6590_v24, %v8103_v16  ;;  %v2661_v13 = vsel %vm1182_vm0, %v2658_v18, %v16197_v36  ;;  %v13537_v5 = vmul.f32 %v13325_v60, %v7995_v27  ;;  %v2942_v58 = vadd.f32 %v2655_v41, %v2175_v21 }
 0x395   :  { %v3071_v9 = vmul.f32 %v13330_v40, %v7995_v27  ;;  %v3072_v63 = vmul.f32 %v13340_v12, %v7995_v27  ;;  %v3073_v1 = vmul.f32 %v13345_v51, %v7995_v27  ;;  %v2943_v22 = vadd.f32 %v2657_v49, %v2176_v19 }
 0x396   :  { %16790 = vst [vmem:[#allocation23_spill] sm:$0xff] %v13537_v5  ;;  %v2944_v56 = vadd.f32 %v2659_v35, %v2177_v59  ;;  %v13546_v57 = vmul.f32 %v7732_v20, %v7995_v27  ;;  %v16198_v33 = vrot.slane %v13537_v5, 1  ;;  %v2945_v8 = vadd.f32 %v2661_v13, %v2178_v29 }
 0x397   :  { %v3421_v60 = vrot.slane %v3071_v9, 1  ;;  %v3423_v18 = vrot.slane %v3072_v63, 1  ;;  %v3425_v21 = vrot.slane %v3073_v1, 1  ;;  %v13550_v24 = vadd.f32 %v5569_v45, %v8103_v16  ;;  %v7709_v9 = vld [vmem:[%s15935_s1 + $0x4b1] ss:$2 sm:$0xff] }
 0x398   :  { %16791 = vst [vmem:[#allocation27_spill] sm:$0xff] %v13546_v57  ;;  %v13553_v40 = vadd.f32 %v6591_v34, %v8103_v16  ;;  %v2050_v12 = vadd.f32 %v8103_v16, %v1921_v44  ;;  %v16196_v51 = vrot.slane %v13546_v57, 1  ;;  %v6718_v19 = vmax.f32 %v13527_v17, 0.0 }
 0x399   :  { %v3422_v59 = vsel %vm1182_vm0, %v16198_v33, %v3421_v60  ;;  %v3424_v29 = vsel %vm1182_vm0, %v3421_v60, %v3423_v18  ;;  %v3426_v41 = vsel %vm1182_vm0, %v3423_v18, %v3425_v21  ;;  %v6782_v45 = vmax.f32 %v13530_v55, 0.0 }
 0x39a   :  { %v3428_v34 = vsel %vm1182_vm0, %v3425_v21, %v16196_v51  ;;  %v3709_v20 = vadd.f32 %v3422_v59, %v2942_v58  ;;  %v3710_v44 = vadd.f32 %v3424_v29, %v2943_v22  ;;  %v3711_v49 = vadd.f32 %v3426_v41, %v2944_v56  ;;  %v7581_v58 = vld [vmem:[%s15935_s1 + $0x4b0] ss:$2 sm:$0xff] }
 0x39b   :  { %v3712_v35 = vadd.f32 %v3428_v34, %v2945_v8  ;;  %v4221_v17 = vmax.f32 %v13508_v2, 0.0  ;;  %v4222_v13 = vmax.f32 %v13511_v38, 0.0  ;;  %v4223_v1 = vmax.f32 %v13514_v46, 0.0  ;;  %v7813_v2 = vld [vmem:[%s15935_s1 + $0x4a0] ss:$2 sm:$0xff] }
 0x39c   :  { %v3837_v63 = vadd.f32 %v3709_v20, %v8081_v6  ;;  %v3838_v55 = vadd.f32 %v3710_v44, %v8081_v6  ;;  %v614_v38 = vmul.f32 %v7813_v2, %v7993_v26  ;;  %v3839_v22 = vadd.f32 %v3711_v49, %v8081_v6  ;;  %v7814_v46 = vld [vmem:[%s15935_s1 + $0x4a1] ss:$2 sm:$0xff] }
 0x39d   :  { %v3840_v56 = vadd.f32 %v3712_v35, %v8081_v6  ;;  %v615_v8 = vmul.f32 %v7581_v58, %v7993_v26  ;;  %v743_v60 = vmul.f32 %v7814_v46, %v7981_v23  ;;  %v4224_v59 = vmax.f32 %v2050_v12, 0.0 }
 0x39e   :  { %v3965_v18 = vmul.f32 %v3837_v63, %v8100_v15  ;;  %v3966_v21 = vmul.f32 %v3838_v55, %v8100_v15  ;;  %v744_v29 = vmul.f32 %v7709_v9, %v7981_v23  ;;  %v3967_v41 = vmul.f32 %v3839_v22, %v8100_v15 }
 0x39f   :  { %v3968_v34 = vmul.f32 %v3840_v56, %v8100_v15  ;;  %v871_v20 = vadd.f32 %v743_v60, %v614_v38  ;;  %v1001_v44 = vmul.f32 %v7581_v58, %v7995_v27  ;;  %v2155_v51 = vmul.f32 %v7814_v46, %v7993_v26  ;;  %v16794_v46 = vld [vmem:[#allocation25_spill] sm:$0xff] }
 0x3a0   :  { %v4093_v49 = vadd.f32 %v3965_v18, %v8103_v16  ;;  %v4094_v35 = vadd.f32 %v3966_v21, %v8103_v16  ;;  %v872_v2 = vadd.f32 %v744_v29, %v615_v8  ;;  %v4095_v63 = vadd.f32 %v3967_v41, %v8103_v16 }
 0x3a1   :  { %v4096_v12 = vadd.f32 %v3968_v34, %v8103_v16  ;;  %v1332_v55 = vrot.slane %v1001_v44, 1  ;;  %v2156_v36 = vmul.f32 %v7709_v9, %v7993_v26  ;;  %v2284_v38 = vmul.f32 %v7581_v58, %v7981_v23 }
 0x3a2   :  { %v4349_v22 = vmax.f32 %v4093_v49, 0.0  ;;  %v4350_v33 = vmax.f32 %v4094_v35, 0.0  ;;  %v3051_v56 = vmul.f32 %v7709_v9, %v7995_v27  ;;  %v4351_v60 = vmax.f32 %v4095_v63, 0.0 }
 0x3a3   :  { %v4352_v18 = vmax.f32 %v4096_v12, 0.0  ;;  %v16793_v21 = vrot.slane %v16792_v62, 1  ;;  %v16795_v29 = vrot.slane %v16794_v46, 1  ;;  %v2614_v37 = vrot.slane %v2284_v38, 1 }
 0x3a4   :  { %v4477_v34 = vmax.f32 %v4221_v17, %v4349_v22  ;;  %v4478_v44 = vmax.f32 %v4222_v13, %v4350_v33  ;;  %v4479_v49 = vmax.f32 %v4223_v1, %v4351_v60  ;;  %v3381_v58 = vrot.slane %v3051_v56, 1  ;;  %v16796_v33 = vld [vmem:[#allocation26_spill] sm:$0xff]  ;;  %v16798_v1 = vld [vmem:[#allocation19_spill] sm:$0xff] }
 0x3a5   :  { %v1333_v8 = vsel %vm1182_vm0, %v16793_v21, %v1332_v55  ;;  %v1335_v41 = vsel %vm1182_vm0, %v1332_v55, %v16795_v29  ;;  %v4480_v35 = vmax.f32 %v4224_v59, %v4352_v18  ;;  %v5451_v9 = vadd.f32 %v13436_v53, %v13415_v50  ;;  %v7109_v21 = vpop.permute.xlu0 %7108 }
 0x3a6   :  { %v1640_v57 = vadd.f32 %v1333_v8, %v871_v20  ;;  %v1641_v52 = vadd.f32 %v1335_v41, %v872_v2  ;;  %v6846_v63 = vmax.f32 %v6718_v19, %v6782_v45  ;;  %4606 = vst.msk [vmem:[#allocation2 + $0x2f0] sm:$0xff] %vm4511_vm1, %v4477_v34  ;;  %v16797_v17 = vrot.slane %v16796_v33, 1  ;;  %v16800_v2 = vld [vmem:[#allocation20_spill] sm:$0xff]  ;;  %v16802_v19 = vld [vmem:[#allocation35_spill] sm:$0xff]  ;;  %v7119_v8 = vpop.permute.xlu2 %7118 }
 0x3a7   :  { %4607 = vst.msk [vmem:[#allocation2 + $0x2f8] sm:$0xff] %vm4511_vm1, %v4478_v44  ;;  %v16799_v59 = vrot.slane %v16798_v1, 1  ;;  %v16801_v50 = vrot.slane %v16800_v2, 1  ;;  %v16803_v45 = vrot.slane %v16802_v19, 1  ;;  %v6787_v56 = vmax.f32 %v13287_v61, 0.0 }
 0x3a8   :  { %v1769_v62 = vadd.f32 %v8081_v6, %v1640_v57  ;;  %v1770_v12 = vadd.f32 %v8081_v6, %v1641_v52  ;;  %v2615_v13 = vsel %vm1182_vm0, %v16797_v17, %v2614_v37  ;;  %v6473_v52 = vadd.f32 %v13448_v0, %v13440_v39  ;;  %4608 = vst.msk [vmem:[#allocation2 + $0x300] sm:$0xff] %vm4511_vm1, %v4479_v49  ;;  %v7815_v19 = vld [vmem:[#allocation2 + $0x240] ss:$2 sm:$0xff] }
 0x3a9   :  { %v2617_v20 = vsel %vm1182_vm0, %v2614_v37, %v16799_v59  ;;  %v3382_v53 = vsel %vm1182_vm0, %v16801_v50, %v3381_v58  ;;  %v3384_v57 = vsel %vm1182_vm0, %v3381_v58, %v16803_v45  ;;  %v2922_v22 = vadd.f32 %v2615_v13, %v2155_v51  ;;  %4609 = vst.msk [vmem:[#allocation2 + $0x308] sm:$0xff] %vm4511_vm1, %v4480_v35  ;;  %v7114_v58 = vpop.permute.xlu1 %7113  ;;  %v13683_v59 = vld [vmem:[%s15935_s1 + $0x650] ss:$2 sm:$0xff] }
 0x3aa   :  { %v1898_v55 = vmul.f32 %v8100_v15, %v1769_v62  ;;  %v2923_v38 = vadd.f32 %v2617_v20, %v2156_v36  ;;  %v6719_v37 = vmax.f32 %v13550_v24, 0.0  ;;  %v6783_v60 = vmax.f32 %v13553_v40, 0.0  ;;  %v13688_v20 = vld [vmem:[%s15935_s1 + $0x660] ss:$2 sm:$0xff] }
 0x3ab   :  { %v1899_v18 = vmul.f32 %v8100_v15, %v1770_v12  ;;  %v7386_v39 = vsel %vm4511_vm1, %v13313_v31, 0.0  ;;  %v7294_v0 = vmul.f32 %v7109_v21, %v6846_v63  ;;  %v3689_v46 = vadd.f32 %v3382_v53, %v2922_v22 }
 0x3ac   :  { %v3690_v29 = vadd.f32 %v3384_v57, %v2923_v38  ;;  %v13640_v36 = vadd.f32 %v13291_v47, %v8103_v16  ;;  %v13644_v61 = vadd.f32 %v13311_v28, %v8103_v16  ;;  %v7387_v24 = vadd.f32 %v7386_v39, %v13315_v25  ;;  %v13698_v57 = vld [vmem:[%s15935_s1 + $0x641] ss:$2 sm:$0xff]  ;;  %v13713_v39 = vld [vmem:[%s15935_s1 + $0x670] ss:$2 sm:$0xff] }
 0x3ad   :  { %v5515_v40 = vadd.f32 %v5451_v9, %v8081_v6  ;;  %v6537_v51 = vadd.f32 %v6473_v52, %v8081_v6  ;;  %v2027_v41 = vadd.f32 %v8103_v16, %v1898_v55  ;;  %v3817_v31 = vadd.f32 %v3689_v46, %v8081_v6  ;;  %v13703_v52 = vld [vmem:[%s15935_s1 + $0x651] ss:$2 sm:$0xff] }
 0x3ae   :  { %v3818_v34 = vadd.f32 %v3690_v29, %v8081_v6  ;;  %v7388_v47 = vsel %vm4511_vm1, %v13277_v11, 0.0  ;;  %v13655_v44 = vmul.f32 %v7119_v8, %v13284_v48  ;;  %v6847_v28 = vmax.f32 %v6719_v37, %v6783_v60  ;;  %v4735_v55 = vld [vmem:[#allocation2 + $0x2f0] ss:$2 sm:$0xff] }
 0x3af   :  { %v2028_v49 = vadd.f32 %v8103_v16, %v1899_v18  ;;  %v16804_v25 = vmax.f32 %v13256_v4, 0.0  ;;  %v7390_v9 = vsel %vm4511_vm1, %v7294_v0, 0.0  ;;  %v3945_v63 = vmul.f32 %v3817_v31, %v8100_v15  ;;  %v13673_v4 = vld [vmem:[%s15935_s1 + $0x640] ss:$2 sm:$0xff]  ;;  %v13718_v0 = vld [vmem:[%s15935_s1 + $0x661] ss:$2 sm:$0xff] }
 0x3b0   :  { %v3946_v62 = vmul.f32 %v3818_v34, %v8100_v15  ;;  %v13668_v48 = vmul.f32 %v5515_v40, %v8100_v15  ;;  %v7389_v21 = vadd.f32 %v7388_v47, %v7387_v24  ;;  %v13676_v33 = vmul.f32 %v6537_v51, %v8100_v15  ;;  %v4737_v22 = vld [vmem:[#allocation2 + $0x300] ss:$2 sm:$0xff]  ;;  %v13731_v51 = vld [vmem:[%s15935_s1 + $0x671] ss:$2 sm:$0xff] }
 0x3b1   :  { %v13660_v35 = vmax.f32 %v16804_v25, %v6787_v56  ;;  %v4073_v17 = vadd.f32 %v3945_v63, %v8103_v16  ;;  %v4201_v1 = vmax.f32 %v2027_v41, 0.0  ;;  %v13690_v2 = vmul.f32 %v7114_v58, %v6847_v28  ;;  %v7816_v56 = vld [vmem:[#allocation2 + $0x241] ss:$2 sm:$0xff]  ;;  %v4863_v47 = vld [vmem:[#allocation2 + $0x2f1] ss:$2 sm:$0xff] }
 0x3b2   :  { %v4074_v13 = vadd.f32 %v3946_v62, %v8103_v16  ;;  %v13692_v50 = vadd.f32 %v7390_v9, %v7389_v21  ;;  %v4202_v53 = vmax.f32 %v2028_v49, 0.0  ;;  %v4932_v45 = vmul.f32 %v7815_v19, %v7993_v26  ;;  %v4865_v9 = vld [vmem:[#allocation2 + $0x301] ss:$2 sm:$0xff]  ;;  %v13757_v21 = vld [vmem:[%s15935_s1 + $0x680] ss:$2 sm:$0xff] }
 0x3b3   :  { %v4329_v38 = vmax.f32 %v4073_v17, 0.0  ;;  %v4996_v37 = vmul.f32 %v7816_v56, %v7981_v23  ;;  %v640_v60 = vmul.f32 %v13673_v4, %v7993_v26  ;;  %v641_v18 = vmul.f32 %v13683_v59, %v7993_v26 }
 0x3b4   :  { %v4330_v8 = vmax.f32 %v4074_v13, 0.0  ;;  %v642_v46 = vmul.f32 %v13688_v20, %v7993_v26  ;;  %v13724_v29 = vmul.f32 %v13673_v4, %v7995_v27  ;;  %v1027_v24 = vmul.f32 %v13683_v59, %v7995_v27 }
 0x3b5   :  { %v4457_v40 = vmax.f32 %v4201_v1, %v4329_v38  ;;  %v643_v41 = vmul.f32 %v13713_v39, %v7993_v26  ;;  %v769_v31 = vmul.f32 %v13698_v57, %v7981_v23  ;;  %v770_v34 = vmul.f32 %v13703_v52, %v7981_v23 }
 0x3b6   :  { %16805 = vst [vmem:[#allocation17_spill] sm:$0xff] %v13724_v29  ;;  %v13740_v28 = vmul.f32 %v4735_v55, %v7981_v23  ;;  %v13743_v49 = vmul.f32 %v4737_v22, %v7981_v23  ;;  %v4458_v25 = vmax.f32 %v4202_v53, %v4330_v8  ;;  %v1028_v58 = vmul.f32 %v13688_v20, %v7995_v27 }
 0x3b7   :  { %v13748_v63 = vmul.f32 %v4735_v55, %v7995_v27  ;;  %v13751_v62 = vmul.f32 %v4737_v22, %v7995_v27  ;;  %4586 = vst.msk [vmem:[#allocation2 + $0x250] sm:$0xff] %vm4511_vm1, %v4457_v40  ;;  %v771_v17 = vmul.f32 %v13718_v0, %v7981_v23  ;;  %v1029_v13 = vmul.f32 %v13713_v39, %v7995_v27 }
 0x3b8   :  { %16806 = vst [vmem:[#allocation36_spill] sm:$0xff] %v13743_v49  ;;  %v772_v1 = vmul.f32 %v13731_v51, %v7981_v23  ;;  %v13768_v53 = vmul.f32 %v13757_v21, %v7995_v27  ;;  %v1384_v22 = vrot.slane %v1027_v24, 1  ;;  %v4943_v38 = vmul.f32 %v4735_v55, %v7993_v26 }
 0x3b9   :  { %16807 = vst [vmem:[#allocation16_spill] sm:$0xff] %v13751_v62  ;;  %v5007_v8 = vmul.f32 %v4863_v47, %v7981_v23  ;;  %v13774_v40 = vmul.f32 %v4863_v47, %v7995_v27  ;;  %v1386_v12 = vrot.slane %v1028_v58, 1  ;;  %v13779_v54 = vmul.f32 %v4865_v9, %v7995_v27 }
 0x3ba   :  { %4587 = vst.msk [vmem:[#allocation2 + $0x258] sm:$0xff] %vm4511_vm1, %v4458_v25  ;;  %v897_v5 = vadd.f32 %v769_v31, %v640_v60  ;;  %v16210_v10 = vrot.slane %v13748_v63, 1  ;;  %v16209_v24 = vrot.slane %v13751_v62, 1  ;;  %v1388_v19 = vrot.slane %v1029_v13, 1 }
 0x3bb   :  { %16808 = vst [vmem:[#allocation12_spill] sm:$0xff] %v13768_v53  ;;  %v5060_v42 = vadd.f32 %v4996_v37, %v4932_v45  ;;  %v5699_v7 = vmul.f32 %v7816_v56, %v7993_v26  ;;  %v898_v3 = vadd.f32 %v770_v34, %v641_v18  ;;  %v16811_v58 = vrot.slane %v13724_v29, 1 }
 0x3bc   :  { %16809 = vst [vmem:[#allocation57_spill] sm:$0xff] %v13774_v40  ;;  %v13788_v11 = vadd.f32 %v5007_v8, %v4943_v38  ;;  %v5710_v9 = vmul.f32 %v4863_v47, %v7993_v26  ;;  %v1387_v31 = vsel %vm1182_vm0, %v1384_v22, %v1386_v12  ;;  %v16812_v13 = vrot.slane %v13743_v49, 1 }
 0x3bd   :  { %16810 = vst [vmem:[#allocation18_spill] sm:$0xff] %v13779_v54  ;;  %v1385_v25 = vsel %vm1182_vm0, %v16811_v58, %v1384_v22  ;;  %v16813_v55 = vrot.slane %v13740_v28, 1  ;;  %v899_v37 = vadd.f32 %v771_v17, %v642_v46  ;;  %v900_v18 = vadd.f32 %v772_v1, %v643_v41 }
 0x3be   :  { %v13804_v34 = vsel %vm1182_vm0, %v16210_v10, %v16209_v24  ;;  %v1389_v22 = vsel %vm1182_vm0, %v1386_v12, %v1388_v19  ;;  %v16814_v8 = vrot.slane %v13768_v53, 1  ;;  %v1667_v17 = vadd.f32 %v1387_v31, %v898_v3  ;;  %v16816_v31 = vld [vmem:[#allocation13_spill] sm:$0xff] }
 0x3bf   :  { %v5951_v45 = vsel %vm1182_vm0, %v16813_v55, %v16812_v13  ;;  %v1666_v55 = vadd.f32 %v1385_v25, %v897_v5  ;;  %v2181_v12 = vmul.f32 %v13698_v57, %v7993_v26  ;;  %v16815_v3 = vrot.slane %v12607_v14, 1 }
 0x3c0   :  { %v1391_v58 = vsel %vm1182_vm0, %v1388_v19, %v16814_v8  ;;  %v13813_v1 = vadd.f32 %v5951_v45, %v5710_v9  ;;  %v1668_v19 = vadd.f32 %v1389_v22, %v899_v37  ;;  %v16817_v45 = vrot.slane %v16816_v31, 1  ;;  %v16819_v37 = vld [vmem:[#allocation32_spill] sm:$0xff] }
 0x3c1   :  { %v4715_v47 = vld [vmem:[#allocation2 + $0x250] ss:$2 sm:$0xff]  ;;  %v4843_v38 = vld [vmem:[#allocation2 + $0x251] ss:$2 sm:$0xff]  ;;  %v1669_v53 = vadd.f32 %v1391_v58, %v900_v18  ;;  %v1795_v49 = vadd.f32 %v8081_v6, %v1666_v55  ;;  %v1796_v62 = vadd.f32 %v8081_v6, %v1667_v17  ;;  %v16820_v18 = vrot.slane %v16819_v37, 1 }
 0x3c2   :  { %v4933_v13 = vmul.f32 %v4715_v47, %v7993_v26  ;;  %v4997_v46 = vmul.f32 %v4843_v38, %v7981_v23  ;;  %v5125_v41 = vmul.f32 %v4715_v47, %v7995_v27  ;;  %v5764_v24 = vmul.f32 %v4715_v47, %v7981_v23  ;;  %v16822_v55 = vld [vmem:[#allocation22_spill] sm:$0xff] }
 0x3c3   :  { %v6147_v10 = vmul.f32 %v4843_v38, %v7995_v27  ;;  %v5700_v5 = vmul.f32 %v4843_v38, %v7993_v26  ;;  %v13838_v22 = vmul.f32 %v13673_v4, %v7981_v23  ;;  %v16824_v17 = vld [vmem:[#allocation30_spill] sm:$0xff]  ;;  %v1798_v31 = vadd.f32 %v8081_v6, %v1669_v53 }
 0x3c4   :  { %v5061_v60 = vadd.f32 %v4997_v46, %v4933_v13  ;;  %v5289_v56 = vrot.slane %v5125_v41, 1  ;;  %v5928_v25 = vrot.slane %v5764_v24, 1  ;;  %v2182_v13 = vmul.f32 %v13703_v52, %v7993_v26 }
 0x3c5   :  { %v6311_v8 = vrot.slane %v6147_v10, 1  ;;  %v16818_v24 = vrot.slane %v12624_v43, 1  ;;  %16821 = vst [vmem:[#allocation25_spill] sm:$0xff] %v13838_v22  ;;  %v16823_v46 = vrot.slane %v16822_v55, 1  ;;  %v13859_v53 = vmul.f32 %v13757_v21, %v7981_v23 }
 0x3c6   :  { %v5292_v9 = vsel %vm1182_vm0, %v5289_v56, %v16815_v3  ;;  %v5290_v47 = vsel %vm1182_vm0, %v16817_v45, %v5289_v56  ;;  %v1924_v45 = vmul.f32 %v8100_v15, %v1795_v49  ;;  %v2184_v21 = vmul.f32 %v13731_v51, %v7993_v26 }
 0x3c7   :  { %v5444_v38 = vadd.f32 %v5292_v9, %v5061_v60  ;;  %v5931_v10 = vsel %vm1182_vm0, %v5928_v25, %v16818_v24  ;;  %v6314_v14 = vsel %vm1182_vm0, %v6311_v8, %v16820_v18  ;;  %v5443_v56 = vadd.f32 %v5290_v47, %v5060_v42  ;;  %16826 = vst [vmem:[#allocation26_spill] sm:$0xff] %v13859_v53 }
 0x3c8   :  { %v6083_v58 = vadd.f32 %v5931_v10, %v5700_v5  ;;  %v5929_v41 = vsel %vm1182_vm0, %v16823_v46, %v5928_v25  ;;  %v16825_v60 = vrot.slane %v16824_v17, 1  ;;  %v1797_v9 = vadd.f32 %v8081_v6, %v1668_v19 }
 0x3c9   :  { %v6082_v3 = vadd.f32 %v5929_v41, %v5699_v7  ;;  %v5507_v4 = vadd.f32 %v5443_v56, %v8081_v6  ;;  %v2310_v42 = vmul.f32 %v13683_v59, %v7981_v23  ;;  %v2311_v5 = vmul.f32 %v13688_v20, %v7981_v23  ;;  %v7738_v41 = vld [vmem:[%s15935_s1 + $0x681] ss:$2 sm:$0xff] }
 0x3ca   :  { %v6312_v43 = vsel %vm1182_vm0, %v16825_v60, %v6311_v8  ;;  %v6466_v24 = vadd.f32 %v6314_v14, %v6083_v58  ;;  %v1925_v47 = vmul.f32 %v8100_v15, %v1796_v62  ;;  %v2312_v7 = vmul.f32 %v13713_v39, %v7981_v23 }
 0x3cb   :  { %v6465_v25 = vadd.f32 %v6312_v43, %v6082_v3  ;;  %v5508_v49 = vadd.f32 %v5444_v38, %v8081_v6  ;;  %v16217_v8 = vrot.slane %v13838_v22, 1  ;;  %v2666_v59 = vrot.slane %v2310_v42, 1 }
 0x3cc   :  { %v6530_v19 = vadd.f32 %v6466_v24, %v8081_v6  ;;  %v5571_v10 = vmul.f32 %v5507_v4, %v8100_v15  ;;  %v2668_v37 = vrot.slane %v2311_v5, 1  ;;  %v2670_v62 = vrot.slane %v2312_v7, 1 }
 0x3cd   :  { %v6529_v20 = vadd.f32 %v6465_v25, %v8081_v6  ;;  %v2183_v39 = vmul.f32 %v13718_v0, %v7993_v26  ;;  %v2667_v38 = vsel %vm1182_vm0, %v16217_v8, %v2666_v59  ;;  %v16215_v18 = vrot.slane %v13859_v53, 1  ;;  %v7820_v53 = vld [vmem:[#allocation2 + $0x271] ss:$2 sm:$0xff] }
 0x3ce   :  { %v1926_v58 = vmul.f32 %v8100_v15, %v1797_v9  ;;  %v1927_v56 = vmul.f32 %v8100_v15, %v1798_v31  ;;  %v13878_v55 = vadd.f32 %v8103_v16, %v1924_v45  ;;  %v5572_v46 = vmul.f32 %v5508_v49, %v8100_v15 }
 0x3cf   :  { %v6593_v14 = vmul.f32 %v6529_v20, %v8100_v15  ;;  %v13885_v17 = vadd.f32 %v8103_v16, %v1925_v47  ;;  %v2669_v60 = vsel %vm1182_vm0, %v2666_v59, %v2668_v37  ;;  %v2671_v43 = vsel %vm1182_vm0, %v2668_v37, %v2670_v62 }
 0x3d0   :  { %v6594_v3 = vmul.f32 %v6530_v19, %v8100_v15  ;;  %v13891_v9 = vadd.f32 %v5571_v10, %v8103_v16  ;;  %v2673_v31 = vsel %vm1182_vm0, %v2670_v62, %v16215_v18  ;;  %v2948_v45 = vadd.f32 %v2667_v38, %v2181_v12 }
 0x3d1   :  { %v13897_v24 = vadd.f32 %v6593_v14, %v8103_v16  ;;  %v13901_v4 = vmul.f32 %v13698_v57, %v7995_v27  ;;  %v3077_v42 = vmul.f32 %v13703_v52, %v7995_v27  ;;  %v3078_v5 = vmul.f32 %v13718_v0, %v7995_v27 }
 0x3d2   :  { %v2949_v25 = vadd.f32 %v2669_v60, %v2182_v13  ;;  %v2950_v47 = vadd.f32 %v2671_v43, %v2183_v39  ;;  %v3079_v7 = vmul.f32 %v13731_v51, %v7995_v27  ;;  %v13910_v12 = vmul.f32 %v7738_v41, %v7995_v27  ;;  %v7715_v60 = vld [vmem:[%s15935_s1 + $0x511] ss:$2 sm:$0xff] }
 0x3d3   :  { %16827 = vst [vmem:[#allocation19_spill] sm:$0xff] %v13901_v4  ;;  %v2951_v49 = vadd.f32 %v2673_v31, %v2184_v21  ;;  %v16216_v19 = vrot.slane %v13901_v4, 1  ;;  %v3433_v59 = vrot.slane %v3077_v42, 1  ;;  %v3435_v57 = vrot.slane %v3078_v5, 1  ;;  %v7817_v31 = vld [vmem:[%s15935_s1 + $0x500] ss:$2 sm:$0xff] }
 0x3d4   :  { %16828 = vst [vmem:[#allocation20_spill] sm:$0xff] %v13910_v12  ;;  %v2055_v10 = vadd.f32 %v8103_v16, %v1926_v58  ;;  %v2056_v52 = vadd.f32 %v8103_v16, %v1927_v56  ;;  %v3437_v20 = vrot.slane %v3079_v7, 1  ;;  %v16214_v0 = vrot.slane %v13910_v12, 1  ;;  %v7818_v7 = vld [vmem:[%s15935_s1 + $0x501] ss:$2 sm:$0xff] }
 0x3d5   :  { %v13917_v13 = vadd.f32 %v5572_v46, %v8103_v16  ;;  %v13920_v51 = vadd.f32 %v6594_v3, %v8103_v16  ;;  %v3434_v37 = vsel %vm1182_vm0, %v16216_v19, %v3433_v59  ;;  %v3436_v62 = vsel %vm1182_vm0, %v3433_v59, %v3435_v57 }
 0x3d6   :  { %v6721_v39 = vmax.f32 %v13891_v9, 0.0  ;;  %v3438_v21 = vsel %vm1182_vm0, %v3435_v57, %v3437_v20  ;;  %v3440_v38 = vsel %vm1182_vm0, %v3437_v20, %v16214_v0  ;;  %v3715_v14 = vadd.f32 %v3434_v37, %v2948_v45  ;;  %v16831_v0 = vld [vmem:[#allocation28_spill] sm:$0xff] }
 0x3d7   :  { %v6785_v58 = vmax.f32 %v13897_v24, 0.0  ;;  %v3716_v56 = vadd.f32 %v3436_v62, %v2949_v25  ;;  %v3717_v46 = vadd.f32 %v3438_v21, %v2950_v47  ;;  %v3718_v41 = vadd.f32 %v3440_v38, %v2951_v49  ;;  %v7587_v47 = vld [vmem:[%s15935_s1 + $0x510] ss:$2 sm:$0xff] }
 0x3d8   :  { %v3843_v43 = vadd.f32 %v3715_v14, %v8081_v6  ;;  %v4227_v3 = vmax.f32 %v13878_v55, 0.0  ;;  %v4228_v9 = vmax.f32 %v13885_v17, 0.0  ;;  %v620_v45 = vmul.f32 %v7817_v31, %v7993_v26 }
 0x3d9   :  { %v3844_v24 = vadd.f32 %v3716_v56, %v8081_v6  ;;  %v3845_v42 = vadd.f32 %v3717_v46, %v8081_v6  ;;  %v3846_v5 = vadd.f32 %v3718_v41, %v8081_v6  ;;  %v4229_v25 = vmax.f32 %v2055_v10, 0.0 }
 0x3da   :  { %v3971_v55 = vmul.f32 %v3843_v43, %v8100_v15  ;;  %v621_v17 = vmul.f32 %v7587_v47, %v7993_v26  ;;  %v749_v49 = vmul.f32 %v7818_v7, %v7981_v23  ;;  %v750_v59 = vmul.f32 %v7715_v60, %v7981_v23 }
 0x3db   :  { %v3972_v57 = vmul.f32 %v3844_v24, %v8100_v15  ;;  %v3973_v10 = vmul.f32 %v3845_v42, %v8100_v15  ;;  %v3974_v20 = vmul.f32 %v3846_v5, %v8100_v15  ;;  %v4230_v37 = vmax.f32 %v2056_v52, 0.0 }
 0x3dc   :  { %v4099_v62 = vadd.f32 %v3971_v55, %v8103_v16  ;;  %v877_v21 = vadd.f32 %v749_v49, %v620_v45  ;;  %v878_v38 = vadd.f32 %v750_v59, %v621_v17  ;;  %v1007_v14 = vmul.f32 %v7587_v47, %v7995_v27  ;;  %v16829_v59 = vld [vmem:[#allocation21_spill] sm:$0xff] }
 0x3dd   :  { %v4100_v56 = vadd.f32 %v3972_v57, %v8103_v16  ;;  %v4101_v46 = vadd.f32 %v3973_v10, %v8103_v16  ;;  %v4102_v41 = vadd.f32 %v3974_v20, %v8103_v16  ;;  %v2161_v43 = vmul.f32 %v7818_v7, %v7993_v26 }
 0x3de   :  { %v4355_v31 = vmax.f32 %v4099_v62, 0.0  ;;  %v1344_v24 = vrot.slane %v1007_v14, 1  ;;  %v2162_v42 = vmul.f32 %v7715_v60, %v7993_v26  ;;  %v2290_v52 = vmul.f32 %v7587_v47, %v7981_v23 }
 0x3df   :  { %v4356_v5 = vmax.f32 %v4100_v56, 0.0  ;;  %v4357_v55 = vmax.f32 %v4101_v46, 0.0  ;;  %v4358_v45 = vmax.f32 %v4102_v41, 0.0  ;;  %v3057_v17 = vmul.f32 %v7715_v60, %v7995_v27  ;;  %v16833_v56 = vld [vmem:[#allocation24_spill] sm:$0xff] }
 0x3e0   :  { %v4483_v49 = vmax.f32 %v4227_v3, %v4355_v31  ;;  %v16830_v57 = vrot.slane %v16829_v59, 1  ;;  %v16832_v20 = vrot.slane %v16831_v0, 1  ;;  %v2626_v62 = vrot.slane %v2290_v52, 1  ;;  %v16835_v3 = vld [vmem:[#allocation29_spill] sm:$0xff] }
 0x3e1   :  { %v4484_v14 = vmax.f32 %v4228_v9, %v4356_v5  ;;  %v4485_v18 = vmax.f32 %v4229_v25, %v4357_v55  ;;  %v4486_v19 = vmax.f32 %v4230_v37, %v4358_v45  ;;  %v16834_v46 = vrot.slane %v16833_v56, 1  ;;  %v16839_v5 = vld [vmem:[#allocation44_spill] sm:$0xff] }
 0x3e2   :  { %v1345_v10 = vsel %vm1182_vm0, %v16830_v57, %v1344_v24  ;;  %v1347_v7 = vsel %vm1182_vm0, %v1344_v24, %v16832_v20  ;;  %4612 = vst.msk [vmem:[#allocation2 + $0x320] sm:$0xff] %vm4511_vm1, %v4483_v49  ;;  %v16836_v41 = vrot.slane %v16835_v3, 1  ;;  %v3393_v59 = vrot.slane %v3057_v17, 1  ;;  %v16841_v17 = vld [vmem:[#allocation46_spill] sm:$0xff]  ;;  %v7124_v20 = vpop.permute.xlu0 %7123 }
 0x3e3   :  { %v1646_v8 = vadd.f32 %v1345_v10, %v877_v21  ;;  %v1647_v47 = vadd.f32 %v1347_v7, %v878_v38  ;;  %v2627_v60 = vsel %vm1182_vm0, %v16834_v46, %v2626_v62  ;;  %v16837_v0 = vrot.slane %v13779_v54, 1  ;;  %4613 = vst.msk [vmem:[#allocation2 + $0x328] sm:$0xff] %vm4511_vm1, %v4484_v14  ;;  %v7134_v14 = vpop.permute.xlu2 %7133 }
 0x3e4   :  { %v2629_v31 = vsel %vm1182_vm0, %v2626_v62, %v16836_v41  ;;  %v16838_v24 = vrot.slane %v13774_v40, 1  ;;  %v2928_v37 = vadd.f32 %v2627_v60, %v2161_v43  ;;  %v6849_v38 = vmax.f32 %v6721_v39, %v6785_v58  ;;  %4614 = vst.msk [vmem:[#allocation2 + $0x330] sm:$0xff] %vm4511_vm1, %v4485_v18  ;;  %v7824_v40 = vld [vmem:[#allocation2 + $0x2a1] ss:$2 sm:$0xff] }
 0x3e5   :  { %v1775_v25 = vadd.f32 %v8081_v6, %v1646_v8  ;;  %v2929_v21 = vadd.f32 %v2629_v31, %v2162_v42  ;;  %v1776_v52 = vadd.f32 %v8081_v6, %v1647_v47  ;;  %v16840_v55 = vrot.slane %v16839_v5, 1  ;;  %4615 = vst.msk [vmem:[#allocation2 + $0x338] sm:$0xff] %vm4511_vm1, %v4486_v19  ;;  %v14049_v5 = vld [vmem:[%s15935_s1 + $0x6a1] ss:$2 sm:$0xff] }
 0x3e6   :  { %v6334_v9 = vsel %vm1182_vm0, %v16838_v24, %v16837_v0  ;;  %v16842_v49 = vrot.slane %v16841_v17, 1  ;;  %v5454_v10 = vadd.f32 %v13804_v34, %v13788_v11  ;;  %v6722_v43 = vmax.f32 %v13917_v13, 0.0  ;;  %v7129_v24 = vpop.permute.xlu1 %7128 }
 0x3e7   :  { %v3394_v45 = vsel %vm1182_vm0, %v16840_v55, %v3393_v59  ;;  %v1904_v8 = vmul.f32 %v8100_v15, %v1775_v25  ;;  %v6476_v58 = vadd.f32 %v6334_v9, %v13813_v1  ;;  %v6786_v42 = vmax.f32 %v13920_v51, 0.0 }
 0x3e8   :  { %v3396_v57 = vsel %vm1182_vm0, %v3393_v59, %v16842_v49  ;;  %v3695_v39 = vadd.f32 %v3394_v45, %v2928_v37  ;;  %v1905_v7 = vmul.f32 %v8100_v15, %v1776_v52  ;;  %v14005_v62 = vadd.f32 %v13668_v48, %v8103_v16 }
 0x3e9   :  { %v3696_v18 = vadd.f32 %v3396_v57, %v2929_v21  ;;  %v7392_v11 = vsel %vm4511_vm1, %v13690_v2, 0.0  ;;  %v14013_v1 = vadd.f32 %v13676_v33, %v8103_v16  ;;  %v7297_v51 = vmul.f32 %v7124_v20, %v6849_v38 }
 0x3ea   :  { %v3823_v34 = vadd.f32 %v3695_v39, %v8081_v6  ;;  %v7393_v13 = vadd.f32 %v7392_v11, %v13692_v50  ;;  %v2033_v47 = vadd.f32 %v8103_v16, %v1904_v8  ;;  %v5518_v48 = vadd.f32 %v5454_v10, %v8081_v6  ;;  %v4741_v38 = vld [vmem:[#allocation2 + $0x320] ss:$2 sm:$0xff]  ;;  %v14062_v10 = vld [vmem:[%s15935_s1 + $0x6b0] ss:$2 sm:$0xff]  ;;  %v4869_v8 = vld [vmem:[#allocation2 + $0x321] ss:$2 sm:$0xff] }
 0x3eb   :  { %v3824_v19 = vadd.f32 %v3696_v18, %v8081_v6  ;;  %v2034_v56 = vadd.f32 %v8103_v16, %v1905_v7  ;;  %v6540_v60 = vadd.f32 %v6476_v58, %v8081_v6  ;;  %v6850_v3 = vmax.f32 %v6722_v43, %v6786_v42  ;;  %v14072_v58 = vld [vmem:[%s15935_s1 + $0x6c0] ss:$2 sm:$0xff] }
 0x3ec   :  { %v3951_v2 = vmul.f32 %v3823_v34, %v8100_v15  ;;  %v7394_v33 = vsel %vm4511_vm1, %v13655_v44, 0.0  ;;  %v14025_v41 = vmul.f32 %v7134_v14, %v13660_v35  ;;  %v16843_v50 = vmax.f32 %v13644_v61, 0.0  ;;  %v14040_v44 = vld [vmem:[%s15935_s1 + $0x6a0] ss:$2 sm:$0xff]  ;;  %v4743_v17 = vld [vmem:[#allocation2 + $0x330] ss:$2 sm:$0xff] }
 0x3ed   :  { %v3952_v46 = vmul.f32 %v3824_v19, %v8100_v15  ;;  %v16844_v31 = vmax.f32 %v13640_v36, 0.0  ;;  %v7396_v9 = vsel %vm4511_vm1, %v7297_v51, 0.0  ;;  %v4207_v21 = vmax.f32 %v2033_v47, 0.0  ;;  %v14091_v51 = vld [vmem:[%s15935_s1 + $0x6d0] ss:$2 sm:$0xff] }
 0x3ee   :  { %v4079_v25 = vadd.f32 %v3951_v2, %v8103_v16  ;;  %v14044_v36 = vmul.f32 %v5518_v48, %v8100_v15  ;;  %v7395_v35 = vadd.f32 %v7394_v33, %v7393_v13  ;;  %v4208_v52 = vmax.f32 %v2034_v56, 0.0  ;;  %v14096_v47 = vld [vmem:[%s15935_s1 + $0x6b1] ss:$2 sm:$0xff] }
 0x3ef   :  { %v14031_v59 = vmax.f32 %v16844_v31, %v16843_v50  ;;  %v4080_v37 = vadd.f32 %v3952_v46, %v8103_v16  ;;  %v14052_v55 = vmul.f32 %v6540_v60, %v8100_v15  ;;  %v14054_v45 = vmul.f32 %v7129_v24, %v6850_v3  ;;  %v4871_v56 = vld [vmem:[#allocation2 + $0x331] ss:$2 sm:$0xff]  ;;  %v14109_v3 = vld [vmem:[%s15935_s1 + $0x6e0] ss:$2 sm:$0xff]  ;;  %v14118_v31 = vld [vmem:[%s15935_s1 + $0x6c1] ss:$2 sm:$0xff] }
 0x3f0   :  { %v14057_v49 = vmul.f32 %v4741_v38, %v7995_v27  ;;  %v4335_v57 = vmax.f32 %v4079_v25, 0.0  ;;  %v14064_v20 = vadd.f32 %v7396_v9, %v7395_v35  ;;  %v14067_v39 = vmul.f32 %v4743_v17, %v7995_v27  ;;  %v14123_v24 = vld [vmem:[%s15935_s1 + $0x6d1] ss:$2 sm:$0xff] }
 0x3f1   :  { %v4336_v18 = vmax.f32 %v4080_v37, 0.0  ;;  %v646_v43 = vmul.f32 %v14040_v44, %v7993_v26  ;;  %v647_v7 = vmul.f32 %v14062_v10, %v7993_v26  ;;  %v648_v11 = vmul.f32 %v14072_v58, %v7993_v26 }
 0x3f2   :  { %16845 = vst [vmem:[#allocation35_spill] sm:$0xff] %v14057_v49  ;;  %v4463_v42 = vmax.f32 %v4207_v21, %v4335_v57  ;;  %v775_v34 = vmul.f32 %v14049_v5, %v7981_v23  ;;  %v14083_v19 = vmul.f32 %v4741_v38, %v7981_v23  ;;  %v14086_v14 = vmul.f32 %v4743_v17, %v7981_v23 }
 0x3f3   :  { %16846 = vst [vmem:[#allocation13_spill] sm:$0xff] %v14067_v39  ;;  %v4464_v13 = vmax.f32 %v4208_v52, %v4336_v18  ;;  %v14100_v48 = vmul.f32 %v14040_v44, %v7995_v27  ;;  %v4946_v2 = vmul.f32 %v4741_v38, %v7993_v26  ;;  %v5010_v46 = vmul.f32 %v4869_v8, %v7981_v23 }
 0x3f4   :  { %16847 = vst [vmem:[#allocation32_spill] sm:$0xff] %v14083_v19  ;;  %v1033_v33 = vmul.f32 %v14062_v10, %v7995_v27  ;;  %v16223_v50 = vrot.slane %v14067_v39, 1  ;;  %v1034_v9 = vmul.f32 %v14072_v58, %v7995_v27  ;;  %v1035_v25 = vmul.f32 %v14091_v51, %v7995_v27 }
 0x3f5   :  { %16848 = vst [vmem:[#allocation22_spill] sm:$0xff] %v14086_v14  ;;  %v14131_v37 = vmul.f32 %v14109_v3, %v7995_v27  ;;  %v649_v21 = vmul.f32 %v14091_v51, %v7993_v26  ;;  %v776_v35 = vmul.f32 %v14096_v47, %v7981_v23  ;;  %v14141_v18 = vmul.f32 %v4869_v8, %v7995_v27 }
 0x3f6   :  { %16849 = vst [vmem:[#allocation30_spill] sm:$0xff] %v14100_v48  ;;  %v1396_v52 = vrot.slane %v1033_v33, 1  ;;  %v777_v0 = vmul.f32 %v14118_v31, %v7981_v23  ;;  %v778_v61 = vmul.f32 %v14123_v24, %v7981_v23  ;;  %v1398_v60 = vrot.slane %v1034_v9, 1 }
 0x3f7   :  { %4592 = vst.msk [vmem:[#allocation2 + $0x280] sm:$0xff] %vm4511_vm1, %v4463_v42  ;;  %v14144_v42 = vmul.f32 %v4871_v56, %v7995_v27  ;;  %v16853_v33 = vrot.slane %v14057_v49, 1  ;;  %v903_v57 = vadd.f32 %v775_v34, %v646_v43  ;;  %v1400_v38 = vrot.slane %v1035_v25, 1 }
 0x3f8   :  { %4593 = vst.msk [vmem:[#allocation2 + $0x288] sm:$0xff] %vm4511_vm1, %v4464_v13  ;;  %v5074_v13 = vadd.f32 %v5010_v46, %v4946_v2  ;;  %v5713_v56 = vmul.f32 %v4869_v8, %v7993_v26  ;;  %v7819_v2 = vld [vmem:[#allocation2 + $0x270] ss:$2 sm:$0xff]  ;;  %v4999_v54 = vmul.f32 %v7820_v53, %v7981_v23  ;;  %v16854_v9 = vrot.slane %v14100_v48, 1 }
 0x3f9   :  { %16850 = vst [vmem:[#allocation21_spill] sm:$0xff] %v14131_v37  ;;  %v5318_v17 = vsel %vm1182_vm0, %v16853_v33, %v16223_v50  ;;  %v4935_v46 = vmul.f32 %v7819_v2, %v7993_v26  ;;  %v16855_v49 = vrot.slane %v14086_v14, 1  ;;  %v16856_v33 = vrot.slane %v14083_v19, 1 }
 0x3fa   :  { %16851 = vst [vmem:[#allocation28_spill] sm:$0xff] %v14141_v18  ;;  %v1397_v39 = vsel %vm1182_vm0, %v16854_v9, %v1396_v52  ;;  %v904_v25 = vadd.f32 %v776_v35, %v647_v7  ;;  %v5457_v50 = vadd.f32 %v5318_v17, %v5074_v13  ;;  %v905_v4 = vadd.f32 %v777_v0, %v648_v11 }
 0x3fb   :  { %16852 = vst [vmem:[#allocation24_spill] sm:$0xff] %v14144_v42  ;;  %v5957_v43 = vsel %vm1182_vm0, %v16856_v33, %v16855_v49  ;;  %v906_v22 = vadd.f32 %v778_v61, %v649_v21  ;;  %v1399_v48 = vsel %vm1182_vm0, %v1396_v52, %v1398_v60  ;;  %v1401_v14 = vsel %vm1182_vm0, %v1398_v60, %v1400_v38 }
 0x3fc   :  { %v16857_v19 = vrot.slane %v14131_v37, 1  ;;  %v1672_v33 = vadd.f32 %v1397_v39, %v903_v57  ;;  %v6096_v34 = vadd.f32 %v5957_v43, %v5713_v56  ;;  %v5702_v35 = vmul.f32 %v7820_v53, %v7993_v26 }
 0x3fd   :  { %v16858_v0 = vrot.slane %v14144_v42, 1  ;;  %v16859_v61 = vrot.slane %v14141_v18, 1  ;;  %v1673_v52 = vadd.f32 %v1399_v48, %v904_v25  ;;  %v14186_v57 = vadd.f32 %v5457_v50, %v8081_v6 }
 0x3fe   :  { %v1403_v49 = vsel %vm1182_vm0, %v1400_v38, %v16857_v19  ;;  %v1674_v38 = vadd.f32 %v1401_v14, %v905_v4  ;;  %v5063_v13 = vadd.f32 %v4999_v54, %v4935_v46  ;;  %v1801_v56 = vadd.f32 %v8081_v6, %v1672_v33  ;;  %v16863_v46 = vld [vmem:[#allocation54_spill] sm:$0xff] }
 0x3ff   :  { %v4721_v2 = vld [vmem:[#allocation2 + $0x280] ss:$2 sm:$0xff]  ;;  %v4849_v12 = vld [vmem:[#allocation2 + $0x281] ss:$2 sm:$0xff]  ;;  %v6340_v11 = vsel %vm1182_vm0, %v16859_v61, %v16858_v0  ;;  %v1675_v17 = vadd.f32 %v1403_v49, %v906_v22  ;;  %v16860_v0 = vrot.slane %v12972_v30, 1  ;;  %v2187_v48 = vmul.f32 %v14049_v5, %v7993_v26 }
 0x400   :  { %v5128_v9 = vmul.f32 %v4721_v2, %v7995_v27  ;;  %v5767_v8 = vmul.f32 %v4721_v2, %v7981_v23  ;;  %v6150_v7 = vmul.f32 %v4849_v12, %v7995_v27  ;;  %v4936_v60 = vmul.f32 %v4721_v2, %v7993_v26  ;;  %v16861_v22 = vld [vmem:[#allocation37_spill] sm:$0xff]  ;;  %v16866_v33 = vld [vmem:[#allocation38_spill] sm:$0xff] }
 0x401   :  { %v5000_v21 = vmul.f32 %v4849_v12, %v7981_v23  ;;  %v5703_v53 = vmul.f32 %v4849_v12, %v7993_v26  ;;  %v14190_v43 = vadd.f32 %v6340_v11, %v6096_v34  ;;  %v16862_v14 = vrot.slane %v16861_v22, 1  ;;  %v16870_v22 = vld [vmem:[#allocation40_spill] sm:$0xff] }
 0x402   :  { %v5295_v19 = vrot.slane %v5128_v9, 1  ;;  %v5934_v39 = vrot.slane %v5767_v8, 1  ;;  %v6317_v61 = vrot.slane %v6150_v7, 1  ;;  %v1802_v12 = vadd.f32 %v8081_v6, %v1673_v52  ;;  %v16868_v52 = vld [vmem:[#allocation39_spill] sm:$0xff] }
 0x403   :  { %v5064_v4 = vadd.f32 %v5000_v21, %v4936_v60  ;;  %v2188_v54 = vmul.f32 %v14096_v47, %v7993_v26  ;;  %v16864_v34 = vrot.slane %v16863_v46, 1  ;;  %v1803_v8 = vadd.f32 %v8081_v6, %v1674_v38 }
 0x404   :  { %v5937_v2 = vsel %vm1182_vm0, %v5934_v39, %v16860_v0  ;;  %v5935_v50 = vsel %vm1182_vm0, %v16862_v14, %v5934_v39  ;;  %v1804_v25 = vadd.f32 %v8081_v6, %v1675_v17  ;;  %v14210_v9 = vmul.f32 %v14040_v44, %v7981_v23 }
 0x405   :  { %v5298_v30 = vsel %vm1182_vm0, %v5295_v19, %v16864_v34  ;;  %v6086_v49 = vadd.f32 %v5937_v2, %v5703_v53  ;;  %v16867_v7 = vrot.slane %v16866_v33, 1  ;;  %v6085_v60 = vadd.f32 %v5935_v50, %v5702_v35 }
 0x406   :  { %16865 = vst [vmem:[#allocation29_spill] sm:$0xff] %v14210_v9  ;;  %v1930_v21 = vmul.f32 %v8100_v15, %v1801_v56  ;;  %v16869_v39 = vrot.slane %v16868_v52, 1  ;;  %v16871_v38 = vrot.slane %v16870_v22, 1  ;;  %v2316_v44 = vmul.f32 %v14062_v10, %v7981_v23 }
 0x407   :  { %v5296_v11 = vsel %vm1182_vm0, %v16867_v7, %v5295_v19  ;;  %v2317_v53 = vmul.f32 %v14072_v58, %v7981_v23  ;;  %v5447_v2 = vadd.f32 %v5298_v30, %v5064_v4  ;;  %v1931_v19 = vmul.f32 %v8100_v15, %v1802_v12  ;;  %v7744_v7 = vld [vmem:[%s15935_s1 + $0x6e1] ss:$2 sm:$0xff] }
 0x408   :  { %v6320_v0 = vsel %vm1182_vm0, %v6317_v61, %v16869_v39  ;;  %v6318_v17 = vsel %vm1182_vm0, %v16871_v38, %v6317_v61  ;;  %v2318_v35 = vmul.f32 %v14091_v51, %v7981_v23  ;;  %v14231_v56 = vmul.f32 %v14109_v3, %v7981_v23 }
 0x409   :  { %v5446_v14 = vadd.f32 %v5296_v11, %v5063_v13  ;;  %v1932_v50 = vmul.f32 %v8100_v15, %v1803_v8  ;;  %v16232_v61 = vrot.slane %v14210_v9, 1  ;;  %v2678_v46 = vrot.slane %v2316_v44, 1 }
 0x40a   :  { %16872 = vst [vmem:[#allocation44_spill] sm:$0xff] %v14231_v56  ;;  %v6469_v10 = vadd.f32 %v6320_v0, %v6086_v49  ;;  %v6468_v34 = vadd.f32 %v6318_v17, %v6085_v60  ;;  %v2680_v33 = vrot.slane %v2317_v53, 1  ;;  %v2682_v58 = vrot.slane %v2318_v35, 1 }
 0x40b   :  { %v1933_v4 = vmul.f32 %v8100_v15, %v1804_v25  ;;  %v2189_v12 = vmul.f32 %v14118_v31, %v7993_v26  ;;  %v2190_v51 = vmul.f32 %v14123_v24, %v7993_v26  ;;  %v16230_v3 = vrot.slane %v14231_v56, 1 }
 0x40c   :  { %v5511_v13 = vadd.f32 %v5447_v2, %v8081_v6  ;;  %v14243_v30 = vadd.f32 %v8103_v16, %v1930_v21  ;;  %v14246_v8 = vadd.f32 %v8103_v16, %v1931_v19  ;;  %v2679_v25 = vsel %vm1182_vm0, %v16232_v61, %v2678_v46 }
 0x40d   :  { %v5510_v49 = vadd.f32 %v5446_v14, %v8081_v6  ;;  %v14256_v11 = vadd.f32 %v8103_v16, %v1932_v50  ;;  %v2681_v60 = vsel %vm1182_vm0, %v2678_v46, %v2680_v33  ;;  %v2683_v21 = vsel %vm1182_vm0, %v2680_v33, %v2682_v58 }
 0x40e   :  { %v6533_v52 = vadd.f32 %v6469_v10, %v8081_v6  ;;  %v6532_v39 = vadd.f32 %v6468_v34, %v8081_v6  ;;  %v2685_v0 = vsel %vm1182_vm0, %v2682_v58, %v16230_v3  ;;  %v14267_v22 = vmul.f32 %v14049_v5, %v7995_v27 }
 0x40f   :  { %v2954_v38 = vadd.f32 %v2679_v25, %v2187_v48  ;;  %v3083_v17 = vmul.f32 %v14096_v47, %v7995_v27  ;;  %v3084_v44 = vmul.f32 %v14118_v31, %v7995_v27  ;;  %v3085_v53 = vmul.f32 %v14123_v24, %v7995_v27 }
 0x410   :  { %16873 = vst [vmem:[#allocation46_spill] sm:$0xff] %v14267_v22  ;;  %v2955_v2 = vadd.f32 %v2681_v60, %v2188_v54  ;;  %v2956_v19 = vadd.f32 %v2683_v21, %v2189_v12  ;;  %v14276_v35 = vmul.f32 %v7744_v7, %v7995_v27  ;;  %v16231_v14 = vrot.slane %v14267_v22, 1  ;;  %v7721_v21 = vld [vmem:[%s15935_s1 + $0x571] ss:$2 sm:$0xff]  ;;  %v7823_v22 = vld [vmem:[#allocation2 + $0x2a0] ss:$2 sm:$0xff] }
 0x411   :  { %v2957_v50 = vadd.f32 %v2685_v0, %v2190_v51  ;;  %v3445_v5 = vrot.slane %v3083_v17, 1  ;;  %v3447_v46 = vrot.slane %v3084_v44, 1  ;;  %v3449_v48 = vrot.slane %v3085_v53, 1 }
 0x412   :  { %16874 = vst [vmem:[#allocation37_spill] sm:$0xff] %v14276_v35  ;;  %v14280_v10 = vmul.f32 %v5511_v13, %v8100_v15  ;;  %v14283_v47 = vmul.f32 %v5510_v49, %v8100_v15  ;;  %v2062_v31 = vadd.f32 %v8103_v16, %v1933_v4  ;;  %v16229_v24 = vrot.slane %v14276_v35, 1 }
 0x413   :  { %v14288_v54 = vmul.f32 %v6533_v52, %v8100_v15  ;;  %v3446_v34 = vsel %vm1182_vm0, %v16231_v14, %v3445_v5  ;;  %v3448_v33 = vsel %vm1182_vm0, %v3445_v5, %v3447_v46  ;;  %v3450_v58 = vsel %vm1182_vm0, %v3447_v46, %v3449_v48 }
 0x414   :  { %v14296_v12 = vmul.f32 %v6532_v39, %v8100_v15  ;;  %v3452_v4 = vsel %vm1182_vm0, %v3449_v48, %v16229_v24  ;;  %v3721_v51 = vadd.f32 %v3446_v34, %v2954_v38  ;;  %v3722_v13 = vadd.f32 %v3448_v33, %v2955_v2  ;;  %v7593_v38 = vld [vmem:[%s15935_s1 + $0x570] ss:$2 sm:$0xff]  ;;  %v16875_v24 = vld [vmem:[#allocation41_spill] sm:$0xff] }
 0x415   :  { %v3723_v25 = vadd.f32 %v3450_v58, %v2956_v19  ;;  %v3724_v49 = vadd.f32 %v3452_v4, %v2957_v50  ;;  %v4233_v7 = vmax.f32 %v14243_v30, 0.0  ;;  %v4234_v60 = vmax.f32 %v14246_v8, 0.0  ;;  %v7821_v30 = vld [vmem:[%s15935_s1 + $0x560] ss:$2 sm:$0xff] }
 0x416   :  { %v3849_v52 = vadd.f32 %v3721_v51, %v8081_v6  ;;  %v3850_v39 = vadd.f32 %v3722_v13, %v8081_v6  ;;  %v4235_v0 = vmax.f32 %v14256_v11, 0.0  ;;  %v626_v8 = vmul.f32 %v7821_v30, %v7993_v26  ;;  %v7822_v11 = vld [vmem:[%s15935_s1 + $0x561] ss:$2 sm:$0xff] }
 0x417   :  { %v3851_v17 = vadd.f32 %v3723_v25, %v8081_v6  ;;  %v3852_v44 = vadd.f32 %v3724_v49, %v8081_v6  ;;  %v627_v53 = vmul.f32 %v7593_v38, %v7993_v26  ;;  %v755_v2 = vmul.f32 %v7822_v11, %v7981_v23 }
 0x418   :  { %v3977_v19 = vmul.f32 %v3849_v52, %v8100_v15  ;;  %v3978_v50 = vmul.f32 %v3850_v39, %v8100_v15  ;;  %v4236_v5 = vmax.f32 %v2062_v31, 0.0  ;;  %v756_v46 = vmul.f32 %v7721_v21, %v7981_v23 }
 0x419   :  { %v3979_v48 = vmul.f32 %v3851_v17, %v8100_v15  ;;  %v3980_v34 = vmul.f32 %v3852_v44, %v8100_v15  ;;  %v883_v33 = vadd.f32 %v755_v2, %v626_v8  ;;  %v1013_v58 = vmul.f32 %v7593_v38, %v7995_v27 }
 0x41a   :  { %v4105_v4 = vadd.f32 %v3977_v19, %v8103_v16  ;;  %v4106_v51 = vadd.f32 %v3978_v50, %v8103_v16  ;;  %v884_v13 = vadd.f32 %v756_v46, %v627_v53  ;;  %v2167_v25 = vmul.f32 %v7822_v11, %v7993_v26  ;;  %v16877_v11 = vld [vmem:[#allocation51_spill] sm:$0xff] }
 0x41b   :  { %v4107_v49 = vadd.f32 %v3979_v48, %v8103_v16  ;;  %v4108_v31 = vadd.f32 %v3980_v34, %v8103_v16  ;;  %v1356_v52 = vrot.slane %v1013_v58, 1  ;;  %v2168_v39 = vmul.f32 %v7721_v21, %v7993_v26 }
 0x41c   :  { %v4361_v30 = vmax.f32 %v4105_v4, 0.0  ;;  %v4362_v17 = vmax.f32 %v4106_v51, 0.0  ;;  %v2296_v8 = vmul.f32 %v7593_v38, %v7981_v23  ;;  %v3063_v44 = vmul.f32 %v7721_v21, %v7995_v27 }
 0x41d   :  { %v4363_v2 = vmax.f32 %v4107_v49, 0.0  ;;  %v4364_v19 = vmax.f32 %v4108_v31, 0.0  ;;  %v16876_v50 = vrot.slane %v16875_v24, 1  ;;  %v16878_v46 = vrot.slane %v16877_v11, 1 }
 0x41e   :  { %v4489_v34 = vmax.f32 %v4233_v7, %v4361_v30  ;;  %v4490_v58 = vmax.f32 %v4234_v60, %v4362_v17  ;;  %v2638_v61 = vrot.slane %v2296_v8, 1  ;;  %v3405_v38 = vrot.slane %v3063_v44, 1  ;;  %v16879_v7 = vld [vmem:[#allocation33_spill] sm:$0xff]  ;;  %v16885_v30 = vld [vmem:[#allocation11_spill] sm:$0xff] }
 0x41f   :  { %v1357_v53 = vsel %vm1182_vm0, %v16876_v50, %v1356_v52  ;;  %v1359_v48 = vsel %vm1182_vm0, %v1356_v52, %v16878_v46  ;;  %v4491_v4 = vmax.f32 %v4235_v0, %v4363_v2  ;;  %v4492_v51 = vmax.f32 %v4236_v5, %v4364_v19  ;;  %v16881_v5 = vld [vmem:[#allocation56_spill] sm:$0xff] }
 0x420   :  { %v1652_v3 = vadd.f32 %v1357_v53, %v883_v33  ;;  %v1653_v14 = vadd.f32 %v1359_v48, %v884_v13  ;;  %v5585_v21 = vmul.f32 %v14186_v57, %v8100_v15  ;;  %v6543_v24 = vadd.f32 %v14190_v43, %v8081_v6  ;;  %4618 = vst.msk [vmem:[#allocation2 + $0x350] sm:$0xff] %vm4511_vm1, %v4489_v34  ;;  %v16883_v57 = vld [vmem:[#allocation52_spill] sm:$0xff] }
 0x421   :  { %4619 = vst.msk [vmem:[#allocation2 + $0x358] sm:$0xff] %vm4511_vm1, %v4490_v58  ;;  %v16880_v60 = vrot.slane %v16879_v7, 1  ;;  %v16882_v33 = vrot.slane %v16881_v5, 1  ;;  %v16884_v52 = vrot.slane %v16883_v57, 1  ;;  %v16886_v17 = vrot.slane %v16885_v30, 1  ;;  %v7139_v5 = vpop.permute.xlu0 %7138 }
 0x422   :  { %v1781_v49 = vadd.f32 %v8081_v6, %v1652_v3  ;;  %v1782_v31 = vadd.f32 %v8081_v6, %v1653_v14  ;;  %v5639_v14 = vadd.f32 %v14280_v10, %v8103_v16  ;;  %4620 = vst.msk [vmem:[#allocation2 + $0x360] sm:$0xff] %vm4511_vm1, %v4491_v4  ;;  %v5638_v19 = vadd.f32 %v14283_v47, %v8103_v16 }
 0x423   :  { %v2639_v0 = vsel %vm1182_vm0, %v16880_v60, %v2638_v61  ;;  %v2641_v13 = vsel %vm1182_vm0, %v2638_v61, %v16882_v33  ;;  %v3406_v43 = vsel %vm1182_vm0, %v16884_v52, %v3405_v38  ;;  %v3408_v3 = vsel %vm1182_vm0, %v3405_v38, %v16886_v17  ;;  %4621 = vst.msk [vmem:[#allocation2 + $0x368] sm:$0xff] %vm4511_vm1, %v4492_v51 }
 0x424   :  { %v1910_v8 = vmul.f32 %v8100_v15, %v1781_v49  ;;  %v2934_v44 = vadd.f32 %v2639_v0, %v2167_v25  ;;  %v2935_v2 = vadd.f32 %v2641_v13, %v2168_v39  ;;  %v6661_v61 = vadd.f32 %v14288_v54, %v8103_v16  ;;  %v7149_v54 = vpop.permute.xlu2 %7148 }
 0x425   :  { %v6660_v50 = vadd.f32 %v14296_v12, %v8103_v16  ;;  %v1911_v53 = vmul.f32 %v8100_v15, %v1782_v31  ;;  %v14377_v10 = vadd.f32 %v14044_v36, %v8103_v16  ;;  %v7398_v25 = vsel %vm4511_vm1, %v14054_v45, 0.0 }
 0x426   :  { %v3701_v39 = vadd.f32 %v3406_v43, %v2934_v44  ;;  %v3702_v11 = vadd.f32 %v3408_v3, %v2935_v2  ;;  %v14383_v47 = vadd.f32 %v14052_v55, %v8103_v16  ;;  %v7399_v12 = vadd.f32 %v7398_v25, %v14064_v20  ;;  %v14437_v44 = vld [vmem:[%s15935_s1 + $0x701] ss:$2 sm:$0xff] }
 0x427   :  { %v14387_v46 = vadd.f32 %v5585_v21, %v8103_v16  ;;  %v6607_v48 = vmul.f32 %v6543_v24, %v8100_v15  ;;  %v6725_v34 = vmax.f32 %v5639_v14, 0.0  ;;  %v2039_v36 = vadd.f32 %v8103_v16, %v1910_v8  ;;  %v14432_v8 = vld [vmem:[%s15935_s1 + $0x720] ss:$2 sm:$0xff] }
 0x428   :  { %v3829_v58 = vadd.f32 %v3701_v39, %v8081_v6  ;;  %v3830_v45 = vadd.f32 %v3702_v11, %v8081_v6  ;;  %v6789_v4 = vmax.f32 %v6661_v61, 0.0  ;;  %v6724_v51 = vmax.f32 %v5638_v19, 0.0  ;;  %v14442_v61 = vld [vmem:[%s15935_s1 + $0x730] ss:$2 sm:$0xff]  ;;  %v14447_v19 = vld [vmem:[%s15935_s1 + $0x711] ss:$2 sm:$0xff] }
 0x429   :  { %v6788_v38 = vmax.f32 %v6660_v50, 0.0  ;;  %v2040_v55 = vadd.f32 %v8103_v16, %v1911_v53  ;;  %v7400_v20 = vsel %vm4511_vm1, %v14025_v41, 0.0  ;;  %v14397_v21 = vmul.f32 %v7149_v54, %v14031_v59  ;;  %v14414_v41 = vld [vmem:[%s15935_s1 + $0x700] ss:$2 sm:$0xff]  ;;  %v14419_v59 = vld [vmem:[%s15935_s1 + $0x710] ss:$2 sm:$0xff] }
 0x42a   :  { %v3957_v24 = vmul.f32 %v3829_v58, %v8100_v15  ;;  %v3958_v49 = vmul.f32 %v3830_v45, %v8100_v15  ;;  %v16887_v31 = vmax.f32 %v14013_v1, 0.0  ;;  %v16888_v7 = vmax.f32 %v14005_v62, 0.0  ;;  %v4747_v1 = vld [vmem:[#allocation2 + $0x350] ss:$2 sm:$0xff]  ;;  %v4749_v13 = vld [vmem:[#allocation2 + $0x360] ss:$2 sm:$0xff] }
 0x42b   :  { %v14409_v33 = vadd.f32 %v7400_v20, %v7399_v12  ;;  %v14422_v62 = vadd.f32 %v6607_v48, %v8103_v16  ;;  %v4213_v43 = vmax.f32 %v2039_v36, 0.0  ;;  %v14427_v17 = vmax.f32 %v6725_v34, %v6789_v4  ;;  %v4875_v39 = vld [vmem:[#allocation2 + $0x351] ss:$2 sm:$0xff]  ;;  %v4877_v11 = vld [vmem:[#allocation2 + $0x361] ss:$2 sm:$0xff] }
 0x42c   :  { %v14405_v60 = vmax.f32 %v16888_v7, %v16887_v31  ;;  %v4085_v57 = vadd.f32 %v3957_v24, %v8103_v16  ;;  %v4086_v52 = vadd.f32 %v3958_v49, %v8103_v16  ;;  %v6852_v3 = vmax.f32 %v6724_v51, %v6788_v38  ;;  %v14466_v58 = vld [vmem:[%s15935_s1 + $0x721] ss:$2 sm:$0xff]  ;;  %v14482_v20 = vld [vmem:[%s15935_s1 + $0x731] ss:$2 sm:$0xff] }
 0x42d   :  { %v4214_v14 = vmax.f32 %v2040_v55, 0.0  ;;  %v652_v50 = vmul.f32 %v14414_v41, %v7993_v26  ;;  %v653_v53 = vmul.f32 %v14419_v59, %v7993_v26  ;;  %v654_v25 = vmul.f32 %v14432_v8, %v7993_v26 }
 0x42e   :  { %v4341_v2 = vmax.f32 %v4085_v57, 0.0  ;;  %v14456_v54 = vmul.f32 %v4747_v1, %v7981_v23  ;;  %v14459_v12 = vmul.f32 %v4749_v13, %v7981_v23  ;;  %v4342_v48 = vmax.f32 %v4086_v52, 0.0  ;;  %v14501_v52 = vld [vmem:[%s15935_s1 + $0x740] ss:$2 sm:$0xff] }
 0x42f   :  { %v655_v34 = vmul.f32 %v14442_v61, %v7993_v26  ;;  %v781_v45 = vmul.f32 %v14437_v44, %v7981_v23  ;;  %v14472_v4 = vmul.f32 %v14414_v41, %v7995_v27  ;;  %v1039_v51 = vmul.f32 %v14419_v59, %v7995_v27 }
 0x430   :  { %16889 = vst [vmem:[#allocation54_spill] sm:$0xff] %v14456_v54  ;;  %v4469_v36 = vmax.f32 %v4213_v43, %v4341_v2  ;;  %v14477_v38 = vmul.f32 %v4747_v1, %v7995_v27  ;;  %v4470_v55 = vmax.f32 %v4214_v14, %v4342_v48  ;;  %v782_v24 = vmul.f32 %v14447_v19, %v7981_v23 }
 0x431   :  { %16890 = vst [vmem:[#allocation38_spill] sm:$0xff] %v14459_v12  ;;  %v1040_v49 = vmul.f32 %v14432_v8, %v7995_v27  ;;  %v14489_v31 = vmul.f32 %v4749_v13, %v7995_v27  ;;  %v14492_v7 = vmul.f32 %v4875_v39, %v7995_v27  ;;  %v14495_v57 = vmul.f32 %v4877_v11, %v7995_v27 }
 0x432   :  { %16891 = vst [vmem:[#allocation39_spill] sm:$0xff] %v14472_v4  ;;  %v1041_v43 = vmul.f32 %v14442_v61, %v7995_v27  ;;  %v783_v2 = vmul.f32 %v14466_v58, %v7981_v23  ;;  %v14512_v11 = vmul.f32 %v14501_v52, %v7995_v27  ;;  %v784_v48 = vmul.f32 %v14482_v20, %v7981_v23 }
 0x433   :  { %16892 = vst [vmem:[#allocation40_spill] sm:$0xff] %v14477_v38  ;;  %v1408_v30 = vrot.slane %v1039_v51, 1  ;;  %v1410_v0 = vrot.slane %v1040_v49, 1  ;;  %v4949_v14 = vmul.f32 %v4747_v1, %v7993_v26  ;;  %v5013_v13 = vmul.f32 %v4875_v39, %v7981_v23 }
 0x434   :  { %16893 = vst [vmem:[#allocation41_spill] sm:$0xff] %v14489_v31  ;;  %v1412_v42 = vrot.slane %v1041_v43, 1  ;;  %v16898_v51 = vrot.slane %v14456_v54, 1  ;;  %v909_v1 = vadd.f32 %v781_v45, %v652_v50  ;;  %v910_v9 = vadd.f32 %v782_v24, %v653_v53 }
 0x435   :  { %16894 = vst [vmem:[#allocation51_spill] sm:$0xff] %v14492_v7  ;;  %v16245_v18 = vrot.slane %v14512_v11, 1  ;;  %v911_v43 = vadd.f32 %v783_v2, %v654_v25  ;;  %v16899_v35 = vrot.slane %v14472_v4, 1  ;;  %v1411_v37 = vsel %vm1182_vm0, %v1408_v30, %v1410_v0 }
 0x436   :  { %16895 = vst [vmem:[#allocation33_spill] sm:$0xff] %v14495_v57  ;;  %v5077_v29 = vadd.f32 %v5013_v13, %v4949_v14  ;;  %v5002_v54 = vmul.f32 %v7824_v40, %v7981_v23  ;;  %v1413_v50 = vsel %vm1182_vm0, %v1410_v0, %v1412_v42  ;;  %v16900_v53 = vrot.slane %v14489_v31, 1 }
 0x437   :  { %4598 = vst.msk [vmem:[#allocation2 + $0x2b0] sm:$0xff] %vm4511_vm1, %v4469_v36  ;;  %v16897_v36 = vrot.slane %v14459_v12, 1  ;;  %v1409_v56 = vsel %vm1182_vm0, %v16899_v35, %v1408_v30  ;;  %v4938_v12 = vmul.f32 %v7823_v22, %v7993_v26  ;;  %v16902_v35 = vrot.slane %v14495_v57, 1 }
 0x438   :  { %4599 = vst.msk [vmem:[#allocation2 + $0x2b8] sm:$0xff] %vm4511_vm1, %v4470_v55  ;;  %v5716_v55 = vmul.f32 %v4875_v39, %v7993_v26  ;;  %v7300_v39 = vmul.f32 %v7139_v5, %v6852_v3  ;;  %v16901_v5 = vrot.slane %v14477_v38, 1  ;;  %v16903_v30 = vrot.slane %v14492_v7, 1 }
 0x439   :  { %16896 = vst [vmem:[#allocation56_spill] sm:$0xff] %v14512_v11  ;;  %v5963_v49 = vsel %vm1182_vm0, %v16898_v51, %v16897_v36  ;;  %v912_v14 = vadd.f32 %v784_v48, %v655_v34  ;;  %v1415_v0 = vsel %vm1182_vm0, %v1412_v42, %v16245_v18  ;;  %v1678_v2 = vadd.f32 %v1409_v56, %v909_v1 }
 0x43a   :  { %v5324_v3 = vsel %vm1182_vm0, %v16901_v5, %v16900_v53  ;;  %v6099_v25 = vadd.f32 %v5963_v49, %v5716_v55  ;;  %v6346_v45 = vsel %vm1182_vm0, %v16903_v30, %v16902_v35  ;;  %v1679_v36 = vadd.f32 %v1411_v37, %v910_v9  ;;  %v16904_v37 = vld [vmem:[#allocation47_spill] sm:$0xff] }
 0x43b   :  { %v14552_v51 = vsel %vm4511_vm1, %v7300_v39, 0.0  ;;  %v1680_v53 = vadd.f32 %v1413_v50, %v911_v43  ;;  %v14556_v5 = vadd.f32 %v5324_v3, %v5077_v29  ;;  %v5066_v34 = vadd.f32 %v5002_v54, %v4938_v12  ;;  %v16906_v3 = vld [vmem:[#allocation49_spill] sm:$0xff] }
 0x43c   :  { %v5705_v48 = vmul.f32 %v7824_v40, %v7993_v26  ;;  %v14559_v30 = vadd.f32 %v6346_v45, %v6099_v25  ;;  %v1681_v56 = vadd.f32 %v1415_v0, %v912_v14  ;;  %v16905_v9 = vrot.slane %v16904_v37, 1  ;;  %v16908_v14 = vld [vmem:[#allocation42_spill] sm:$0xff] }
 0x43d   :  { %v1807_v39 = vadd.f32 %v8081_v6, %v1678_v2  ;;  %v1808_v18 = vadd.f32 %v8081_v6, %v1679_v36  ;;  %v2193_v29 = vmul.f32 %v14437_v44, %v7993_v26  ;;  %v1809_v12 = vadd.f32 %v8081_v6, %v1680_v53 }
 0x43e   :  { %v2194_v43 = vmul.f32 %v14447_v19, %v7993_v26  ;;  %v16907_v25 = vrot.slane %v16906_v3, 1  ;;  %v16911_v2 = vrot.slane %v13369_v32, 1  ;;  %v2323_v3 = vmul.f32 %v14432_v8, %v7981_v23 }
 0x43f   :  { %v4727_v24 = vld [vmem:[#allocation2 + $0x2b0] ss:$2 sm:$0xff]  ;;  %v4855_v22 = vld [vmem:[#allocation2 + $0x2b1] ss:$2 sm:$0xff]  ;;  %v1936_v53 = vmul.f32 %v8100_v15, %v1807_v39  ;;  %v1937_v37 = vmul.f32 %v8100_v15, %v1808_v18  ;;  %v2324_v32 = vmul.f32 %v14442_v61, %v7981_v23 }
 0x440   :  { %v5131_v13 = vmul.f32 %v4727_v24, %v7995_v27  ;;  %v5770_v55 = vmul.f32 %v4727_v24, %v7981_v23  ;;  %v6153_v49 = vmul.f32 %v4855_v22, %v7995_v27  ;;  %v4939_v54 = vmul.f32 %v4727_v24, %v7993_v26 }
 0x441   :  { %v5003_v40 = vmul.f32 %v4855_v22, %v7981_v23  ;;  %v5706_v50 = vmul.f32 %v4855_v22, %v7993_v26  ;;  %v14582_v24 = vmul.f32 %v14414_v41, %v7981_v23  ;;  %v1810_v22 = vadd.f32 %v8081_v6, %v1681_v56 }
 0x442   :  { %v5301_v35 = vrot.slane %v5131_v13, 1  ;;  %v5940_v57 = vrot.slane %v5770_v55, 1  ;;  %v6323_v42 = vrot.slane %v6153_v49, 1  ;;  %v16909_v13 = vrot.slane %v16908_v14, 1 }
 0x443   :  { %16910 = vst [vmem:[#allocation52_spill] sm:$0xff] %v14582_v24  ;;  %v5067_v41 = vadd.f32 %v5003_v40, %v4939_v54  ;;  %v2692_v54 = vrot.slane %v2323_v3, 1  ;;  %v2694_v40 = vrot.slane %v2324_v32, 1  ;;  %v14637_v32 = vmul.f32 %v14437_v44, %v7995_v27 }
 0x444   :  { %v5302_v1 = vsel %vm1182_vm0, %v16905_v9, %v5301_v35  ;;  %v5941_v45 = vsel %vm1182_vm0, %v16907_v25, %v5940_v57  ;;  %v6324_v0 = vsel %vm1182_vm0, %v16909_v13, %v6323_v42  ;;  %v5943_v36 = vsel %vm1182_vm0, %v5940_v57, %v16911_v2 }
 0x445   :  { %v5449_v55 = vadd.f32 %v5302_v1, %v5066_v34  ;;  %v6088_v49 = vadd.f32 %v5941_v45, %v5705_v48  ;;  %v2322_v9 = vmul.f32 %v14419_v59, %v7981_v23  ;;  %v14598_v57 = vmul.f32 %v14501_v52, %v7981_v23  ;;  %v16913_v34 = vld [vmem:[#allocation34_spill] sm:$0xff]  ;;  %16917 = vst [vmem:[#allocation47_spill] sm:$0xff] %v14637_v32 }
 0x446   :  { %v16914_v48 = vrot.slane %v16913_v34, 1  ;;  %v6089_v18 = vadd.f32 %v5943_v36, %v5706_v50  ;;  %v16249_v1 = vrot.slane %v14582_v24, 1  ;;  %v16915_v45 = vld [vmem:[#allocation14_spill] sm:$0xff]  ;;  %v2195_v52 = vmul.f32 %v14466_v58, %v7993_v26 }
 0x447   :  { %v6471_v25 = vadd.f32 %v6324_v0, %v6088_v49  ;;  %16912 = vst [vmem:[#allocation11_spill] sm:$0xff] %v14598_v57  ;;  %v2690_v59 = vrot.slane %v2322_v9, 1  ;;  %v5513_v39 = vadd.f32 %v5449_v55, %v8081_v6  ;;  %v16916_v61 = vrot.slane %v16915_v45, 1  ;;  %v7750_v55 = vld [vmem:[%s15935_s1 + $0x741] ss:$2 sm:$0xff] }
 0x448   :  { %v5304_v56 = vsel %vm1182_vm0, %v5301_v35, %v16914_v48  ;;  %v2196_v35 = vmul.f32 %v14482_v20, %v7993_v26  ;;  %v16247_v50 = vrot.slane %v14598_v57, 1  ;;  %v1938_v13 = vmul.f32 %v8100_v15, %v1809_v12 }
 0x449   :  { %v6535_v8 = vadd.f32 %v6471_v25, %v8081_v6  ;;  %v6326_v14 = vsel %vm1182_vm0, %v6323_v42, %v16916_v61  ;;  %v1939_v0 = vmul.f32 %v8100_v15, %v1810_v22  ;;  %v14617_v2 = vadd.f32 %v8103_v16, %v1936_v53 }
 0x44a   :  { %v2691_v36 = vsel %vm1182_vm0, %v16249_v1, %v2690_v59  ;;  %v5450_v42 = vadd.f32 %v5304_v56, %v5067_v41  ;;  %v14626_v49 = vadd.f32 %v8103_v16, %v1937_v37  ;;  %v2693_v9 = vsel %vm1182_vm0, %v2690_v59, %v2692_v54 }
 0x44b   :  { %v2695_v12 = vsel %vm1182_vm0, %v2692_v54, %v2694_v40  ;;  %v6472_v22 = vadd.f32 %v6326_v14, %v6089_v18  ;;  %v5577_v53 = vmul.f32 %v5513_v39, %v8100_v15  ;;  %v6599_v3 = vmul.f32 %v6535_v8, %v8100_v15 }
 0x44c   :  { %v2697_v41 = vsel %vm1182_vm0, %v2694_v40, %v16247_v50  ;;  %v2960_v25 = vadd.f32 %v2691_v36, %v2193_v29  ;;  %v3089_v37 = vmul.f32 %v14447_v19, %v7995_v27  ;;  %v3090_v34 = vmul.f32 %v14466_v58, %v7995_v27 }
 0x44d   :  { %v2961_v48 = vadd.f32 %v2693_v9, %v2194_v43  ;;  %v2962_v56 = vadd.f32 %v2695_v12, %v2195_v52  ;;  %v3091_v18 = vmul.f32 %v14482_v20, %v7995_v27  ;;  %v14646_v59 = vmul.f32 %v7750_v55, %v7995_v27  ;;  %v7727_v9 = vld [vmem:[%s15935_s1 + $0x5d1] ss:$2 sm:$0xff] }
 0x44e   :  { %v2963_v39 = vadd.f32 %v2697_v41, %v2196_v35  ;;  %v16248_v29 = vrot.slane %v14637_v32, 1  ;;  %v3457_v8 = vrot.slane %v3089_v37, 1  ;;  %v3459_v44 = vrot.slane %v3090_v34, 1  ;;  %v7825_v41 = vld [vmem:[%s15935_s1 + $0x5c0] ss:$2 sm:$0xff] }
 0x44f   :  { %16918 = vst [vmem:[#allocation49_spill] sm:$0xff] %v14646_v59  ;;  %v14650_v54 = vadd.f32 %v5450_v42, %v8081_v6  ;;  %v2067_v19 = vadd.f32 %v8103_v16, %v1938_v13  ;;  %v3461_v40 = vrot.slane %v3091_v18, 1  ;;  %v16246_v58 = vrot.slane %v14646_v59, 1  ;;  %v7826_v18 = vld [vmem:[%s15935_s1 + $0x5c1] ss:$2 sm:$0xff] }
 0x450   :  { %v14655_v43 = vadd.f32 %v6472_v22, %v8081_v6  ;;  %v2068_v20 = vadd.f32 %v8103_v16, %v1939_v0  ;;  %v3458_v45 = vsel %vm1182_vm0, %v16248_v29, %v3457_v8  ;;  %v3460_v61 = vsel %vm1182_vm0, %v3457_v8, %v3459_v44 }
 0x451   :  { %v14663_v14 = vadd.f32 %v5577_v53, %v8103_v16  ;;  %v3462_v52 = vsel %vm1182_vm0, %v3459_v44, %v3461_v40  ;;  %v3464_v35 = vsel %vm1182_vm0, %v3461_v40, %v16246_v58  ;;  %v3727_v13 = vadd.f32 %v3458_v45, %v2960_v25  ;;  %v16921_v58 = vld [vmem:[#allocation15_spill] sm:$0xff] }
 0x452   :  { %v14670_v36 = vadd.f32 %v6599_v3, %v8103_v16  ;;  %v3728_v0 = vadd.f32 %v3460_v61, %v2961_v48  ;;  %v3729_v42 = vadd.f32 %v3462_v52, %v2962_v56  ;;  %v3730_v55 = vadd.f32 %v3464_v35, %v2963_v39  ;;  %v7599_v56 = vld [vmem:[%s15935_s1 + $0x5d0] ss:$2 sm:$0xff] }
 0x453   :  { %v3855_v12 = vadd.f32 %v3727_v13, %v8081_v6  ;;  %v4239_v22 = vmax.f32 %v14617_v2, 0.0  ;;  %v4240_v53 = vmax.f32 %v14626_v49, 0.0  ;;  %v632_v3 = vmul.f32 %v7825_v41, %v7993_v26 }
 0x454   :  { %v3856_v25 = vadd.f32 %v3728_v0, %v8081_v6  ;;  %v3857_v37 = vadd.f32 %v3729_v42, %v8081_v6  ;;  %v3858_v34 = vadd.f32 %v3730_v55, %v8081_v6  ;;  %v4241_v48 = vmax.f32 %v2067_v19, 0.0 }
 0x455   :  { %v3983_v2 = vmul.f32 %v3855_v12, %v8100_v15  ;;  %v633_v49 = vmul.f32 %v7599_v56, %v7993_v26  ;;  %v761_v39 = vmul.f32 %v7826_v18, %v7981_v23  ;;  %v762_v8 = vmul.f32 %v7727_v9, %v7981_v23 }
 0x456   :  { %v3984_v44 = vmul.f32 %v3856_v25, %v8100_v15  ;;  %v3985_v19 = vmul.f32 %v3857_v37, %v8100_v15  ;;  %v3986_v40 = vmul.f32 %v3858_v34, %v8100_v15  ;;  %v4242_v45 = vmax.f32 %v2068_v20, 0.0 }
 0x457   :  { %v4111_v61 = vadd.f32 %v3983_v2, %v8103_v16  ;;  %v889_v52 = vadd.f32 %v761_v39, %v632_v3  ;;  %v890_v35 = vadd.f32 %v762_v8, %v633_v49  ;;  %v1019_v13 = vmul.f32 %v7599_v56, %v7995_v27  ;;  %v16919_v8 = vld [vmem:[#allocation48_spill] sm:$0xff] }
 0x458   :  { %v4112_v0 = vadd.f32 %v3984_v44, %v8103_v16  ;;  %v4113_v42 = vadd.f32 %v3985_v19, %v8103_v16  ;;  %v4114_v55 = vadd.f32 %v3986_v40, %v8103_v16  ;;  %v2173_v12 = vmul.f32 %v7826_v18, %v7993_v26 }
 0x459   :  { %v4367_v41 = vmax.f32 %v4111_v61, 0.0  ;;  %v1368_v25 = vrot.slane %v1019_v13, 1  ;;  %v2174_v37 = vmul.f32 %v7727_v9, %v7993_v26  ;;  %v2302_v20 = vmul.f32 %v7599_v56, %v7981_v23 }
 0x45a   :  { %v4368_v34 = vmax.f32 %v4112_v0, 0.0  ;;  %v4369_v2 = vmax.f32 %v4113_v42, 0.0  ;;  %v4370_v3 = vmax.f32 %v4114_v55, 0.0  ;;  %v3069_v49 = vmul.f32 %v7727_v9, %v7995_v27  ;;  %v16923_v0 = vld [vmem:[#allocation43_spill] sm:$0xff] }
 0x45b   :  { %v4495_v39 = vmax.f32 %v4239_v22, %v4367_v41  ;;  %v16920_v44 = vrot.slane %v16919_v8, 1  ;;  %v16922_v40 = vrot.slane %v16921_v58, 1  ;;  %v2650_v61 = vrot.slane %v2302_v20, 1  ;;  %v16925_v22 = vld [vmem:[#allocation31_spill] sm:$0xff]  ;;  %v16927_v20 = vld [vmem:[#allocation45_spill] sm:$0xff] }
 0x45c   :  { %v4496_v13 = vmax.f32 %v4240_v53, %v4368_v34  ;;  %v4497_v50 = vmax.f32 %v4241_v48, %v4369_v2  ;;  %v4498_v29 = vmax.f32 %v4242_v45, %v4370_v3  ;;  %v16924_v42 = vrot.slane %v16923_v0, 1  ;;  %v16929_v3 = vld [vmem:[#allocation23_spill] sm:$0xff] }
 0x45d   :  { %v1369_v19 = vsel %vm1182_vm0, %v16920_v44, %v1368_v25  ;;  %v1371_v18 = vsel %vm1182_vm0, %v1368_v25, %v16922_v40  ;;  %4624 = vst.msk [vmem:[#allocation2 + $0x380] sm:$0xff] %vm4511_vm1, %v4495_v39  ;;  %v16926_v55 = vrot.slane %v16925_v22, 1  ;;  %v3417_v8 = vrot.slane %v3069_v49, 1 }
 0x45e   :  { %v1658_v1 = vadd.f32 %v1369_v19, %v889_v52  ;;  %v1659_v56 = vadd.f32 %v1371_v18, %v890_v35  ;;  %v2651_v9 = vsel %vm1182_vm0, %v16924_v42, %v2650_v61  ;;  %v5524_v58 = vadd.f32 %v14556_v5, %v8081_v6  ;;  %4625 = vst.msk [vmem:[#allocation2 + $0x388] sm:$0xff] %vm4511_vm1, %v4496_v13  ;;  %v7144_v52 = vpop.permute.xlu1 %7143 }
 0x45f   :  { %v2653_v41 = vsel %vm1182_vm0, %v2650_v61, %v16926_v55  ;;  %v2940_v48 = vadd.f32 %v2651_v9, %v2173_v12  ;;  %v6546_v35 = vadd.f32 %v14559_v30, %v8081_v6  ;;  %4626 = vst.msk [vmem:[#allocation2 + $0x390] sm:$0xff] %vm4511_vm1, %v4497_v50  ;;  %v16928_v34 = vrot.slane %v16927_v20, 1  ;;  %v7164_v61 = vpop.permute.xlu2 %7163  ;;  %v14798_v20 = vld [vmem:[%s15935_s1 + $0x770] ss:$2 sm:$0xff] }
 0x460   :  { %v1787_v53 = vadd.f32 %v8081_v6, %v1658_v1  ;;  %v2941_v45 = vadd.f32 %v2653_v41, %v2174_v37  ;;  %v1788_v25 = vadd.f32 %v8081_v6, %v1659_v56  ;;  %v16930_v5 = vrot.slane %v16929_v3, 1  ;;  %4627 = vst.msk [vmem:[#allocation2 + $0x398] sm:$0xff] %vm4511_vm1, %v4498_v29 }
 0x461   :  { %v3418_v2 = vsel %vm1182_vm0, %v16928_v34, %v3417_v8  ;;  %v5578_v1 = vmul.f32 %v14650_v54, %v8100_v15  ;;  %v6600_v50 = vmul.f32 %v14655_v43, %v8100_v15  ;;  %v6727_v39 = vmax.f32 %v14663_v14, 0.0  ;;  %v14803_v34 = vld [vmem:[%s15935_s1 + $0x780] ss:$2 sm:$0xff] }
 0x462   :  { %v3420_v49 = vsel %vm1182_vm0, %v3417_v8, %v16930_v5  ;;  %v1916_v12 = vmul.f32 %v8100_v15, %v1787_v53  ;;  %v3707_v30 = vadd.f32 %v3418_v2, %v2940_v48  ;;  %v6791_v44 = vmax.f32 %v14670_v36, 0.0  ;;  %v7154_v53 = vpop.permute.xlu0 %7153 }
 0x463   :  { %v3708_v37 = vadd.f32 %v3420_v49, %v2941_v45  ;;  %v1917_v19 = vmul.f32 %v8100_v15, %v1788_v25  ;;  %v6799_v40 = vmax.f32 %v14422_v62, 0.0  ;;  %v7301_v18 = vmul.f32 %v7144_v52, %v14427_v17  ;;  %v7827_v49 = vld [vmem:[#allocation2 + $0x2d0] ss:$2 sm:$0xff] }
 0x464   :  { %v3835_v54 = vadd.f32 %v3707_v30, %v8081_v6  ;;  %v7403_v13 = vadd.f32 %v14552_v51, %v14409_v33  ;;  %v5588_v43 = vmul.f32 %v5524_v58, %v8100_v15  ;;  %v6610_v14 = vmul.f32 %v6546_v35, %v8100_v15  ;;  %v14817_v30 = vld [vmem:[%s15935_s1 + $0x771] ss:$2 sm:$0xff] }
 0x465   :  { %v3836_v29 = vadd.f32 %v3708_v37, %v8081_v6  ;;  %v2045_v36 = vadd.f32 %v8103_v16, %v1916_v12  ;;  %v14753_v56 = vadd.f32 %v5578_v1, %v8103_v16  ;;  %v2046_v62 = vadd.f32 %v8103_v16, %v1917_v19  ;;  %v14812_v12 = vld [vmem:[%s15935_s1 + $0x761] ss:$2 sm:$0xff]  ;;  %v14826_v19 = vld [vmem:[%s15935_s1 + $0x790] ss:$2 sm:$0xff] }
 0x466   :  { %v3963_v17 = vmul.f32 %v3835_v54, %v8100_v15  ;;  %v14760_v42 = vsel %vm4511_vm1, %v14397_v21, 0.0  ;;  %v14763_v33 = vadd.f32 %v6600_v50, %v8103_v16  ;;  %v6855_v51 = vmax.f32 %v6727_v39, %v6791_v44  ;;  %v7828_v50 = vld [vmem:[#allocation2 + $0x2d1] ss:$2 sm:$0xff]  ;;  %v4753_v54 = vld [vmem:[#allocation2 + $0x380] ss:$2 sm:$0xff] }
 0x467   :  { %v3964_v0 = vmul.f32 %v3836_v29, %v8100_v15  ;;  %v14766_v9 = vmul.f32 %v7164_v61, %v14405_v60  ;;  %v16932_v22 = vmax.f32 %v14383_v47, 0.0  ;;  %v16933_v55 = vmax.f32 %v14377_v10, 0.0  ;;  %v14786_v10 = vld [vmem:[%s15935_s1 + $0x760] ss:$2 sm:$0xff]  ;;  %v4755_v29 = vld [vmem:[#allocation2 + $0x390] ss:$2 sm:$0xff] }
 0x468   :  { %v16934_v8 = vmax.f32 %v14387_v46, 0.0  ;;  %v7404_v21 = vsel %vm4511_vm1, %v7301_v18, 0.0  ;;  %v4091_v45 = vadd.f32 %v3963_v17, %v8103_v16  ;;  %v4219_v52 = vmax.f32 %v2045_v36, 0.0  ;;  %v4881_v36 = vld [vmem:[#allocation2 + $0x381] ss:$2 sm:$0xff] }
 0x469   :  { %16931 = vst [vmem:[#allocation42_spill] sm:$0xff] %v14766_v9  ;;  %v14772_v41 = vmax.f32 %v16933_v55, %v16932_v22  ;;  %v14779_v48 = vadd.f32 %v7404_v21, %v7403_v13  ;;  %v4092_v60 = vadd.f32 %v3964_v0, %v8103_v16  ;;  %v14789_v47 = vadd.f32 %v5588_v43, %v8103_v16  ;;  %v14844_v17 = vld [vmem:[%s15935_s1 + $0x791] ss:$2 sm:$0xff] }
 0x46a   :  { %v14776_v58 = vmax.f32 %v16934_v8, %v6799_v40  ;;  %v14792_v46 = vadd.f32 %v6610_v14, %v8103_v16  ;;  %v4220_v25 = vmax.f32 %v2046_v62, 0.0  ;;  %v14806_v3 = vmul.f32 %v7154_v53, %v6855_v51  ;;  %v14831_v40 = vld [vmem:[%s15935_s1 + $0x781] ss:$2 sm:$0xff]  ;;  %v4883_v55 = vld [vmem:[#allocation2 + $0x391] ss:$2 sm:$0xff] }
 0x46b   :  { %v4347_v5 = vmax.f32 %v4091_v45, 0.0  ;;  %v4941_v1 = vmul.f32 %v7827_v49, %v7993_v26  ;;  %v4348_v37 = vmax.f32 %v4092_v60, 0.0  ;;  %v5005_v39 = vmul.f32 %v7828_v50, %v7981_v23 }
 0x46c   :  { %16935 = vst [vmem:[#allocation34_spill] sm:$0xff] %v14776_v58  ;;  %v14821_v44 = vmul.f32 %v7828_v50, %v7993_v26  ;;  %v658_v18 = vmul.f32 %v14786_v10, %v7993_v26  ;;  %v659_v13 = vmul.f32 %v14798_v20, %v7993_v26  ;;  %v660_v43 = vmul.f32 %v14803_v34, %v7993_v26 }
 0x46d   :  { %v4475_v61 = vmax.f32 %v4219_v52, %v4347_v5  ;;  %v661_v14 = vmul.f32 %v14826_v19, %v7993_v26  ;;  %v4476_v62 = vmax.f32 %v4220_v25, %v4348_v37  ;;  %v787_v0 = vmul.f32 %v14812_v12, %v7981_v23  ;;  %v14875_v25 = vld [vmem:[%s15935_s1 + $0x7a0] ss:$2 sm:$0xff] }
 0x46e   :  { %v788_v51 = vmul.f32 %v14817_v30, %v7981_v23  ;;  %v14852_v22 = vmul.f32 %v14786_v10, %v7995_v27  ;;  %v14855_v8 = vmul.f32 %v4753_v54, %v7995_v27  ;;  %v14858_v21 = vmul.f32 %v4755_v29, %v7995_v27 }
 0x46f   :  { %4604 = vst.msk [vmem:[#allocation2 + $0x2e0] sm:$0xff] %vm4511_vm1, %v4475_v61  ;;  %v789_v53 = vmul.f32 %v14831_v40, %v7981_v23  ;;  %v1045_v45 = vmul.f32 %v14798_v20, %v7995_v27  ;;  %v14866_v60 = vmul.f32 %v4753_v54, %v7981_v23  ;;  %v14869_v52 = vmul.f32 %v4755_v29, %v7981_v23 }
 0x470   :  { %16936 = vst [vmem:[#allocation14_spill] sm:$0xff] %v14858_v21  ;;  %v1046_v5 = vmul.f32 %v14803_v34, %v7995_v27  ;;  %v1047_v49 = vmul.f32 %v14826_v19, %v7995_v27  ;;  %v4952_v37 = vmul.f32 %v4753_v54, %v7993_v26  ;;  %v5016_v50 = vmul.f32 %v4881_v36, %v7981_v23 }
 0x471   :  { %16937 = vst [vmem:[#allocation48_spill] sm:$0xff] %v14866_v60  ;;  %v790_v29 = vmul.f32 %v14844_v17, %v7981_v23  ;;  %v14887_v61 = vmul.f32 %v14875_v25, %v7995_v27  ;;  %v14893_v35 = vmul.f32 %v4883_v55, %v7995_v27  ;;  %v1420_v59 = vrot.slane %v1045_v45, 1 }
 0x472   :  { %16938 = vst [vmem:[#allocation15_spill] sm:$0xff] %v14869_v52  ;;  %v16259_v31 = vrot.slane %v14858_v21, 1  ;;  %v1422_v57 = vrot.slane %v1046_v5, 1  ;;  %v1424_v11 = vrot.slane %v1047_v49, 1  ;;  %v16261_v7 = vrot.slane %v14866_v60, 1 }
 0x473   :  { %4605 = vst.msk [vmem:[#allocation2 + $0x2e8] sm:$0xff] %vm4511_vm1, %v4476_v62  ;;  %v14890_v62 = vmul.f32 %v4881_v36, %v7995_v27  ;;  %v16260_v38 = vrot.slane %v14869_v52, 1  ;;  %v5069_v32 = vadd.f32 %v5005_v39, %v4941_v1  ;;  %v915_v24 = vadd.f32 %v787_v0, %v658_v18 }
 0x474   :  { %16939 = vst [vmem:[#allocation43_spill] sm:$0xff] %v14887_v61  ;;  %v5080_v4 = vadd.f32 %v5016_v50, %v4952_v37  ;;  %v5719_v9 = vmul.f32 %v4881_v36, %v7993_v26  ;;  %v916_v55 = vadd.f32 %v788_v51, %v659_v13  ;;  %v16268_v58 = vrot.slane %v14887_v61, 1 }
 0x475   :  { %16940 = vst [vmem:[#allocation31_spill] sm:$0xff] %v14893_v35  ;;  %v917_v2 = vadd.f32 %v789_v53, %v660_v43  ;;  %v16941_v5 = vrot.slane %v14852_v22, 1  ;;  %v16942_v1 = vrot.slane %v14855_v8, 1  ;;  %v918_v13 = vadd.f32 %v790_v29, %v661_v14 }
 0x476   :  { %v1423_v0 = vsel %vm1182_vm0, %v1420_v59, %v1422_v57  ;;  %v1425_v51 = vsel %vm1182_vm0, %v1422_v57, %v1424_v11  ;;  %v5969_v43 = vsel %vm1182_vm0, %v16261_v7, %v16260_v38  ;;  %v1427_v57 = vsel %vm1182_vm0, %v1424_v11, %v16268_v58 }
 0x477   :  { %v1421_v49 = vsel %vm1182_vm0, %v16941_v5, %v1420_v59  ;;  %v5330_v39 = vsel %vm1182_vm0, %v16942_v1, %v16259_v31  ;;  %v1685_v31 = vadd.f32 %v1423_v0, %v916_v55  ;;  %v1686_v38 = vadd.f32 %v1425_v51, %v917_v2 }
 0x478   :  { %v1684_v59 = vadd.f32 %v1421_v49, %v915_v24  ;;  %v14927_v29 = vadd.f32 %v5330_v39, %v5080_v4  ;;  %v14930_v21 = vadd.f32 %v5969_v43, %v5719_v9  ;;  %v16944_v60 = vrot.slane %v14890_v62, 1  ;;  %v16947_v49 = vld [vmem:[#allocation50_spill] sm:$0xff]  ;;  %v16951_v43 = vld [vmem:[#allocation53_spill] sm:$0xff] }
 0x479   :  { %v16945_v4 = vrot.slane %v13748_v63, 1  ;;  %v1687_v24 = vadd.f32 %v1427_v57, %v918_v13  ;;  %v16946_v2 = vrot.slane %v13740_v28, 1  ;;  %v16948_v39 = vrot.slane %v16947_v49, 1 }
 0x47a   :  { %v4733_v18 = vld [vmem:[#allocation2 + $0x2e0] ss:$2 sm:$0xff]  ;;  %v4861_v36 = vld [vmem:[#allocation2 + $0x2e1] ss:$2 sm:$0xff]  ;;  %v2199_v0 = vmul.f32 %v14812_v12, %v7993_v26  ;;  %v1814_v28 = vadd.f32 %v8081_v6, %v1685_v31  ;;  %v14962_v57 = vmul.f32 %v14786_v10, %v7981_v23  ;;  %v2200_v31 = vmul.f32 %v14817_v30, %v7993_v26 }
 0x47b   :  { %v4942_v53 = vmul.f32 %v4733_v18, %v7993_v26  ;;  %v5006_v37 = vmul.f32 %v4861_v36, %v7981_v23  ;;  %v5134_v50 = vmul.f32 %v4733_v18, %v7995_v27  ;;  %v5773_v5 = vmul.f32 %v4733_v18, %v7981_v23 }
 0x47c   :  { %v6156_v14 = vmul.f32 %v4861_v36, %v7995_v27  ;;  %v5709_v45 = vmul.f32 %v4861_v36, %v7993_v26  ;;  %v16943_v18 = vrot.slane %v14893_v35, 1  ;;  %v1813_v36 = vadd.f32 %v8081_v6, %v1684_v59  ;;  %v16953_v59 = vld [vmem:[#allocation57_spill] sm:$0xff]  ;;  %v16977_v35 = vld [vmem:[#allocation35_spill] sm:$0xff] }
 0x47d   :  { %v5307_v1 = vrot.slane %v5134_v50, 1  ;;  %v5070_v7 = vadd.f32 %v5006_v37, %v4942_v53  ;;  %v5946_v54 = vrot.slane %v5773_v5, 1  ;;  %v16952_v53 = vrot.slane %v16951_v43, 1 }
 0x47e   :  { %v6329_v52 = vrot.slane %v6156_v14, 1  ;;  %v14937_v61 = vsel %vm1182_vm0, %v16944_v60, %v16943_v18  ;;  %v16949_v60 = vld [vmem:[#allocation9_spill] sm:$0xff]  ;;  %v1815_v37 = vadd.f32 %v8081_v6, %v1686_v38  ;;  %v1942_v38 = vmul.f32 %v8100_v15, %v1813_v36 }
 0x47f   :  { %v5310_v11 = vsel %vm1182_vm0, %v5307_v1, %v16945_v4  ;;  %v5949_v55 = vsel %vm1182_vm0, %v5946_v54, %v16946_v2  ;;  %v5308_v9 = vsel %vm1182_vm0, %v16948_v39, %v5307_v1  ;;  %v16950_v51 = vrot.slane %v16949_v60, 1 }
 0x480   :  { %v6330_v13 = vsel %vm1182_vm0, %v16952_v53, %v6329_v52  ;;  %v5453_v50 = vadd.f32 %v5310_v11, %v5070_v7  ;;  %v6092_v5 = vadd.f32 %v5949_v55, %v5709_v45  ;;  %v16954_v1 = vrot.slane %v16953_v59, 1 }
 0x481   :  { %v5947_v63 = vsel %vm1182_vm0, %v16950_v51, %v5946_v54  ;;  %v5452_v18 = vadd.f32 %v5308_v9, %v5069_v32  ;;  %v1816_v4 = vadd.f32 %v8081_v6, %v1687_v24  ;;  %v2328_v7 = vmul.f32 %v14798_v20, %v7981_v23 }
 0x482   :  { %v6091_v14 = vadd.f32 %v5947_v63, %v14821_v44  ;;  %v6332_v54 = vsel %vm1182_vm0, %v6329_v52, %v16954_v1  ;;  %v2329_v10 = vmul.f32 %v14803_v34, %v7981_v23  ;;  %v1943_v44 = vmul.f32 %v8100_v15, %v1814_v28 }
 0x483   :  { %v1944_v45 = vmul.f32 %v8100_v15, %v1815_v37  ;;  %v2330_v32 = vmul.f32 %v14826_v19, %v7981_v23  ;;  %v14981_v52 = vmul.f32 %v14875_v25, %v7981_v23  ;;  %v5517_v11 = vadd.f32 %v5453_v50, %v8081_v6  ;;  %v7756_v37 = vld [vmem:[%s15935_s1 + $0x7a1] ss:$2 sm:$0xff] }
 0x484   :  { %v6474_v2 = vadd.f32 %v6330_v13, %v6091_v14  ;;  %v6475_v24 = vadd.f32 %v6332_v54, %v6092_v5  ;;  %v16271_v55 = vrot.slane %v14962_v57, 1  ;;  %v2702_v20 = vrot.slane %v2328_v7, 1 }
 0x485   :  { %16955 = vst [vmem:[#allocation45_spill] sm:$0xff] %v14981_v52  ;;  %v5516_v49 = vadd.f32 %v5452_v18, %v8081_v6  ;;  %v2704_v39 = vrot.slane %v2329_v10, 1  ;;  %v2706_v9 = vrot.slane %v2330_v32, 1  ;;  %v1945_v36 = vmul.f32 %v8100_v15, %v1816_v4 }
 0x486   :  { %v6538_v34 = vadd.f32 %v6474_v2, %v8081_v6  ;;  %v2201_v19 = vmul.f32 %v14831_v40, %v7993_v26  ;;  %v2202_v25 = vmul.f32 %v14844_v17, %v7993_v26  ;;  %v16267_v60 = vrot.slane %v14981_v52, 1  ;;  %v16979_v52 = vld [vmem:[#allocation16_spill] sm:$0xff] }
 0x487   :  { %v14994_v51 = vadd.f32 %v8103_v16, %v1942_v38  ;;  %v14997_v63 = vadd.f32 %v8103_v16, %v1943_v44  ;;  %v15000_v43 = vadd.f32 %v8103_v16, %v1944_v45  ;;  %v2703_v53 = vsel %vm1182_vm0, %v16271_v55, %v2702_v20 }
 0x488   :  { %v5581_v13 = vmul.f32 %v5517_v11, %v8100_v15  ;;  %v6539_v28 = vadd.f32 %v6475_v24, %v8081_v6  ;;  %v2705_v50 = vsel %vm1182_vm0, %v2702_v20, %v2704_v39  ;;  %v2707_v5 = vsel %vm1182_vm0, %v2704_v39, %v2706_v9 }
 0x489   :  { %v5580_v14 = vmul.f32 %v5516_v49, %v8100_v15  ;;  %v6602_v59 = vmul.f32 %v6538_v34, %v8100_v15  ;;  %v2709_v1 = vsel %vm1182_vm0, %v2706_v9, %v16267_v60  ;;  %v15019_v54 = vmul.f32 %v14812_v12, %v7995_v27 }
 0x48a   :  { %v2966_v18 = vadd.f32 %v2703_v53, %v2199_v0  ;;  %v3095_v4 = vmul.f32 %v14817_v30, %v7995_v27  ;;  %v3096_v2 = vmul.f32 %v14831_v40, %v7995_v27  ;;  %v3097_v38 = vmul.f32 %v14844_v17, %v7995_v27 }
 0x48b   :  { %v2967_v7 = vadd.f32 %v2705_v50, %v2200_v31  ;;  %v2968_v10 = vadd.f32 %v2707_v5, %v2201_v19  ;;  %v15028_v44 = vmul.f32 %v7756_v37, %v7995_v27  ;;  %v16269_v45 = vrot.slane %v15019_v54, 1  ;;  %v7733_v37 = vld [vmem:[%s15935_s1 + $0x631] ss:$2 sm:$0xff]  ;;  %v15056_v50 = vpop.permute.xlu2 %7178 }
 0x48c   :  { %v2969_v32 = vadd.f32 %v2709_v1, %v2202_v25  ;;  %v3469_v12 = vrot.slane %v3095_v4, 1  ;;  %v3471_v11 = vrot.slane %v3096_v2, 1  ;;  %v3473_v0 = vrot.slane %v3097_v38, 1  ;;  %v7605_v1 = vld [vmem:[%s15935_s1 + $0x630] ss:$2 sm:$0xff] }
 0x48d   :  { %16956 = vst [vmem:[#allocation23_spill] sm:$0xff] %v15028_v44  ;;  %v15032_v24 = vadd.f32 %v5581_v13, %v8103_v16  ;;  %v6603_v30 = vmul.f32 %v6539_v28, %v8100_v15  ;;  %v2074_v40 = vadd.f32 %v8103_v16, %v1945_v36  ;;  %v16266_v17 = vrot.slane %v15028_v44, 1 }
 0x48e   :  { %v15038_v31 = vadd.f32 %v5580_v14, %v8103_v16  ;;  %v3470_v20 = vsel %vm1182_vm0, %v16269_v45, %v3469_v12  ;;  %v3472_v49 = vsel %vm1182_vm0, %v3469_v12, %v3471_v11  ;;  %v3474_v34 = vsel %vm1182_vm0, %v3471_v11, %v3473_v0 }
 0x48f   :  { %v15046_v39 = vadd.f32 %v6602_v59, %v8103_v16  ;;  %v3476_v9 = vsel %vm1182_vm0, %v3473_v0, %v16266_v17  ;;  %v3733_v36 = vadd.f32 %v3470_v20, %v2966_v18  ;;  %v3734_v19 = vadd.f32 %v3472_v49, %v2967_v7 }
 0x490   :  { %v3735_v25 = vadd.f32 %v3474_v34, %v2968_v10  ;;  %v3736_v53 = vadd.f32 %v3476_v9, %v2969_v32  ;;  %v4245_v13 = vmax.f32 %v14994_v51, 0.0  ;;  %v4246_v28 = vmax.f32 %v14997_v63, 0.0  ;;  %v7829_v51 = vld [vmem:[%s15935_s1 + $0x620] ss:$2 sm:$0xff] }
 0x491   :  { %v3861_v5 = vadd.f32 %v3733_v36, %v8081_v6  ;;  %v3862_v14 = vadd.f32 %v3734_v19, %v8081_v6  ;;  %v4247_v59 = vmax.f32 %v15000_v43, 0.0  ;;  %v638_v63 = vmul.f32 %v7829_v51, %v7993_v26  ;;  %v7830_v43 = vld [vmem:[%s15935_s1 + $0x621] ss:$2 sm:$0xff] }
 0x492   :  { %v3863_v18 = vadd.f32 %v3735_v25, %v8081_v6  ;;  %v3864_v4 = vadd.f32 %v3736_v53, %v8081_v6  ;;  %v639_v2 = vmul.f32 %v7605_v1, %v7993_v26  ;;  %v767_v38 = vmul.f32 %v7830_v43, %v7981_v23 }
 0x493   :  { %v3989_v7 = vmul.f32 %v3861_v5, %v8100_v15  ;;  %v3990_v10 = vmul.f32 %v3862_v14, %v8100_v15  ;;  %v4248_v32 = vmax.f32 %v2074_v40, 0.0  ;;  %v768_v12 = vmul.f32 %v7733_v37, %v7981_v23  ;;  %v7194_v45 = vpop.permute.xlu2 %7193 }
 0x494   :  { %v3991_v11 = vmul.f32 %v3863_v18, %v8100_v15  ;;  %v3992_v0 = vmul.f32 %v3864_v4, %v8100_v15  ;;  %v895_v20 = vadd.f32 %v767_v38, %v638_v63  ;;  %v1025_v49 = vmul.f32 %v7605_v1, %v7995_v27 }
 0x495   :  { %v4117_v34 = vadd.f32 %v3989_v7, %v8103_v16  ;;  %v4118_v9 = vadd.f32 %v3990_v10, %v8103_v16  ;;  %v896_v36 = vadd.f32 %v768_v12, %v639_v2  ;;  %v2179_v19 = vmul.f32 %v7830_v43, %v7993_v26  ;;  %v16957_v7 = vld [vmem:[#allocation10_spill] sm:$0xff]  ;;  %v16959_v43 = vld [vmem:[#allocation17_spill] sm:$0xff] }
 0x496   :  { %v4119_v25 = vadd.f32 %v3991_v11, %v8103_v16  ;;  %v4120_v40 = vadd.f32 %v3992_v0, %v8103_v16  ;;  %v1380_v53 = vrot.slane %v1025_v49, 1  ;;  %v2180_v5 = vmul.f32 %v7733_v37, %v7993_v26 }
 0x497   :  { %v4373_v14 = vmax.f32 %v4117_v34, 0.0  ;;  %v4374_v51 = vmax.f32 %v4118_v9, 0.0  ;;  %v2308_v63 = vmul.f32 %v7605_v1, %v7981_v23  ;;  %v3075_v18 = vmul.f32 %v7733_v37, %v7995_v27  ;;  %v7159_v37 = vpop.permute.xlu1 %7158 }
 0x498   :  { %v4375_v4 = vmax.f32 %v4119_v25, 0.0  ;;  %v4376_v38 = vmax.f32 %v4120_v40, 0.0  ;;  %v16958_v10 = vrot.slane %v16957_v7, 1  ;;  %v16960_v12 = vrot.slane %v16959_v43, 1 }
 0x499   :  { %v4501_v0 = vmax.f32 %v4245_v13, %v4373_v14  ;;  %v4502_v49 = vmax.f32 %v4246_v28, %v4374_v51  ;;  %v2662_v58 = vrot.slane %v2308_v63, 1  ;;  %v3429_v1 = vrot.slane %v3075_v18, 1  ;;  %v16961_v13 = vld [vmem:[#allocation55_spill] sm:$0xff] }
 0x49a   :  { %v1381_v2 = vsel %vm1182_vm0, %v16958_v10, %v1380_v53  ;;  %v1383_v11 = vsel %vm1182_vm0, %v1380_v53, %v16960_v12  ;;  %v4503_v34 = vmax.f32 %v4247_v59, %v4375_v4  ;;  %v4504_v9 = vmax.f32 %v4248_v32, %v4376_v38  ;;  %v16963_v32 = vld [vmem:[#allocation25_spill] sm:$0xff]  ;;  %v16965_v14 = vld [vmem:[#allocation27_spill] sm:$0xff] }
 0x49b   :  { %v1664_v17 = vadd.f32 %v1381_v2, %v895_v20  ;;  %v1665_v60 = vadd.f32 %v1383_v11, %v896_v36  ;;  %v6667_v25 = vadd.f32 %v6603_v30, %v8103_v16  ;;  %v6730_v40 = vmax.f32 %v15038_v31, 0.0  ;;  %4630 = vst.msk [vmem:[#allocation2 + $0x3b0] sm:$0xff] %vm4511_vm1, %v4501_v0  ;;  %v16967_v51 = vld [vmem:[#allocation19_spill] sm:$0xff] }
 0x49c   :  { %4631 = vst.msk [vmem:[#allocation2 + $0x3b8] sm:$0xff] %vm4511_vm1, %v4502_v49  ;;  %v16962_v28 = vrot.slane %v16961_v13, 1  ;;  %v16964_v20 = vrot.slane %v16963_v32, 1  ;;  %v16966_v30 = vrot.slane %v16965_v14, 1  ;;  %v16968_v63 = vrot.slane %v16967_v51, 1 }
 0x49d   :  { %v1793_v7 = vadd.f32 %v8081_v6, %v1664_v17  ;;  %v1794_v53 = vadd.f32 %v8081_v6, %v1665_v60  ;;  %v6794_v60 = vmax.f32 %v15046_v39, 0.0  ;;  %4632 = vst.msk [vmem:[#allocation2 + $0x3c0] sm:$0xff] %vm4511_vm1, %v4503_v34  ;;  %v16969_v10 = vmax.f32 %v14763_v33, 0.0 }
 0x49e   :  { %v2663_v59 = vsel %vm1182_vm0, %v16962_v28, %v2662_v58  ;;  %v2665_v36 = vsel %vm1182_vm0, %v2662_v58, %v16964_v20  ;;  %v3430_v31 = vsel %vm1182_vm0, %v16966_v30, %v3429_v1  ;;  %v3432_v17 = vsel %vm1182_vm0, %v3429_v1, %v16968_v63  ;;  %4633 = vst.msk [vmem:[#allocation2 + $0x3c8] sm:$0xff] %vm4511_vm1, %v4504_v9  ;;  %v7169_v1 = vpop.permute.xlu0 %7168 }
 0x49f   :  { %v1922_v18 = vmul.f32 %v8100_v15, %v1793_v7  ;;  %v2946_v4 = vadd.f32 %v2663_v59, %v2179_v19  ;;  %v2947_v38 = vadd.f32 %v2665_v36, %v2180_v5  ;;  %v16970_v58 = vmax.f32 %v14753_v56, 0.0  ;;  %v16971_v7 = vld [vmem:[#allocation34_spill] sm:$0xff]  ;;  %v7209_v59 = vpop.permute.xlu2 %7208  ;;  %v7174_v32 = vpop.permute.xlu1 %7173 }
 0x4a0   :  { %v7407_v43 = vadd.f32 %v14760_v42, %v14779_v48  ;;  %v7408_v12 = vsel %vm4511_vm1, %v14806_v3, 0.0  ;;  %v1923_v39 = vmul.f32 %v8100_v15, %v1794_v53  ;;  %v5527_v11 = vadd.f32 %v14927_v29, %v8081_v6  ;;  %v16972_v36 = vld [vmem:[#allocation42_spill] sm:$0xff] }
 0x4a1   :  { %v6856_v2 = vmax.f32 %v16970_v58, %v16969_v10  ;;  %v6485_v19 = vadd.f32 %v14937_v61, %v14930_v21  ;;  %v3713_v33 = vadd.f32 %v3430_v31, %v2946_v4  ;;  %v3714_v5 = vadd.f32 %v3432_v17, %v2947_v38 }
 0x4a2   :  { %v6738_v56 = vmax.f32 %v14789_v47, 0.0  ;;  %v6802_v0 = vmax.f32 %v14792_v46, 0.0  ;;  %v6731_v42 = vmax.f32 %v15032_v24, 0.0  ;;  %v6795_v48 = vmax.f32 %v6667_v25, 0.0 }
 0x4a3   :  { %v6858_v3 = vmax.f32 %v6730_v40, %v6794_v60  ;;  %v2051_v49 = vadd.f32 %v8103_v16, %v1922_v18  ;;  %v3841_v34 = vadd.f32 %v3713_v33, %v8081_v6  ;;  %v3842_v9 = vadd.f32 %v3714_v5, %v8081_v6  ;;  %v15159_v18 = vld [vmem:[%s15935_s1 + $0x7c0] ss:$2 sm:$0xff]  ;;  %v7832_v33 = vld [vmem:[#allocation2 + $0x301] ss:$2 sm:$0xff] }
 0x4a4   :  { %v7308_v29 = vmul.f32 %v15056_v50, %v14772_v41  ;;  %v7304_v21 = vmul.f32 %v7159_v37, %v6856_v2  ;;  %v7409_v61 = vadd.f32 %v7408_v12, %v7407_v43  ;;  %v2052_v47 = vadd.f32 %v8103_v16, %v1923_v39  ;;  %v15169_v2 = vld [vmem:[%s15935_s1 + $0x7d0] ss:$2 sm:$0xff]  ;;  %v15174_v43 = vld [vmem:[%s15935_s1 + $0x7e0] ss:$2 sm:$0xff] }
 0x4a5   :  { %v5591_v46 = vmul.f32 %v5527_v11, %v8100_v15  ;;  %v6549_v24 = vadd.f32 %v6485_v19, %v8081_v6  ;;  %v3969_v25 = vmul.f32 %v3841_v34, %v8100_v15  ;;  %v3970_v40 = vmul.f32 %v3842_v9, %v8100_v15  ;;  %v7831_v11 = vld [vmem:[#allocation2 + $0x300] ss:$2 sm:$0xff] }
 0x4a6   :  { %v7311_v53 = vmul.f32 %v7194_v45, %v16971_v7  ;;  %v6866_v13 = vmax.f32 %v6738_v56, %v6802_v0  ;;  %v6859_v28 = vmax.f32 %v6731_v42, %v6795_v48  ;;  %v7306_v41 = vmul.f32 %v7169_v1, %v6858_v3  ;;  %v15182_v56 = vld [vmem:[%s15935_s1 + $0x7c1] ss:$2 sm:$0xff]  ;;  %v15187_v0 = vld [vmem:[%s15935_s1 + $0x7d1] ss:$2 sm:$0xff] }
 0x4a7   :  { %v4097_v50 = vadd.f32 %v3969_v25, %v8103_v16  ;;  %v4098_v37 = vadd.f32 %v3970_v40, %v8103_v16  ;;  %v4225_v20 = vmax.f32 %v2051_v49, 0.0  ;;  %v7412_v14 = vsel %vm4511_vm1, %v16972_v36, 0.0  ;;  %v15192_v48 = vld [vmem:[%s15935_s1 + $0x7f0] ss:$2 sm:$0x7f] }
 0x4a8   :  { %v15149_v30 = vsel %vm4511_vm1, %v7308_v29, 0.0  ;;  %v7410_v31 = vsel %vm4511_vm1, %v7304_v21, 0.0  ;;  %v4226_v51 = vmax.f32 %v2052_v47, 0.0  ;;  %v15153_v63 = vadd.f32 %v5591_v46, %v8103_v16  ;;  %v15218_v47 = vld [vmem:[%s15935_s1 + $0x7f1] ss:$2 sm:$0x7f] }
 0x4a9   :  { %v7411_v45 = vadd.f32 %v7410_v31, %v7409_v61  ;;  %v6613_v17 = vmul.f32 %v6549_v24, %v8100_v15  ;;  %v4353_v60 = vmax.f32 %v4097_v50, 0.0  ;;  %v15162_v4 = vsel %vm4511_vm1, %v7311_v53, 0.0  ;;  %v15210_v61 = vld [vmem:[%s15935_s1 + $0x7e1] ss:$2 sm:$0xff] }
 0x4aa   :  { %v15164_v38 = vmul.f32 %v7209_v59, %v6866_v13  ;;  %v7307_v10 = vmul.f32 %v7174_v32, %v6859_v28  ;;  %v4354_v58 = vmax.f32 %v4098_v37, 0.0  ;;  %v7414_v12 = vsel %vm4511_vm1, %v7306_v41, 0.0  ;;  %v4759_v13 = vld [vmem:[#allocation2 + $0x3b0] ss:$2 sm:$0xff]  ;;  %v4887_v32 = vld [vmem:[#allocation2 + $0x3b1] ss:$2 sm:$0xff] }
 0x4ab   :  { %v4481_v39 = vmax.f32 %v4225_v20, %v4353_v60  ;;  %v4944_v19 = vmul.f32 %v7831_v11, %v7993_v26  ;;  %v5008_v5 = vmul.f32 %v7832_v33, %v7981_v23  ;;  %v15196_v3 = vmul.f32 %v15159_v18, %v7995_v27 }
 0x4ac   :  { %16973 = vst [vmem:[#allocation50_spill] sm:$0xff] %v15164_v38  ;;  %v4482_v42 = vmax.f32 %v4226_v51, %v4354_v58  ;;  %v1051_v49 = vmul.f32 %v15169_v2, %v7995_v27  ;;  %v1052_v34 = vmul.f32 %v15174_v43, %v7995_v27  ;;  %v15203_v9 = vadd.f32 %v6613_v17, %v8103_v16 }
 0x4ad   :  { %16974 = vst [vmem:[#allocation9_spill] sm:$0xff] %v15196_v3  ;;  %v7413_v21 = vadd.f32 %v7412_v14, %v7411_v45  ;;  %v1053_v1 = vmul.f32 %v15192_v48, %v7995_v27  ;;  %v664_v46 = vmul.f32 %v15159_v18, %v7993_v26  ;;  %v665_v24 = vmul.f32 %v15169_v2, %v7993_v26  ;;  %v4761_v45 = vld [vmem:[#allocation2 + $0x3c0] ss:$2 sm:$0xff] }
 0x4ae   :  { %4610 = vst.msk [vmem:[#allocation2 + $0x310] sm:$0xff] %vm4511_vm1, %v4481_v39  ;;  %v793_v25 = vmul.f32 %v15182_v56, %v7981_v23  ;;  %v794_v40 = vmul.f32 %v15187_v0, %v7981_v23  ;;  %v15229_v7 = vsel %vm4511_vm1, %v7307_v10, 0.0  ;;  %v5072_v28 = vadd.f32 %v5008_v5, %v4944_v19 }
 0x4af   :  { %4611 = vst.msk [vmem:[#allocation2 + $0x318] sm:$0xff] %vm4511_vm1, %v4482_v42  ;;  %v15231_v53 = vadd.f32 %v7414_v12, %v7413_v21  ;;  %v666_v59 = vmul.f32 %v15174_v43, %v7993_v26  ;;  %v795_v41 = vmul.f32 %v15210_v61, %v7981_v23  ;;  %v16270_v50 = vrot.slane %v15196_v3, 1 }
 0x4b0   :  { %v1432_v37 = vrot.slane %v1051_v49, 1  ;;  %v1434_v20 = vrot.slane %v1052_v34, 1  ;;  %v15239_v36 = vmul.f32 %v4759_v13, %v7995_v27  ;;  %v667_v14 = vmul.f32 %v15192_v48, %v7993_v26 }
 0x4b1   :  { %v796_v31 = vmul.f32 %v15218_v47, %v7981_v23  ;;  %v1436_v51 = vrot.slane %v1053_v1, 1  ;;  %v15246_v17 = vmul.f32 %v4759_v13, %v7981_v23  ;;  %v5711_v60 = vmul.f32 %v7832_v33, %v7993_v26 }
 0x4b2   :  { %v921_v10 = vadd.f32 %v793_v25, %v664_v46  ;;  %v922_v58 = vadd.f32 %v794_v40, %v665_v24  ;;  %v15250_v12 = vmul.f32 %v4759_v13, %v7993_v26  ;;  %v15253_v39 = vmul.f32 %v4887_v32, %v7981_v23 }
 0x4b3   :  { %v15256_v11 = vmul.f32 %v4887_v32, %v7993_v26  ;;  %v15259_v19 = vmul.f32 %v4887_v32, %v7995_v27  ;;  %v15262_v5 = vmul.f32 %v4761_v45, %v7995_v27  ;;  %v923_v42 = vadd.f32 %v795_v41, %v666_v59 }
 0x4b4   :  { %v1433_v33 = vsel %vm1182_vm0, %v16270_v50, %v1432_v37  ;;  %v1435_v49 = vsel %vm1182_vm0, %v1432_v37, %v1434_v20  ;;  %v15270_v21 = vmul.f32 %v4761_v45, %v7981_v23  ;;  %v924_v24 = vadd.f32 %v796_v31, %v667_v14 }
 0x4b5   :  { %16975 = vst [vmem:[#allocation53_spill] sm:$0xff] %v15262_v5  ;;  %v1437_v25 = vsel %vm1182_vm0, %v1434_v20, %v1436_v51  ;;  %v1690_v50 = vadd.f32 %v1433_v33, %v921_v10  ;;  %v1691_v45 = vadd.f32 %v1435_v49, %v922_v58  ;;  %v15282_v38 = vmul.f32 %v15159_v18, %v7981_v23 }
 0x4b6   :  { %16976 = vst [vmem:[#allocation57_spill] sm:$0xff] %v15270_v21  ;;  %v4739_v1 = vld [vmem:[#allocation2 + $0x310] ss:$2 sm:$0xff]  ;;  %v4867_v46 = vld [vmem:[#allocation2 + $0x311] ss:$2 sm:$0xff]  ;;  %v1692_v31 = vadd.f32 %v1437_v25, %v923_v42  ;;  %v1693_v40 = vadd.f32 %v1436_v51, %v924_v24  ;;  %v16978_v44 = vrot.slane %v16977_v35, 1  ;;  %v2334_v58 = vmul.f32 %v15169_v2, %v7981_v23 }
 0x4b7   :  { %v4945_v13 = vmul.f32 %v4739_v1, %v7993_v26  ;;  %v5009_v59 = vmul.f32 %v4867_v46, %v7981_v23  ;;  %v5137_v32 = vmul.f32 %v4739_v1, %v7995_v27  ;;  %v5776_v41 = vmul.f32 %v4739_v1, %v7981_v23  ;;  %v16981_v51 = vld [vmem:[#allocation32_spill] sm:$0xff] }
 0x4b8   :  { %v6159_v37 = vmul.f32 %v4867_v46, %v7995_v27  ;;  %v5712_v14 = vmul.f32 %v4867_v46, %v7993_v26  ;;  %v16980_v3 = vrot.slane %v16979_v52, 1  ;;  %v2335_v42 = vmul.f32 %v15174_v43, %v7981_v23  ;;  %v16983_v46 = vld [vmem:[#allocation28_spill] sm:$0xff] }
 0x4b9   :  { %v5073_v55 = vadd.f32 %v5009_v59, %v4945_v13  ;;  %v5313_v29 = vrot.slane %v5137_v32, 1  ;;  %v5952_v20 = vrot.slane %v5776_v41, 1  ;;  %v16982_v49 = vrot.slane %v16981_v51, 1  ;;  %v16987_v13 = vld [vmem:[#allocation18_spill] sm:$0xff] }
 0x4ba   :  { %v6335_v34 = vrot.slane %v6159_v37, 1  ;;  %v16984_v24 = vrot.slane %v16983_v46, 1  ;;  %v2336_v52 = vmul.f32 %v15192_v48, %v7981_v23  ;;  %v1819_v43 = vadd.f32 %v8081_v6, %v1690_v50 }
 0x4bb   :  { %v5316_v1 = vsel %vm1182_vm0, %v5313_v29, %v16978_v44  ;;  %v5314_v10 = vsel %vm1182_vm0, %v16980_v3, %v5313_v29  ;;  %v5955_v18 = vsel %vm1182_vm0, %v5952_v20, %v16982_v49  ;;  %v16985_v29 = vld [vmem:[#allocation36_spill] sm:$0xff]  ;;  %v16988_v59 = vrot.slane %v16987_v13, 1 }
 0x4bc   :  { %v5456_v33 = vadd.f32 %v5316_v1, %v5073_v55  ;;  %v6338_v35 = vsel %vm1182_vm0, %v6335_v34, %v16984_v24  ;;  %v6095_v44 = vadd.f32 %v5955_v18, %v5712_v14  ;;  %v5455_v3 = vadd.f32 %v5314_v10, %v5072_v28 }
 0x4bd   :  { %v16986_v25 = vrot.slane %v16985_v29, 1  ;;  %v6336_v32 = vsel %vm1182_vm0, %v16988_v59, %v6335_v34  ;;  %v1820_v41 = vadd.f32 %v8081_v6, %v1691_v45  ;;  %v1821_v37 = vadd.f32 %v8081_v6, %v1692_v31 }
 0x4be   :  { %v6478_v1 = vadd.f32 %v6338_v35, %v6095_v44  ;;  %v1822_v48 = vadd.f32 %v8081_v6, %v1693_v40  ;;  %v16281_v28 = vrot.slane %v15282_v38, 1  ;;  %v2714_v14 = vrot.slane %v2334_v58, 1 }
 0x4bf   :  { %v5953_v2 = vsel %vm1182_vm0, %v16986_v25, %v5952_v20  ;;  %v5520_v10 = vadd.f32 %v5456_v33, %v8081_v6  ;;  %v5519_v20 = vadd.f32 %v5455_v3, %v8081_v6  ;;  %v2716_v50 = vrot.slane %v2335_v42, 1 }
 0x4c0   :  { %v6094_v55 = vadd.f32 %v5953_v2, %v5711_v60  ;;  %v2718_v60 = vrot.slane %v2336_v52, 1  ;;  %v6542_v51 = vadd.f32 %v6478_v1, %v8081_v6  ;;  %v2205_v34 = vmul.f32 %v15182_v56, %v7993_v26 }
 0x4c1   :  { %v2206_v45 = vmul.f32 %v15187_v0, %v7993_v26  ;;  %v1948_v40 = vmul.f32 %v8100_v15, %v1819_v43  ;;  %v2207_v31 = vmul.f32 %v15210_v61, %v7993_v26  ;;  %v2208_v58 = vmul.f32 %v15218_v47, %v7993_v26 }
 0x4c2   :  { %v6477_v49 = vadd.f32 %v6336_v32, %v6094_v55  ;;  %v15327_v42 = vmul.f32 %v15182_v56, %v7995_v27  ;;  %v1949_v33 = vmul.f32 %v8100_v15, %v1820_v41  ;;  %v1950_v18 = vmul.f32 %v8100_v15, %v1821_v37 }
 0x4c3   :  { %v2715_v46 = vsel %vm1182_vm0, %v16281_v28, %v2714_v14  ;;  %v2717_v24 = vsel %vm1182_vm0, %v2714_v14, %v2716_v50  ;;  %v5584_v35 = vmul.f32 %v5520_v10, %v8100_v15  ;;  %v5583_v52 = vmul.f32 %v5519_v20, %v8100_v15 }
 0x4c4   :  { %v1951_v44 = vmul.f32 %v8100_v15, %v1822_v48  ;;  %v2719_v3 = vsel %vm1182_vm0, %v2716_v50, %v2718_v60  ;;  %v6606_v56 = vmul.f32 %v6542_v51, %v8100_v15  ;;  %v6541_v29 = vadd.f32 %v6477_v49, %v8081_v6 }
 0x4c5   :  { %v3101_v25 = vmul.f32 %v15187_v0, %v7995_v27  ;;  %v3102_v2 = vmul.f32 %v15210_v61, %v7995_v27  ;;  %v2972_v43 = vadd.f32 %v2715_v46, %v2205_v34  ;;  %v2973_v55 = vadd.f32 %v2717_v24, %v2206_v45 }
 0x4c6   :  { %v3103_v13 = vmul.f32 %v15218_v47, %v7995_v27  ;;  %v16280_v59 = vrot.slane %v15327_v42, 1  ;;  %v2974_v32 = vadd.f32 %v2719_v3, %v2207_v31  ;;  %v2975_v41 = vadd.f32 %v2718_v60, %v2208_v58 }
 0x4c7   :  { %v3481_v37 = vrot.slane %v3101_v25, 1  ;;  %v3483_v1 = vrot.slane %v3102_v2, 1  ;;  %v2077_v48 = vadd.f32 %v8103_v16, %v1948_v40  ;;  %v2078_v14 = vadd.f32 %v8103_v16, %v1949_v33  ;;  %v7739_v33 = vld [vmem:[%s15935_s1 + $0x691] ss:$2 sm:$0xff]  ;;  %v7834_v25 = vld [vmem:[%s15935_s1 + $0x681] ss:$2 sm:$0xff] }
 0x4c8   :  { %v2079_v0 = vadd.f32 %v8103_v16, %v1950_v18  ;;  %v3485_v10 = vrot.slane %v3103_v13, 1  ;;  %v15352_v61 = vadd.f32 %v5584_v35, %v8103_v16  ;;  %v2080_v20 = vadd.f32 %v8103_v16, %v1951_v44  ;;  %v7611_v35 = vld [vmem:[%s15935_s1 + $0x690] ss:$2 sm:$0xff] }
 0x4c9   :  { %v3482_v47 = vsel %vm1182_vm0, %v16280_v59, %v3481_v37  ;;  %v3484_v50 = vsel %vm1182_vm0, %v3481_v37, %v3483_v1  ;;  %v15360_v60 = vadd.f32 %v5583_v52, %v8103_v16  ;;  %v15364_v45 = vadd.f32 %v6606_v56, %v8103_v16  ;;  %v7833_v52 = vld [vmem:[%s15935_s1 + $0x680] ss:$2 sm:$0xff] }
 0x4ca   :  { %v3486_v51 = vsel %vm1182_vm0, %v3483_v1, %v3485_v10  ;;  %v3739_v49 = vadd.f32 %v3482_v47, %v2972_v43  ;;  %v3740_v34 = vadd.f32 %v3484_v50, %v2973_v55  ;;  %v6605_v40 = vmul.f32 %v6541_v29, %v8100_v15 }
 0x4cb   :  { %v3741_v31 = vadd.f32 %v3486_v51, %v2974_v32  ;;  %v3742_v58 = vadd.f32 %v3485_v10, %v2975_v41  ;;  %v4251_v24 = vmax.f32 %v2077_v48, 0.0  ;;  %v644_v44 = vmul.f32 %v7833_v52, %v7993_v26 }
 0x4cc   :  { %v3867_v18 = vadd.f32 %v3739_v49, %v8081_v6  ;;  %v3868_v46 = vadd.f32 %v3740_v34, %v8081_v6  ;;  %v645_v29 = vmul.f32 %v7611_v35, %v7993_v26  ;;  %v773_v2 = vmul.f32 %v7834_v25, %v7981_v23 }
 0x4cd   :  { %v3869_v3 = vadd.f32 %v3741_v31, %v8081_v6  ;;  %v3870_v56 = vadd.f32 %v3742_v58, %v8081_v6  ;;  %v4252_v13 = vmax.f32 %v2078_v14, 0.0  ;;  %v774_v32 = vmul.f32 %v7739_v33, %v7981_v23 }
 0x4ce   :  { %v3995_v43 = vmul.f32 %v3867_v18, %v8100_v15  ;;  %v3996_v55 = vmul.f32 %v3868_v46, %v8100_v15  ;;  %v4253_v1 = vmax.f32 %v2079_v0, 0.0  ;;  %v4254_v48 = vmax.f32 %v2080_v20, 0.0 }
 0x4cf   :  { %v3997_v41 = vmul.f32 %v3869_v3, %v8100_v15  ;;  %v3998_v37 = vmul.f32 %v3870_v56, %v8100_v15  ;;  %v901_v50 = vadd.f32 %v773_v2, %v644_v44  ;;  %v1031_v51 = vmul.f32 %v7611_v35, %v7995_v27 }
 0x4d0   :  { %v4123_v10 = vadd.f32 %v3995_v43, %v8103_v16  ;;  %v4124_v47 = vadd.f32 %v3996_v55, %v8103_v16  ;;  %v902_v14 = vadd.f32 %v774_v32, %v645_v29  ;;  %v2185_v31 = vmul.f32 %v7834_v25, %v7993_v26  ;;  %v16989_v43 = vld [vmem:[#allocation12_spill] sm:$0xff]  ;;  %v16991_v29 = vld [vmem:[#allocation30_spill] sm:$0xff] }
 0x4d1   :  { %v4125_v49 = vadd.f32 %v3997_v41, %v8103_v16  ;;  %v4126_v34 = vadd.f32 %v3998_v37, %v8103_v16  ;;  %v1392_v46 = vrot.slane %v1031_v51, 1  ;;  %v2186_v0 = vmul.f32 %v7739_v33, %v7993_v26 }
 0x4d2   :  { %v4379_v58 = vmax.f32 %v4123_v10, 0.0  ;;  %v4380_v18 = vmax.f32 %v4124_v47, 0.0  ;;  %v2314_v3 = vmul.f32 %v7611_v35, %v7981_v23  ;;  %v3081_v44 = vmul.f32 %v7739_v33, %v7995_v27 }
 0x4d3   :  { %v4381_v20 = vmax.f32 %v4125_v49, 0.0  ;;  %v4382_v52 = vmax.f32 %v4126_v34, 0.0  ;;  %v16990_v55 = vrot.slane %v16989_v43, 1  ;;  %v16992_v32 = vrot.slane %v16991_v29, 1 }
 0x4d4   :  { %v4507_v56 = vmax.f32 %v4251_v24, %v4379_v58  ;;  %v4508_v2 = vmax.f32 %v4252_v13, %v4380_v18  ;;  %v6669_v49 = vadd.f32 %v6605_v40, %v8103_v16  ;;  %v2674_v33 = vrot.slane %v2314_v3, 1  ;;  %v16994_v40 = vld [vmem:[#allocation26_spill] sm:$0xff]  ;;  %v16996_v58 = vld [vmem:[#allocation29_spill] sm:$0xff] }
 0x4d5   :  { %v1393_v41 = vsel %vm1182_vm0, %v16990_v55, %v1392_v46  ;;  %v1395_v25 = vsel %vm1182_vm0, %v1392_v46, %v16992_v32  ;;  %v4509_v37 = vmax.f32 %v4253_v1, %v4381_v20  ;;  %v4510_v10 = vmax.f32 %v4254_v48, %v4382_v52  ;;  %v15413_v48 = vld [vmem:[#allocation2 + $0x3c1] ss:$2 sm:$0xff] }
 0x4d6   :  { %v1670_v47 = vadd.f32 %v1393_v41, %v901_v50  ;;  %v1671_v51 = vadd.f32 %v1395_v25, %v902_v14  ;;  %4636 = vst.msk [vmem:[#allocation2 + $0x3e0] sm:$0xff] %vm4511_vm1, %v4507_v56  ;;  %v3441_v24 = vrot.slane %v3081_v44, 1  ;;  %v16278_v35 = vrot.slane %v15262_v5, 1  ;;  %v16998_v20 = vld [vmem:[#allocation20_spill] sm:$0xff]  ;;  %v17000_v44 = vld [vmem:[#allocation46_spill] sm:$0xff] }
 0x4d7   :  { %v16276_v13 = vrot.slane %v15270_v21, 1  ;;  %4637 = vst.msk [vmem:[#allocation2 + $0x3e8] sm:$0xff] %vm4511_vm1, %v4508_v2  ;;  %v16995_v50 = vrot.slane %v16994_v40, 1  ;;  %v16997_v18 = vrot.slane %v16996_v58, 1  ;;  %v16999_v52 = vrot.slane %v16998_v20, 1 }
 0x4d8   :  { %v1799_v34 = vadd.f32 %v8081_v6, %v1670_v47  ;;  %v1800_v1 = vadd.f32 %v8081_v6, %v1671_v51  ;;  %16993 = vst [vmem:[#allocation10_spill] sm:$0xff] %v15413_v48  ;;  %v17001_v56 = vrot.slane %v17000_v44, 1  ;;  %v6734_v43 = vmax.f32 %v15352_v61, 0.0 }
 0x4d9   :  { %4638 = vst.msk [vmem:[#allocation2 + $0x3f0] sm:$0xff] %vm4511_vm1, %v4509_v37  ;;  %v2675_v14 = vsel %vm1182_vm0, %v16995_v50, %v2674_v33  ;;  %v2677_v46 = vsel %vm1182_vm0, %v2674_v33, %v16997_v18  ;;  %v3442_v3 = vsel %vm1182_vm0, %v16999_v52, %v3441_v24  ;;  %v6798_v55 = vmax.f32 %v15364_v45, 0.0  ;;  %v7189_v18 = vpop.permute.xlu1 %7188 }
 0x4da   :  { %v3444_v2 = vsel %vm1182_vm0, %v3441_v24, %v17001_v56  ;;  %4640 = vst.msk [vmem:[#allocation2 + $0x3f8] sm:$0x3f] %vm4639_vm2, %v4510_v10  ;;  %v2952_v41 = vadd.f32 %v2675_v14, %v2185_v31  ;;  %v2953_v29 = vadd.f32 %v2677_v46, %v2186_v0  ;;  %v5083_v32 = vadd.f32 %v15253_v39, %v15250_v12  ;;  %v7617_v31 = vld [vmem:[%s15935_s1 + $0x6f0] ss:$2 sm:$0xff]  ;;  %v7745_v12 = vld [vmem:[%s15935_s1 + $0x6f1] ss:$2 sm:$0xff] }
 0x4db   :  { %v6733_v25 = vmax.f32 %v15360_v60, 0.0  ;;  %v6797_v37 = vmax.f32 %v6669_v49, 0.0  ;;  %v1928_v47 = vmul.f32 %v8100_v15, %v1799_v34  ;;  %v15437_v51 = vmul.f32 %v15413_v48, %v7995_v27  ;;  %v7835_v0 = vld [vmem:[%s15935_s1 + $0x6e0] ss:$2 sm:$0xff]  ;;  %v7836_v49 = vld [vmem:[%s15935_s1 + $0x6e1] ss:$2 sm:$0xff] }
 0x4dc   :  { %v1929_v61 = vmul.f32 %v8100_v15, %v1800_v1  ;;  %v3719_v33 = vadd.f32 %v3442_v3, %v2952_v41  ;;  %v3720_v45 = vadd.f32 %v3444_v2, %v2953_v29  ;;  %v17003_v39 = vrot.slane %v15239_v36, 1  ;;  %v7184_v2 = vpop.permute.xlu0 %7183 }
 0x4dd   :  { %17002 = vst [vmem:[#allocation17_spill] sm:$0xff] %v15437_v51  ;;  %v650_v10 = vmul.f32 %v7835_v0, %v7993_v26  ;;  %v779_v24 = vmul.f32 %v7836_v49, %v7981_v23  ;;  %v1037_v34 = vmul.f32 %v7617_v31, %v7995_v27  ;;  %v17004_v1 = vrot.slane %v15246_v17, 1 }
 0x4de   :  { %v5336_v60 = vsel %vm1182_vm0, %v17003_v39, %v16278_v35  ;;  %v6862_v50 = vmax.f32 %v6734_v43, %v6798_v55  ;;  %v3847_v14 = vadd.f32 %v3719_v33, %v8081_v6  ;;  %v3848_v58 = vadd.f32 %v3720_v45, %v8081_v6 }
 0x4df   :  { %v5975_v40 = vsel %vm1182_vm0, %v17004_v1, %v16276_v13  ;;  %v6861_v46 = vmax.f32 %v6733_v25, %v6797_v37  ;;  %v2057_v20 = vadd.f32 %v8103_v16, %v1928_v47  ;;  %v651_v52 = vmul.f32 %v7617_v31, %v7993_v26  ;;  %v17005_v1 = vld [vmem:[#allocation21_spill] sm:$0xff] }
 0x4e0   :  { %v780_v3 = vmul.f32 %v7745_v12, %v7981_v23  ;;  %v6805_v44 = vmax.f32 %v15203_v9, 0.0  ;;  %v7417_v56 = vadd.f32 %v15229_v7, %v15231_v53  ;;  %v2058_v43 = vadd.f32 %v8103_v16, %v1929_v61 }
 0x4e1   :  { %v1404_v55 = vrot.slane %v1037_v34, 1  ;;  %v16279_v41 = vrot.slane %v15259_v19, 1  ;;  %v3975_v29 = vmul.f32 %v3847_v14, %v8100_v15  ;;  %v3976_v25 = vmul.f32 %v3848_v58, %v8100_v15 }
 0x4e2   :  { %v907_v37 = vadd.f32 %v779_v24, %v650_v10  ;;  %v5466_v47 = vadd.f32 %v5336_v60, %v5083_v32  ;;  %v6105_v33 = vadd.f32 %v5975_v40, %v15256_v11  ;;  %v16277_v45 = vrot.slane %v15437_v51, 1  ;;  %v17007_v60 = vld [vmem:[#allocation39_spill] sm:$0xff] }
 0x4e3   :  { %v7310_v9 = vmul.f32 %v7189_v18, %v6862_v50  ;;  %v7309_v39 = vmul.f32 %v7184_v2, %v6861_v46  ;;  %v4103_v7 = vadd.f32 %v3975_v29, %v8103_v16  ;;  %v4231_v53 = vmax.f32 %v2057_v20, 0.0 }
 0x4e4   :  { %v908_v0 = vadd.f32 %v780_v3, %v651_v52  ;;  %v4104_v61 = vadd.f32 %v3976_v25, %v8103_v16  ;;  %v4232_v34 = vmax.f32 %v2058_v43, 0.0  ;;  %v17006_v13 = vrot.slane %v17005_v1, 1  ;;  %v7838_v1 = vld [vmem:[#allocation2 + $0x331] ss:$2 sm:$0xff] }
 0x4e5   :  { %v2320_v10 = vmul.f32 %v7617_v31, %v7981_v23  ;;  %v4359_v32 = vmax.f32 %v4103_v7, 0.0  ;;  %v17008_v11 = vrot.slane %v17007_v60, 1  ;;  %v3087_v50 = vmul.f32 %v7745_v12, %v7995_v27 }
 0x4e6   :  { %v1405_v14 = vsel %vm1182_vm0, %v17006_v13, %v1404_v55  ;;  %v17009_v58 = vmax.f32 %v15153_v63, 0.0  ;;  %v6358_v13 = vsel %vm1182_vm0, %v16279_v41, %v16277_v45  ;;  %v7419_v31 = vadd.f32 %v15149_v30, %v7417_v56  ;;  %v15597_v45 = vld [vmem:[#allocation2 + $0x3f1] ss:$2 sm:$0x7f] }
 0x4e7   :  { %v1407_v24 = vsel %vm1182_vm0, %v1404_v55, %v17008_v11  ;;  %v1676_v40 = vadd.f32 %v1405_v14, %v907_v37  ;;  %v4360_v46 = vmax.f32 %v4104_v61, 0.0  ;;  %v7420_v20 = vsel %vm4511_vm1, %v7309_v39, 0.0  ;;  %v4893_v39 = vld [vmem:[#allocation2 + $0x3e1] ss:$2 sm:$0xff] }
 0x4e8   :  { %v15491_v18 = vmax.f32 %v17009_v58, %v6805_v44  ;;  %v4487_v52 = vmax.f32 %v4231_v53, %v4359_v32  ;;  %v2191_v3 = vmul.f32 %v7836_v49, %v7993_v26  ;;  %v2192_v2 = vmul.f32 %v7745_v12, %v7993_v26  ;;  %v17010_v12 = vld [vmem:[#allocation44_spill] sm:$0xff]  ;;  %v17016_v58 = vld [vmem:[#allocation47_spill] sm:$0xff] }
 0x4e9   :  { %v4488_v43 = vmax.f32 %v4232_v34, %v4360_v46  ;;  %v1677_v63 = vadd.f32 %v1407_v24, %v908_v0  ;;  %v1805_v44 = vadd.f32 %v8081_v6, %v1676_v40  ;;  %v2686_v55 = vrot.slane %v2320_v10, 1  ;;  %v17012_v0 = vld [vmem:[#allocation52_spill] sm:$0xff]  ;;  %v17014_v24 = vld [vmem:[#allocation37_spill] sm:$0xff] }
 0x4ea   :  { %v5530_v29 = vadd.f32 %v5466_v47, %v8081_v6  ;;  %v6488_v25 = vadd.f32 %v6358_v13, %v6105_v33  ;;  %v7422_v37 = vsel %vm4511_vm1, %v7310_v9, 0.0  ;;  %4616 = vst.msk [vmem:[#allocation2 + $0x340] sm:$0xff] %vm4511_vm1, %v4487_v52  ;;  %v3453_v30 = vrot.slane %v3087_v50, 1  ;;  %v4765_v33 = vld [vmem:[#allocation2 + $0x3e0] ss:$2 sm:$0xff] }
 0x4eb   :  { %v7421_v56 = vadd.f32 %v7420_v20, %v7419_v31  ;;  %4617 = vst.msk [vmem:[#allocation2 + $0x348] sm:$0xff] %vm4511_vm1, %v4488_v43  ;;  %v1806_v49 = vadd.f32 %v8081_v6, %v1677_v63  ;;  %v17011_v7 = vrot.slane %v17010_v12, 1  ;;  %v17013_v61 = vrot.slane %v17012_v0, 1  ;;  %v7837_v34 = vld [vmem:[#allocation2 + $0x330] ss:$2 sm:$0xff] }
 0x4ec   :  { %v4947_v9 = vmul.f32 %v7837_v34, %v7993_v26  ;;  %v5011_v14 = vmul.f32 %v7838_v1, %v7981_v23  ;;  %v4958_v60 = vmul.f32 %v4765_v33, %v7993_v26  ;;  %v1934_v11 = vmul.f32 %v8100_v15, %v1805_v44 }
 0x4ed   :  { %v2687_v53 = vsel %vm1182_vm0, %v17011_v7, %v2686_v55  ;;  %v2689_v47 = vsel %vm1182_vm0, %v2686_v55, %v17013_v61  ;;  %v17015_v40 = vrot.slane %v17014_v24, 1  ;;  %v17017_v13 = vrot.slane %v17016_v58, 1  ;;  %v15540_v7 = vld [vmem:[#allocation2 + $0x3f0] ss:$2 sm:$0x7f] }
 0x4ee   :  { %v2958_v10 = vadd.f32 %v2687_v53, %v2191_v3  ;;  %v2959_v32 = vadd.f32 %v2689_v47, %v2192_v2  ;;  %v5022_v46 = vmul.f32 %v4893_v39, %v7981_v23  ;;  %v1935_v20 = vmul.f32 %v8100_v15, %v1806_v49 }
 0x4ef   :  { %v3454_v50 = vsel %vm1182_vm0, %v17015_v40, %v3453_v30  ;;  %v3456_v31 = vsel %vm1182_vm0, %v3453_v30, %v17017_v13  ;;  %v15527_v3 = vmul.f32 %v5530_v29, %v8100_v15  ;;  %v15530_v2 = vadd.f32 %v6488_v25, %v8081_v6 }
 0x4f0   :  { %v3725_v52 = vadd.f32 %v3454_v50, %v2958_v10  ;;  %v3726_v43 = vadd.f32 %v3456_v31, %v2959_v32  ;;  %v15532_v63 = vadd.f32 %v7422_v37, %v7421_v56  ;;  %v5714_v44 = vmul.f32 %v7838_v1, %v7993_v26 }
 0x4f1   :  { %v15536_v55 = vmul.f32 %v4765_v33, %v7995_v27  ;;  %v5075_v30 = vadd.f32 %v5011_v14, %v4947_v9  ;;  %v15543_v29 = vmul.f32 %v4893_v39, %v7993_v26  ;;  %v15546_v25 = vmul.f32 %v4765_v33, %v7981_v23 }
 0x4f2   :  { %v3853_v12 = vadd.f32 %v3725_v52, %v8081_v6  ;;  %v3854_v49 = vadd.f32 %v3726_v43, %v8081_v6  ;;  %v15549_v37 = vmul.f32 %v4893_v39, %v7995_v27  ;;  %v2063_v56 = vadd.f32 %v8103_v16, %v1934_v11  ;;  %v4745_v0 = vld [vmem:[#allocation2 + $0x340] ss:$2 sm:$0xff]  ;;  %v4873_v61 = vld [vmem:[#allocation2 + $0x341] ss:$2 sm:$0xff]  ;;  %v7623_v52 = vld [vmem:[%s15935_s1 + $0x750] ss:$2 sm:$0xff] }
 0x4f3   :  { %17018 = vst [vmem:[#allocation55_spill] sm:$0xff] %v15546_v25  ;;  %v15552_v53 = vadd.f32 %v5022_v46, %v4958_v60  ;;  %v2064_v47 = vadd.f32 %v8103_v16, %v1935_v20  ;;  %v15559_v1 = vmul.f32 %v15540_v7, %v7995_v27  ;;  %v4948_v33 = vmul.f32 %v4745_v0, %v7993_v26 }
 0x4f4   :  { %v3981_v34 = vmul.f32 %v3853_v12, %v8100_v15  ;;  %v3982_v9 = vmul.f32 %v3854_v49, %v8100_v15  ;;  %v5012_v39 = vmul.f32 %v4873_v61, %v7981_v23  ;;  %v5140_v14 = vmul.f32 %v4745_v0, %v7995_v27  ;;  %v7751_v49 = vld [vmem:[%s15935_s1 + $0x751] ss:$2 sm:$0xff] }
 0x4f5   :  { %v15566_v10 = vmul.f32 %v15540_v7, %v7981_v23  ;;  %v5779_v32 = vmul.f32 %v4745_v0, %v7981_v23  ;;  %v6162_v60 = vmul.f32 %v4873_v61, %v7995_v27  ;;  %v5715_v40 = vmul.f32 %v4873_v61, %v7993_v26  ;;  %v7839_v0 = vld [vmem:[%s15935_s1 + $0x740] ss:$2 sm:$0xff] }
 0x4f6   :  { %v4109_v11 = vadd.f32 %v3981_v34, %v8103_v16  ;;  %v5319_v24 = vrot.slane %v5140_v14, 1  ;;  %v4110_v50 = vadd.f32 %v3982_v9, %v8103_v16  ;;  %v4237_v58 = vmax.f32 %v2063_v56, 0.0  ;;  %v17021_v14 = vld [vmem:[#allocation54_spill] sm:$0xff] }
 0x4f7   :  { %v5958_v13 = vrot.slane %v5779_v32, 1  ;;  %v6341_v31 = vrot.slane %v6162_v60, 1  ;;  %v4238_v46 = vmax.f32 %v2064_v47, 0.0  ;;  %v5076_v43 = vadd.f32 %v5012_v39, %v4948_v33  ;;  %v17019_v47 = vld [vmem:[#allocation40_spill] sm:$0xff]  ;;  %v17023_v39 = vld [vmem:[#allocation13_spill] sm:$0xff] }
 0x4f8   :  { %v4365_v20 = vmax.f32 %v4109_v11, 0.0  ;;  %v4366_v12 = vmax.f32 %v4110_v50, 0.0  ;;  %v656_v56 = vmul.f32 %v7839_v0, %v7993_v26  ;;  %v657_v61 = vmul.f32 %v7623_v52, %v7993_v26  ;;  %v7840_v50 = vld [vmem:[%s15935_s1 + $0x741] ss:$2 sm:$0xff] }
 0x4f9   :  { %v17020_v34 = vrot.slane %v17019_v47, 1  ;;  %v17022_v32 = vrot.slane %v17021_v14, 1  ;;  %v17024_v60 = vrot.slane %v17023_v39, 1  ;;  %v785_v0 = vmul.f32 %v7840_v50, %v7981_v23  ;;  %v17025_v47 = vld [vmem:[#allocation51_spill] sm:$0xff]  ;;  %v17027_v14 = vld [vmem:[#allocation22_spill] sm:$0xff]  ;;  %v17029_v39 = vld [vmem:[#allocation24_spill] sm:$0xff] }
 0x4fa   :  { %v17026_v41 = vrot.slane %v17025_v47, 1  ;;  %v17028_v59 = vrot.slane %v17027_v14, 1  ;;  %v17030_v28 = vrot.slane %v17029_v39, 1  ;;  %v4493_v51 = vmax.f32 %v4237_v58, %v4365_v20  ;;  %v7841_v20 = vld [vmem:[#allocation2 + $0x360] ss:$2 sm:$0xff] }
 0x4fb   :  { %v5322_v9 = vsel %vm1182_vm0, %v5319_v24, %v17020_v34  ;;  %v5961_v33 = vsel %vm1182_vm0, %v5958_v13, %v17022_v32  ;;  %v5320_v11 = vsel %vm1182_vm0, %v17024_v60, %v5319_v24  ;;  %v4494_v21 = vmax.f32 %v4238_v46, %v4366_v12  ;;  %v17038_v46 = vld [vmem:[#allocation41_spill] sm:$0xff] }
 0x4fc   :  { %v6098_v35 = vadd.f32 %v5961_v33, %v5715_v40  ;;  %v6344_v34 = vsel %vm1182_vm0, %v6341_v31, %v17026_v41  ;;  %v5959_v32 = vsel %vm1182_vm0, %v17028_v59, %v5958_v13  ;;  %v6342_v24 = vsel %vm1182_vm0, %v17030_v28, %v6341_v31  ;;  %4622 = vst.msk [vmem:[#allocation2 + $0x370] sm:$0xff] %vm4511_vm1, %v4493_v51 }
 0x4fd   :  { %v6097_v60 = vadd.f32 %v5959_v32, %v5714_v44  ;;  %v786_v5 = vmul.f32 %v7751_v49, %v7981_v23  ;;  %v16288_v48 = vrot.slane %v15536_v55, 1  ;;  %v16287_v40 = vrot.slane %v15546_v25, 1  ;;  %4623 = vst.msk [vmem:[#allocation2 + $0x378] sm:$0xff] %vm4511_vm1, %v4494_v21 }
 0x4fe   :  { %v5459_v33 = vadd.f32 %v5322_v9, %v5076_v43  ;;  %v1043_v41 = vmul.f32 %v7623_v52, %v7995_v27  ;;  %v15614_v47 = vmul.f32 %v15597_v45, %v7995_v27  ;;  %v6481_v59 = vadd.f32 %v6344_v34, %v6098_v35  ;;  %v7842_v9 = vld [vmem:[#allocation2 + $0x361] ss:$2 sm:$0xff] }
 0x4ff   :  { %v5458_v13 = vadd.f32 %v5320_v11, %v5075_v30  ;;  %v6480_v14 = vadd.f32 %v6342_v24, %v6097_v60  ;;  %v16289_v28 = vrot.slane %v15559_v1, 1  ;;  %v16290_v44 = vrot.slane %v15566_v10, 1  ;;  %v17031_v11 = vld [vmem:[#allocation56_spill] sm:$0xff] }
 0x500   :  { %v913_v58 = vadd.f32 %v785_v0, %v656_v56  ;;  %v1416_v31 = vrot.slane %v1043_v41, 1  ;;  %v4950_v43 = vmul.f32 %v7841_v20, %v7993_v26  ;;  %v914_v12 = vadd.f32 %v786_v5, %v657_v61 }
 0x501   :  { %v2326_v35 = vmul.f32 %v7623_v52, %v7981_v23  ;;  %v5523_v30 = vadd.f32 %v5459_v33, %v8081_v6  ;;  %v5014_v51 = vmul.f32 %v7842_v9, %v7981_v23  ;;  %v17032_v34 = vrot.slane %v17031_v11, 1 }
 0x502   :  { %v17033_v21 = vrot.slane %v14852_v22, 1  ;;  %v6545_v0 = vadd.f32 %v6481_v59, %v8081_v6  ;;  %v5522_v39 = vadd.f32 %v5458_v13, %v8081_v6  ;;  %v6544_v5 = vadd.f32 %v6480_v14, %v8081_v6 }
 0x503   :  { %v1417_v32 = vsel %vm1182_vm0, %v17032_v34, %v1416_v31  ;;  %v3093_v52 = vmul.f32 %v7751_v49, %v7995_v27  ;;  %v15640_v61 = vsel %vm1182_vm0, %v16288_v48, %v16289_v28  ;;  %v5981_v22 = vsel %vm1182_vm0, %v16287_v40, %v16290_v44 }
 0x504   :  { %v1419_v56 = vsel %vm1182_vm0, %v1416_v31, %v17033_v21  ;;  %v1682_v60 = vadd.f32 %v1417_v32, %v913_v58  ;;  %v15650_v33 = vadd.f32 %v15162_v4, %v15532_v63  ;;  %v5717_v41 = vmul.f32 %v7842_v9, %v7993_v26  ;;  %v4751_v32 = vld [vmem:[#allocation2 + $0x370] ss:$2 sm:$0xff]  ;;  %v4879_v4 = vld [vmem:[#allocation2 + $0x371] ss:$2 sm:$0xff] }
 0x505   :  { %v1683_v59 = vadd.f32 %v1419_v56, %v914_v12  ;;  %v2698_v13 = vrot.slane %v2326_v35, 1  ;;  %v5587_v14 = vmul.f32 %v5523_v30, %v8100_v15  ;;  %v5078_v31 = vadd.f32 %v5014_v51, %v4950_v43  ;;  %v17034_v51 = vld [vmem:[#allocation11_spill] sm:$0xff] }
 0x506   :  { %v2197_v20 = vmul.f32 %v7840_v50, %v7993_v26  ;;  %v2198_v11 = vmul.f32 %v7751_v49, %v7993_v26  ;;  %v6609_v34 = vmul.f32 %v6545_v0, %v8100_v15  ;;  %v5586_v21 = vmul.f32 %v5522_v39, %v8100_v15 }
 0x507   :  { %v6608_v58 = vmul.f32 %v6544_v5, %v8100_v15  ;;  %v3465_v63 = vrot.slane %v3093_v52, 1  ;;  %v4951_v9 = vmul.f32 %v4751_v32, %v7993_v26  ;;  %v5015_v12 = vmul.f32 %v4879_v4, %v7981_v23 }
 0x508   :  { %v5143_v35 = vmul.f32 %v4751_v32, %v7995_v27  ;;  %v1811_v43 = vadd.f32 %v8081_v6, %v1682_v60  ;;  %v5782_v50 = vmul.f32 %v4751_v32, %v7981_v23  ;;  %v6165_v49 = vmul.f32 %v4879_v4, %v7995_v27 }
 0x509   :  { %v1812_v30 = vadd.f32 %v8081_v6, %v1683_v59  ;;  %v17035_v56 = vrot.slane %v17034_v51, 1  ;;  %v5079_v39 = vadd.f32 %v5015_v12, %v4951_v9  ;;  %v5718_v52 = vmul.f32 %v4879_v4, %v7993_v26  ;;  %v17040_v4 = vld [vmem:[#allocation49_spill] sm:$0xff] }
 0x50a   :  { %v5325_v5 = vrot.slane %v5143_v35, 1  ;;  %v17036_v40 = vrot.slane %v14962_v57, 1  ;;  %v5650_v60 = vadd.f32 %v5586_v21, %v8103_v16  ;;  %v6672_v32 = vadd.f32 %v6608_v58, %v8103_v16 }
 0x50b   :  { %v2699_v0 = vsel %vm1182_vm0, %v17035_v56, %v2698_v13  ;;  %v5964_v28 = vrot.slane %v5782_v50, 1  ;;  %v6347_v44 = vrot.slane %v6165_v49, 1  ;;  %v17037_v59 = vrot.slane %v14855_v8, 1 }
 0x50c   :  { %v2701_v48 = vsel %vm1182_vm0, %v2698_v13, %v17036_v40  ;;  %v17039_v56 = vrot.slane %v17038_v46, 1  ;;  %v2964_v12 = vadd.f32 %v2699_v0, %v2197_v20  ;;  %v17041_v35 = vrot.slane %v17040_v4, 1  ;;  %v17042_v13 = vld [vmem:[#allocation48_spill] sm:$0xff] }
 0x50d   :  { %v5328_v51 = vsel %vm1182_vm0, %v5325_v5, %v17037_v59  ;;  %v17043_v21 = vrot.slane %v17042_v13, 1  ;;  %v1940_v50 = vmul.f32 %v8100_v15, %v1811_v43  ;;  %v2965_v49 = vadd.f32 %v2701_v48, %v2198_v11  ;;  %v17044_v59 = vld [vmem:[#allocation38_spill] sm:$0xff] }
 0x50e   :  { %v5326_v9 = vsel %vm1182_vm0, %v17039_v56, %v5325_v5  ;;  %v3466_v57 = vsel %vm1182_vm0, %v17041_v35, %v3465_v63  ;;  %v5462_v40 = vadd.f32 %v5328_v51, %v5079_v39  ;;  %v17045_v25 = vrot.slane %v17044_v59, 1  ;;  %v17047_v51 = vld [vmem:[#allocation33_spill] sm:$0xff] }
 0x50f   :  { %v5967_v58 = vsel %vm1182_vm0, %v5964_v28, %v17043_v21  ;;  %v5461_v24 = vadd.f32 %v5326_v9, %v5078_v31  ;;  %v1941_v20 = vmul.f32 %v8100_v15, %v1812_v30  ;;  %v17046_v0 = vrot.slane %v14890_v62, 1 }
 0x510   :  { %v6101_v8 = vadd.f32 %v5967_v58, %v5718_v52  ;;  %v5965_v46 = vsel %vm1182_vm0, %v17045_v25, %v5964_v28  ;;  %v17048_v56 = vrot.slane %v17047_v51, 1  ;;  %v17049_v43 = vrot.slane %v15019_v54, 1  ;;  %v7757_v58 = vld [vmem:[%s15935_s1 + $0x7b1] ss:$2 sm:$0xff]  ;;  %v7844_v51 = vld [vmem:[%s15935_s1 + $0x7a1] ss:$2 sm:$0xff] }
 0x511   :  { %v6350_v5 = vsel %vm1182_vm0, %v6347_v44, %v17046_v0  ;;  %v6100_v39 = vadd.f32 %v5965_v46, %v5717_v41  ;;  %v5651_v31 = vadd.f32 %v5587_v14, %v8103_v16  ;;  %v6673_v11 = vadd.f32 %v6609_v34, %v8103_v16 }
 0x512   :  { %v6348_v4 = vsel %vm1182_vm0, %v17048_v56, %v6347_v44  ;;  %v3468_v48 = vsel %vm1182_vm0, %v3465_v63, %v17049_v43  ;;  %v6736_v25 = vmax.f32 %v5650_v60, 0.0  ;;  %v3731_v28 = vadd.f32 %v3466_v57, %v2964_v12 }
 0x513   :  { %v6800_v30 = vmax.f32 %v6672_v32, 0.0  ;;  %v5526_v62 = vadd.f32 %v5462_v40, %v8081_v6  ;;  %v6483_v52 = vadd.f32 %v6348_v4, %v6100_v39  ;;  %v3732_v9 = vadd.f32 %v3468_v48, %v2965_v49  ;;  %v7843_v40 = vld [vmem:[%s15935_s1 + $0x7a0] ss:$2 sm:$0xff]  ;;  %v7199_v49 = vpop.permute.xlu0 %7198 }
 0x514   :  { %v6484_v41 = vadd.f32 %v6350_v5, %v6101_v8  ;;  %v5525_v35 = vadd.f32 %v5461_v24, %v8081_v6  ;;  %v2069_v44 = vadd.f32 %v8103_v16, %v1940_v50  ;;  %v3859_v54 = vadd.f32 %v3731_v28, %v8081_v6  ;;  %v7629_v24 = vld [vmem:[%s15935_s1 + $0x7b0] ss:$2 sm:$0xff]  ;;  %s7506_s1 = sld [smem:[#allocation4 + $0x6]] }
 0x515   :  { %v15708_v63 = vadd.f32 %v5981_v22, %v15543_v29  ;;  %v6547_v14 = vadd.f32 %v6483_v52, %v8081_v6  ;;  %v2070_v34 = vadd.f32 %v8103_v16, %v1941_v20  ;;  %v3860_v60 = vadd.f32 %v3732_v9, %v8081_v6 }
 0x516   :  { %v6737_v32 = vmax.f32 %v5651_v31, 0.0  ;;  %v6801_v12 = vmax.f32 %v6673_v11, 0.0  ;;  %v3987_v57 = vmul.f32 %v3859_v54, %v8100_v15  ;;  %v662_v29 = vmul.f32 %v7843_v40, %v7993_v26 }
 0x517   :  { %v6864_v22 = vmax.f32 %v6736_v25, %v6800_v30  ;;  %v5590_v13 = vmul.f32 %v5526_v62, %v8100_v15  ;;  %v3988_v21 = vmul.f32 %v3860_v60, %v8100_v15  ;;  %v663_v50 = vmul.f32 %v7629_v24, %v7993_v26 }
 0x518   :  { %v6548_v8 = vadd.f32 %v6484_v41, %v8081_v6  ;;  %v5589_v59 = vmul.f32 %v5525_v35, %v8100_v15  ;;  %v4115_v46 = vadd.f32 %v3987_v57, %v8103_v16  ;;  %v4243_v20 = vmax.f32 %v2069_v44, 0.0 }
 0x519   :  { %v6611_v0 = vmul.f32 %v6547_v14, %v8100_v15  ;;  %v4116_v5 = vadd.f32 %v3988_v21, %v8103_v16  ;;  %v4244_v39 = vmax.f32 %v2070_v34, 0.0  ;;  %v791_v56 = vmul.f32 %v7844_v51, %v7981_v23  ;;  %v17050_v34 = vld [vmem:[#allocation43_spill] sm:$0xff] }
 0x51a   :  { %v6865_v4 = vmax.f32 %v6737_v32, %v6801_v12  ;;  %v4371_v43 = vmax.f32 %v4115_v46, 0.0  ;;  %v792_v48 = vmul.f32 %v7757_v58, %v7981_v23  ;;  %v1049_v31 = vmul.f32 %v7629_v24, %v7995_v27  ;;  %v17052_v12 = vld [vmem:[#allocation9_spill] sm:$0xff]  ;;  %v7846_v46 = vld [vmem:[#allocation2 + $0x391] ss:$2 sm:$0xff] }
 0x51b   :  { %v7312_v11 = vmul.f32 %v7199_v49, %v6864_v22  ;;  %v15739_v25 = vadd.f32 %v5590_v13, %v8103_v16  ;;  %v4372_v28 = vmax.f32 %v4116_v5, 0.0  ;;  %v919_v30 = vadd.f32 %v791_v56, %v662_v29  ;;  %v7204_v5 = vpop.permute.xlu1 %7203 }
 0x51c   :  { %v6612_v62 = vmul.f32 %v6548_v8, %v8100_v15  ;;  %v4499_v52 = vmax.f32 %v4243_v20, %v4371_v43  ;;  %v920_v9 = vadd.f32 %v792_v48, %v663_v50  ;;  %v1428_v41 = vrot.slane %v1049_v31, 1  ;;  %v7845_v8 = vld [vmem:[#allocation2 + $0x390] ss:$2 sm:$0xff]  ;;  %v17054_v43 = vld [vmem:[#allocation45_spill] sm:$0xff] }
 0x51d   :  { %v5653_v35 = vadd.f32 %v5589_v59, %v8103_v16  ;;  %v6675_v44 = vadd.f32 %v6611_v0, %v8103_v16  ;;  %v4500_v54 = vmax.f32 %v4244_v39, %v4372_v28  ;;  %v2332_v14 = vmul.f32 %v7629_v24, %v7981_v23 }
 0x51e   :  { %4628 = vst.msk [vmem:[#allocation2 + $0x3a0] sm:$0xff] %vm4511_vm1, %v4499_v52  ;;  %v17051_v60 = vrot.slane %v17050_v34, 1  ;;  %v17053_v57 = vrot.slane %v17052_v12, 1  ;;  %v2203_v29 = vmul.f32 %v7844_v51, %v7993_v26  ;;  %v3099_v22 = vmul.f32 %v7757_v58, %v7995_v27  ;;  %v17057_v52 = vld [vmem:[#allocation23_spill] sm:$0xff] }
 0x51f   :  { %4629 = vst.msk [vmem:[#allocation2 + $0x3a8] sm:$0xff] %vm4511_vm1, %v4500_v54  ;;  %v2204_v24 = vmul.f32 %v7757_v58, %v7993_v26  ;;  %v2710_v50 = vrot.slane %v2332_v14, 1  ;;  %v15757_v49 = vadd.f32 %v6612_v62, %v8103_v16  ;;  %v4953_v59 = vmul.f32 %v7845_v8, %v7993_v26 }
 0x520   :  { %v1429_v32 = vsel %vm1182_vm0, %v17051_v60, %v1428_v41  ;;  %v1431_v40 = vsel %vm1182_vm0, %v1428_v41, %v17053_v57  ;;  %v5017_v20 = vmul.f32 %v7846_v46, %v7981_v23  ;;  %v3477_v0 = vrot.slane %v3099_v22, 1 }
 0x521   :  { %v1688_v13 = vadd.f32 %v1429_v32, %v919_v30  ;;  %v1689_v21 = vadd.f32 %v1431_v40, %v920_v9  ;;  %v6739_v39 = vmax.f32 %v5653_v35, 0.0  ;;  %v17055_v48 = vrot.slane %v17054_v43, 1 }
 0x522   :  { %v6803_v31 = vmax.f32 %v6675_v44, 0.0  ;;  %v17056_v28 = vrot.slane %v15282_v38, 1  ;;  %v17058_v9 = vrot.slane %v17057_v52, 1  ;;  %v17059_v34 = vrot.slane %v15327_v42, 1 }
 0x523   :  { %v1817_v51 = vadd.f32 %v8081_v6, %v1688_v13  ;;  %v1818_v56 = vadd.f32 %v8081_v6, %v1689_v21  ;;  %v2711_v58 = vsel %vm1182_vm0, %v17055_v48, %v2710_v50  ;;  %v17060_v44 = vrot.slane %v15614_v47, 1 }
 0x524   :  { %v2713_v30 = vsel %vm1182_vm0, %v2710_v50, %v17056_v28  ;;  %v2970_v62 = vadd.f32 %v2711_v58, %v2203_v29  ;;  %v3478_v41 = vsel %vm1182_vm0, %v17058_v9, %v3477_v0  ;;  %v3480_v60 = vsel %vm1182_vm0, %v3477_v0, %v17059_v34  ;;  %v17063_v9 = vld [vmem:[#allocation14_spill] sm:$0xff] }
 0x525   :  { %v1946_v35 = vmul.f32 %v8100_v15, %v1817_v51  ;;  %v1947_v54 = vmul.f32 %v8100_v15, %v1818_v56  ;;  %v2971_v14 = vadd.f32 %v2713_v30, %v2204_v24  ;;  %v17061_v38 = vrot.slane %v15549_v37, 1 }
 0x526   :  { %v7313_v12 = vmul.f32 %v7204_v5, %v6865_v4  ;;  %v7426_v57 = vsel %vm4511_vm1, %v7312_v11, 0.0  ;;  %v3737_v40 = vadd.f32 %v3478_v41, %v2970_v62  ;;  %v6740_v29 = vmax.f32 %v15739_v25, 0.0  ;;  %v4757_v50 = vld [vmem:[#allocation2 + $0x3a0] ss:$2 sm:$0xff]  ;;  %v4885_v8 = vld [vmem:[#allocation2 + $0x3a1] ss:$2 sm:$0xff] }
 0x527   :  { %v6364_v32 = vsel %vm1182_vm0, %v17061_v38, %v17060_v44  ;;  %v5720_v22 = vmul.f32 %v7846_v46, %v7993_v26  ;;  %v2075_v13 = vadd.f32 %v8103_v16, %v1946_v35  ;;  %v3738_v21 = vadd.f32 %v3480_v60, %v2971_v14 }
 0x528   :  { %v6804_v42 = vmax.f32 %v15757_v49, 0.0  ;;  %v6867_v24 = vmax.f32 %v6739_v39, %v6803_v31  ;;  %v5081_v0 = vadd.f32 %v5017_v20, %v4953_v59  ;;  %v3865_v51 = vadd.f32 %v3737_v40, %v8081_v6 }
 0x529   :  { %v4954_v4 = vmul.f32 %v4757_v50, %v7993_v26  ;;  %v5018_v11 = vmul.f32 %v4885_v8, %v7981_v23  ;;  %v5146_v5 = vmul.f32 %v4757_v50, %v7995_v27  ;;  %v2076_v25 = vadd.f32 %v8103_v16, %v1947_v54 }
 0x52a   :  { %v5785_v46 = vmul.f32 %v4757_v50, %v7981_v23  ;;  %v6168_v56 = vmul.f32 %v4885_v8, %v7995_v27  ;;  %v3866_v49 = vadd.f32 %v3738_v21, %v8081_v6  ;;  %v3993_v39 = vmul.f32 %v3865_v51, %v8100_v15  ;;  %v17067_v21 = vld [vmem:[#allocation15_spill] sm:$0xff] }
 0x52b   :  { %v5082_v43 = vadd.f32 %v5018_v11, %v4954_v4  ;;  %v5331_v59 = vrot.slane %v5146_v5, 1  ;;  %v5721_v20 = vmul.f32 %v4885_v8, %v7993_v26  ;;  %v4249_v48 = vmax.f32 %v2075_v13, 0.0  ;;  %v17069_v51 = vld [vmem:[#allocation31_spill] sm:$0xff]  ;;  %v7214_v11 = vpop.permute.xlu0 %7213 }
 0x52c   :  { %v5970_v58 = vrot.slane %v5785_v46, 1  ;;  %v6353_v31 = vrot.slane %v6168_v56, 1  ;;  %v3994_v28 = vmul.f32 %v3866_v49, %v8100_v15  ;;  %v4121_v30 = vadd.f32 %v3993_v39, %v8103_v16 }
 0x52d   :  { %v17062_v62 = vrot.slane %v15239_v36, 1  ;;  %v17064_v41 = vrot.slane %v17063_v9, 1  ;;  %v4250_v54 = vmax.f32 %v2076_v25, 0.0  ;;  %v4959_v14 = vmul.f32 %v15540_v7, %v7993_v26 }
 0x52e   :  { %v17065_v34 = vrot.slane %v15246_v17, 1  ;;  %v17066_v44 = vrot.slane %v15259_v19, 1  ;;  %v5023_v36 = vmul.f32 %v15597_v45, %v7981_v23  ;;  %v17068_v50 = vrot.slane %v17067_v21, 1 }
 0x52f   :  { %v5334_v52 = vsel %vm1182_vm0, %v5331_v59, %v17062_v62  ;;  %v5332_v35 = vsel %vm1182_vm0, %v17064_v41, %v5331_v59  ;;  %v17070_v4 = vrot.slane %v17069_v51, 1  ;;  %v4122_v17 = vadd.f32 %v3994_v28, %v8103_v16  ;;  %v7224_v59 = vpop.permute.xlu2 %7223  ;;  %v17074_v51 = vld [vmem:[#allocation10_spill] sm:$0xff] }
 0x530   :  { %v5973_v60 = vsel %vm1182_vm0, %v5970_v58, %v17065_v34  ;;  %v6356_v38 = vsel %vm1182_vm0, %v6353_v31, %v17066_v44  ;;  %v5464_v40 = vadd.f32 %v5332_v35, %v5081_v0  ;;  %v5971_v8 = vsel %vm1182_vm0, %v17068_v50, %v5970_v58  ;;  %v7847_v50 = vld [vmem:[#allocation2 + $0x3c0] ss:$2 sm:$0xff] }
 0x531   :  { %v6104_v13 = vadd.f32 %v5973_v60, %v5721_v20  ;;  %v6354_v7 = vsel %vm1182_vm0, %v17070_v4, %v6353_v31  ;;  %v5465_v5 = vadd.f32 %v5334_v52, %v5082_v43  ;;  %v6103_v25 = vadd.f32 %v5971_v8, %v5720_v22 }
 0x532   :  { %v5528_v19 = vadd.f32 %v5464_v40, %v8081_v6  ;;  %v4377_v0 = vmax.f32 %v4121_v30, 0.0  ;;  %v5469_v46 = vadd.f32 %v15640_v61, %v15552_v53  ;;  %v7427_v56 = vadd.f32 %v7426_v57, %v15650_v33  ;;  %v7219_v30 = vpop.permute.xlu1 %7218 }
 0x533   :  { %v6487_v49 = vadd.f32 %v6356_v38, %v6104_v13  ;;  %v4378_v39 = vmax.f32 %v4122_v17, 0.0  ;;  %v6491_v20 = vadd.f32 %v6364_v32, %v15708_v63  ;;  %v7428_v58 = vsel %vm4511_vm1, %v7313_v12, 0.0 }
 0x534   :  { %v6486_v31 = vadd.f32 %v6354_v7, %v6103_v25  ;;  %v4505_v28 = vmax.f32 %v4249_v48, %v4377_v0  ;;  %v6868_v62 = vmax.f32 %v6740_v29, %v6804_v42  ;;  %v7315_v43 = vmul.f32 %v7214_v11, %v6867_v24 }
 0x535   :  { %v4506_v52 = vmax.f32 %v4250_v54, %v4378_v39  ;;  %v5726_v22 = vmul.f32 %v15597_v45, %v7993_v26  ;;  %v5529_v53 = vadd.f32 %v5465_v5, %v8081_v6  ;;  %v5592_v61 = vmul.f32 %v5528_v19, %v8100_v15  ;;  %v17071_v45 = vld [vmem:[#allocation50_spill] sm:$0xff] }
 0x536   :  { %v6550_v33 = vadd.f32 %v6486_v31, %v8081_v6  ;;  %4634 = vst.msk [vmem:[#allocation2 + $0x3d0] sm:$0xff] %vm4511_vm1, %v4505_v28  ;;  %v5087_v63 = vadd.f32 %v5023_v36, %v4959_v14  ;;  %v7317_v32 = vmul.f32 %v7224_v59, %v15491_v18  ;;  %v6616_v12 = vmul.f32 %v15530_v2, %v8100_v15  ;;  %v7229_v59 = vpop.permute.xlu0 %7228 }
 0x537   :  { %v7429_v57 = vadd.f32 %v7428_v58, %v7427_v56  ;;  %v6551_v29 = vadd.f32 %v6487_v49, %v8081_v6  ;;  %4635 = vst.msk [vmem:[#allocation2 + $0x3d8] sm:$0xff] %vm4511_vm1, %v4506_v52  ;;  %v7430_v42 = vsel %vm4511_vm1, %v17071_v45, 0.0  ;;  %v15843_v24 = vadd.f32 %v15527_v3, %v8103_v16 }
 0x538   :  { %v5533_v48 = vadd.f32 %v5469_v46, %v8081_v6  ;;  %v6614_v9 = vmul.f32 %v6550_v33, %v8100_v15  ;;  %v6555_v18 = vadd.f32 %v6491_v20, %v8081_v6  ;;  %v7316_v41 = vmul.f32 %v7219_v30, %v6868_v62 }
 0x539   :  { %v7432_v2 = vsel %vm4511_vm1, %v7315_v43, 0.0  ;;  %v17072_v35 = vrot.slane %v15566_v10, 1  ;;  %v5593_v14 = vmul.f32 %v5529_v53, %v8100_v15  ;;  %v5656_v34 = vadd.f32 %v5592_v61, %v8103_v16 }
 0x53a   :  { %v6678_v60 = vadd.f32 %v6614_v9, %v8103_v16  ;;  %v17073_v3 = vrot.slane %v15559_v1, 1  ;;  %v15857_v38 = vsel %vm4511_vm1, %v7317_v32, 0.0  ;;  %v15860_v40 = vadd.f32 %v6616_v12, %v8103_v16  ;;  %v17079_v9 = vld [vmem:[#allocation55_spill] sm:$0xff] }
 0x53b   :  { %v6109_v54 = vadd.f32 %v17072_v35, %v5726_v22  ;;  %v7431_v36 = vadd.f32 %v7430_v42, %v7429_v57  ;;  %v6615_v13 = vmul.f32 %v6551_v29, %v8100_v15  ;;  %v6744_v10 = vmax.f32 %v15843_v24, 0.0 }
 0x53c   :  { %v5470_v44 = vadd.f32 %v17073_v3, %v5087_v63  ;;  %v5597_v21 = vmul.f32 %v5533_v48, %v8100_v15  ;;  %v4956_v8 = vmul.f32 %v7847_v50, %v7993_v26  ;;  %v5020_v1 = vmul.f32 %v17074_v51, %v7981_v23 }
 0x53d   :  { %v6619_v4 = vmul.f32 %v6555_v18, %v8100_v15  ;;  %v7434_v7 = vsel %vm4511_vm1, %v7316_v41, 0.0  ;;  %v7433_v17 = vadd.f32 %v7432_v2, %v7431_v36  ;;  %v17075_v11 = vrot.slane %v15614_v47, 1 }
 0x53e   :  { %v5657_v19 = vadd.f32 %v5593_v14, %v8103_v16  ;;  %v6742_v25 = vmax.f32 %v5656_v34, 0.0  ;;  %v6806_v0 = vmax.f32 %v6678_v60, 0.0  ;;  %v4763_v46 = vld [vmem:[#allocation2 + $0x3d0] ss:$2 sm:$0xff]  ;;  %v4891_v56 = vld [vmem:[#allocation2 + $0x3d1] ss:$2 sm:$0xff]  ;;  %v5534_v49 = vadd.f32 %v5470_v44, %v8081_v6 }
 0x53f   :  { %v6492_v5 = vadd.f32 %v17075_v11, %v6109_v54  ;;  %v6679_v39 = vadd.f32 %v6615_v13, %v8103_v16  ;;  %v4957_v20 = vmul.f32 %v4763_v46, %v7993_v26  ;;  %v5021_v58 = vmul.f32 %v4891_v56, %v7981_v23  ;;  %v17084_v60 = vld [vmem:[#allocation17_spill] sm:$0xff] }
 0x540   :  { %v5149_v31 = vmul.f32 %v4763_v46, %v7995_v27  ;;  %v5788_v47 = vmul.f32 %v4763_v46, %v7981_v23  ;;  %v6171_v28 = vmul.f32 %v4891_v56, %v7995_v27  ;;  %v5084_v62 = vadd.f32 %v5020_v1, %v4956_v8  ;;  %v17077_v27 = vld [vmem:[#allocation53_spill] sm:$0xff] }
 0x541   :  { %v5723_v43 = vmul.f32 %v17074_v51, %v7993_v26  ;;  %v5085_v52 = vadd.f32 %v5021_v58, %v4957_v20  ;;  %v5724_v30 = vmul.f32 %v4891_v56, %v7993_v26  ;;  %v6556_v53 = vadd.f32 %v6492_v5, %v8081_v6  ;;  %v7234_v5 = vpop.permute.xlu1 %7233  ;;  %v7244_v20 = vpop.permute.xlu0 %7243 }
 0x542   :  { %v5337_v22 = vrot.slane %v5149_v31, 1  ;;  %v6743_v61 = vmax.f32 %v5657_v19, 0.0  ;;  %v6870_v33 = vmax.f32 %v6742_v25, %v6806_v0  ;;  %v5976_v63 = vrot.slane %v5788_v47, 1 }
 0x543   :  { %v6359_v32 = vrot.slane %v6171_v28, 1  ;;  %v6807_v12 = vmax.f32 %v6679_v39, 0.0  ;;  %v17076_v57 = vrot.slane %v15536_v55, 1  ;;  %v17078_v29 = vrot.slane %v17077_v27, 1  ;;  %v17082_v55 = vld [vmem:[#allocation57_spill] sm:$0xff] }
 0x544   :  { %v5598_v42 = vmul.f32 %v5534_v49, %v8100_v15  ;;  %v17080_v26 = vrot.slane %v17079_v9, 1  ;;  %v17081_v41 = vrot.slane %v15549_v37, 1  ;;  %v17083_v14 = vrot.slane %v17082_v55, 1  ;;  %v7239_v49 = vpop.permute.xlu2 %7238 }
 0x545   :  { %v5340_v23 = vsel %vm1182_vm0, %v5337_v22, %v17076_v57  ;;  %v5338_v45 = vsel %vm1182_vm0, %v17078_v29, %v5337_v22  ;;  %v17085_v3 = vrot.slane %v17084_v60, 1  ;;  %v6620_v36 = vmul.f32 %v6556_v53, %v8100_v15 }
 0x546   :  { %v5468_v48 = vadd.f32 %v5340_v23, %v5085_v52  ;;  %v5979_v18 = vsel %vm1182_vm0, %v5976_v63, %v17080_v26  ;;  %v6362_v2 = vsel %vm1182_vm0, %v6359_v32, %v17081_v41  ;;  %v5467_v35 = vadd.f32 %v5338_v45, %v5084_v62 }
 0x547   :  { %v6107_v54 = vadd.f32 %v5979_v18, %v5724_v30  ;;  %v5977_v34 = vsel %vm1182_vm0, %v17083_v14, %v5976_v63  ;;  %v6360_v44 = vsel %vm1182_vm0, %v17085_v3, %v6359_v32  ;;  %v7318_v13 = vmul.f32 %v7229_v59, %v6870_v33 }
 0x548   :  { %v5532_v50 = vadd.f32 %v5468_v48, %v8081_v6  ;;  %v5531_v8 = vadd.f32 %v5467_v35, %v8081_v6  ;;  %v6106_v37 = vadd.f32 %v5977_v34, %v5723_v43  ;;  %v6808_v51 = vmax.f32 %v15860_v40, 0.0 }
 0x549   :  { %v5661_v1 = vadd.f32 %v5597_v21, %v8103_v16  ;;  %v7435_v11 = vadd.f32 %v7434_v7, %v7433_v17  ;;  %v6490_v19 = vadd.f32 %v6362_v2, %v6107_v54  ;;  %v6871_v25 = vmax.f32 %v6743_v61, %v6807_v12  ;;  %v7249_v23 = vpop.permute.xlu1 %7248  ;;  %v7259_v48 = vpop.permute.xlu0 %7258 }
 0x54a   :  { %v5596_v0 = vmul.f32 %v5532_v50, %v8100_v15  ;;  %v5595_v46 = vmul.f32 %v5531_v8, %v8100_v15  ;;  %v6489_v56 = vadd.f32 %v6360_v44, %v6106_v37  ;;  %v6683_v39 = vadd.f32 %v6619_v4, %v8103_v16 }
 0x54b   :  { %v6554_v59 = vadd.f32 %v6490_v19, %v8081_v6  ;;  %v5662_v58 = vadd.f32 %v5598_v42, %v8103_v16  ;;  %v6684_v40 = vadd.f32 %v6620_v36, %v8103_v16  ;;  %v7438_v21 = vsel %vm4511_vm1, %v7318_v13, 0.0 }
 0x54c   :  { %v5660_v7 = vadd.f32 %v5596_v0, %v8103_v16  ;;  %v5659_v17 = vadd.f32 %v5595_v46, %v8103_v16  ;;  %v6553_v31 = vadd.f32 %v6489_v56, %v8081_v6  ;;  %v7437_v47 = vadd.f32 %v15857_v38, %v7435_v11  ;;  %v7254_v42 = vpop.permute.xlu2 %7253 }
 0x54d   :  { %v6618_v28 = vmul.f32 %v6554_v59, %v8100_v15  ;;  %v6872_v4 = vmax.f32 %v6744_v10, %v6808_v51  ;;  %v6747_v62 = vmax.f32 %v5661_v1, 0.0  ;;  %v7319_v43 = vmul.f32 %v7234_v5, %v6871_v25 }
 0x54e   :  { %v6617_v52 = vmul.f32 %v6553_v31, %v8100_v15  ;;  %v6811_v22 = vmax.f32 %v6683_v39, 0.0  ;;  %v7439_v30 = vadd.f32 %v7438_v21, %v7437_v47  ;;  %v6746_v61 = vmax.f32 %v5660_v7, 0.0 }
 0x54f   :  { %v6682_v53 = vadd.f32 %v6618_v28, %v8103_v16  ;;  %v6745_v63 = vmax.f32 %v5659_v17, 0.0  ;;  %v6748_v6 = vmax.f32 %v5662_v58, 0.0  ;;  %v6812_v32 = vmax.f32 %v6684_v40, 0.0 }
 0x550   :  { %v6681_v33 = vadd.f32 %v6617_v52, %v8103_v16  ;;  %v7320_v12 = vmul.f32 %v7239_v49, %v6872_v4  ;;  %v7440_v57 = vsel %vm4511_vm1, %v7319_v43, 0.0  ;;  %v6875_v29 = vmax.f32 %v6747_v62, %v6811_v22 }
 0x551   :  { %v6810_v38 = vmax.f32 %v6682_v53, 0.0  ;;  %v7441_v10 = vadd.f32 %v7440_v57, %v7439_v30  ;;  %v6876_v45 = vmax.f32 %v6748_v6, %v6812_v32  ;;  %v7460_v36 = vlaneseq }
 0x552   :  { %v6809_v24 = vmax.f32 %v6681_v33, 0.0  ;;  %v7442_v9 = vsel %vm4511_vm1, %v7320_v12, 0.0  ;;  %v7323_v41 = vmul.f32 %v7254_v42, %v6875_v29  ;;  %v7458_v11 = vstv %s7506_s1 }
 0x553   :  { %v6874_v27 = vmax.f32 %v6746_v61, %v6810_v38  ;;  %v7443_v18 = vadd.f32 %v7442_v9, %v7441_v10  ;;  %v7324_v35 = vmul.f32 %v7259_v48, %v6876_v45  ;;  %v7461_v8 = vshrl.u32 %v7460_v36, 7 }
 0x554   :  { %v6873_v15 = vmax.f32 %v6745_v63, %v6809_v24  ;;  %v7448_v34 = vsel %vm4511_vm1, %v7323_v41, 0.0  ;;  %v7890_v19 = vmov -1.0  }
 0x555   :  { %v7322_v26 = vmul.f32 %v7249_v23, %v6874_v27  ;;  %v7450_v60 = vsel %vm4639_vm2, %v7324_v35, 0.0  ;;  %vm7462_vm3 = vcmp.eq.s32.totalorder %v7461_v8, 0 }
 0x556   :  { %v7321_v16 = vmul.f32 %v7244_v20, %v6873_v15  ;;  %v7463_v25 = vsel %vm7462_vm3, 1.0, %v7890_v19 }
 0x557   :  { %v7446_v55 = vsel %vm4511_vm1, %v7322_v26, 0.0 }
 0x558   :  { %v7444_v2 = vsel %vm4511_vm1, %v7321_v16, 0.0 }
 0x559   :  { %v7445_v54 = vadd.f32 %v7444_v2, %v7443_v18 }
 0x55b   :  { %v7447_v14 = vadd.f32 %v7446_v55, %v7445_v54 }
 0x55d   :  { %v7449_v3 = vadd.f32 %v7448_v34, %v7447_v14 }
 0x55f   :  { %v7451_v44 = vadd.f32 %v7450_v60, %v7449_v3 }
 0x561   :  { %v7452_v13 = vrot.slane %v7451_v44, 4 }
 0x563   :  { %v7453_v50 = vadd.f32 %v7452_v13, %v7451_v44 }
 0x565   :  { %v7454_v37 = vrot.slane %v7453_v50, 2 }
 0x567   :  { %v7455_v51 = vadd.f32 %v7454_v37, %v7453_v50 }
 0x569   :  { %v7456_v1 = vrot.slane %v7455_v51, 1 }
 0x56b   :  { %v7457_v5 = vadd.f32 %v7456_v1, %v7455_v51 }
 0x56d   :  { %v7459_v0 = vadd.f32 %v7458_v11, %v7457_v5 }
 0x56f   :  { %v7464_v46 = vmul.f32 %v7463_v25, %v7459_v0 }
 0x571   :  { %v7465_v56 = vmul.f32 1.442695, %v7464_v46 }
 0x573   :  { %7769 = vpow2.f32 %v7465_v56 }
 0x579   :  { %v7770_v49 = vpop.eup %7769 }
 0x57a   :  { %v7467_v39 = vadd.f32 1.0, %v7770_v49 }
 0x57c   :  { %7771 = vrcp.f32 %v7467_v39  ;;  %v7479_v40 = vand.u32 2147483648, %v7467_v39  ;;  %v7477_v7 = vand.u32 2147483647, %v7467_v39  ;;  %vm7473_vm5 = vweird.f32 %v7467_v39 }
 0x57e   :  { %v7480_v31 = vor.u32 1.1754944e-38, %v7479_v40  ;;  %vm7478_vm8 = vcmp.eq.f32.partialorder %v7477_v7, 8.507059e+37 }
 0x582   :  { %v7772_v59 = vpop.eup %7771 }
 0x583   :  { %v7469_v20 = vmul.f32 %v7772_v59, %v7467_v39  ;;  %vm7474_vm4 = vweird.f32 %v7772_v59 }
 0x584   :  { %vm7475_vm6 = vmor %vm7473_vm5, %vm7474_vm4 }
 0x585   :  { %v7470_v58 = vsub.f32 1.0, %v7469_v20 }
 0x587   :  { %v7471_v21 = vmul.f32 %v7772_v59, %v7470_v58 }
 0x589   :  { %v7472_v17 = vadd.f32 %v7772_v59, %v7471_v21 }
 0x58b   :  { %v7476_v47 = vsel %vm7475_vm6, %v7772_v59, %v7472_v17 }
 0x58c   :  { %v7481_v28 = vsel %vm7478_vm8, %v7480_v31, %v7476_v47 }
 0x58d   :  { %7484 = vst.msk [vmem:[#allocation5] sm:$0x3] %vm7483_vm7, %v7481_v28 }
 0x58e   :  { %7495 = dma.vmem_to_hbm [thread:$0]  %s7491_s27, 32, %s7493_s30, [#allocation6]  }
 0x58f   :  { %7886 = dma.done.wait [#allocation6], 32  }
 0x590   :  { %7887 = vsyncadd [#allocation6], 4294967264 }
 0x591   :  { %7500 = vsyncpa [#allocation6], 1 }

</bundles_post_ra>
